<compile_context>
chip_gen: v7x
topology: tpu7x:2x2x1
jax: 0.10.0
libtpu: 0.0.40
codegen_flags: <defaults>
</compile_context>

<pallas_src>
import functools

import jax
import jax.numpy as jnp
from jax.experimental import pallas as pl
from jax.experimental.pallas import tpu as pltpu


def _round_up(x, m):
  return ((x + m - 1) // m) * m


def _contract_last(vec, mat):
  # (B, K), (B, N, K) -> (B, N): per-batch vec @ mat^T on the MXU.
  return jnp.einsum('bok,bnk->bon', vec[:, None, :], mat,
                    preferred_element_type=jnp.float32)[:, 0, :]


def _contract_mid(vec, mat):
  # (B, N), (B, N, K) -> (B, K): per-batch vec @ mat on the MXU.
  return jnp.einsum('bon,bnk->bok', vec[:, None, :], mat,
                    preferred_element_type=jnp.float32)[:, 0, :]


def graph_reasoning_kernel(
    q_emb_ref, q_word_ref, mask_ref, heads_ref,
    sub1h_ref, rel1h_ref, obj1h_ref,
    w_step_ref, b_step_ref, w_rel_ref, b_rel_ref, w_hop_ref, b_hop_ref,
    out_ref,
    *, num_steps, num_ways):
  """Single invocation: ways and steps unrolled, one lane-dense store at the end."""
  q_emb = q_emb_ref[...]          # (B, H)
  q_word = q_word_ref[...]        # (B, S, H)
  mask = mask_ref[...]            # (B, S)
  heads = heads_ref[...]          # (B, E)
  sub1h = sub1h_ref[...]          # (B, T, E)
  rel1h = rel1h_ref[...]          # (B, T, R)
  obj1h = obj1h_ref[...]          # (B, T, E)

  H = q_emb.shape[1]              # padded hidden size (multiple of 128)

  # --- q_emb-only linears, fused across ways/steps into single wide matmuls ---
  # step encoders: (B, H) @ (H, W*NS*H) -> (B, W*NS*H), then tanh.
  cq_all = jnp.tanh(
      jnp.dot(q_emb, w_step_ref[...], preferred_element_type=jnp.float32)
      + b_step_ref[...])
  # hop selectors: (B, H) @ (H, W*NS) -> (B, W*NS).
  hop_all = jnp.dot(q_emb, w_hop_ref[...],
                    preferred_element_type=jnp.float32) + b_hop_ref[...]

  e_prod = jnp.ones_like(heads)

  # num_ways / num_steps are tiny (2 / 3): static unrolling is cheapest.
  # TODO(synk): switch to lax.fori_loop(..., unroll=True) + pl.ds weight slicing
  #             if num_steps grows (static unroll doesn't bound vreg live ranges).
  for w in range(num_ways):
    # hop selector: softmax over num_steps (lane slice of the fused matmul)
    hop_logit = hop_all[:, w * num_steps:(w + 1) * num_steps]        # (B, NS)
    hop_logit = hop_logit - jnp.max(hop_logit, axis=1, keepdims=True)
    hop_e = jnp.exp(hop_logit)
    hop_attn = hop_e * pl.reciprocal(
        jnp.sum(hop_e, axis=1, keepdims=True), approx=True)          # (B, NS)

    # per-way relation-classifier parameters (hoisted out of the step loop)
    w_rel_w = w_rel_ref[w]                                           # (H, R)
    b_rel_w = b_rel_ref[w]                                           # (1, R)

    last_e = heads
    way_e = jnp.zeros_like(heads)

    for t in range(num_steps):
      # step encoder output: lane-aligned (multiple-of-128) slice of cq_all
      n = w * num_steps + t
      cq_t = cq_all[:, n * H:(n + 1) * H]                            # (B, H)

      # attention over question words (softmax, mask, renormalize)
      q_logits = _contract_last(cq_t, q_word)                        # (B, S)
      q_logits = q_logits - jnp.max(q_logits, axis=1, keepdims=True)
      qe = jnp.exp(q_logits)
      q_dist = qe * pl.reciprocal(
          jnp.sum(qe, axis=1, keepdims=True), approx=True)
      q_dist = q_dist * mask
      q_dist = q_dist * pl.reciprocal(
          jnp.sum(q_dist, axis=1, keepdims=True) + 1e-6, approx=True)

      # context vector and relation distribution
      ctx_h = _contract_mid(q_dist, q_word)                          # (B, H)
      rel_dist = jax.nn.sigmoid(
          jnp.dot(ctx_h, w_rel_w, preferred_element_type=jnp.float32)
          + b_rel_w)                                                 # (B, R)

      # triple propagation: gather + index_add as one-hot MXU contractions
      sub_p = _contract_last(last_e, sub1h)                          # (B, T)
      rel_p = _contract_last(rel_dist, rel1h)                        # (B, T)
      obj_p = sub_p * rel_p                                          # (B, T)
      new_e = _contract_mid(obj_p, obj1h)                            # (B, E)

      # "divide entries > 1 by themselves" == clamp to 1 (new_e >= 0)
      last_e = jnp.minimum(new_e, 1.0)

      # weighted hop aggregation
      way_e = way_e + last_e * hop_attn[:, t:t + 1]

    e_prod = e_prod * way_e

  out_ref[...] = e_prod


def graph_reasoning(q_emb, q_word, mask, heads, sub1h, rel1h, obj1h,
                    w_step, b_step, w_rel, b_rel, w_hop, b_hop):
  num_ways, num_steps, H, _ = w_step.shape
  B, S, _ = q_word.shape
  E = heads.shape[1]
  T = sub1h.shape[1]
  R = rel1h.shape[2]

  # Lane/sublane zero-padding (pure wrapper plumbing; exact for this graph:
  # padded rows/columns stay identically zero through every op; padded R lanes
  # produce sigmoid(0)=0.5 but multiply zero one-hot columns so contribute 0).
  Bp = _round_up(B, 8)
  Hp = _round_up(H, 128)
  Ep = _round_up(E, 128)
  Rp = _round_up(R, 128)
  Tp = _round_up(T, 8)

  def pad(x, shape):
    return jnp.pad(x, [(0, t - s) for s, t in zip(x.shape, shape)])

  q_emb_p = pad(q_emb, (Bp, Hp))
  q_word_p = pad(q_word, (Bp, S, Hp))
  mask_p = pad(mask, (Bp, S))
  heads_p = pad(heads, (Bp, Ep))
  sub1h_p = pad(sub1h, (Bp, Tp, Ep))
  rel1h_p = pad(rel1h, (Bp, Tp, Rp))
  obj1h_p = pad(obj1h, (Bp, Tp, Ep))
  w_rel_p = pad(w_rel, (num_ways, Hp, Rp))
  b_rel_p = pad(b_rel, (num_ways, 1, Rp))

  # Fuse step-encoder weights across (way, step) along the output-feature axis:
  #   (W, NS, H, H) -> (H, W*NS*H), biases -> (1, W*NS*H)
  w_step_p = pad(w_step, (num_ways, num_steps, Hp, Hp))
  w_step_cat = jnp.transpose(w_step_p, (2, 0, 1, 3)).reshape(
      Hp, num_ways * num_steps * Hp)
  b_step_p = pad(b_step, (num_ways, num_steps, Hp))
  b_step_cat = b_step_p.reshape(1, num_ways * num_steps * Hp)

  # Fuse hop-selector weights across ways: (W, H, NS) -> (H, W*NS)
  w_hop_p = pad(w_hop, (num_ways, Hp, num_steps))
  w_hop_cat = jnp.transpose(w_hop_p, (1, 0, 2)).reshape(
      Hp, num_ways * num_steps)
  b_hop_cat = jnp.transpose(b_hop, (1, 0, 2)).reshape(
      1, num_ways * num_steps)

  kernel = functools.partial(graph_reasoning_kernel,
                             num_steps=num_steps, num_ways=num_ways)

  grid_spec = pltpu.PrefetchScalarGridSpec(
      num_scalar_prefetch=0,
      grid=(1,),   # single invocation: ways/steps are unrolled in the kernel
      in_specs=[
          pl.BlockSpec((Bp, Hp), lambda i: (0, 0)),
          pl.BlockSpec((Bp, S, Hp), lambda i: (0, 0, 0)),
          pl.BlockSpec((Bp, S), lambda i: (0, 0)),
          pl.BlockSpec((Bp, Ep), lambda i: (0, 0)),
          pl.BlockSpec((Bp, Tp, Ep), lambda i: (0, 0, 0)),
          pl.BlockSpec((Bp, Tp, Rp), lambda i: (0, 0, 0)),
          pl.BlockSpec((Bp, Tp, Ep), lambda i: (0, 0, 0)),
          pl.BlockSpec((Hp, num_ways * num_steps * Hp), lambda i: (0, 0)),
          pl.BlockSpec((1, num_ways * num_steps * Hp), lambda i: (0, 0)),
          pl.BlockSpec((num_ways, Hp, Rp), lambda i: (0, 0, 0)),
          pl.BlockSpec((num_ways, 1, Rp), lambda i: (0, 0, 0)),
          pl.BlockSpec((Hp, num_ways * num_steps), lambda i: (0, 0)),
          pl.BlockSpec((1, num_ways * num_steps), lambda i: (0, 0)),
      ],
      out_specs=pl.BlockSpec((Bp, Ep), lambda i: (0, 0)),
  )

  out_p = pl.pallas_call(
      kernel,
      out_shape=jax.ShapeDtypeStruct((Bp, Ep), jnp.float32),
      grid_spec=grid_spec,
      compiler_params=pltpu.CompilerParams(
          dimension_semantics=("arbitrary",)),
  )(q_emb_p, q_word_p, mask_p, heads_p, sub1h_p, rel1h_p, obj1h_p,
    w_step_cat, b_step_cat, w_rel_p, b_rel_p, w_hop_cat, b_hop_cat)

  return out_p[:B, :E]


def reference_forward(q_emb, q_word, mask, heads, sub1h, rel1h, obj1h,
                      w_step, b_step, w_rel, b_rel, w_hop, b_hop):
  """Pure-JAX mirror of the PyTorch forward (eval path) for correctness check."""
  num_ways, num_steps = w_step.shape[0], w_step.shape[1]
  e_scores = []
  for w in range(num_ways):
    last_e = heads
    hop_attn = jax.nn.softmax(q_emb @ w_hop[w] + b_hop[w], axis=1)  # (B, NS)
    ent_probs = []
    for t in range(num_steps):
      cq_t = jnp.tanh(q_emb @ w_step[w, t] + b_step[w, t][None, :])
      q_logits = jnp.sum(cq_t[:, None, :] * q_word, axis=2)
      q_dist = jax.nn.softmax(q_logits, axis=1)
      q_dist = q_dist * mask
      q_dist = q_dist / (jnp.sum(q_dist, axis=1, keepdims=True) + 1e-6)
      ctx_h = jnp.sum(q_dist[:, :, None] * q_word, axis=1)
      rel_dist = jax.nn.sigmoid(ctx_h @ w_rel[w] + b_rel[w])
      sub_p = jnp.sum(last_e[:, None, :] * sub1h, axis=2)
      rel_p = jnp.sum(rel_dist[:, None, :] * rel1h, axis=2)
      obj_p = sub_p * rel_p
      new_e = jnp.sum(obj_p[:, :, None] * obj1h, axis=1)
      z = jnp.where(new_e > 1.0, new_e, 1.0)
      last_e = new_e / z
      ent_probs.append(last_e)
    hop_res = jnp.stack(ent_probs, axis=1)
    e_scores.append(jnp.sum(hop_res * hop_attn[:, :, None], axis=1))
  return jnp.prod(jnp.stack(e_scores, axis=0), axis=0)


if __name__ == "__main__":
  # small, forward-consistent shapes
  B, S, H = 2, 8, 32          # batch, question length, BERT hidden size
  E, R = 32, 16               # num entities, num relations
  T = 24                      # triples per batch example
  NUM_STEPS, NUM_WAYS = 3, 2

  key = jax.random.PRNGKey(0)
  keys = jax.random.split(key, 12)

  # synthetic BERT outputs
  q_emb = jax.random.normal(keys[0], (B, H), dtype=jnp.float32)
  q_word = jax.random.normal(keys[1], (B, S, H), dtype=jnp.float32)
  mask = jnp.array([[1.0] * S, [1.0] * 5 + [0.0] * (S - 5)], dtype=jnp.float32)

  # initial entity distribution (one-hot heads)
  head_ids = jnp.array([3, 7], dtype=jnp.int32)
  heads = jax.nn.one_hot(head_ids, E, dtype=jnp.float32)

  # random triples per batch example, encoded one-hot (glue, plain JAX)
  sub_idx = jax.random.randint(keys[2], (B, T), 0, E)
  rel_idx = jax.random.randint(keys[3], (B, T), 0, R)
  obj_idx = jax.random.randint(keys[4], (B, T), 0, E)
  sub1h = jax.nn.one_hot(sub_idx, E, dtype=jnp.float32)
  rel1h = jax.nn.one_hot(rel_idx, R, dtype=jnp.float32)
  obj1h = jax.nn.one_hot(obj_idx, E, dtype=jnp.float32)

  # deterministic parameters (Linear weights stored as (in, out))
  scale = 0.1
  w_step = scale * jax.random.normal(keys[5], (NUM_WAYS, NUM_STEPS, H, H), jnp.float32)
  b_step = scale * jax.random.normal(keys[6], (NUM_WAYS, NUM_STEPS, H), jnp.float32)
  w_rel = scale * jax.random.normal(keys[7], (NUM_WAYS, H, R), jnp.float32)
  b_rel = scale * jax.random.normal(keys[8], (NUM_WAYS, 1, R), jnp.float32)
  w_hop = scale * jax.random.normal(keys[9], (NUM_WAYS, H, NUM_STEPS), jnp.float32)
  b_hop = scale * jax.random.normal(keys[10], (NUM_WAYS, 1, NUM_STEPS), jnp.float32)

  e_score = graph_reasoning(q_emb, q_word, mask, heads, sub1h, rel1h, obj1h,
                            w_step, b_step, w_rel, b_rel, w_hop, b_hop)
  e_score = jax.block_until_ready(e_score)

  ref = reference_forward(q_emb, q_word, mask, heads, sub1h, rel1h, obj1h,
                          w_step, b_step, w_rel, b_rel, w_hop, b_hop)
  assert e_score.shape == (B, E)
  # tolerance slightly loosened vs. exact math because the kernel uses the
  # EUP approximate reciprocal for softmax / renormalization denominators.
  assert jnp.allclose(e_score, ref, atol=2e-3, rtol=2e-2), "mismatch vs reference"

  print("KERNEL_OK")
</pallas_src>

<mosaic_0001>
module attributes {stable_mosaic.version = 11 : i64} {
  func.func @graph_reasoning_kernel(%arg0: i32, %arg1: memref<8x128xf32, #tpu.memory_space<vmem>>, %arg2: memref<8x8x128xf32, #tpu.memory_space<vmem>>, %arg3: memref<8x8xf32, #tpu.memory_space<vmem>>, %arg4: memref<8x128xf32, #tpu.memory_space<vmem>>, %arg5: memref<8x24x128xf32, #tpu.memory_space<vmem>>, %arg6: memref<8x24x128xf32, #tpu.memory_space<vmem>>, %arg7: memref<8x24x128xf32, #tpu.memory_space<vmem>>, %arg8: memref<128x768xf32, #tpu.memory_space<vmem>>, %arg9: memref<1x768xf32, #tpu.memory_space<vmem>>, %arg10: memref<2x128x128xf32, #tpu.memory_space<vmem>>, %arg11: memref<2x1x128xf32, #tpu.memory_space<vmem>>, %arg12: memref<128x6xf32, #tpu.memory_space<vmem>>, %arg13: memref<1x6xf32, #tpu.memory_space<vmem>>, %arg14: memref<8x128xf32, #tpu.memory_space<vmem>>) attributes {dimension_semantics = [#tpu.dimension_semantics<arbitrary>], iteration_bounds = array<i64: 1>, scalar_prefetch = 0 : i64, scratch_operands = 0 : i64, tpu.core_type = #tpu.core_type<tc>, window_params = [{pipeline_mode = #tpu.pipeline_mode<synchronous>, transform_indices = @transform_0, window_bounds = array<i64: 8, 128>}, {pipeline_mode = #tpu.pipeline_mode<synchronous>, transform_indices = @transform_1, window_bounds = array<i64: 8, 8, 128>}, {pipeline_mode = #tpu.pipeline_mode<synchronous>, transform_indices = @transform_2, window_bounds = array<i64: 8, 8>}, {pipeline_mode = #tpu.pipeline_mode<synchronous>, transform_indices = @transform_3, window_bounds = array<i64: 8, 128>}, {pipeline_mode = #tpu.pipeline_mode<synchronous>, transform_indices = @transform_4, window_bounds = array<i64: 8, 24, 128>}, {pipeline_mode = #tpu.pipeline_mode<synchronous>, transform_indices = @transform_5, window_bounds = array<i64: 8, 24, 128>}, {pipeline_mode = #tpu.pipeline_mode<synchronous>, transform_indices = @transform_6, window_bounds = array<i64: 8, 24, 128>}, {pipeline_mode = #tpu.pipeline_mode<synchronous>, transform_indices = @transform_7, window_bounds = array<i64: 128, 768>}, {pipeline_mode = #tpu.pipeline_mode<synchronous>, transform_indices = @transform_8, window_bounds = array<i64: 1, 768>}, {pipeline_mode = #tpu.pipeline_mode<synchronous>, transform_indices = @transform_9, window_bounds = array<i64: 2, 128, 128>}, {pipeline_mode = #tpu.pipeline_mode<synchronous>, transform_indices = @transform_10, window_bounds = array<i64: 2, 1, 128>}, {pipeline_mode = #tpu.pipeline_mode<synchronous>, transform_indices = @transform_11, window_bounds = array<i64: 128, 6>}, {pipeline_mode = #tpu.pipeline_mode<synchronous>, transform_indices = @transform_12, window_bounds = array<i64: 1, 6>}, {pipeline_mode = #tpu.pipeline_mode<synchronous>, transform_indices = @transform_13, window_bounds = array<i64: 8, 128>}]} {
    %c0 = arith.constant 0 : index
    %c0_0 = arith.constant 0 : index
    %0 = vector.load %arg1[%c0, %c0_0] : memref<8x128xf32, #tpu.memory_space<vmem>>, vector<8x128xf32>
    %c0_1 = arith.constant 0 : index
    %c0_2 = arith.constant 0 : index
    %c0_3 = arith.constant 0 : index
    %1 = vector.load %arg2[%c0_1, %c0_2, %c0_3] : memref<8x8x128xf32, #tpu.memory_space<vmem>>, vector<8x8x128xf32>
    %c0_4 = arith.constant 0 : index
    %c0_5 = arith.constant 0 : index
    %2 = vector.load %arg3[%c0_4, %c0_5] : memref<8x8xf32, #tpu.memory_space<vmem>>, vector<8x8xf32>
    %c0_6 = arith.constant 0 : index
    %c0_7 = arith.constant 0 : index
    %3 = vector.load %arg4[%c0_6, %c0_7] : memref<8x128xf32, #tpu.memory_space<vmem>>, vector<8x128xf32>
    %c0_8 = arith.constant 0 : index
    %c0_9 = arith.constant 0 : index
    %c0_10 = arith.constant 0 : index
    %4 = vector.load %arg5[%c0_8, %c0_9, %c0_10] : memref<8x24x128xf32, #tpu.memory_space<vmem>>, vector<8x24x128xf32>
    %c0_11 = arith.constant 0 : index
    %c0_12 = arith.constant 0 : index
    %c0_13 = arith.constant 0 : index
    %5 = vector.load %arg6[%c0_11, %c0_12, %c0_13] : memref<8x24x128xf32, #tpu.memory_space<vmem>>, vector<8x24x128xf32>
    %c0_14 = arith.constant 0 : index
    %c0_15 = arith.constant 0 : index
    %c0_16 = arith.constant 0 : index
    %6 = vector.load %arg7[%c0_14, %c0_15, %c0_16] : memref<8x24x128xf32, #tpu.memory_space<vmem>>, vector<8x24x128xf32>
    %c0_17 = arith.constant 0 : index
    %c0_18 = arith.constant 0 : index
    %7 = vector.load %arg8[%c0_17, %c0_18] : memref<128x768xf32, #tpu.memory_space<vmem>>, vector<128x768xf32>
    %cst = arith.constant dense<0.000000e+00> : vector<8x768xf32>
    %8 = tpu.matmul %0, %7, %cst {dimension_numbers = #tpu.dot_dimension_numbers<[1], [0], [0], [1], [0, 0, 1, 1], [], []>} : vector<8x128xf32>, vector<128x768xf32>, vector<8x768xf32> -> vector<8x768xf32>
    %c0_19 = arith.constant 0 : index
    %c0_20 = arith.constant 0 : index
    %9 = vector.load %arg9[%c0_19, %c0_20] : memref<1x768xf32, #tpu.memory_space<vmem>>, vector<1x768xf32>
    %10 = vector.broadcast %9 : vector<1x768xf32> to vector<8x768xf32>
    %11 = arith.addf %8, %10 : vector<8x768xf32>
    %12 = math.tanh %11 : vector<8x768xf32>
    %c0_21 = arith.constant 0 : index
    %c0_22 = arith.constant 0 : index
    %13 = vector.load %arg12[%c0_21, %c0_22] : memref<128x6xf32, #tpu.memory_space<vmem>>, vector<128x6xf32>
    %cst_23 = arith.constant dense<0.000000e+00> : vector<8x6xf32>
    %14 = tpu.matmul %0, %13, %cst_23 {dimension_numbers = #tpu.dot_dimension_numbers<[1], [0], [0], [1], [0, 0, 1, 1], [], []>} : vector<8x128xf32>, vector<128x6xf32>, vector<8x6xf32> -> vector<8x6xf32>
    %c0_24 = arith.constant 0 : index
    %c0_25 = arith.constant 0 : index
    %15 = vector.load %arg13[%c0_24, %c0_25] : memref<1x6xf32, #tpu.memory_space<vmem>>, vector<1x6xf32>
    %16 = vector.broadcast %15 : vector<1x6xf32> to vector<8x6xf32>
    %17 = arith.addf %14, %16 : vector<8x6xf32>
    %cst_26 = arith.constant 1.000000e+00 : f32
    %18 = vector.broadcast %cst_26 : f32 to vector<8x128xf32>
    %19 = vector.extract_strided_slice %17 {offsets = [0, 0], sizes = [8, 3], strides = [1, 1]} : vector<8x6xf32> to vector<8x3xf32>
    %cst_27 = arith.constant dense<0xFF800000> : vector<8xf32>
    %20 = vector.multi_reduction <maximumf>, %19, %cst_27 [1] : vector<8x3xf32> to vector<8xf32>
    %21 = vector.shape_cast %20 : vector<8xf32> to vector<8x1xf32>
    %22 = vector.broadcast %21 : vector<8x1xf32> to vector<8x3xf32>
    %23 = arith.subf %19, %22 : vector<8x3xf32>
    %24 = math.exp %23 : vector<8x3xf32>
    %cst_28 = arith.constant dense<0.000000e+00> : vector<8xf32>
    %25 = vector.multi_reduction <add>, %24, %cst_28 [1] : vector<8x3xf32> to vector<8xf32>
    %26 = vector.shape_cast %25 : vector<8xf32> to vector<8x1xf32>
    %27 = tpu.reciprocal %26 {approx = true} : vector<8x1xf32> -> vector<8x1xf32>
    %28 = vector.broadcast %27 : vector<8x1xf32> to vector<8x3xf32>
    %29 = arith.mulf %24, %28 : vector<8x3xf32>
    %c0_29 = arith.constant 0 : index
    %c0_30 = arith.constant 0 : index
    %c0_31 = arith.constant 0 : index
    %30 = vector.load %arg10[%c0_29, %c0_30, %c0_31] : memref<2x128x128xf32, #tpu.memory_space<vmem>>, vector<1x128x128xf32>
    %31 = vector.shape_cast %30 : vector<1x128x128xf32> to vector<128x128xf32>
    %c0_32 = arith.constant 0 : index
    %c0_33 = arith.constant 0 : index
    %c0_34 = arith.constant 0 : index
    %32 = vector.load %arg11[%c0_32, %c0_33, %c0_34] : memref<2x1x128xf32, #tpu.memory_space<vmem>>, vector<1x1x128xf32>
    %33 = vector.shape_cast %32 : vector<1x1x128xf32> to vector<1x128xf32>
    %cst_35 = arith.constant 0.000000e+00 : f32
    %34 = vector.broadcast %cst_35 : f32 to vector<8x128xf32>
    %35 = vector.extract_strided_slice %12 {offsets = [0, 0], sizes = [8, 128], strides = [1, 1]} : vector<8x768xf32> to vector<8x128xf32>
    %36 = vector.shape_cast %35 : vector<8x128xf32> to vector<8x1x128xf32>
    "tpu.trace_start"() <{level = 10 : i32, message = "bok,bnk->bon"}> : () -> ()
    %cst_36 = arith.constant dense<0.000000e+00> : vector<8x1x8xf32>
    %37 = tpu.matmul %36, %1, %cst_36 {dimension_numbers = #tpu.dot_dimension_numbers<[2], [2], [1], [1], [0, 0, 0, 1, 1, 1], [0], [0]>} : vector<8x1x128xf32>, vector<8x8x128xf32>, vector<8x1x8xf32> -> vector<8x1x8xf32>
    "tpu.trace_stop"() : () -> ()
    %38 = vector.shape_cast %37 : vector<8x1x8xf32> to vector<8x8xf32>
    %cst_37 = arith.constant dense<0xFF800000> : vector<8xf32>
    %39 = vector.multi_reduction <maximumf>, %38, %cst_37 [1] : vector<8x8xf32> to vector<8xf32>
    %40 = vector.shape_cast %39 : vector<8xf32> to vector<8x1xf32>
    %41 = vector.broadcast %40 : vector<8x1xf32> to vector<8x8xf32>
    %42 = arith.subf %38, %41 : vector<8x8xf32>
    %43 = math.exp %42 : vector<8x8xf32>
    %cst_38 = arith.constant dense<0.000000e+00> : vector<8xf32>
    %44 = vector.multi_reduction <add>, %43, %cst_38 [1] : vector<8x8xf32> to vector<8xf32>
    %45 = vector.shape_cast %44 : vector<8xf32> to vector<8x1xf32>
    %46 = tpu.reciprocal %45 {approx = true} : vector<8x1xf32> -> vector<8x1xf32>
    %47 = vector.broadcast %46 : vector<8x1xf32> to vector<8x8xf32>
    %48 = arith.mulf %43, %47 : vector<8x8xf32>
    %49 = arith.mulf %48, %2 : vector<8x8xf32>
    %cst_39 = arith.constant dense<0.000000e+00> : vector<8xf32>
    %50 = vector.multi_reduction <add>, %49, %cst_39 [1] : vector<8x8xf32> to vector<8xf32>
    %51 = vector.shape_cast %50 : vector<8xf32> to vector<8x1xf32>
    %cst_40 = arith.constant 9.99999997E-7 : f32
    %52 = vector.broadcast %cst_40 : f32 to vector<8x1xf32>
    %53 = arith.addf %51, %52 : vector<8x1xf32>
    %54 = tpu.reciprocal %53 {approx = true} : vector<8x1xf32> -> vector<8x1xf32>
    %55 = vector.broadcast %54 : vector<8x1xf32> to vector<8x8xf32>
    %56 = arith.mulf %49, %55 : vector<8x8xf32>
    %57 = vector.shape_cast %56 : vector<8x8xf32> to vector<8x1x8xf32>
    "tpu.trace_start"() <{level = 10 : i32, message = "bon,bnk->bok"}> : () -> ()
    %cst_41 = arith.constant dense<0.000000e+00> : vector<8x1x128xf32>
    %58 = tpu.matmul %57, %1, %cst_41 {dimension_numbers = #tpu.dot_dimension_numbers<[2], [1], [1], [2], [0, 0, 0, 1, 1, 2], [0], [0]>} : vector<8x1x8xf32>, vector<8x8x128xf32>, vector<8x1x128xf32> -> vector<8x1x128xf32>
    "tpu.trace_stop"() : () -> ()
    %59 = vector.shape_cast %58 : vector<8x1x128xf32> to vector<8x128xf32>
    %cst_42 = arith.constant dense<0.000000e+00> : vector<8x128xf32>
    %60 = tpu.matmul %59, %31, %cst_42 {dimension_numbers = #tpu.dot_dimension_numbers<[1], [0], [0], [1], [0, 0, 1, 1], [], []>} : vector<8x128xf32>, vector<128x128xf32>, vector<8x128xf32> -> vector<8x128xf32>
    %61 = vector.broadcast %33 : vector<1x128xf32> to vector<8x128xf32>
    %62 = arith.addf %60, %61 : vector<8x128xf32>
    %63 = arith.negf %62 : vector<8x128xf32>
    %64 = math.exp %63 : vector<8x128xf32>
    %cst_43 = arith.constant 1.000000e+00 : f32
    %65 = vector.broadcast %cst_43 : f32 to vector<8x128xf32>
    %66 = arith.addf %65, %64 : vector<8x128xf32>
    %67 = arith.divf %65, %66 : vector<8x128xf32>
    %68 = vector.shape_cast %3 : vector<8x128xf32> to vector<8x1x128xf32>
    "tpu.trace_start"() <{level = 10 : i32, message = "bok,bnk->bon"}> : () -> ()
    %cst_44 = arith.constant dense<0.000000e+00> : vector<8x1x24xf32>
    %69 = tpu.matmul %68, %4, %cst_44 {dimension_numbers = #tpu.dot_dimension_numbers<[2], [2], [1], [1], [0, 0, 0, 1, 1, 1], [0], [0]>} : vector<8x1x128xf32>, vector<8x24x128xf32>, vector<8x1x24xf32> -> vector<8x1x24xf32>
    "tpu.trace_stop"() : () -> ()
    %70 = vector.shape_cast %69 : vector<8x1x24xf32> to vector<8x24xf32>
    %71 = vector.shape_cast %67 : vector<8x128xf32> to vector<8x1x128xf32>
    "tpu.trace_start"() <{level = 10 : i32, message = "bok,bnk->bon"}> : () -> ()
    %cst_45 = arith.constant dense<0.000000e+00> : vector<8x1x24xf32>
    %72 = tpu.matmul %71, %5, %cst_45 {dimension_numbers = #tpu.dot_dimension_numbers<[2], [2], [1], [1], [0, 0, 0, 1, 1, 1], [0], [0]>} : vector<8x1x128xf32>, vector<8x24x128xf32>, vector<8x1x24xf32> -> vector<8x1x24xf32>
    "tpu.trace_stop"() : () -> ()
    %73 = vector.shape_cast %72 : vector<8x1x24xf32> to vector<8x24xf32>
    %74 = arith.mulf %70, %73 : vector<8x24xf32>
    %75 = vector.shape_cast %74 : vector<8x24xf32> to vector<8x1x24xf32>
    "tpu.trace_start"() <{level = 10 : i32, message = "bon,bnk->bok"}> : () -> ()
    %cst_46 = arith.constant dense<0.000000e+00> : vector<8x1x128xf32>
    %76 = tpu.matmul %75, %6, %cst_46 {dimension_numbers = #tpu.dot_dimension_numbers<[2], [1], [1], [2], [0, 0, 0, 1, 1, 2], [0], [0]>} : vector<8x1x24xf32>, vector<8x24x128xf32>, vector<8x1x128xf32> -> vector<8x1x128xf32>
    "tpu.trace_stop"() : () -> ()
    %77 = vector.shape_cast %76 : vector<8x1x128xf32> to vector<8x128xf32>
    %cst_47 = arith.constant 1.000000e+00 : f32
    %78 = vector.broadcast %cst_47 : f32 to vector<8x128xf32>
    %79 = arith.minimumf %77, %78 : vector<8x128xf32>
    %80 = vector.extract_strided_slice %29 {offsets = [0, 0], sizes = [8, 1], strides = [1, 1]} : vector<8x3xf32> to vector<8x1xf32>
    %81 = vector.broadcast %80 : vector<8x1xf32> to vector<8x128xf32>
    %82 = arith.mulf %79, %81 : vector<8x128xf32>
    %83 = arith.addf %34, %82 : vector<8x128xf32>
    %84 = vector.extract_strided_slice %12 {offsets = [0, 128], sizes = [8, 128], strides = [1, 1]} : vector<8x768xf32> to vector<8x128xf32>
    %85 = vector.shape_cast %84 : vector<8x128xf32> to vector<8x1x128xf32>
    "tpu.trace_start"() <{level = 10 : i32, message = "bok,bnk->bon"}> : () -> ()
    %cst_48 = arith.constant dense<0.000000e+00> : vector<8x1x8xf32>
    %86 = tpu.matmul %85, %1, %cst_48 {dimension_numbers = #tpu.dot_dimension_numbers<[2], [2], [1], [1], [0, 0, 0, 1, 1, 1], [0], [0]>} : vector<8x1x128xf32>, vector<8x8x128xf32>, vector<8x1x8xf32> -> vector<8x1x8xf32>
    "tpu.trace_stop"() : () -> ()
    %87 = vector.shape_cast %86 : vector<8x1x8xf32> to vector<8x8xf32>
    %cst_49 = arith.constant dense<0xFF800000> : vector<8xf32>
    %88 = vector.multi_reduction <maximumf>, %87, %cst_49 [1] : vector<8x8xf32> to vector<8xf32>
    %89 = vector.shape_cast %88 : vector<8xf32> to vector<8x1xf32>
    %90 = vector.broadcast %89 : vector<8x1xf32> to vector<8x8xf32>
    %91 = arith.subf %87, %90 : vector<8x8xf32>
    %92 = math.exp %91 : vector<8x8xf32>
    %cst_50 = arith.constant dense<0.000000e+00> : vector<8xf32>
    %93 = vector.multi_reduction <add>, %92, %cst_50 [1] : vector<8x8xf32> to vector<8xf32>
    %94 = vector.shape_cast %93 : vector<8xf32> to vector<8x1xf32>
    %95 = tpu.reciprocal %94 {approx = true} : vector<8x1xf32> -> vector<8x1xf32>
    %96 = vector.broadcast %95 : vector<8x1xf32> to vector<8x8xf32>
    %97 = arith.mulf %92, %96 : vector<8x8xf32>
    %98 = arith.mulf %97, %2 : vector<8x8xf32>
    %cst_51 = arith.constant dense<0.000000e+00> : vector<8xf32>
    %99 = vector.multi_reduction <add>, %98, %cst_51 [1] : vector<8x8xf32> to vector<8xf32>
    %100 = vector.shape_cast %99 : vector<8xf32> to vector<8x1xf32>
    %cst_52 = arith.constant 9.99999997E-7 : f32
    %101 = vector.broadcast %cst_52 : f32 to vector<8x1xf32>
    %102 = arith.addf %100, %101 : vector<8x1xf32>
    %103 = tpu.reciprocal %102 {approx = true} : vector<8x1xf32> -> vector<8x1xf32>
    %104 = vector.broadcast %103 : vector<8x1xf32> to vector<8x8xf32>
    %105 = arith.mulf %98, %104 : vector<8x8xf32>
    %106 = vector.shape_cast %105 : vector<8x8xf32> to vector<8x1x8xf32>
    "tpu.trace_start"() <{level = 10 : i32, message = "bon,bnk->bok"}> : () -> ()
    %cst_53 = arith.constant dense<0.000000e+00> : vector<8x1x128xf32>
    %107 = tpu.matmul %106, %1, %cst_53 {dimension_numbers = #tpu.dot_dimension_numbers<[2], [1], [1], [2], [0, 0, 0, 1, 1, 2], [0], [0]>} : vector<8x1x8xf32>, vector<8x8x128xf32>, vector<8x1x128xf32> -> vector<8x1x128xf32>
    "tpu.trace_stop"() : () -> ()
    %108 = vector.shape_cast %107 : vector<8x1x128xf32> to vector<8x128xf32>
    %cst_54 = arith.constant dense<0.000000e+00> : vector<8x128xf32>
    %109 = tpu.matmul %108, %31, %cst_54 {dimension_numbers = #tpu.dot_dimension_numbers<[1], [0], [0], [1], [0, 0, 1, 1], [], []>} : vector<8x128xf32>, vector<128x128xf32>, vector<8x128xf32> -> vector<8x128xf32>
    %110 = vector.broadcast %33 : vector<1x128xf32> to vector<8x128xf32>
    %111 = arith.addf %109, %110 : vector<8x128xf32>
    %112 = arith.negf %111 : vector<8x128xf32>
    %113 = math.exp %112 : vector<8x128xf32>
    %cst_55 = arith.constant 1.000000e+00 : f32
    %114 = vector.broadcast %cst_55 : f32 to vector<8x128xf32>
    %115 = arith.addf %114, %113 : vector<8x128xf32>
    %116 = arith.divf %114, %115 : vector<8x128xf32>
    %117 = vector.shape_cast %79 : vector<8x128xf32> to vector<8x1x128xf32>
    "tpu.trace_start"() <{level = 10 : i32, message = "bok,bnk->bon"}> : () -> ()
    %cst_56 = arith.constant dense<0.000000e+00> : vector<8x1x24xf32>
    %118 = tpu.matmul %117, %4, %cst_56 {dimension_numbers = #tpu.dot_dimension_numbers<[2], [2], [1], [1], [0, 0, 0, 1, 1, 1], [0], [0]>} : vector<8x1x128xf32>, vector<8x24x128xf32>, vector<8x1x24xf32> -> vector<8x1x24xf32>
    "tpu.trace_stop"() : () -> ()
    %119 = vector.shape_cast %118 : vector<8x1x24xf32> to vector<8x24xf32>
    %120 = vector.shape_cast %116 : vector<8x128xf32> to vector<8x1x128xf32>
    "tpu.trace_start"() <{level = 10 : i32, message = "bok,bnk->bon"}> : () -> ()
    %cst_57 = arith.constant dense<0.000000e+00> : vector<8x1x24xf32>
    %121 = tpu.matmul %120, %5, %cst_57 {dimension_numbers = #tpu.dot_dimension_numbers<[2], [2], [1], [1], [0, 0, 0, 1, 1, 1], [0], [0]>} : vector<8x1x128xf32>, vector<8x24x128xf32>, vector<8x1x24xf32> -> vector<8x1x24xf32>
    "tpu.trace_stop"() : () -> ()
    %122 = vector.shape_cast %121 : vector<8x1x24xf32> to vector<8x24xf32>
    %123 = arith.mulf %119, %122 : vector<8x24xf32>
    %124 = vector.shape_cast %123 : vector<8x24xf32> to vector<8x1x24xf32>
    "tpu.trace_start"() <{level = 10 : i32, message = "bon,bnk->bok"}> : () -> ()
    %cst_58 = arith.constant dense<0.000000e+00> : vector<8x1x128xf32>
    %125 = tpu.matmul %124, %6, %cst_58 {dimension_numbers = #tpu.dot_dimension_numbers<[2], [1], [1], [2], [0, 0, 0, 1, 1, 2], [0], [0]>} : vector<8x1x24xf32>, vector<8x24x128xf32>, vector<8x1x128xf32> -> vector<8x1x128xf32>
    "tpu.trace_stop"() : () -> ()
    %126 = vector.shape_cast %125 : vector<8x1x128xf32> to vector<8x128xf32>
    %cst_59 = arith.constant 1.000000e+00 : f32
    %127 = vector.broadcast %cst_59 : f32 to vector<8x128xf32>
    %128 = arith.minimumf %126, %127 : vector<8x128xf32>
    %129 = vector.extract_strided_slice %29 {offsets = [0, 1], sizes = [8, 1], strides = [1, 1]} : vector<8x3xf32> to vector<8x1xf32>
    %130 = vector.broadcast %129 : vector<8x1xf32> to vector<8x128xf32>
    %131 = arith.mulf %128, %130 : vector<8x128xf32>
    %132 = arith.addf %83, %131 : vector<8x128xf32>
    %133 = vector.extract_strided_slice %12 {offsets = [0, 256], sizes = [8, 128], strides = [1, 1]} : vector<8x768xf32> to vector<8x128xf32>
    %134 = vector.shape_cast %133 : vector<8x128xf32> to vector<8x1x128xf32>
    "tpu.trace_start"() <{level = 10 : i32, message = "bok,bnk->bon"}> : () -> ()
    %cst_60 = arith.constant dense<0.000000e+00> : vector<8x1x8xf32>
    %135 = tpu.matmul %134, %1, %cst_60 {dimension_numbers = #tpu.dot_dimension_numbers<[2], [2], [1], [1], [0, 0, 0, 1, 1, 1], [0], [0]>} : vector<8x1x128xf32>, vector<8x8x128xf32>, vector<8x1x8xf32> -> vector<8x1x8xf32>
    "tpu.trace_stop"() : () -> ()
    %136 = vector.shape_cast %135 : vector<8x1x8xf32> to vector<8x8xf32>
    %cst_61 = arith.constant dense<0xFF800000> : vector<8xf32>
    %137 = vector.multi_reduction <maximumf>, %136, %cst_61 [1] : vector<8x8xf32> to vector<8xf32>
    %138 = vector.shape_cast %137 : vector<8xf32> to vector<8x1xf32>
    %139 = vector.broadcast %138 : vector<8x1xf32> to vector<8x8xf32>
    %140 = arith.subf %136, %139 : vector<8x8xf32>
    %141 = math.exp %140 : vector<8x8xf32>
    %cst_62 = arith.constant dense<0.000000e+00> : vector<8xf32>
    %142 = vector.multi_reduction <add>, %141, %cst_62 [1] : vector<8x8xf32> to vector<8xf32>
    %143 = vector.shape_cast %142 : vector<8xf32> to vector<8x1xf32>
    %144 = tpu.reciprocal %143 {approx = true} : vector<8x1xf32> -> vector<8x1xf32>
    %145 = vector.broadcast %144 : vector<8x1xf32> to vector<8x8xf32>
    %146 = arith.mulf %141, %145 : vector<8x8xf32>
    %147 = arith.mulf %146, %2 : vector<8x8xf32>
    %cst_63 = arith.constant dense<0.000000e+00> : vector<8xf32>
    %148 = vector.multi_reduction <add>, %147, %cst_63 [1] : vector<8x8xf32> to vector<8xf32>
    %149 = vector.shape_cast %148 : vector<8xf32> to vector<8x1xf32>
    %cst_64 = arith.constant 9.99999997E-7 : f32
    %150 = vector.broadcast %cst_64 : f32 to vector<8x1xf32>
    %151 = arith.addf %149, %150 : vector<8x1xf32>
    %152 = tpu.reciprocal %151 {approx = true} : vector<8x1xf32> -> vector<8x1xf32>
    %153 = vector.broadcast %152 : vector<8x1xf32> to vector<8x8xf32>
    %154 = arith.mulf %147, %153 : vector<8x8xf32>
    %155 = vector.shape_cast %154 : vector<8x8xf32> to vector<8x1x8xf32>
    "tpu.trace_start"() <{level = 10 : i32, message = "bon,bnk->bok"}> : () -> ()
    %cst_65 = arith.constant dense<0.000000e+00> : vector<8x1x128xf32>
    %156 = tpu.matmul %155, %1, %cst_65 {dimension_numbers = #tpu.dot_dimension_numbers<[2], [1], [1], [2], [0, 0, 0, 1, 1, 2], [0], [0]>} : vector<8x1x8xf32>, vector<8x8x128xf32>, vector<8x1x128xf32> -> vector<8x1x128xf32>
    "tpu.trace_stop"() : () -> ()
    %157 = vector.shape_cast %156 : vector<8x1x128xf32> to vector<8x128xf32>
    %cst_66 = arith.constant dense<0.000000e+00> : vector<8x128xf32>
    %158 = tpu.matmul %157, %31, %cst_66 {dimension_numbers = #tpu.dot_dimension_numbers<[1], [0], [0], [1], [0, 0, 1, 1], [], []>} : vector<8x128xf32>, vector<128x128xf32>, vector<8x128xf32> -> vector<8x128xf32>
    %159 = vector.broadcast %33 : vector<1x128xf32> to vector<8x128xf32>
    %160 = arith.addf %158, %159 : vector<8x128xf32>
    %161 = arith.negf %160 : vector<8x128xf32>
    %162 = math.exp %161 : vector<8x128xf32>
    %cst_67 = arith.constant 1.000000e+00 : f32
    %163 = vector.broadcast %cst_67 : f32 to vector<8x128xf32>
    %164 = arith.addf %163, %162 : vector<8x128xf32>
    %165 = arith.divf %163, %164 : vector<8x128xf32>
    %166 = vector.shape_cast %128 : vector<8x128xf32> to vector<8x1x128xf32>
    "tpu.trace_start"() <{level = 10 : i32, message = "bok,bnk->bon"}> : () -> ()
    %cst_68 = arith.constant dense<0.000000e+00> : vector<8x1x24xf32>
    %167 = tpu.matmul %166, %4, %cst_68 {dimension_numbers = #tpu.dot_dimension_numbers<[2], [2], [1], [1], [0, 0, 0, 1, 1, 1], [0], [0]>} : vector<8x1x128xf32>, vector<8x24x128xf32>, vector<8x1x24xf32> -> vector<8x1x24xf32>
    "tpu.trace_stop"() : () -> ()
    %168 = vector.shape_cast %167 : vector<8x1x24xf32> to vector<8x24xf32>
    %169 = vector.shape_cast %165 : vector<8x128xf32> to vector<8x1x128xf32>
    "tpu.trace_start"() <{level = 10 : i32, message = "bok,bnk->bon"}> : () -> ()
    %cst_69 = arith.constant dense<0.000000e+00> : vector<8x1x24xf32>
    %170 = tpu.matmul %169, %5, %cst_69 {dimension_numbers = #tpu.dot_dimension_numbers<[2], [2], [1], [1], [0, 0, 0, 1, 1, 1], [0], [0]>} : vector<8x1x128xf32>, vector<8x24x128xf32>, vector<8x1x24xf32> -> vector<8x1x24xf32>
    "tpu.trace_stop"() : () -> ()
    %171 = vector.shape_cast %170 : vector<8x1x24xf32> to vector<8x24xf32>
    %172 = arith.mulf %168, %171 : vector<8x24xf32>
    %173 = vector.shape_cast %172 : vector<8x24xf32> to vector<8x1x24xf32>
    "tpu.trace_start"() <{level = 10 : i32, message = "bon,bnk->bok"}> : () -> ()
    %cst_70 = arith.constant dense<0.000000e+00> : vector<8x1x128xf32>
    %174 = tpu.matmul %173, %6, %cst_70 {dimension_numbers = #tpu.dot_dimension_numbers<[2], [1], [1], [2], [0, 0, 0, 1, 1, 2], [0], [0]>} : vector<8x1x24xf32>, vector<8x24x128xf32>, vector<8x1x128xf32> -> vector<8x1x128xf32>
    "tpu.trace_stop"() : () -> ()
    %175 = vector.shape_cast %174 : vector<8x1x128xf32> to vector<8x128xf32>
    %cst_71 = arith.constant 1.000000e+00 : f32
    %176 = vector.broadcast %cst_71 : f32 to vector<8x128xf32>
    %177 = arith.minimumf %175, %176 : vector<8x128xf32>
    %178 = vector.extract_strided_slice %29 {offsets = [0, 2], sizes = [8, 1], strides = [1, 1]} : vector<8x3xf32> to vector<8x1xf32>
    %179 = vector.broadcast %178 : vector<8x1xf32> to vector<8x128xf32>
    %180 = arith.mulf %177, %179 : vector<8x128xf32>
    %181 = arith.addf %132, %180 : vector<8x128xf32>
    %182 = arith.mulf %18, %181 : vector<8x128xf32>
    %183 = vector.extract_strided_slice %17 {offsets = [0, 3], sizes = [8, 3], strides = [1, 1]} : vector<8x6xf32> to vector<8x3xf32>
    %cst_72 = arith.constant dense<0xFF800000> : vector<8xf32>
    %184 = vector.multi_reduction <maximumf>, %183, %cst_72 [1] : vector<8x3xf32> to vector<8xf32>
    %185 = vector.shape_cast %184 : vector<8xf32> to vector<8x1xf32>
    %186 = vector.broadcast %185 : vector<8x1xf32> to vector<8x3xf32>
    %187 = arith.subf %183, %186 : vector<8x3xf32>
    %188 = math.exp %187 : vector<8x3xf32>
    %cst_73 = arith.constant dense<0.000000e+00> : vector<8xf32>
    %189 = vector.multi_reduction <add>, %188, %cst_73 [1] : vector<8x3xf32> to vector<8xf32>
    %190 = vector.shape_cast %189 : vector<8xf32> to vector<8x1xf32>
    %191 = tpu.reciprocal %190 {approx = true} : vector<8x1xf32> -> vector<8x1xf32>
    %192 = vector.broadcast %191 : vector<8x1xf32> to vector<8x3xf32>
    %193 = arith.mulf %188, %192 : vector<8x3xf32>
    %c1 = arith.constant 1 : index
    %c0_74 = arith.constant 0 : index
    %c0_75 = arith.constant 0 : index
    %194 = vector.load %arg10[%c1, %c0_74, %c0_75] : memref<2x128x128xf32, #tpu.memory_space<vmem>>, vector<1x128x128xf32>
    %195 = vector.shape_cast %194 : vector<1x128x128xf32> to vector<128x128xf32>
    %c1_76 = arith.constant 1 : index
    %c0_77 = arith.constant 0 : index
    %c0_78 = arith.constant 0 : index
    %196 = vector.load %arg11[%c1_76, %c0_77, %c0_78] : memref<2x1x128xf32, #tpu.memory_space<vmem>>, vector<1x1x128xf32>
    %197 = vector.shape_cast %196 : vector<1x1x128xf32> to vector<1x128xf32>
    %cst_79 = arith.constant 0.000000e+00 : f32
    %198 = vector.broadcast %cst_79 : f32 to vector<8x128xf32>
    %199 = vector.extract_strided_slice %12 {offsets = [0, 384], sizes = [8, 128], strides = [1, 1]} : vector<8x768xf32> to vector<8x128xf32>
    %200 = vector.shape_cast %199 : vector<8x128xf32> to vector<8x1x128xf32>
    "tpu.trace_start"() <{level = 10 : i32, message = "bok,bnk->bon"}> : () -> ()
    %cst_80 = arith.constant dense<0.000000e+00> : vector<8x1x8xf32>
    %201 = tpu.matmul %200, %1, %cst_80 {dimension_numbers = #tpu.dot_dimension_numbers<[2], [2], [1], [1], [0, 0, 0, 1, 1, 1], [0], [0]>} : vector<8x1x128xf32>, vector<8x8x128xf32>, vector<8x1x8xf32> -> vector<8x1x8xf32>
    "tpu.trace_stop"() : () -> ()
    %202 = vector.shape_cast %201 : vector<8x1x8xf32> to vector<8x8xf32>
    %cst_81 = arith.constant dense<0xFF800000> : vector<8xf32>
    %203 = vector.multi_reduction <maximumf>, %202, %cst_81 [1] : vector<8x8xf32> to vector<8xf32>
    %204 = vector.shape_cast %203 : vector<8xf32> to vector<8x1xf32>
    %205 = vector.broadcast %204 : vector<8x1xf32> to vector<8x8xf32>
    %206 = arith.subf %202, %205 : vector<8x8xf32>
    %207 = math.exp %206 : vector<8x8xf32>
    %cst_82 = arith.constant dense<0.000000e+00> : vector<8xf32>
    %208 = vector.multi_reduction <add>, %207, %cst_82 [1] : vector<8x8xf32> to vector<8xf32>
    %209 = vector.shape_cast %208 : vector<8xf32> to vector<8x1xf32>
    %210 = tpu.reciprocal %209 {approx = true} : vector<8x1xf32> -> vector<8x1xf32>
    %211 = vector.broadcast %210 : vector<8x1xf32> to vector<8x8xf32>
    %212 = arith.mulf %207, %211 : vector<8x8xf32>
    %213 = arith.mulf %212, %2 : vector<8x8xf32>
    %cst_83 = arith.constant dense<0.000000e+00> : vector<8xf32>
    %214 = vector.multi_reduction <add>, %213, %cst_83 [1] : vector<8x8xf32> to vector<8xf32>
    %215 = vector.shape_cast %214 : vector<8xf32> to vector<8x1xf32>
    %cst_84 = arith.constant 9.99999997E-7 : f32
    %216 = vector.broadcast %cst_84 : f32 to vector<8x1xf32>
    %217 = arith.addf %215, %216 : vector<8x1xf32>
    %218 = tpu.reciprocal %217 {approx = true} : vector<8x1xf32> -> vector<8x1xf32>
    %219 = vector.broadcast %218 : vector<8x1xf32> to vector<8x8xf32>
    %220 = arith.mulf %213, %219 : vector<8x8xf32>
    %221 = vector.shape_cast %220 : vector<8x8xf32> to vector<8x1x8xf32>
    "tpu.trace_start"() <{level = 10 : i32, message = "bon,bnk->bok"}> : () -> ()
    %cst_85 = arith.constant dense<0.000000e+00> : vector<8x1x128xf32>
    %222 = tpu.matmul %221, %1, %cst_85 {dimension_numbers = #tpu.dot_dimension_numbers<[2], [1], [1], [2], [0, 0, 0, 1, 1, 2], [0], [0]>} : vector<8x1x8xf32>, vector<8x8x128xf32>, vector<8x1x128xf32> -> vector<8x1x128xf32>
    "tpu.trace_stop"() : () -> ()
    %223 = vector.shape_cast %222 : vector<8x1x128xf32> to vector<8x128xf32>
    %cst_86 = arith.constant dense<0.000000e+00> : vector<8x128xf32>
    %224 = tpu.matmul %223, %195, %cst_86 {dimension_numbers = #tpu.dot_dimension_numbers<[1], [0], [0], [1], [0, 0, 1, 1], [], []>} : vector<8x128xf32>, vector<128x128xf32>, vector<8x128xf32> -> vector<8x128xf32>
    %225 = vector.broadcast %197 : vector<1x128xf32> to vector<8x128xf32>
    %226 = arith.addf %224, %225 : vector<8x128xf32>
    %227 = arith.negf %226 : vector<8x128xf32>
    %228 = math.exp %227 : vector<8x128xf32>
    %cst_87 = arith.constant 1.000000e+00 : f32
    %229 = vector.broadcast %cst_87 : f32 to vector<8x128xf32>
    %230 = arith.addf %229, %228 : vector<8x128xf32>
    %231 = arith.divf %229, %230 : vector<8x128xf32>
    %232 = vector.shape_cast %3 : vector<8x128xf32> to vector<8x1x128xf32>
    "tpu.trace_start"() <{level = 10 : i32, message = "bok,bnk->bon"}> : () -> ()
    %cst_88 = arith.constant dense<0.000000e+00> : vector<8x1x24xf32>
    %233 = tpu.matmul %232, %4, %cst_88 {dimension_numbers = #tpu.dot_dimension_numbers<[2], [2], [1], [1], [0, 0, 0, 1, 1, 1], [0], [0]>} : vector<8x1x128xf32>, vector<8x24x128xf32>, vector<8x1x24xf32> -> vector<8x1x24xf32>
    "tpu.trace_stop"() : () -> ()
    %234 = vector.shape_cast %233 : vector<8x1x24xf32> to vector<8x24xf32>
    %235 = vector.shape_cast %231 : vector<8x128xf32> to vector<8x1x128xf32>
    "tpu.trace_start"() <{level = 10 : i32, message = "bok,bnk->bon"}> : () -> ()
    %cst_89 = arith.constant dense<0.000000e+00> : vector<8x1x24xf32>
    %236 = tpu.matmul %235, %5, %cst_89 {dimension_numbers = #tpu.dot_dimension_numbers<[2], [2], [1], [1], [0, 0, 0, 1, 1, 1], [0], [0]>} : vector<8x1x128xf32>, vector<8x24x128xf32>, vector<8x1x24xf32> -> vector<8x1x24xf32>
    "tpu.trace_stop"() : () -> ()
    %237 = vector.shape_cast %236 : vector<8x1x24xf32> to vector<8x24xf32>
    %238 = arith.mulf %234, %237 : vector<8x24xf32>
    %239 = vector.shape_cast %238 : vector<8x24xf32> to vector<8x1x24xf32>
    "tpu.trace_start"() <{level = 10 : i32, message = "bon,bnk->bok"}> : () -> ()
    %cst_90 = arith.constant dense<0.000000e+00> : vector<8x1x128xf32>
    %240 = tpu.matmul %239, %6, %cst_90 {dimension_numbers = #tpu.dot_dimension_numbers<[2], [1], [1], [2], [0, 0, 0, 1, 1, 2], [0], [0]>} : vector<8x1x24xf32>, vector<8x24x128xf32>, vector<8x1x128xf32> -> vector<8x1x128xf32>
    "tpu.trace_stop"() : () -> ()
    %241 = vector.shape_cast %240 : vector<8x1x128xf32> to vector<8x128xf32>
    %cst_91 = arith.constant 1.000000e+00 : f32
    %242 = vector.broadcast %cst_91 : f32 to vector<8x128xf32>
    %243 = arith.minimumf %241, %242 : vector<8x128xf32>
    %244 = vector.extract_strided_slice %193 {offsets = [0, 0], sizes = [8, 1], strides = [1, 1]} : vector<8x3xf32> to vector<8x1xf32>
    %245 = vector.broadcast %244 : vector<8x1xf32> to vector<8x128xf32>
    %246 = arith.mulf %243, %245 : vector<8x128xf32>
    %247 = arith.addf %198, %246 : vector<8x128xf32>
    %248 = vector.extract_strided_slice %12 {offsets = [0, 512], sizes = [8, 128], strides = [1, 1]} : vector<8x768xf32> to vector<8x128xf32>
    %249 = vector.shape_cast %248 : vector<8x128xf32> to vector<8x1x128xf32>
    "tpu.trace_start"() <{level = 10 : i32, message = "bok,bnk->bon"}> : () -> ()
    %cst_92 = arith.constant dense<0.000000e+00> : vector<8x1x8xf32>
    %250 = tpu.matmul %249, %1, %cst_92 {dimension_numbers = #tpu.dot_dimension_numbers<[2], [2], [1], [1], [0, 0, 0, 1, 1, 1], [0], [0]>} : vector<8x1x128xf32>, vector<8x8x128xf32>, vector<8x1x8xf32> -> vector<8x1x8xf32>
    "tpu.trace_stop"() : () -> ()
    %251 = vector.shape_cast %250 : vector<8x1x8xf32> to vector<8x8xf32>
    %cst_93 = arith.constant dense<0xFF800000> : vector<8xf32>
    %252 = vector.multi_reduction <maximumf>, %251, %cst_93 [1] : vector<8x8xf32> to vector<8xf32>
    %253 = vector.shape_cast %252 : vector<8xf32> to vector<8x1xf32>
    %254 = vector.broadcast %253 : vector<8x1xf32> to vector<8x8xf32>
    %255 = arith.subf %251, %254 : vector<8x8xf32>
    %256 = math.exp %255 : vector<8x8xf32>
    %cst_94 = arith.constant dense<0.000000e+00> : vector<8xf32>
    %257 = vector.multi_reduction <add>, %256, %cst_94 [1] : vector<8x8xf32> to vector<8xf32>
    %258 = vector.shape_cast %257 : vector<8xf32> to vector<8x1xf32>
    %259 = tpu.reciprocal %258 {approx = true} : vector<8x1xf32> -> vector<8x1xf32>
    %260 = vector.broadcast %259 : vector<8x1xf32> to vector<8x8xf32>
    %261 = arith.mulf %256, %260 : vector<8x8xf32>
    %262 = arith.mulf %261, %2 : vector<8x8xf32>
    %cst_95 = arith.constant dense<0.000000e+00> : vector<8xf32>
    %263 = vector.multi_reduction <add>, %262, %cst_95 [1] : vector<8x8xf32> to vector<8xf32>
    %264 = vector.shape_cast %263 : vector<8xf32> to vector<8x1xf32>
    %cst_96 = arith.constant 9.99999997E-7 : f32
    %265 = vector.broadcast %cst_96 : f32 to vector<8x1xf32>
    %266 = arith.addf %264, %265 : vector<8x1xf32>
    %267 = tpu.reciprocal %266 {approx = true} : vector<8x1xf32> -> vector<8x1xf32>
    %268 = vector.broadcast %267 : vector<8x1xf32> to vector<8x8xf32>
    %269 = arith.mulf %262, %268 : vector<8x8xf32>
    %270 = vector.shape_cast %269 : vector<8x8xf32> to vector<8x1x8xf32>
    "tpu.trace_start"() <{level = 10 : i32, message = "bon,bnk->bok"}> : () -> ()
    %cst_97 = arith.constant dense<0.000000e+00> : vector<8x1x128xf32>
    %271 = tpu.matmul %270, %1, %cst_97 {dimension_numbers = #tpu.dot_dimension_numbers<[2], [1], [1], [2], [0, 0, 0, 1, 1, 2], [0], [0]>} : vector<8x1x8xf32>, vector<8x8x128xf32>, vector<8x1x128xf32> -> vector<8x1x128xf32>
    "tpu.trace_stop"() : () -> ()
    %272 = vector.shape_cast %271 : vector<8x1x128xf32> to vector<8x128xf32>
    %cst_98 = arith.constant dense<0.000000e+00> : vector<8x128xf32>
    %273 = tpu.matmul %272, %195, %cst_98 {dimension_numbers = #tpu.dot_dimension_numbers<[1], [0], [0], [1], [0, 0, 1, 1], [], []>} : vector<8x128xf32>, vector<128x128xf32>, vector<8x128xf32> -> vector<8x128xf32>
    %274 = vector.broadcast %197 : vector<1x128xf32> to vector<8x128xf32>
    %275 = arith.addf %273, %274 : vector<8x128xf32>
    %276 = arith.negf %275 : vector<8x128xf32>
    %277 = math.exp %276 : vector<8x128xf32>
    %cst_99 = arith.constant 1.000000e+00 : f32
    %278 = vector.broadcast %cst_99 : f32 to vector<8x128xf32>
    %279 = arith.addf %278, %277 : vector<8x128xf32>
    %280 = arith.divf %278, %279 : vector<8x128xf32>
    %281 = vector.shape_cast %243 : vector<8x128xf32> to vector<8x1x128xf32>
    "tpu.trace_start"() <{level = 10 : i32, message = "bok,bnk->bon"}> : () -> ()
    %cst_100 = arith.constant dense<0.000000e+00> : vector<8x1x24xf32>
    %282 = tpu.matmul %281, %4, %cst_100 {dimension_numbers = #tpu.dot_dimension_numbers<[2], [2], [1], [1], [0, 0, 0, 1, 1, 1], [0], [0]>} : vector<8x1x128xf32>, vector<8x24x128xf32>, vector<8x1x24xf32> -> vector<8x1x24xf32>
    "tpu.trace_stop"() : () -> ()
    %283 = vector.shape_cast %282 : vector<8x1x24xf32> to vector<8x24xf32>
    %284 = vector.shape_cast %280 : vector<8x128xf32> to vector<8x1x128xf32>
    "tpu.trace_start"() <{level = 10 : i32, message = "bok,bnk->bon"}> : () -> ()
    %cst_101 = arith.constant dense<0.000000e+00> : vector<8x1x24xf32>
    %285 = tpu.matmul %284, %5, %cst_101 {dimension_numbers = #tpu.dot_dimension_numbers<[2], [2], [1], [1], [0, 0, 0, 1, 1, 1], [0], [0]>} : vector<8x1x128xf32>, vector<8x24x128xf32>, vector<8x1x24xf32> -> vector<8x1x24xf32>
    "tpu.trace_stop"() : () -> ()
    %286 = vector.shape_cast %285 : vector<8x1x24xf32> to vector<8x24xf32>
    %287 = arith.mulf %283, %286 : vector<8x24xf32>
    %288 = vector.shape_cast %287 : vector<8x24xf32> to vector<8x1x24xf32>
    "tpu.trace_start"() <{level = 10 : i32, message = "bon,bnk->bok"}> : () -> ()
    %cst_102 = arith.constant dense<0.000000e+00> : vector<8x1x128xf32>
    %289 = tpu.matmul %288, %6, %cst_102 {dimension_numbers = #tpu.dot_dimension_numbers<[2], [1], [1], [2], [0, 0, 0, 1, 1, 2], [0], [0]>} : vector<8x1x24xf32>, vector<8x24x128xf32>, vector<8x1x128xf32> -> vector<8x1x128xf32>
    "tpu.trace_stop"() : () -> ()
    %290 = vector.shape_cast %289 : vector<8x1x128xf32> to vector<8x128xf32>
    %cst_103 = arith.constant 1.000000e+00 : f32
    %291 = vector.broadcast %cst_103 : f32 to vector<8x128xf32>
    %292 = arith.minimumf %290, %291 : vector<8x128xf32>
    %293 = vector.extract_strided_slice %193 {offsets = [0, 1], sizes = [8, 1], strides = [1, 1]} : vector<8x3xf32> to vector<8x1xf32>
    %294 = vector.broadcast %293 : vector<8x1xf32> to vector<8x128xf32>
    %295 = arith.mulf %292, %294 : vector<8x128xf32>
    %296 = arith.addf %247, %295 : vector<8x128xf32>
    %297 = vector.extract_strided_slice %12 {offsets = [0, 640], sizes = [8, 128], strides = [1, 1]} : vector<8x768xf32> to vector<8x128xf32>
    %298 = vector.shape_cast %297 : vector<8x128xf32> to vector<8x1x128xf32>
    "tpu.trace_start"() <{level = 10 : i32, message = "bok,bnk->bon"}> : () -> ()
    %cst_104 = arith.constant dense<0.000000e+00> : vector<8x1x8xf32>
    %299 = tpu.matmul %298, %1, %cst_104 {dimension_numbers = #tpu.dot_dimension_numbers<[2], [2], [1], [1], [0, 0, 0, 1, 1, 1], [0], [0]>} : vector<8x1x128xf32>, vector<8x8x128xf32>, vector<8x1x8xf32> -> vector<8x1x8xf32>
    "tpu.trace_stop"() : () -> ()
    %300 = vector.shape_cast %299 : vector<8x1x8xf32> to vector<8x8xf32>
    %cst_105 = arith.constant dense<0xFF800000> : vector<8xf32>
    %301 = vector.multi_reduction <maximumf>, %300, %cst_105 [1] : vector<8x8xf32> to vector<8xf32>
    %302 = vector.shape_cast %301 : vector<8xf32> to vector<8x1xf32>
    %303 = vector.broadcast %302 : vector<8x1xf32> to vector<8x8xf32>
    %304 = arith.subf %300, %303 : vector<8x8xf32>
    %305 = math.exp %304 : vector<8x8xf32>
    %cst_106 = arith.constant dense<0.000000e+00> : vector<8xf32>
    %306 = vector.multi_reduction <add>, %305, %cst_106 [1] : vector<8x8xf32> to vector<8xf32>
    %307 = vector.shape_cast %306 : vector<8xf32> to vector<8x1xf32>
    %308 = tpu.reciprocal %307 {approx = true} : vector<8x1xf32> -> vector<8x1xf32>
    %309 = vector.broadcast %308 : vector<8x1xf32> to vector<8x8xf32>
    %310 = arith.mulf %305, %309 : vector<8x8xf32>
    %311 = arith.mulf %310, %2 : vector<8x8xf32>
    %cst_107 = arith.constant dense<0.000000e+00> : vector<8xf32>
    %312 = vector.multi_reduction <add>, %311, %cst_107 [1] : vector<8x8xf32> to vector<8xf32>
    %313 = vector.shape_cast %312 : vector<8xf32> to vector<8x1xf32>
    %cst_108 = arith.constant 9.99999997E-7 : f32
    %314 = vector.broadcast %cst_108 : f32 to vector<8x1xf32>
    %315 = arith.addf %313, %314 : vector<8x1xf32>
    %316 = tpu.reciprocal %315 {approx = true} : vector<8x1xf32> -> vector<8x1xf32>
    %317 = vector.broadcast %316 : vector<8x1xf32> to vector<8x8xf32>
    %318 = arith.mulf %311, %317 : vector<8x8xf32>
    %319 = vector.shape_cast %318 : vector<8x8xf32> to vector<8x1x8xf32>
    "tpu.trace_start"() <{level = 10 : i32, message = "bon,bnk->bok"}> : () -> ()
    %cst_109 = arith.constant dense<0.000000e+00> : vector<8x1x128xf32>
    %320 = tpu.matmul %319, %1, %cst_109 {dimension_numbers = #tpu.dot_dimension_numbers<[2], [1], [1], [2], [0, 0, 0, 1, 1, 2], [0], [0]>} : vector<8x1x8xf32>, vector<8x8x128xf32>, vector<8x1x128xf32> -> vector<8x1x128xf32>
    "tpu.trace_stop"() : () -> ()
    %321 = vector.shape_cast %320 : vector<8x1x128xf32> to vector<8x128xf32>
    %cst_110 = arith.constant dense<0.000000e+00> : vector<8x128xf32>
    %322 = tpu.matmul %321, %195, %cst_110 {dimension_numbers = #tpu.dot_dimension_numbers<[1], [0], [0], [1], [0, 0, 1, 1], [], []>} : vector<8x128xf32>, vector<128x128xf32>, vector<8x128xf32> -> vector<8x128xf32>
    %323 = vector.broadcast %197 : vector<1x128xf32> to vector<8x128xf32>
    %324 = arith.addf %322, %323 : vector<8x128xf32>
    %325 = arith.negf %324 : vector<8x128xf32>
    %326 = math.exp %325 : vector<8x128xf32>
    %cst_111 = arith.constant 1.000000e+00 : f32
    %327 = vector.broadcast %cst_111 : f32 to vector<8x128xf32>
    %328 = arith.addf %327, %326 : vector<8x128xf32>
    %329 = arith.divf %327, %328 : vector<8x128xf32>
    %330 = vector.shape_cast %292 : vector<8x128xf32> to vector<8x1x128xf32>
    "tpu.trace_start"() <{level = 10 : i32, message = "bok,bnk->bon"}> : () -> ()
    %cst_112 = arith.constant dense<0.000000e+00> : vector<8x1x24xf32>
    %331 = tpu.matmul %330, %4, %cst_112 {dimension_numbers = #tpu.dot_dimension_numbers<[2], [2], [1], [1], [0, 0, 0, 1, 1, 1], [0], [0]>} : vector<8x1x128xf32>, vector<8x24x128xf32>, vector<8x1x24xf32> -> vector<8x1x24xf32>
    "tpu.trace_stop"() : () -> ()
    %332 = vector.shape_cast %331 : vector<8x1x24xf32> to vector<8x24xf32>
    %333 = vector.shape_cast %329 : vector<8x128xf32> to vector<8x1x128xf32>
    "tpu.trace_start"() <{level = 10 : i32, message = "bok,bnk->bon"}> : () -> ()
    %cst_113 = arith.constant dense<0.000000e+00> : vector<8x1x24xf32>
    %334 = tpu.matmul %333, %5, %cst_113 {dimension_numbers = #tpu.dot_dimension_numbers<[2], [2], [1], [1], [0, 0, 0, 1, 1, 1], [0], [0]>} : vector<8x1x128xf32>, vector<8x24x128xf32>, vector<8x1x24xf32> -> vector<8x1x24xf32>
    "tpu.trace_stop"() : () -> ()
    %335 = vector.shape_cast %334 : vector<8x1x24xf32> to vector<8x24xf32>
    %336 = arith.mulf %332, %335 : vector<8x24xf32>
    %337 = vector.shape_cast %336 : vector<8x24xf32> to vector<8x1x24xf32>
    "tpu.trace_start"() <{level = 10 : i32, message = "bon,bnk->bok"}> : () -> ()
    %cst_114 = arith.constant dense<0.000000e+00> : vector<8x1x128xf32>
    %338 = tpu.matmul %337, %6, %cst_114 {dimension_numbers = #tpu.dot_dimension_numbers<[2], [1], [1], [2], [0, 0, 0, 1, 1, 2], [0], [0]>} : vector<8x1x24xf32>, vector<8x24x128xf32>, vector<8x1x128xf32> -> vector<8x1x128xf32>
    "tpu.trace_stop"() : () -> ()
    %339 = vector.shape_cast %338 : vector<8x1x128xf32> to vector<8x128xf32>
    %cst_115 = arith.constant 1.000000e+00 : f32
    %340 = vector.broadcast %cst_115 : f32 to vector<8x128xf32>
    %341 = arith.minimumf %339, %340 : vector<8x128xf32>
    %342 = vector.extract_strided_slice %193 {offsets = [0, 2], sizes = [8, 1], strides = [1, 1]} : vector<8x3xf32> to vector<8x1xf32>
    %343 = vector.broadcast %342 : vector<8x1xf32> to vector<8x128xf32>
    %344 = arith.mulf %341, %343 : vector<8x128xf32>
    %345 = arith.addf %296, %344 : vector<8x128xf32>
    %346 = arith.mulf %182, %345 : vector<8x128xf32>
    %c0_116 = arith.constant 0 : index
    %c0_117 = arith.constant 0 : index
    %347 = vector.load %arg14[%c0_116, %c0_117] : memref<8x128xf32, #tpu.memory_space<vmem>>, vector<8x128xf32>
    tpu.vector_store %arg14[%c0_116, %c0_117], %346 {strides = array<i32>} : memref<8x128xf32, #tpu.memory_space<vmem>>, vector<8x128xf32>,
    return
  }
  func.func @transform_0(%arg0: i32) -> (i32, i32) {
    %c0_i32 = arith.constant 0 : i32
    %c0_i32_0 = arith.constant 0 : i32
    %c0_i32_1 = arith.constant 0 : i32
    return %c0_i32, %c0_i32_0 : i32, i32
  }
  func.func @transform_1(%arg0: i32) -> (i32, i32, i32) {
    %c0_i32 = arith.constant 0 : i32
    %c0_i32_0 = arith.constant 0 : i32
    %c0_i32_1 = arith.constant 0 : i32
    %c0_i32_2 = arith.constant 0 : i32
    return %c0_i32, %c0_i32_0, %c0_i32_1 : i32, i32, i32
  }
  func.func @transform_2(%arg0: i32) -> (i32, i32) {
    %c0_i32 = arith.constant 0 : i32
    %c0_i32_0 = arith.constant 0 : i32
    %c0_i32_1 = arith.constant 0 : i32
    return %c0_i32, %c0_i32_0 : i32, i32
  }
  func.func @transform_3(%arg0: i32) -> (i32, i32) {
    %c0_i32 = arith.constant 0 : i32
    %c0_i32_0 = arith.constant 0 : i32
    %c0_i32_1 = arith.constant 0 : i32
    return %c0_i32, %c0_i32_0 : i32, i32
  }
  func.func @transform_4(%arg0: i32) -> (i32, i32, i32) {
    %c0_i32 = arith.constant 0 : i32
    %c0_i32_0 = arith.constant 0 : i32
    %c0_i32_1 = arith.constant 0 : i32
    %c0_i32_2 = arith.constant 0 : i32
    return %c0_i32, %c0_i32_0, %c0_i32_1 : i32, i32, i32
  }
  func.func @transform_5(%arg0: i32) -> (i32, i32, i32) {
    %c0_i32 = arith.constant 0 : i32
    %c0_i32_0 = arith.constant 0 : i32
    %c0_i32_1 = arith.constant 0 : i32
    %c0_i32_2 = arith.constant 0 : i32
    return %c0_i32, %c0_i32_0, %c0_i32_1 : i32, i32, i32
  }
  func.func @transform_6(%arg0: i32) -> (i32, i32, i32) {
    %c0_i32 = arith.constant 0 : i32
    %c0_i32_0 = arith.constant 0 : i32
    %c0_i32_1 = arith.constant 0 : i32
    %c0_i32_2 = arith.constant 0 : i32
    return %c0_i32, %c0_i32_0, %c0_i32_1 : i32, i32, i32
  }
  func.func @transform_7(%arg0: i32) -> (i32, i32) {
    %c0_i32 = arith.constant 0 : i32
    %c0_i32_0 = arith.constant 0 : i32
    %c0_i32_1 = arith.constant 0 : i32
    return %c0_i32, %c0_i32_0 : i32, i32
  }
  func.func @transform_8(%arg0: i32) -> (i32, i32) {
    %c0_i32 = arith.constant 0 : i32
    %c0_i32_0 = arith.constant 0 : i32
    %c0_i32_1 = arith.constant 0 : i32
    return %c0_i32, %c0_i32_0 : i32, i32
  }
  func.func @transform_9(%arg0: i32) -> (i32, i32, i32) {
    %c0_i32 = arith.constant 0 : i32
    %c0_i32_0 = arith.constant 0 : i32
    %c0_i32_1 = arith.constant 0 : i32
    %c0_i32_2 = arith.constant 0 : i32
    return %c0_i32, %c0_i32_0, %c0_i32_1 : i32, i32, i32
  }
  func.func @transform_10(%arg0: i32) -> (i32, i32, i32) {
    %c0_i32 = arith.constant 0 : i32
    %c0_i32_0 = arith.constant 0 : i32
    %c0_i32_1 = arith.constant 0 : i32
    %c0_i32_2 = arith.constant 0 : i32
    return %c0_i32, %c0_i32_0, %c0_i32_1 : i32, i32, i32
  }
  func.func @transform_11(%arg0: i32) -> (i32, i32) {
    %c0_i32 = arith.constant 0 : i32
    %c0_i32_0 = arith.constant 0 : i32
    %c0_i32_1 = arith.constant 0 : i32
    return %c0_i32, %c0_i32_0 : i32, i32
  }
  func.func @transform_12(%arg0: i32) -> (i32, i32) {
    %c0_i32 = arith.constant 0 : i32
    %c0_i32_0 = arith.constant 0 : i32
    %c0_i32_1 = arith.constant 0 : i32
    return %c0_i32, %c0_i32_0 : i32, i32
  }
  func.func @transform_13(%arg0: i32) -> (i32, i32) {
    %c0_i32 = arith.constant 0 : i32
    %c0_i32_0 = arith.constant 0 : i32
    %c0_i32_1 = arith.constant 0 : i32
    return %c0_i32, %c0_i32_0 : i32, i32
  }
}

</mosaic_0001>

<bundles_post_ra>
// kernel: tpu_custom_call.1
= control target key start
LH: loop header
LB: loop body
LE: loop exit
PB: predicated region body
PF: predicated region fallthrough
CT: control target
= control target key end

     0   :  { %18 = vsyncpa [#allocation3], 0  ;;  %s26894_s0 = inlined_call_operand.vmem [shape: f32[8,128], index: 0, kind: input, shape index: {}]   ;;  %s26895_s1 = inlined_call_operand.vmem [shape: f32[8,8,128], index: 1, kind: input, shape index: {}]   ;;  %s26896_s2 = inlined_call_operand.vmem [shape: f32[8,8], index: 2, kind: input, shape index: {}]   ;;  %s26897_s3 = inlined_call_operand.vmem [shape: f32[8,128], index: 3, kind: input, shape index: {}]   ;;  %s26898_s4 = inlined_call_operand.hbm [shape: f32[8,24,128], index: 4, kind: input, shape index: {}]   ;;  %s26899_s5 = inlined_call_operand.hbm [shape: f32[8,24,128], index: 5, kind: input, shape index: {}]   ;;  %s26900_s6 = inlined_call_operand.hbm [shape: f32[8,24,128], index: 6, kind: input, shape index: {}]   ;;  %s26901_s7 = inlined_call_operand.hbm [shape: f32[128,768], index: 7, kind: input, shape index: {}]   ;;  %s26902_s8 = inlined_call_operand.vmem [shape: f32[1,768], index: 8, kind: input, shape index: {}]   ;;  %s26903_s9 = inlined_call_operand.hbm [shape: f32[2,128,128], index: 9, kind: input, shape index: {}]   ;;  %s26904_s10 = inlined_call_operand.vmem [shape: f32[2,1,128], index: 10, kind: input, shape index: {}]   ;;  %s26905_s11 = inlined_call_operand.vmem [shape: f32[128,6], index: 11, kind: input, shape index: {}]   ;;  %s26906_s12 = inlined_call_operand.vmem [shape: f32[1,6], index: 12, kind: input, shape index: {}]   ;;  %s26907_s13 = inlined_call_operand.hbm [shape: f32[8,128], index: 13, kind: output, shape index: {}]  }
   0x1   :  { %19 = vsyncpa [#allocation6], 0 }
   0x2   :  { %20 = vsyncpa [#allocation9], 0 }
   0x3   :  { %21 = vsyncpa [#allocation4], 0  ;;  %s24061_s25 = smov [#allocation5]   ;;  %s24062_s27 = smov [#allocation8]  }
   0x4   :  { %s47_s26 = sshll.u32 %s24061_s25, 4  ;;  %s71_s28 = sshll.u32 %s24062_s27, 4  ;;  %s48_s26 = int_to_ptr.vmem [resolvable:$true] %s47_s26  ;;  %s24152_s28 = int_to_ptr.vmem [resolvable:$true] %s71_s28 }
   0x5   :  { %s23921_s14 = scalar_lea.hbm %s26899_s5, 3072 }
   0x6   :  { %p23922_p0 = scmp.ne.s32.totalorder %s26899_s5, %s23921_s14  ;;  %p23925_p1 = scmp.lt.u32.totalorder %s23921_s14, %s26899_s5 }
   0x8   :  { %p23927_p2 = pnand %p23925_p1, %p23922_p0 }
   0xa   :  { %23930 = shalt.err (!%p23927_p2)
}
   0xb   :  { %s23931_s19 = scalar_lea.vmem %s48_s26, 3072  ;;  %p23936_p4 = scmp.lt.s32.totalorder %s48_s26, %s48_s26 }
   0xc   :  { %p23932_p3 = scmp.ne.s32.totalorder %s48_s26, %s23931_s19  ;;  %p23937_p5 = scmp.lt.s32.totalorder %s23931_s19, %s23931_s19 }
   0xe   :  { %p23938_p6 = por %p23937_p5, %p23936_p4 }
  0x10   :  { %p23939_p7 = pnand %p23938_p6, %p23932_p3 }
  0x12   :  { %23942 = shalt.err (!%p23939_p7)
}
  0x13   :  { %s24063_s20 = smov 128   ;;  %s24064_s21 = smov 8  }
  0x14   :  { %53 = dma.hbm_to_vmem [thread:$0]  %s26899_s5, 3072, %s48_s26, [#allocation6], %s24063_s20, %s24063_s20, %s24064_s21  }
  0x15   :  { %s23943_s27 = scalar_lea.hbm %s26901_s7, 12288 }
  0x16   :  { %p23944_p8 = scmp.ne.s32.totalorder %s26901_s7, %s23943_s27  ;;  %p23947_p9 = scmp.lt.u32.totalorder %s23943_s27, %s26901_s7 }
  0x18   :  { %p23949_p10 = pnand %p23947_p9, %p23944_p8 }
  0x1a   :  { %23952 = shalt.err (!%p23949_p10)
}
  0x1b   :  { %s23953_s16 = scalar_lea.vmem %s24152_s28, 12288  ;;  %p23958_p12 = scmp.lt.s32.totalorder %s24152_s28, %s24152_s28 }
  0x1c   :  { %p23954_p11 = scmp.ne.s32.totalorder %s24152_s28, %s23953_s16  ;;  %p23959_p13 = scmp.lt.s32.totalorder %s23953_s16, %s23953_s16 }
  0x1e   :  { %p23960_p0 = por %p23959_p13, %p23958_p12 }
  0x20   :  { %p23961_p1 = pnand %p23960_p0, %p23954_p11 }
  0x22   :  { %23964 = shalt.err (!%p23961_p1)
}
  0x23   :  { %s24065_s5 = smov 768   ;;  %s24066_s26 = smov 48  }
  0x24   :  { %77 = dma.hbm_to_vmem [thread:$0]  %s26901_s7, 12288, %s24152_s28, [#allocation9], %s24065_s5, %s24065_s5, %s24066_s26  }
  0x25   :  { %s24067_s19 = smov [#allocation2]   ;;  %s24068_s23 = smov [#allocation7]  }
  0x26   :  { %s35_s22 = sshll.u32 %s24067_s19, 4  ;;  %s59_s24 = sshll.u32 %s24068_s23, 4  ;;  %s36_s22 = int_to_ptr.vmem [resolvable:$true] %s35_s22  ;;  %s24186_s24 = int_to_ptr.vmem [resolvable:$true] %s59_s24 }
  0x27   :  { %s23965_s29 = scalar_lea.hbm %s26898_s4, 3072 }
  0x28   :  { %p23966_p2 = scmp.ne.s32.totalorder %s26898_s4, %s23965_s29  ;;  %p23969_p3 = scmp.lt.u32.totalorder %s23965_s29, %s26898_s4 }
  0x2a   :  { %p23971_p4 = pnand %p23969_p3, %p23966_p2 }
  0x2c   :  { %23974 = shalt.err (!%p23971_p4)
}
  0x2d   :  { %s23975_s7 = scalar_lea.vmem %s36_s22, 3072  ;;  %p23980_p6 = scmp.lt.s32.totalorder %s36_s22, %s36_s22 }
  0x2e   :  { %p23976_p5 = scmp.ne.s32.totalorder %s36_s22, %s23975_s7  ;;  %p23981_p7 = scmp.lt.s32.totalorder %s23975_s7, %s23975_s7 }
  0x30   :  { %p23982_p8 = por %p23981_p7, %p23980_p6 }
  0x32   :  { %p23983_p9 = pnand %p23982_p8, %p23976_p5 }
  0x34   :  { %23986 = shalt.err (!%p23983_p9)
}
  0x35   :  { %41 = dma.hbm_to_vmem [thread:$0]  %s26898_s4, 3072, %s36_s22, [#allocation3], %s24063_s20, %s24063_s20, %s24064_s21  }
  0x36   :  { %s23987_s18 = scalar_lea.hbm %s26900_s6, 3072 }
  0x37   :  { %p23988_p10 = scmp.ne.s32.totalorder %s26900_s6, %s23987_s18  ;;  %p23991_p11 = scmp.lt.u32.totalorder %s23987_s18, %s26900_s6 }
  0x39   :  { %p23993_p12 = pnand %p23991_p11, %p23988_p10 }
  0x3b   :  { %23996 = shalt.err (!%p23993_p12)
}
  0x3c   :  { %s23997_s29 = scalar_lea.vmem %s24186_s24, 3072  ;;  %p24002_p0 = scmp.lt.s32.totalorder %s24186_s24, %s24186_s24 }
  0x3d   :  { %p23998_p13 = scmp.ne.s32.totalorder %s24186_s24, %s23997_s29  ;;  %p24003_p1 = scmp.lt.s32.totalorder %s23997_s29, %s23997_s29 }
  0x3f   :  { %p24004_p2 = por %p24003_p1, %p24002_p0 }
  0x41   :  { %p24005_p3 = pnand %p24004_p2, %p23998_p13 }
  0x43   :  { %24008 = shalt.err (!%p24005_p3)
}
  0x44   :  { %65 = dma.hbm_to_vmem [thread:$0]  %s26900_s6, 3072, %s24186_s24, [#allocation6], %s24063_s20, %s24063_s20, %s24064_s21  }
  0x45   :  { %s24069_s30 = smov [#allocation10]   ;;  %s24009_s7 = scalar_lea.hbm %s26903_s9, 4096 }
  0x46   :  { %s85_s14 = sshll.u32 %s24069_s30, 4  ;;  %p24010_p4 = scmp.ne.s32.totalorder %s26903_s9, %s24009_s7  ;;  %s86_s14 = int_to_ptr.vmem [resolvable:$true] %s85_s14 }
  0x47   :  { %p24013_p5 = scmp.lt.u32.totalorder %s24009_s7, %s26903_s9 }
  0x49   :  { %p24015_p6 = pnand %p24013_p5, %p24010_p4 }
  0x4b   :  { %24018 = shalt.err (!%p24015_p6)
}
  0x4c   :  { %s24019_s18 = scalar_lea.vmem %s86_s14, 4096  ;;  %p24024_p8 = scmp.lt.s32.totalorder %s86_s14, %s86_s14 }
  0x4d   :  { %p24020_p7 = scmp.ne.s32.totalorder %s86_s14, %s24019_s18  ;;  %p24025_p9 = scmp.lt.s32.totalorder %s24019_s18, %s24019_s18 }
  0x4f   :  { %p24026_p10 = por %p24025_p9, %p24024_p8 }
  0x51   :  { %p24027_p11 = pnand %p24026_p10, %p24020_p7 }
  0x53   :  { %24030 = shalt.err (!%p24027_p11)
}
  0x54   :  { %91 = dma.hbm_to_vmem [thread:$0]  %s26903_s9, 4096, %s86_s14, [#allocation9], %s24063_s20, %s24063_s20, %s24064_s21  }
  0x55   :  { %24053 = dma.done.wait [#allocation3], 3072  }
  0x56   :  { %24054 = vsyncadd [#allocation3], 4294964224 }
  0x57   :  { %24055 = dma.done.wait [#allocation6], 6144  }
  0x58   :  { %24056 = vsyncadd [#allocation6], 4294961152 }
  0x59   :  { %24057 = dma.done.wait [#allocation9], 16384  }
  0x5a   :  { %24058 = vsyncadd [#allocation9], 4294950912  ;;  %v26910_v0 = vmov 0.0   ;;  %v197_v1 = vld [vmem:[#allocation8 + $0x8] sm:$0xff]  ;;  %v203_v2 = vld [vmem:[#allocation8 + $0x38] sm:$0xff]  ;;  %vm24072_vm0 = vmmov 0  }
  0x5b   :  { %388 = vmatprep.mubr.f32.mxu0 %v26910_v0  ;;  %459 = vmatprep.mubr.f32.mxu1 %v26910_v0  ;;  %v196_v3 = vld [vmem:[#allocation8] sm:$0xff]  ;;  %v22936_v4 = vpack.c.bf16 %v203_v2, %v197_v1  ;;  %v202_v5 = vld [vmem:[#allocation8 + $0x30] sm:$0xff]  ;;  %v209_v6 = vld [vmem:[#allocation8 + $0x68] sm:$0xff]  ;;  %vm1292_vm1 = vcmask 1041409   ;;  %vm1295_vm2 = vcmask 1042434   ;;  %vm1298_vm3 = vcmask 1043459  }
  0x5c   :  { %v215_v7 = vld [vmem:[#allocation8 + $0x98] sm:$0xff]  ;;  %v22938_v8 = vpack.c.bf16 %v202_v5, %v196_v3  ;;  %v208_v10 = vld [vmem:[#allocation8 + $0x60] sm:$0xff]  ;;  %v214_v11 = vld [vmem:[#allocation8 + $0x90] sm:$0xff]  ;;  %vm1301_vm4 = vcmask 1044484   ;;  %vm1304_vm5 = vcmask 1045509   ;;  %vm1307_vm6 = vcmask 1046534  }
  0x5d   :  { %v22940_v9 = vpack.c.bf16 %v215_v7, %v209_v6  ;;  %v221_v12 = vld [vmem:[#allocation8 + $0xc8] sm:$0xff]  ;;  %22937 = vmatprep.subr.bf16.mxu0 %v22936_v4  ;;  %v227_v13 = vld [vmem:[#allocation8 + $0xf8] sm:$0xff]  ;;  %v22942_v14 = vpack.c.bf16 %v214_v11, %v208_v10  ;;  %v220_v16 = vld [vmem:[#allocation8 + $0xc0] sm:$0xff]  ;;  %vm1310_vm7 = vcmask 1047559   ;;  %vm1313_vm8 = vcmask 64512  }
  0x5e   :  { %22939 = vmatpush1.bf16.msra.mxu0 %v22938_v8  ;;  %v22944_v15 = vpack.c.bf16 %v227_v13, %v221_v12  ;;  %v226_v17 = vld [vmem:[#allocation8 + $0xf0] sm:$0xff]  ;;  %v233_v18 = vld [vmem:[#allocation8 + $0x128] sm:$0xff]  ;;  %v239_v19 = vld [vmem:[#allocation8 + $0x158] sm:$0xff]  ;;  %vm3417_vm9 = vcmask 195584   ;;  %vm10625_vm10 = vcmask 48152   ;;  %vm636_vm11 = vcmask 23552  }
  0x5f   :  { %22941 = vmatprep.subr.bf16.mxu0 %v22940_v9  ;;  %v22946_v20 = vpack.c.bf16 %v226_v17, %v220_v16  ;;  %v22948_v21 = vpack.c.bf16 %v239_v19, %v233_v18  ;;  %v232_v22 = vld [vmem:[#allocation8 + $0x120] sm:$0xff]  ;;  %v238_v23 = vld [vmem:[#allocation8 + $0x150] sm:$0xff]  ;;  %v245_v24 = vld [vmem:[#allocation8 + $0x188] sm:$0xff] }
  0x60   :  { %v251_v25 = vld [vmem:[#allocation8 + $0x1b8] sm:$0xff]  ;;  %v244_v26 = vld [vmem:[#allocation8 + $0x180] sm:$0xff]  ;;  %v250_v27 = vld [vmem:[#allocation8 + $0x1b0] sm:$0xff]  ;;  %v22950_v31 = vpack.c.bf16 %v238_v23, %v232_v22 }
  0x61   :  { %v199_v28 = vld [vmem:[#allocation8 + $0x18] sm:$0xff]  ;;  %v205_v29 = vld [vmem:[#allocation8 + $0x48] sm:$0xff]  ;;  %v198_v30 = vld [vmem:[#allocation8 + $0x10] sm:$0xff]  ;;  %v22952_v36 = vpack.c.bf16 %v251_v25, %v245_v24  ;;  %v22954_v46 = vpack.c.bf16 %v250_v27, %v244_v26 }
  0x62   :  { %22943 = vmatpush1.bf16.msra.mxu0 %v22942_v14  ;;  %v22968_v32 = vpack.c.bf16 %v205_v29, %v199_v28  ;;  %v204_v33 = vld [vmem:[#allocation8 + $0x40] sm:$0xff]  ;;  %v211_v34 = vld [vmem:[#allocation8 + $0x78] sm:$0xff]  ;;  %v217_v35 = vld [vmem:[#allocation8 + $0xa8] sm:$0xff] }
  0x63   :  { %22945 = vmatprep.subr.bf16.mxu0 %v22944_v15  ;;  %v22970_v37 = vpack.c.bf16 %v204_v33, %v198_v30  ;;  %v22972_v38 = vpack.c.bf16 %v217_v35, %v211_v34  ;;  %v210_v39 = vld [vmem:[#allocation8 + $0x70] sm:$0xff]  ;;  %v216_v40 = vld [vmem:[#allocation8 + $0xa0] sm:$0xff]  ;;  %v223_v41 = vld [vmem:[#allocation8 + $0xd8] sm:$0xff] }
  0x64   :  { %v257_v42 = vld [vmem:[#allocation8 + $0x1e8] sm:$0xff]  ;;  %v263_v43 = vld [vmem:[#allocation8 + $0x218] sm:$0xff]  ;;  %22969 = vmatprep.subr.bf16.mxu1 %v22968_v32  ;;  %v22974_v45 = vpack.c.bf16 %v216_v40, %v210_v39  ;;  %v256_v47 = vld [vmem:[#allocation8 + $0x1e0] sm:$0xff] }
  0x65   :  { %v229_v44 = vld [vmem:[#allocation8 + $0x108] sm:$0xff]  ;;  %22971 = vmatpush1.bf16.msra.mxu1 %v22970_v37  ;;  %v222_v49 = vld [vmem:[#allocation8 + $0xd0] sm:$0xff]  ;;  %v228_v50 = vld [vmem:[#allocation8 + $0x100] sm:$0xff]  ;;  %v22956_v51 = vpack.c.bf16 %v263_v43, %v257_v42 }
  0x66   :  { %22947 = vmatpush1.bf16.msra.mxu0 %v22946_v20  ;;  %22973 = vmatprep.subr.bf16.mxu1 %v22972_v38  ;;  %v22976_v48 = vpack.c.bf16 %v229_v44, %v223_v41  ;;  %v262_v52 = vld [vmem:[#allocation8 + $0x210] sm:$0xff]  ;;  %v235_v53 = vld [vmem:[#allocation8 + $0x138] sm:$0xff]  ;;  %v241_v54 = vld [vmem:[#allocation8 + $0x168] sm:$0xff]  ;;  %v22978_v57 = vpack.c.bf16 %v228_v50, %v222_v49 }
  0x67   :  { %22949 = vmatprep.subr.bf16.mxu0 %v22948_v21  ;;  %v269_v55 = vld [vmem:[#allocation8 + $0x248] sm:$0xff]  ;;  %v275_v56 = vld [vmem:[#allocation8 + $0x278] sm:$0xff]  ;;  %v22958_v58 = vpack.c.bf16 %v262_v52, %v256_v47  ;;  %v268_v59 = vld [vmem:[#allocation8 + $0x240] sm:$0xff]  ;;  %v22980_v60 = vpack.c.bf16 %v241_v54, %v235_v53 }
  0x68   :  { %v234_v61 = vld [vmem:[#allocation8 + $0x130] sm:$0xff]  ;;  %v240_v62 = vld [vmem:[#allocation8 + $0x160] sm:$0xff]  ;;  %v22960_v63 = vpack.c.bf16 %v275_v56, %v269_v55  ;;  %v247_v2 = vld [vmem:[#allocation8 + $0x198] sm:$0xff] }
  0x69   :  { %22975 = vmatpush1.bf16.msra.mxu1 %v22974_v45  ;;  %v274_v1 = vld [vmem:[#allocation8 + $0x270] sm:$0xff]  ;;  %v253_v3 = vld [vmem:[#allocation8 + $0x1c8] sm:$0xff]  ;;  %v287_v5 = vld [vmem:[#allocation8 + $0x2d8] sm:$0xff]  ;;  %v22982_v6 = vpack.c.bf16 %v240_v62, %v234_v61 }
  0x6a   :  { %22951 = vmatpush1.bf16.msra.mxu0 %v22950_v31  ;;  %22977 = vmatprep.subr.bf16.mxu1 %v22976_v48  ;;  %v281_v4 = vld [vmem:[#allocation8 + $0x2a8] sm:$0xff]  ;;  %v22962_v7 = vpack.c.bf16 %v274_v1, %v268_v59  ;;  %v280_v8 = vld [vmem:[#allocation8 + $0x2a0] sm:$0xff]  ;;  %v22984_v9 = vpack.c.bf16 %v253_v3, %v247_v2  ;;  %v246_v10 = vld [vmem:[#allocation8 + $0x190] sm:$0xff] }
  0x6b   :  { %22953 = vmatprep.subr.bf16.mxu0 %v22952_v36  ;;  %v252_v11 = vld [vmem:[#allocation8 + $0x1c0] sm:$0xff]  ;;  %v22964_v12 = vpack.c.bf16 %v287_v5, %v281_v4  ;;  %v286_v13 = vld [vmem:[#allocation8 + $0x2d0] sm:$0xff]  ;;  %v259_v14 = vld [vmem:[#allocation8 + $0x1f8] sm:$0xff] }
  0x6c   :  { %v265_v15 = vld [vmem:[#allocation8 + $0x228] sm:$0xff]  ;;  %v207_v17 = vld [vmem:[#allocation8 + $0x58] sm:$0xff]  ;;  %v22986_v18 = vpack.c.bf16 %v252_v11, %v246_v10  ;;  %v22966_v19 = vpack.c.bf16 %v286_v13, %v280_v8  ;;  %v258_v21 = vld [vmem:[#allocation8 + $0x1f0] sm:$0xff] }
  0x6d   :  { %22979 = vmatpush1.bf16.msra.mxu1 %v22978_v57  ;;  %v201_v16 = vld [vmem:[#allocation8 + $0x28] sm:$0xff]  ;;  %v22988_v20 = vpack.c.bf16 %v265_v15, %v259_v14  ;;  %v264_v22 = vld [vmem:[#allocation8 + $0x220] sm:$0xff]  ;;  %v271_v23 = vld [vmem:[#allocation8 + $0x258] sm:$0xff] }
  0x6e   :  { %22955 = vmatpush1.bf16.msra.mxu0 %v22954_v46  ;;  %22981 = vmatprep.subr.bf16.mxu1 %v22980_v60  ;;  %v277_v24 = vld [vmem:[#allocation8 + $0x288] sm:$0xff]  ;;  %v23000_v25 = vpack.c.bf16 %v207_v17, %v201_v16  ;;  %v200_v26 = vld [vmem:[#allocation8 + $0x20] sm:$0xff]  ;;  %v206_v27 = vld [vmem:[#allocation8 + $0x50] sm:$0xff]  ;;  %v22990_v31 = vpack.c.bf16 %v264_v22, %v258_v21 }
  0x6f   :  { %22957 = vmatprep.subr.bf16.mxu0 %v22956_v51  ;;  %v213_v28 = vld [vmem:[#allocation8 + $0x88] sm:$0xff]  ;;  %v219_v29 = vld [vmem:[#allocation8 + $0xb8] sm:$0xff]  ;;  %v24243_v30 = vld [vmem:[%s26894_s0] sm:$0xff]  ;;  %v22992_v32 = vpack.c.bf16 %v277_v24, %v271_v23  ;;  %v23002_v36 = vpack.c.bf16 %v206_v27, %v200_v26 }
  0x70   :  { %v270_v33 = vld [vmem:[#allocation8 + $0x250] sm:$0xff]  ;;  %v276_v34 = vld [vmem:[#allocation8 + $0x280] sm:$0xff]  ;;  %v283_v35 = vld [vmem:[#allocation8 + $0x2b8] sm:$0xff]  ;;  %v23004_v38 = vpack.c.bf16 %v219_v29, %v213_v28 }
  0x71   :  { %22983 = vmatpush1.bf16.msra.mxu1 %v22982_v6  ;;  %v289_v37 = vld [vmem:[#allocation8 + $0x2e8] sm:$0xff]  ;;  %v212_v39 = vld [vmem:[#allocation8 + $0x80] sm:$0xff]  ;;  %v218_v40 = vld [vmem:[#allocation8 + $0xb0] sm:$0xff]  ;;  %v22994_v43 = vpack.c.bf16 %v276_v34, %v270_v33 }
  0x72   :  { %22959 = vmatpush1.bf16.msra.mxu0 %v22958_v58  ;;  %22985 = vmatprep.subr.bf16.mxu1 %v22984_v9  ;;  %v225_v41 = vld [vmem:[#allocation8 + $0xe8] sm:$0xff]  ;;  %v231_v42 = vld [vmem:[#allocation8 + $0x118] sm:$0xff]  ;;  %v22996_v44 = vpack.c.bf16 %v289_v37, %v283_v35  ;;  %v282_v45 = vld [vmem:[#allocation8 + $0x2b0] sm:$0xff]  ;;  %v23006_v47 = vpack.c.bf16 %v218_v40, %v212_v39 }
  0x73   :  { %22961 = vmatprep.subr.bf16.mxu0 %v22960_v63  ;;  %v288_v46 = vld [vmem:[#allocation8 + $0x2e0] sm:$0xff]  ;;  %v23008_v48 = vpack.c.bf16 %v231_v42, %v225_v41  ;;  %v230_v50 = vld [vmem:[#allocation8 + $0x110] sm:$0xff]  ;;  %v237_v51 = vld [vmem:[#allocation8 + $0x148] sm:$0xff]  ;;  %v26908_v63 = vmov 0.0|0.0  }
  0x74   :  { %v224_v49 = vld [vmem:[#allocation8 + $0xe0] sm:$0xff]  ;;  %v243_v52 = vld [vmem:[#allocation8 + $0x178] sm:$0xff]  ;;  %v22998_v53 = vpack.c.bf16 %v288_v46, %v282_v45  ;;  %v544_v55 = vld [vmem:[%s26905_s11 + $0x8] sm:$0xff] }
  0x75   :  { %22987 = vmatpush1.bf16.msra.mxu1 %v22986_v18  ;;  %v543_v54 = vld [vmem:[%s26905_s11] sm:$0xff]  ;;  %v23010_v56 = vpack.c.bf16 %v230_v50, %v224_v49  ;;  %v23012_v57 = vpack.c.bf16 %v243_v52, %v237_v51  ;;  %v242_v59 = vld [vmem:[#allocation8 + $0x170] sm:$0xff]  ;;  %v249_v60 = vld [vmem:[#allocation8 + $0x1a8] sm:$0xff] }
  0x76   :  { %22963 = vmatpush1.bf16.msra.mxu0 %v22962_v7  ;;  %22989 = vmatprep.subr.bf16.mxu1 %v22988_v20  ;;  %v236_v58 = vld [vmem:[#allocation8 + $0x140] sm:$0xff]  ;;  %v255_v61 = vld [vmem:[#allocation8 + $0x1d8] sm:$0xff]  ;;  %v23033_v62 = vpack.c.bf16 %v544_v55, %v543_v54  ;;  %v545_v1 = vld [vmem:[%s26905_s11 + $0x10] sm:$0xff]  ;;  %v24073_v55 = vmov 1966171168  }
  0x77   :  { %22965 = vmatprep.subr.bf16.mxu0 %v22964_v12  ;;  %v546_v2 = vld [vmem:[%s26905_s11 + $0x18] sm:$0xff]  ;;  %v23014_v3 = vpack.c.bf16 %v242_v59, %v236_v58  ;;  %v23016_v4 = vpack.c.bf16 %v255_v61, %v249_v60  ;;  %v248_v5 = vld [vmem:[#allocation8 + $0x1a0] sm:$0xff]  ;;  %v254_v6 = vld [vmem:[#allocation8 + $0x1d0] sm:$0xff] }
  0x78   :  { %v261_v7 = vld [vmem:[#allocation8 + $0x208] sm:$0xff]  ;;  %v267_v8 = vld [vmem:[#allocation8 + $0x238] sm:$0xff]  ;;  %v23036_v9 = vpack.c.bf16 %v546_v2, %v545_v1  ;;  %v547_v10 = vld [vmem:[%s26905_s11 + $0x20] sm:$0xff]  ;;  %v23018_v12 = vpack.c.bf16 %v254_v6, %v248_v5 }
  0x79   :  { %22991 = vmatpush1.bf16.msra.mxu1 %v22990_v31  ;;  %v548_v11 = vld [vmem:[%s26905_s11 + $0x28] sm:$0xff]  ;;  %v23020_v13 = vpack.c.bf16 %v267_v8, %v261_v7  ;;  %v260_v14 = vld [vmem:[#allocation8 + $0x200] sm:$0xff]  ;;  %v266_v15 = vld [vmem:[#allocation8 + $0x230] sm:$0xff] }
  0x7a   :  { %22967 = vmatpush1.bf16.msra.mxu0 %v22966_v19  ;;  %22993 = vmatprep.subr.bf16.mxu1 %v22992_v32  ;;  %v23039_v16 = vpack.c.bf16 %v548_v11, %v547_v10  ;;  %v549_v17 = vld [vmem:[%s26905_s11 + $0x30] sm:$0xff]  ;;  %v550_v18 = vld [vmem:[%s26905_s11 + $0x38] sm:$0xff]  ;;  %v23022_v19 = vpack.c.bf16 %v266_v15, %v260_v14  ;;  %v551_v21 = vld [vmem:[%s26905_s11 + $0x40] sm:$0xff] }
  0x7b   :  { %23001 = vmatprep.subr.bf16.mxu0 %v23000_v25  ;;  %v23042_v20 = vpack.c.bf16 %v550_v18, %v549_v17  ;;  %v552_v22 = vld [vmem:[%s26905_s11 + $0x48] sm:$0xff]  ;;  %v553_v24 = vld [vmem:[%s26905_s11 + $0x50] sm:$0xff]  ;;  %v554_v25 = vld [vmem:[%s26905_s11 + $0x58] sm:$0xff] }
  0x7c   :  { %v23045_v23 = vpack.c.bf16 %v552_v22, %v551_v21  ;;  %v23048_v26 = vpack.c.bf16 %v554_v25, %v553_v24  ;;  %v273_v27 = vld [vmem:[#allocation8 + $0x268] sm:$0xff]  ;;  %v279_v28 = vld [vmem:[#allocation8 + $0x298] sm:$0xff]  ;;  %v272_v31 = vld [vmem:[#allocation8 + $0x260] sm:$0xff] }
  0x7d   :  { %389 = vmatmul.mubr.f32.vlgmr.msra.gmra.mrb[0].mxu0 %v24243_v30  ;;  %22995 = vmatpush1.bf16.msra.mxu1 %v22994_v43  ;;  %v23024_v29 = vpack.c.bf16 %v279_v28, %v273_v27  ;;  %v278_v32 = vld [vmem:[#allocation8 + $0x290] sm:$0xff]  ;;  %v555_v34 = vld [vmem:[%s26905_s11 + $0x60] sm:$0xff]  ;;  %v556_v35 = vld [vmem:[%s26905_s11 + $0x68] sm:$0xff] }
  0x7e   :  { %23003 = vmatpush1.bf16.msra.mxu0 %v23002_v36  ;;  %530 = vmatprep.mubr.f32.mxu0 %v26910_v0  ;;  %v23026_v33 = vpack.c.bf16 %v278_v32, %v272_v31  ;;  %v23051_v36 = vpack.c.bf16 %v556_v35, %v555_v34  ;;  %v285_v37 = vld [vmem:[#allocation8 + $0x2c8] sm:$0xff]  ;;  %v284_v40 = vld [vmem:[#allocation8 + $0x2c0] sm:$0xff]  ;;  %v290_v41 = vld [vmem:[#allocation8 + $0x2f0] sm:$0xff] }
  0x7f   :  { %23005 = vmatprep.subr.bf16.mxu0 %v23004_v38  ;;  %22997 = vmatprep.subr.bf16.mxu1 %v22996_v44  ;;  %v291_v38 = vld [vmem:[#allocation8 + $0x2f8] sm:$0xff]  ;;  %v23030_v42 = vpack.c.bf16 %v290_v41, %v284_v40  ;;  %v557_v43 = vld [vmem:[%s26905_s11 + $0x70] sm:$0xff]  ;;  %v24315_v46 = vld [vmem:[%s26895_s1] sm:$0xff] }
  0x80   :  { %v23028_v39 = vpack.c.bf16 %v291_v38, %v285_v37  ;;  %v558_v44 = vld [vmem:[%s26905_s11 + $0x78] sm:$0xff]  ;;  %v292_v50 = vld [vmem:[%s26902_s8] sm:$0x3f]  ;;  %v24373_v11 = vld [vmem:[%s26895_s1 + $0x28] sm:$0xff] }
  0x81   :  { %22999 = vmatpush1.bf16.msra.mxu1 %v22998_v53  ;;  %v23054_v45 = vpack.c.bf16 %v558_v44, %v557_v43  ;;  %v24354_v6 = vld [vmem:[%s26895_s1 + $0x18] sm:$0xff]  ;;  %v24383_v14 = vld [vmem:[%s26895_s1 + $0x30] sm:$0xff] }
  0x82   :  { %23007 = vmatpush1.bf16.msra.mxu0 %v23006_v47  ;;  %23032 = vmatprep.subr.bf16.mxu1 %v26908_v63  ;;  %v24322_v47 = vld [vmem:[%s26895_s1 + $0x8] sm:$0xff] }
  0x83   :  { %23009 = vmatprep.subr.bf16.mxu0 %v23008_v48 }
  0x84   :  { %460 = vmatmul.mubr.f32.vlgmr.msra.gmra.mrb[0].mxu1 %v24243_v30 }
  0x85   :  { %23034 = vmatpush3.bf16.msra.mxu1 %v23033_v62  ;;  %21019 = vmatprep.mubr.msk.f32.mxu1 %vm24072_vm0, %v26910_v0 }
  0x86   :  { %23011 = vmatpush1.bf16.msra.mxu0 %v23010_v56  ;;  %23035 = vmatprep.subr.bf16.mxu1 %v26908_v63  ;;  %v668_v56 = vunpack.c.l.s4 %v24073_v55 }
  0x87   :  { %23013 = vmatprep.subr.bf16.mxu0 %v23012_v57 }
  0x88   :  { %v669_v57 = vunpack.c.0.s8 %v668_v56 }
  0x89   :  { %23037 = vmatpush3.bf16.msra.mxu1 %v23036_v9  ;;  %v24364_v9 = vld [vmem:[%s26895_s1 + $0x20] sm:$0xff] }
  0x8a   :  { %23015 = vmatpush1.bf16.msra.mxu0 %v23014_v3  ;;  %23038 = vmatprep.subr.bf16.mxu1 %v26908_v63  ;;  %v24348_v3 = vld [vmem:[%s26895_s1 + $0x10] sm:$0xff] }
  0x8b   :  { %23017 = vmatprep.subr.bf16.mxu0 %v23016_v4 }
  0x8d   :  { %23040 = vmatpush3.bf16.msra.mxu1 %v23039_v16  ;;  %v24393_v16 = vld [vmem:[%s26895_s1 + $0x38] sm:$0xff] }
  0x8e   :  { %23019 = vmatpush1.bf16.msra.mxu0 %v23018_v12  ;;  %23041 = vmatprep.subr.bf16.mxu1 %v26908_v63 }
  0x8f   :  { %23021 = vmatprep.subr.bf16.mxu0 %v23020_v13 }
  0x91   :  { %23043 = vmatpush3.bf16.msra.mxu1 %v23042_v20 }
  0x92   :  { %23023 = vmatpush1.bf16.msra.mxu0 %v23022_v19  ;;  %23044 = vmatprep.subr.bf16.mxu1 %v26908_v63 }
  0x93   :  { %23025 = vmatprep.subr.bf16.mxu0 %v23024_v29 }
  0x95   :  { %23046 = vmatpush3.bf16.msra.mxu1 %v23045_v23 }
  0x96   :  { %23047 = vmatprep.subr.bf16.mxu1 %v26908_v63  ;;  %23027 = vmatpush1.bf16.msra.mxu0 %v23026_v33 }
  0x97   :  { %23029 = vmatprep.subr.bf16.mxu0 %v23028_v39 }
  0x99   :  { %23049 = vmatpush3.bf16.msra.mxu1 %v23048_v26 }
  0x9a   :  { %23050 = vmatprep.subr.bf16.mxu1 %v26908_v63  ;;  %23031 = vmatpush1.bf16.msra.mxu0 %v23030_v42 }
  0x9b   :  { %21022 = vmatprep.subr.mxu0 %v26910_v0 }
  0x9d   :  { %23052 = vmatpush3.bf16.msra.mxu1 %v23051_v36  ;;  %531 = vmatmul.mubr.f32.vlgmr.msra.gmra.mrb[2].mxu0 %v24243_v30 }
  0x9e   :  { %23053 = vmatprep.subr.bf16.mxu1 %v26908_v63  ;;  %21024 = vmatprep.mubr.msk.f32.mxu0 %vm24072_vm0, %v26910_v0 }
  0xa1   :  { %23055 = vmatpush3.bf16.msra.mxu1 %v23054_v45 }
  0xa2   :  { %21027 = vmatprep.subr.mxu1 %v26910_v0 }
  0xa3   :  { %21023 = vmatpush3.xpose.msra.mxu0 %v24315_v46 }
  0xa4   :  { %21020 = vmatmul.mubr.f32.vlgmr.msra.gmra.mrb[2].mxu1 %v24243_v30  ;;  %21032 = vmatprep.subr.mxu0 %v26910_v0  ;;  %v294_v30 = vlaneseq }
  0xa5   :  { %21029 = vmatprep.mubr.msk.f32.mxu1 %vm24072_vm0, %v26910_v0 }
  0xa6   :  { %v24328_v48 = vshrl.u32 %v294_v30, 7 }
  0xa8   :  { %27093 = vst [vmem:[#allocation16_spill] sm:$0xff] %v24328_v48  ;;  %v296_v49 = vsub.s32 0, %v24328_v48  ;;  %v24337_v58 = vsub.s32 %v669_v57, %v24328_v48 }
  0xaa   :  { %21028 = vmatpush3.xpose.msra.mxu1 %v24322_v47  ;;  %v297_v51 = vrot.slane %v292_v50, %v296_v49  ;;  %27094 = vst [vmem:[#allocation17_spill] sm:$0xff] %v24337_v58 }
  0xab   :  { %21037 = vmatprep.subr.mxu1 %v26910_v0 }
 0x150   :  { %v390_v52 = vpop.f32.mrb[0].mxu0 }
 0x151   :  { %v391_v53 = vadd.f32 %v390_v52, %v297_v51  ;;  %v24334_v54 = vpop.f32.mrb[1].mxu0 }
 0x153   :  { %23637 = vtanh.f32 %v391_v53 }
 0x157   :  { %v24339_v59 = vpop.f32.mrb[0].mxu1 }
 0x158   :  { %27095 = vst [vmem:[#allocation18_spill] sm:$0xff] %v24339_v59  ;;  %v24341_v60 = vpop.f32.mrb[1].mxu1 }
 0x159   :  { %27096 = vst [vmem:[#allocation19_spill] sm:$0xff] %v24341_v60 }
 0x15d   :  { %v23638_v61 = vpop.eup %23637 }
 0x15e   :  { %v673_v62 = vrot.slane %v23638_v61, %v24337_v58  ;;  %v666_v1 = vcombine.high %v23638_v61, %v23638_v61 }
 0x160   :  { %v689_v2 = vrot.slane %v673_v62, %v24337_v58  ;;  %v681_v4 = vcombine.high %v673_v62, %v673_v62  ;;  %v680_v7 = vrot.slane %v666_v1, %v24337_v58 }
 0x162   :  { %21025 = vmatmul.mubr.f32.vlgmr.msra.gmra.mrb[4].mxu0 %v689_v2  ;;  %v703_v5 = vrot.slane %v681_v4, %v24337_v58  ;;  %v711_v8 = vcombine.high %v689_v2, %v689_v2  ;;  %v682_v12 = vcombine.high %v680_v7, %v680_v7  ;;  %v696_v13 = vrot.slane %v680_v7, %v24337_v58 }
 0x163   :  { %21033 = vmatpush3.xpose.msra.mxu0 %v24348_v3  ;;  %21034 = vmatprep.mubr.msk.f32.mxu0 %vm24072_vm0, %v26910_v0 }
 0x164   :  { %21030 = vmatmul.mubr.f32.vlgmr.msra.gmra.mrb[4].mxu1 %v703_v5  ;;  %21042 = vmatprep.subr.mxu0 %v26910_v0  ;;  %v713_v10 = vcombine.high %v703_v5, %v703_v5  ;;  %v710_v15 = vrot.slane %v682_v12, %v24337_v58  ;;  %v712_v17 = vcombine.high %v696_v13, %v696_v13 }
 0x165   :  { %21038 = vmatpush3.xpose.msra.mxu1 %v24354_v6  ;;  %21039 = vmatprep.mubr.msk.f32.mxu1 %vm24072_vm0, %v26910_v0 }
 0x166   :  { %21035 = vmatmul.mubr.f32.vlgmr.msra.gmra.mrb[6].mxu0 %v711_v8  ;;  %21047 = vmatprep.subr.mxu1 %v26910_v0  ;;  %v714_v18 = vcombine.high %v710_v15, %v710_v15 }
 0x167   :  { %21043 = vmatpush3.xpose.msra.mxu0 %v24364_v9  ;;  %21044 = vmatprep.mubr.msk.f32.mxu0 %vm24072_vm0, %v26910_v0 }
 0x168   :  { %21040 = vmatmul.mubr.f32.vlgmr.msra.gmra.mrb[6].mxu1 %v713_v10  ;;  %21052 = vmatprep.subr.mxu0 %v26910_v0 }
 0x169   :  { %21048 = vmatpush3.xpose.msra.mxu1 %v24373_v11  ;;  %21049 = vmatprep.mubr.msk.f32.mxu1 %vm24072_vm0, %v26910_v0 }
 0x16a   :  { %21045 = vmatmul.mubr.f32.vlgmr.msra.gmra.mrb[8].mxu0 %v696_v13  ;;  %21057 = vmatprep.subr.mxu1 %v26910_v0 }
 0x16b   :  { %21053 = vmatpush3.xpose.msra.mxu0 %v24383_v14  ;;  %21054 = vmatprep.mubr.msk.f32.mxu0 %vm24072_vm0, %v26910_v0 }
 0x16c   :  { %21050 = vmatmul.mubr.f32.vlgmr.msra.gmra.mrb[8].mxu1 %v710_v15  ;;  %21062 = vmatprep.subr.mxu0 %v26910_v0 }
 0x16d   :  { %21058 = vmatpush3.xpose.msra.mxu1 %v24393_v16  ;;  %21059 = vmatprep.mubr.msk.f32.mxu1 %vm24072_vm0, %v26910_v0 }
 0x16e   :  { %21055 = vmatmul.mubr.f32.vlgmr.msra.gmra.mrb[10].mxu0 %v712_v17  ;;  %21067 = vmatprep.subr.mxu1 %v26910_v0 }
 0x16f   :  { %21063 = vmatpush3.msra.mxu0 %v24315_v46  ;;  %21064 = vmatprep.mubr.msk.f32.mxu0 %vm24072_vm0, %v26910_v0 }
 0x170   :  { %21060 = vmatmul.mubr.f32.vlgmr.msra.gmra.mrb[10].mxu1 %v714_v18  ;;  %21072 = vmatprep.subr.mxu0 %v26910_v0  ;;  %v24411_v19 = vpop.f32.mrb[2].mxu0 }
 0x171   :  { %21068 = vmatpush3.msra.mxu1 %v24322_v47  ;;  %21069 = vmatprep.mubr.msk.f32.mxu1 %vm24072_vm0, %v26910_v0  ;;  %27097 = vst [vmem:[#allocation20_spill] sm:$0xff] %v24411_v19  ;;  %v24413_v20 = vpop.f32.mrb[3].mxu0 }
 0x172   :  { %21077 = vmatprep.subr.mxu1 %v26910_v0  ;;  %27098 = vst [vmem:[#allocation21_spill] sm:$0xff] %v24413_v20 }
 0x177   :  { %v24415_v21 = vpop.f32.mrb[2].mxu1 }
 0x178   :  { %27099 = vst [vmem:[#allocation22_spill] sm:$0xff] %v24415_v21  ;;  %v21021_v22 = vpop.f32.mrb[3].mxu1 }
 0x235   :  { %v789_v23 = vpop.f32.mrb[4].mxu0 }
 0x236   :  { %v21026_v24 = vpop.f32.mrb[5].mxu0 }
 0x237   :  { %v859_v25 = vpop.f32.mrb[4].mxu1 }
 0x238   :  { %v1291_v26 = vrot.slane %v859_v25, 7  ;;  %v21031_v27 = vpop.f32.mrb[5].mxu1 }
 0x239   :  { %v929_v28 = vpop.f32.mrb[6].mxu0 }
 0x23a   :  { %v1293_v29 = vsel %vm1292_vm1, %v1291_v26, %v789_v23  ;;  %v1294_v31 = vrot.slane %v929_v28, 6  ;;  %v21036_v32 = vpop.f32.mrb[7].mxu0 }
 0x23b   :  { %v999_v33 = vpop.f32.mrb[6].mxu1 }
 0x23c   :  { %v1296_v34 = vsel %vm1295_vm2, %v1294_v31, %v1293_v29  ;;  %v1297_v35 = vrot.slane %v999_v33, 5  ;;  %v21041_v36 = vpop.f32.mrb[7].mxu1 }
 0x23d   :  { %v1069_v37 = vpop.f32.mrb[8].mxu0 }
 0x23e   :  { %v1299_v38 = vsel %vm1298_vm3, %v1297_v35, %v1296_v34  ;;  %v1300_v39 = vrot.slane %v1069_v37, 4  ;;  %v21046_v40 = vpop.f32.mrb[9].mxu0 }
 0x23f   :  { %v1139_v41 = vpop.f32.mrb[8].mxu1 }
 0x240   :  { %v1302_v42 = vsel %vm1301_vm4, %v1300_v39, %v1299_v38  ;;  %v1303_v43 = vrot.slane %v1139_v41, 3  ;;  %v21051_v44 = vpop.f32.mrb[9].mxu1 }
 0x241   :  { %v1209_v45 = vpop.f32.mrb[10].mxu0 }
 0x242   :  { %v1306_v46 = vrot.slane %v1209_v45, 2  ;;  %v21056_v47 = vpop.f32.mrb[11].mxu0  ;;  %v1305_v30 = vsel %vm1304_vm5, %v1303_v43, %v1302_v42 }
 0x243   :  { %v1279_v49 = vpop.f32.mrb[10].mxu1 }
 0x244   :  { %v1309_v50 = vrot.slane %v1279_v49, 1  ;;  %v21061_v51 = vpop.f32.mrb[11].mxu1  ;;  %v1308_v52 = vsel %vm1307_vm6, %v1306_v46, %v1305_v30 }
 0x246   :  { %v1311_v53 = vsel %vm1310_vm7, %v1309_v50, %v1308_v52 }
 0x247   :  { %v1314_v55 = vsel %vm1313_vm8, %v1311_v53, -inf }
 0x248   :  { %1315 = vmax.xlane.f32.xlu0 %v1314_v55 }
 0x2d5   :  { %v1316_v56 = vpop.xlane.xlu0 %1315 }
 0x2d6   :  { %v1318_v57 = vrot.slane %v1316_v56, 1  ;;  %v1319_v61 = vrot.slane %v1316_v56, 2  ;;  %v1320_v62 = vrot.slane %v1316_v56, 3  ;;  %v1321_v1 = vrot.slane %v1316_v56, 4 }
 0x2d7   :  { %v1322_v2 = vrot.slane %v1316_v56, 5  ;;  %v1323_v4 = vrot.slane %v1316_v56, 6  ;;  %v1324_v5 = vrot.slane %v1316_v56, 7  ;;  %v1333_v7 = vsub.f32 %v789_v23, %v1316_v56  ;;  %v122_v56 = vld [vmem:[%s26896_s2] sm:$0xff] }
 0x2d8   :  { %v1334_v8 = vsub.f32 %v859_v25, %v1318_v57  ;;  %v1335_v10 = vsub.f32 %v929_v28, %v1319_v61  ;;  %v1336_v12 = vsub.f32 %v999_v33, %v1320_v62  ;;  %v1337_v13 = vsub.f32 %v1069_v37, %v1321_v1 }
 0x2d9   :  { %v1338_v15 = vsub.f32 %v1139_v41, %v1322_v2  ;;  %v1341_v17 = vmul.f32 1.442695, %v1333_v7  ;;  %v1339_v18 = vsub.f32 %v1209_v45, %v1323_v4  ;;  %v1340_v27 = vsub.f32 %v1279_v49, %v1324_v5 }
 0x2da   :  { %v1343_v22 = vmul.f32 1.442695, %v1334_v8  ;;  %v1345_v24 = vmul.f32 1.442695, %v1335_v10  ;;  %v1347_v26 = vmul.f32 1.442695, %v1336_v12 }
 0x2db   :  { %23639 = vpow2.f32 %v1341_v17  ;;  %v1349_v29 = vmul.f32 1.442695, %v1337_v13  ;;  %v1351_v31 = vmul.f32 1.442695, %v1338_v15  ;;  %v1353_v32 = vmul.f32 1.442695, %v1339_v18 }
 0x2dc   :  { %23641 = vpow2.f32 %v1343_v22  ;;  %v1355_v34 = vmul.f32 1.442695, %v1340_v27  ;;  %v24436_v57 = vrot.slane %v122_v56, 1  ;;  %v24438_v62 = vrot.slane %v122_v56, 2 }
 0x2dd   :  { %23643 = vpow2.f32 %v1345_v24  ;;  %v24440_v1 = vrot.slane %v122_v56, 3  ;;  %v24442_v2 = vrot.slane %v122_v56, 4  ;;  %v24444_v4 = vrot.slane %v122_v56, 5 }
 0x2de   :  { %23645 = vpow2.f32 %v1347_v26 }
 0x2df   :  { %23647 = vpow2.f32 %v1349_v29 }
 0x2e0   :  { %23649 = vpow2.f32 %v1351_v31  ;;  %v24446_v31 = vrot.slane %v122_v56, 6 }
 0x2e1   :  { %23651 = vpow2.f32 %v1353_v32  ;;  %v24448_v32 = vrot.slane %v122_v56, 7 }
 0x2e2   :  { %23653 = vpow2.f32 %v1355_v34 }
 0x2e5   :  { %v23640_v23 = vpop.eup %23639 }
 0x2e6   :  { %v23642_v25 = vpop.eup %23641 }
 0x2e7   :  { %v23644_v28 = vpop.eup %23643  ;;  %v1365_v33 = vrot.slane %v23642_v25, 7 }
 0x2e8   :  { %v23646_v35 = vpop.eup %23645  ;;  %v1367_v36 = vrot.slane %v23644_v28, 6 }
 0x2e9   :  { %v23648_v37 = vpop.eup %23647  ;;  %v1366_v38 = vsel %vm1292_vm1, %v1365_v33, %v23640_v23  ;;  %v1369_v39 = vrot.slane %v23646_v35, 5 }
 0x2ea   :  { %v23650_v40 = vpop.eup %23649  ;;  %v1368_v41 = vsel %vm1295_vm2, %v1367_v36, %v1366_v38  ;;  %v1371_v42 = vrot.slane %v23648_v37, 4 }
 0x2eb   :  { %v23652_v43 = vpop.eup %23651  ;;  %v1370_v44 = vsel %vm1298_vm3, %v1369_v39, %v1368_v41  ;;  %v1373_v45 = vrot.slane %v23650_v40, 3 }
 0x2ec   :  { %v23654_v46 = vpop.eup %23653  ;;  %v1372_v47 = vsel %vm1301_vm4, %v1371_v42, %v1370_v44  ;;  %v1375_v30 = vrot.slane %v23652_v43, 2 }
 0x2ed   :  { %v1374_v49 = vsel %vm1304_vm5, %v1373_v45, %v1372_v47  ;;  %v1377_v50 = vrot.slane %v23654_v46, 1 }
 0x2ee   :  { %v1376_v51 = vsel %vm1307_vm6, %v1375_v30, %v1374_v49 }
 0x2ef   :  { %v1378_v52 = vsel %vm1310_vm7, %v1377_v50, %v1376_v51 }
 0x2f0   :  { %v1380_v53 = vsel %vm1313_vm8, %v1378_v52, 0.0 }
 0x2f1   :  { %1381 = vadd.xlane.f32.xlu0 %v1380_v53 }
 0x37e   :  { %v1382_v55 = vpop.xlane.xlu0 %1381 }
 0x37f   :  { %23655 = vrcp.f32 %v1382_v55 }
 0x389   :  { %v23656_v61 = vpop.eup %23655 }
 0x38a   :  { %v1385_v5 = vrot.slane %v23656_v61, 1  ;;  %v1386_v7 = vrot.slane %v23656_v61, 2  ;;  %v1387_v8 = vrot.slane %v23656_v61, 3  ;;  %v1388_v10 = vrot.slane %v23656_v61, 4 }
 0x38b   :  { %v1389_v12 = vrot.slane %v23656_v61, 5  ;;  %v1390_v13 = vrot.slane %v23656_v61, 6  ;;  %v1391_v15 = vrot.slane %v23656_v61, 7  ;;  %v1400_v17 = vmul.f32 %v23656_v61, %v23640_v23 }
 0x38c   :  { %v1401_v18 = vmul.f32 %v23642_v25, %v1385_v5  ;;  %v1402_v22 = vmul.f32 %v23644_v28, %v1386_v7  ;;  %v1403_v24 = vmul.f32 %v23646_v35, %v1387_v8  ;;  %v1404_v26 = vmul.f32 %v23648_v37, %v1388_v10 }
 0x38d   :  { %v1405_v27 = vmul.f32 %v23650_v40, %v1389_v12  ;;  %v1406_v29 = vmul.f32 %v23652_v43, %v1390_v13  ;;  %v1407_v34 = vmul.f32 %v23654_v46, %v1391_v15  ;;  %v1424_v23 = vmul.f32 %v1400_v17, %v122_v56 }
 0x38e   :  { %v1425_v33 = vmul.f32 %v24436_v57, %v1401_v18  ;;  %v1426_v36 = vmul.f32 %v24438_v62, %v1402_v22  ;;  %v1427_v38 = vmul.f32 %v24440_v1, %v1403_v24  ;;  %v1428_v39 = vmul.f32 %v24442_v2, %v1404_v26  ;;  %v648_v22 = vld [vmem:[#allocation10] sm:$0xff]  ;;  %v649_v24 = vld [vmem:[#allocation10 + $0x8] sm:$0xff] }
 0x38f   :  { %v1429_v25 = vmul.f32 %v24444_v4, %v1405_v27  ;;  %v1430_v37 = vmul.f32 %v24446_v31, %v1406_v29  ;;  %v1431_v40 = vmul.f32 %v24448_v32, %v1407_v34  ;;  %v24489_v27 = vpack.c.bf16 %v649_v24, %v648_v22  ;;  %v651_v34 = vld [vmem:[#allocation10 + $0x18] sm:$0xff] }
 0x390   :  { %v1440_v28 = vrot.slane %v1425_v33, 7  ;;  %v1442_v35 = vrot.slane %v1426_v36, 6  ;;  %v1444_v42 = vrot.slane %v1427_v38, 5  ;;  %v1446_v44 = vrot.slane %v1428_v39, 4 }
 0x391   :  { %v1448_v46 = vrot.slane %v1429_v25, 3  ;;  %v1450_v30 = vrot.slane %v1430_v37, 2  ;;  %v1452_v50 = vrot.slane %v1431_v40, 1 }
 0x392   :  { %v1441_v41 = vsel %vm1292_vm1, %v1440_v28, %v1424_v23  ;;  %v656_v28 = vld [vmem:[#allocation10 + $0x40] sm:$0xff] }
 0x393   :  { %v1443_v43 = vsel %vm1295_vm2, %v1442_v35, %v1441_v41  ;;  %v657_v35 = vld [vmem:[#allocation10 + $0x48] sm:$0xff]  ;;  %v659_v41 = vld [vmem:[#allocation10 + $0x58] sm:$0xff] }
 0x394   :  { %v1445_v45 = vsel %vm1298_vm3, %v1444_v42, %v1443_v43  ;;  %v660_v43 = vld [vmem:[#allocation10 + $0x60] sm:$0xff] }
 0x395   :  { %v1447_v47 = vsel %vm1301_vm4, %v1446_v44, %v1445_v45  ;;  %v661_v44 = vld [vmem:[#allocation10 + $0x68] sm:$0xff] }
 0x396   :  { %v1449_v49 = vsel %vm1304_vm5, %v1448_v46, %v1447_v47  ;;  %v24525_v45 = vpack.c.bf16 %v661_v44, %v660_v43  ;;  %v662_v46 = vld [vmem:[#allocation10 + $0x70] sm:$0xff]  ;;  %v663_v47 = vld [vmem:[#allocation10 + $0x78] sm:$0xff] }
 0x397   :  { %v1451_v51 = vsel %vm1307_vm6, %v1450_v30, %v1449_v49  ;;  %v24528_v30 = vpack.c.bf16 %v663_v47, %v662_v46  ;;  %v124_v49 = vld [vmem:[#allocation2] sm:$0xff] }
 0x398   :  { %v1453_v52 = vsel %vm1310_vm7, %v1452_v50, %v1451_v51  ;;  %v125_v50 = vld [vmem:[#allocation2 + $0x8] sm:$0xff] }
 0x399   :  { %v1455_v53 = vsel %vm1313_vm8, %v1453_v52, 0.0  ;;  %v24531_v51 = vpack.c.bf16 %v125_v50, %v124_v49  ;;  %v24538_v52 = vld [vmem:[%s26897_s3] sm:$0xff] }
 0x39a   :  { %1456 = vadd.xlane.f32.xlu1 %v1455_v53  ;;  %v2181_v53 = vrot.slane %v24538_v52, %v24337_v58 }
 0x39b   :  { %27100 = vst [vmem:[#allocation23_spill] sm:$0xff] %v24531_v51 }
 0x427   :  { %v1457_v55 = vpop.xlane.xlu1 %1456 }
 0x428   :  { %v1458_v56 = vadd.f32 1e-06, %v1457_v55  ;;  %v126_v55 = vld [vmem:[#allocation2 + $0x10] sm:$0xff] }
 0x42a   :  { %23657 = vrcp.f32 %v1458_v56  ;;  %v127_v56 = vld [vmem:[#allocation2 + $0x18] sm:$0xff] }
 0x434   :  { %v23658_v61 = vpop.eup %23657 }
 0x435   :  { %v1476_v5 = vmul.f32 %v23658_v61, %v1424_v23  ;;  %v1461_v7 = vrot.slane %v23658_v61, 1  ;;  %v1462_v8 = vrot.slane %v23658_v61, 2  ;;  %v1463_v12 = vrot.slane %v23658_v61, 3  ;;  %v655_v23 = vld [vmem:[#allocation10 + $0x38] sm:$0xff] }
 0x436   :  { %v1464_v15 = vrot.slane %v23658_v61, 4  ;;  %v1467_v26 = vrot.slane %v23658_v61, 7 }
 0x437   :  { %21065 = vmatmul.mubr.msk.f32.vlgmr.msra.gmra.mrb[12].mxu0 %vm1313_vm8, %v1476_v5  ;;  %v1477_v10 = vmul.f32 %v1461_v7, %v1425_v33  ;;  %v1478_v13 = vmul.f32 %v1462_v8, %v1426_v36  ;;  %v1479_v17 = vmul.f32 %v1463_v12, %v1427_v38  ;;  %v653_v36 = vld [vmem:[#allocation10 + $0x28] sm:$0xff]  ;;  %v2197_v5 = vrot.slane %v2181_v53, %v24337_v58  ;;  %v130_v12 = vld [vmem:[#allocation2 + $0x30] sm:$0xff] }
 0x438   :  { %21073 = vmatpush3.msra.mxu0 %v24348_v3  ;;  %21074 = vmatprep.mubr.msk.f32.mxu0 %vm24072_vm0, %v26910_v0  ;;  %v1465_v3 = vrot.slane %v23658_v61, 5  ;;  %v1480_v18 = vmul.f32 %v1464_v15, %v1428_v39  ;;  %v654_v39 = vld [vmem:[#allocation10 + $0x30] sm:$0xff]  ;;  %v2189_v8 = vcombine.high %v2181_v53, %v2181_v53 }
 0x439   :  { %21070 = vmatmul.mubr.msk.f32.vlgmr.msra.gmra.mrb[12].mxu1 %vm1313_vm8, %v1477_v10  ;;  %21082 = vmatprep.subr.mxu0 %v26910_v0  ;;  %v129_v10 = vld [vmem:[#allocation2 + $0x28] sm:$0xff]  ;;  %v2219_v22 = vcombine.high %v2197_v5, %v2197_v5 }
 0x43a   :  { %21078 = vmatpush3.msra.mxu1 %v24354_v6  ;;  %21079 = vmatprep.mubr.msk.f32.mxu1 %vm24072_vm0, %v26910_v0  ;;  %v1466_v6 = vrot.slane %v23658_v61, 6  ;;  %v128_v61 = vld [vmem:[#allocation2 + $0x20] sm:$0xff]  ;;  %v24553_v15 = vrot.slane %v2189_v8, %v24337_v58 }
 0x43b   :  { %21075 = vmatmul.mubr.msk.f32.vlgmr.msra.gmra.mrb[14].mxu0 %vm1313_vm8, %v1478_v13  ;;  %21087 = vmatprep.subr.mxu1 %v26910_v0  ;;  %v24545_v7 = vpack.c.bf16 %v128_v61, %v127_v56  ;;  %v131_v13 = vld [vmem:[#allocation2 + $0x38] sm:$0xff]  ;;  %v133_v56 = vld [vmem:[#allocation2 + $0x48] sm:$0xff]  ;;  %v134_v61 = vld [vmem:[#allocation2 + $0x50] sm:$0xff] }
 0x43c   :  { %21083 = vmatpush3.msra.mxu0 %v24364_v9  ;;  %21084 = vmatprep.mubr.msk.f32.mxu0 %vm24072_vm0, %v26910_v0  ;;  %v1481_v9 = vmul.f32 %v1465_v3, %v1429_v25  ;;  %v1482_v29 = vmul.f32 %v1466_v6, %v1430_v37  ;;  %v24512_v25 = vpack.c.bf16 %v655_v23, %v654_v39  ;;  %v132_v3 = vld [vmem:[#allocation2 + $0x40] sm:$0xff]  ;;  %v137_v6 = vld [vmem:[#allocation2 + $0x68] sm:$0xff] }
 0x43d   :  { %21080 = vmatmul.mubr.msk.f32.vlgmr.msra.gmra.mrb[14].mxu1 %vm1313_vm8, %v1479_v17  ;;  %21092 = vmatprep.subr.mxu0 %v26910_v0  ;;  %v24517_v37 = vpack.c.bf16 %v657_v35, %v656_v28  ;;  %27101 = vst [vmem:[#allocation24_spill] sm:$0xff] %v24545_v7  ;;  %v24555_v17 = vpack.c.bf16 %v131_v13, %v130_v12 }
 0x43e   :  { %21088 = vmatpush3.msra.mxu1 %v24373_v11  ;;  %21089 = vmatprep.mubr.msk.f32.mxu1 %vm24072_vm0, %v26910_v0  ;;  %v650_v11 = vld [vmem:[#allocation10 + $0x10] sm:$0xff] }
 0x43f   :  { %21085 = vmatmul.mubr.msk.f32.vlgmr.msra.gmra.mrb[16].mxu0 %vm1313_vm8, %v1480_v18  ;;  %21097 = vmatprep.subr.mxu1 %v26910_v0  ;;  %v24499_v33 = vpack.c.bf16 %v651_v34, %v650_v11  ;;  %27102 = vst [vmem:[#allocation25_spill] sm:$0xff] %v24555_v17  ;;  %v136_v18 = vld [vmem:[#allocation2 + $0x60] sm:$0xff] }
 0x440   :  { %21093 = vmatpush3.msra.mxu0 %v24383_v14  ;;  %21094 = vmatprep.mubr.msk.f32.mxu0 %vm24072_vm0, %v26910_v0  ;;  %v1483_v14 = vmul.f32 %v1467_v26, %v1431_v40  ;;  %v658_v40 = vld [vmem:[#allocation10 + $0x50] sm:$0xff]  ;;  %v24563_v24 = vpack.c.bf16 %v137_v6, %v136_v18  ;;  %v24576_v6 = vpack.c.bf16 %v134_v61, %v133_v56  ;;  %v151_v56 = vld [vmem:[#allocation5 + $0x18] sm:$0xff]  ;;  %v152_v61 = vld [vmem:[#allocation5 + $0x20] sm:$0xff] }
 0x441   :  { %21090 = vmatmul.mubr.msk.f32.vlgmr.msra.gmra.mrb[16].mxu1 %vm1313_vm8, %v1481_v9  ;;  %23056 = vmatprep.subr.bf16.mxu0 %v26908_v63  ;;  %v24521_v42 = vpack.c.bf16 %v659_v41, %v658_v40 }
 0x442   :  { %21098 = vmatpush3.msra.mxu1 %v24393_v16  ;;  %21099 = vmatprep.mubr.msk.f32.mxu1 %vm24072_vm0, %v26910_v0  ;;  %v652_v16 = vld [vmem:[#allocation10 + $0x20] sm:$0xff]  ;;  %27103 = vst [vmem:[#allocation26_spill] sm:$0xff] %v24563_v24  ;;  %27104 = vst [vmem:[#allocation27_spill] sm:$0xff] %v24576_v6 }
 0x443   :  { %21095 = vmatmul.mubr.msk.f32.vlgmr.msra.gmra.mrb[18].mxu0 %vm1313_vm8, %v1482_v29  ;;  %23080 = vmatprep.subr.bf16.mxu1 %v26908_v63  ;;  %v24508_v38 = vpack.c.bf16 %v653_v36, %v652_v16 }
 0x444   :  { %23058 = vmatpush3.bf16.msra.mxu0 %v24489_v27  ;;  %21134 = vmatprep.mubr.msk.f32.mxu0 %vm24072_vm0, %v26910_v0 }
 0x445   :  { %21100 = vmatmul.mubr.msk.f32.vlgmr.msra.gmra.mrb[18].mxu1 %vm1313_vm8, %v1483_v14  ;;  %23059 = vmatprep.subr.bf16.mxu0 %v26908_v63 }
 0x446   :  { %21143 = vmatprep.mubr.msk.f32.mxu1 %vm24072_vm0, %v26910_v0 }
 0x448   :  { %23061 = vmatpush3.bf16.msra.mxu0 %v24499_v33 }
 0x449   :  { %23062 = vmatprep.subr.bf16.mxu0 %v26908_v63  ;;  %23082 = vmatpush3.bf16.xpose.msra.mxu1 %v24531_v51 }
 0x44a   :  { %21141 = vmatprep.subr.mxu1 %v26910_v0 }
 0x44c   :  { %23064 = vmatpush3.bf16.msra.mxu0 %v24508_v38 }
 0x44d   :  { %23065 = vmatprep.subr.bf16.mxu0 %v26908_v63 }
 0x450   :  { %23067 = vmatpush3.bf16.msra.mxu0 %v24512_v25 }
 0x451   :  { %23068 = vmatprep.subr.bf16.mxu0 %v26908_v63  ;;  %21142 = vmatpush3.xpose.msra.mxu1 %v126_v55 }
 0x452   :  { %23083 = vmatprep.subr.bf16.mxu1 %v26908_v63 }
 0x454   :  { %23070 = vmatpush3.bf16.msra.mxu0 %v24517_v37  ;;  %21144 = vmatmul.mubr.f32.vlgmr.msra.gmra.mrb[20].mxu1 %v2197_v5 }
 0x455   :  { %23071 = vmatprep.subr.bf16.mxu0 %v26908_v63  ;;  %23085 = vmatpush3.bf16.xpose.msra.mxu1 %v24545_v7 }
 0x456   :  { %21152 = vmatprep.mubr.msk.f32.mxu1 %vm24072_vm0, %v26910_v0  ;;  %21150 = vmatprep.subr.mxu1 %v26910_v0 }
 0x458   :  { %23073 = vmatpush3.bf16.msra.mxu0 %v24521_v42 }
 0x459   :  { %23074 = vmatprep.subr.bf16.mxu0 %v26908_v63 }
 0x45c   :  { %23076 = vmatpush3.bf16.msra.mxu0 %v24525_v45 }
 0x45d   :  { %23077 = vmatprep.subr.bf16.mxu0 %v26908_v63  ;;  %21151 = vmatpush3.xpose.msra.mxu1 %v129_v10 }
 0x45e   :  { %23086 = vmatprep.subr.bf16.mxu1 %v26908_v63 }
 0x460   :  { %23079 = vmatpush3.bf16.msra.mxu0 %v24528_v30  ;;  %21153 = vmatmul.mubr.f32.vlgmr.msra.gmra.mrb[22].mxu1 %v24553_v15 }
 0x461   :  { %23089 = vmatprep.subr.bf16.mxu0 %v26908_v63  ;;  %23088 = vmatpush3.bf16.xpose.msra.mxu1 %v24555_v17 }
 0x462   :  { %21161 = vmatprep.mubr.msk.f32.mxu1 %vm24072_vm0, %v26910_v0  ;;  %21159 = vmatprep.subr.mxu1 %v26910_v0 }
 0x469   :  { %21160 = vmatpush3.xpose.msra.mxu1 %v132_v3 }
 0x46a   :  { %23092 = vmatprep.subr.bf16.mxu1 %v26908_v63 }
 0x46c   :  { %21162 = vmatmul.mubr.f32.vlgmr.msra.gmra.mrb[24].mxu1 %v2219_v22 }
 0x46d   :  { %23094 = vmatpush3.bf16.xpose.msra.mxu1 %v24563_v24  ;;  %21179 = vmatprep.mubr.msk.f32.mxu1 %vm24072_vm0, %v26910_v0 }
 0x46e   :  { %21177 = vmatprep.subr.mxu1 %v26910_v0 }
 0x50a   :  { %v1553_v9 = vpop.f32.mrb[12].mxu0 }
 0x50b   :  { %v21066_v26 = vpop.f32.mrb[13].mxu0 }
 0x50c   :  { %v1626_v29 = vpop.f32.mrb[12].mxu1  ;;  %v139_v26 = vld [vmem:[#allocation2 + $0x78] sm:$0xff] }
 0x50d   :  { %v2082_v11 = vrot.slane %v1626_v29, 7  ;;  %v21071_v34 = vpop.f32.mrb[13].mxu1  ;;  %v140_v29 = vld [vmem:[#allocation2 + $0x80] sm:$0xff] }
 0x50e   :  { %v1699_v14 = vpop.f32.mrb[14].mxu0  ;;  %v24585_v34 = vpack.c.bf16 %v140_v29, %v139_v26  ;;  %v20035_v29 = vld [vmem:[%s26904_s10] ss:$0 sm:$0xff] }
 0x50f   :  { %v2083_v16 = vsel %vm1292_vm1, %v2082_v11, %v1553_v9  ;;  %v2084_v36 = vrot.slane %v1699_v14, 6  ;;  %v21076_v39 = vpop.f32.mrb[15].mxu0  ;;  %v135_v9 = vld [vmem:[#allocation2 + $0x58] sm:$0xff]  ;;  %v2221_v11 = vcombine.high %v24553_v15, %v24553_v15  ;;  %v2174_v14 = vcombine.high %v24538_v52, %v24538_v52  ;;  %v141_v15 = vld [vmem:[#allocation2 + $0x88] sm:$0xff]  ;;  %v146_v52 = vld [vmem:[#allocation2 + $0xb0] sm:$0xff] }
 0x510   :  { %v1772_v23 = vpop.f32.mrb[14].mxu1  ;;  %27105 = vst [vmem:[#allocation28_spill] sm:$0xff] %v24585_v34 }
 0x511   :  { %v2085_v28 = vsel %vm1295_vm2, %v2084_v36, %v2083_v16  ;;  %v2086_v35 = vrot.slane %v1772_v23, 5  ;;  %v21081_v40 = vpop.f32.mrb[15].mxu1  ;;  %v138_v16 = vld [vmem:[#allocation2 + $0x70] sm:$0xff]  ;;  %v2188_v36 = vrot.slane %v2174_v14, %v24337_v58 }
 0x512   :  { %v1845_v41 = vpop.f32.mrb[16].mxu0  ;;  %21178 = vmatpush3.xpose.msra.mxu1 %v138_v16  ;;  %v142_v23 = vld [vmem:[#allocation2 + $0x90] sm:$0xff] }
 0x513   :  { %v2087_v43 = vsel %vm1298_vm3, %v2086_v35, %v2085_v28  ;;  %v2088_v44 = vrot.slane %v1845_v41, 4  ;;  %v21086_v46 = vpop.f32.mrb[17].mxu0  ;;  %v2204_v39 = vrot.slane %v2188_v36, %v24337_v58  ;;  %23098 = vmatprep.subr.bf16.mxu1 %v26908_v63  ;;  %v143_v28 = vld [vmem:[#allocation2 + $0x98] sm:$0xff]  ;;  %v2190_v40 = vcombine.high %v2188_v36, %v2188_v36  ;;  %v145_v41 = vld [vmem:[#allocation2 + $0xa8] sm:$0xff] }
 0x514   :  { %v1918_v47 = vpop.f32.mrb[16].mxu1  ;;  %v24597_v35 = vpack.c.bf16 %v143_v28, %v142_v23  ;;  %v144_v46 = vld [vmem:[#allocation2 + $0xa0] sm:$0xff] }
 0x515   :  { %v2089_v49 = vsel %vm1301_vm4, %v2088_v44, %v2087_v43  ;;  %v2090_v50 = vrot.slane %v1918_v47, 3  ;;  %v21091_v53 = vpop.f32.mrb[17].mxu1  ;;  %21180 = vmatmul.mubr.f32.vlgmr.msra.gmra.mrb[26].mxu1 %v2204_v39  ;;  %v2218_v43 = vrot.slane %v2190_v40, %v24337_v58  ;;  %v24602_v44 = vpack.c.bf16 %v146_v52, %v145_v41  ;;  %v148_v47 = vld [vmem:[#allocation5] sm:$0xff]  ;;  %v154_v40 = vld [vmem:[#allocation5 + $0x30] sm:$0xff]  ;;  %v155_v41 = vld [vmem:[#allocation5 + $0x38] sm:$0xff] }
 0x516   :  { %v1991_v55 = vpop.f32.mrb[18].mxu0  ;;  %27106 = vst [vmem:[#allocation29_spill] sm:$0xff] %v24597_v35  ;;  %23100 = vmatpush3.bf16.xpose.msra.mxu1 %v24597_v35  ;;  %21197 = vmatprep.mubr.msk.f32.mxu1 %vm24072_vm0, %v26910_v0  ;;  %v147_v53 = vld [vmem:[#allocation2 + $0xb8] sm:$0xff] }
 0x517   :  { %v2091_v5 = vsel %vm1304_vm5, %v2090_v50, %v2089_v49  ;;  %v2092_v8 = vrot.slane %v1991_v55, 2  ;;  %v21096_v10 = vpop.f32.mrb[19].mxu0  ;;  %27107 = vst [vmem:[#allocation30_spill] sm:$0xff] %v24602_v44  ;;  %21195 = vmatprep.subr.mxu1 %v26910_v0  ;;  %v149_v49 = vld [vmem:[#allocation5 + $0x8] sm:$0xff]  ;;  %v2220_v50 = vcombine.high %v2204_v39, %v2204_v39 }
 0x518   :  { %v2064_v12 = vpop.f32.mrb[18].mxu1  ;;  %v24611_v55 = vpack.c.bf16 %v149_v49, %v148_v47  ;;  %v150_v10 = vld [vmem:[#allocation5 + $0x10] sm:$0xff]  ;;  %v24639_v49 = vpack.c.bf16 %v155_v41, %v154_v40  ;;  %v167_v40 = vld [vmem:[#allocation5 + $0x98] sm:$0xff]  ;;  %v165_v41 = vld [vmem:[#allocation5 + $0x88] sm:$0xff] }
 0x519   :  { %v2093_v13 = vsel %vm1307_vm6, %v2092_v8, %v2091_v5  ;;  %v2094_v3 = vrot.slane %v2064_v12, 1  ;;  %v21101_v18 = vpop.f32.mrb[19].mxu1  ;;  %v2222_v5 = vcombine.high %v2218_v43, %v2218_v43  ;;  %v24614_v8 = vpack.c.bf16 %v152_v61, %v151_v56  ;;  %v153_v12 = vld [vmem:[#allocation5 + $0x28] sm:$0xff]  ;;  %v158_v47 = vld [vmem:[#allocation5 + $0x50] sm:$0xff] }
 0x51a   :  { %27108 = vst [vmem:[#allocation31_spill] sm:$0xff] %v24611_v55  ;;  %27114 = vst [vmem:[#allocation37_spill] sm:$0xff] %v24639_v49 }
 0x51b   :  { %v2095_v22 = vsel %vm1310_vm7, %v2094_v3, %v2093_v13  ;;  %27109 = vst [vmem:[#allocation32_spill] sm:$0xff] %v24614_v8 }
 0x51c   :  { %21135 = vmatmul.mubr.f32.vlgmr.msra.gmra.mrb[20].mxu0 %v2095_v22 }
 0x51d   :  { %23091 = vmatpush3.bf16.xpose.msra.mxu0 %v24576_v6  ;;  %21170 = vmatprep.mubr.msk.f32.mxu0 %vm24072_vm0, %v26910_v0 }
 0x51e   :  { %21168 = vmatprep.subr.mxu0 %v26910_v0  ;;  %21196 = vmatpush3.xpose.msra.mxu1 %v144_v46  ;;  %v157_v46 = vld [vmem:[#allocation5 + $0x48] sm:$0xff] }
 0x51f   :  { %23104 = vmatprep.subr.bf16.mxu1 %v26908_v63  ;;  %v24642_v56 = vpack.c.bf16 %v158_v47, %v157_v46  ;;  %v170_v46 = vld [vmem:[#allocation5 + $0xb0] sm:$0xff] }
 0x521   :  { %21198 = vmatmul.mubr.f32.vlgmr.msra.gmra.mrb[28].mxu1 %v2220_v50  ;;  %27115 = vst [vmem:[#allocation38_spill] sm:$0xff] %v24642_v56 }
 0x522   :  { %23106 = vmatpush3.bf16.xpose.msra.mxu1 %v24611_v55  ;;  %21215 = vmatprep.mubr.msk.f32.mxu1 %vm24072_vm0, %v26910_v0 }
 0x523   :  { %21213 = vmatprep.subr.mxu1 %v26910_v0 }
 0x525   :  { %21169 = vmatpush3.xpose.msra.mxu0 %v135_v9 }
 0x526   :  { %23095 = vmatprep.subr.bf16.mxu0 %v26908_v63 }
 0x527   :  { %v24627_v13 = vpop.f32.mrb[20].mxu1 }
 0x528   :  { %21171 = vmatmul.mubr.f32.vlgmr.msra.gmra.mrb[22].mxu0 %v2221_v11  ;;  %27110 = vst [vmem:[#allocation33_spill] sm:$0xff] %v24627_v13  ;;  %v21145_v3 = vpop.f32.mrb[21].mxu1 }
 0x529   :  { %23097 = vmatpush3.bf16.xpose.msra.mxu0 %v24585_v34  ;;  %21188 = vmatprep.mubr.msk.f32.mxu0 %vm24072_vm0, %v26910_v0  ;;  %v159_v3 = vld [vmem:[#allocation5 + $0x58] sm:$0xff] }
 0x52a   :  { %21186 = vmatprep.subr.mxu0 %v26910_v0  ;;  %21214 = vmatpush3.xpose.msra.mxu1 %v150_v10  ;;  %v160_v10 = vld [vmem:[#allocation5 + $0x60] sm:$0xff] }
 0x52b   :  { %23110 = vmatprep.subr.bf16.mxu1 %v26908_v63 }
 0x531   :  { %21187 = vmatpush3.xpose.msra.mxu0 %v141_v15 }
 0x532   :  { %23101 = vmatprep.subr.bf16.mxu0 %v26908_v63 }
 0x533   :  { %v24629_v18 = vpop.f32.mrb[22].mxu1 }
 0x534   :  { %21189 = vmatmul.mubr.f32.vlgmr.msra.gmra.mrb[24].mxu0 %v2218_v43  ;;  %27111 = vst [vmem:[#allocation34_spill] sm:$0xff] %v24629_v18  ;;  %v21154_v22 = vpop.f32.mrb[23].mxu1 }
 0x535   :  { %23103 = vmatpush3.bf16.xpose.msra.mxu0 %v24602_v44  ;;  %21206 = vmatprep.mubr.msk.f32.mxu0 %vm24072_vm0, %v26910_v0  ;;  %v163_v22 = vld [vmem:[#allocation5 + $0x78] sm:$0xff] }
 0x536   :  { %21204 = vmatprep.subr.mxu0 %v26910_v0 }
 0x53d   :  { %21205 = vmatpush3.xpose.msra.mxu0 %v147_v53 }
 0x53e   :  { %23107 = vmatprep.subr.bf16.mxu0 %v26908_v63 }
 0x53f   :  { %v24631_v9 = vpop.f32.mrb[24].mxu1 }
 0x540   :  { %21207 = vmatmul.mubr.f32.vlgmr.msra.gmra.mrb[26].mxu0 %v2222_v5  ;;  %27112 = vst [vmem:[#allocation35_spill] sm:$0xff] %v24631_v9  ;;  %v21163_v26 = vpop.f32.mrb[25].mxu1  ;;  %v156_v5 = vld [vmem:[#allocation5 + $0x40] sm:$0xff] }
 0x541   :  { %23109 = vmatpush3.bf16.xpose.msra.mxu0 %v24614_v8  ;;  %21224 = vmatprep.mubr.msk.f32.mxu0 %vm24072_vm0, %v26910_v0  ;;  %v164_v26 = vld [vmem:[#allocation5 + $0x80] sm:$0xff] }
 0x542   :  { %21222 = vmatprep.subr.mxu0 %v26910_v0 }
 0x549   :  { %21223 = vmatpush3.xpose.msra.mxu0 %v153_v12  ;;  %v161_v12 = vld [vmem:[#allocation5 + $0x68] sm:$0xff] }
 0x54a   :  { %23113 = vmatprep.subr.bf16.mxu0 %v26908_v63 }
 0x5ef   :  { %v2163_v11 = vpop.f32.mrb[20].mxu0 }
 0x5f0   :  { %v2164_v14 = vadd.f32 %v20035_v29, %v2163_v11  ;;  %v21136_v16 = vpop.f32.mrb[21].mxu0  ;;  %v24653_v29 = vpack.c.bf16 %v161_v12, %v160_v10  ;;  %v172_v10 = vld [vmem:[#allocation7] sm:$0xff]  ;;  %v173_v12 = vld [vmem:[#allocation7 + $0x8] sm:$0xff] }
 0x5f2   :  { %v20036_v36 = vmul.f32 -1.442695, %v2164_v14  ;;  %27116 = vst [vmem:[#allocation39_spill] sm:$0xff] %v24653_v29  ;;  %v24656_v14 = vpack.c.bf16 %v164_v26, %v163_v22  ;;  %v24684_v22 = vpack.c.bf16 %v173_v12, %v172_v10  ;;  %v175_v10 = vld [vmem:[#allocation7 + $0x18] sm:$0xff]  ;;  %v176_v12 = vld [vmem:[#allocation7 + $0x20] sm:$0xff] }
 0x5f4   :  { %23659 = vpow2.f32 %v20036_v36  ;;  %27117 = vst [vmem:[#allocation40_spill] sm:$0xff] %v24656_v14  ;;  %27120 = vst [vmem:[#allocation43_spill] sm:$0xff] %v24684_v22 }
 0x5fb   :  { %v24636_v15 = vpop.f32.mrb[22].mxu0 }
 0x5fc   :  { %27113 = vst [vmem:[#allocation36_spill] sm:$0xff] %v24636_v15  ;;  %v21172_v39 = vpop.f32.mrb[23].mxu0 }
 0x5fe   :  { %v23660_v23 = vpop.eup %23659 }
 0x5ff   :  { %v2170_v28 = vadd.f32 1.0, %v23660_v23  ;;  %v162_v23 = vld [vmem:[#allocation5 + $0x70] sm:$0xff] }
 0x601   :  { %23661 = vrcp.f32 %v2170_v28  ;;  %v166_v28 = vld [vmem:[#allocation5 + $0x90] sm:$0xff] }
 0x602   :  { %v24668_v47 = vpack.c.bf16 %v167_v40, %v166_v28 }
 0x604   :  { %27118 = vst [vmem:[#allocation41_spill] sm:$0xff] %v24668_v47 }
 0x60b   :  { %v23662_v52 = vpop.eup %23661 }
 0x60c   :  { %v2799_v43 = vrot.slane %v23662_v52, %v24337_v58  ;;  %v2792_v36 = vcombine.high %v23662_v52, %v23662_v52 }
 0x60e   :  { %v2815_v50 = vrot.slane %v2799_v43, %v24337_v58  ;;  %v2807_v53 = vcombine.high %v2799_v43, %v2799_v43  ;;  %v2806_v39 = vrot.slane %v2792_v36, %v24337_v58  ;;  %v169_v43 = vld [vmem:[#allocation5 + $0xa8] sm:$0xff] }
 0x610   :  { %21216 = vmatmul.mubr.f32.vlgmr.msra.gmra.mrb[30].mxu1 %v2815_v50  ;;  %v2829_v61 = vrot.slane %v2807_v53, %v24337_v58  ;;  %v2837_v11 = vcombine.high %v2815_v50, %v2815_v50  ;;  %v2808_v52 = vcombine.high %v2806_v39, %v2806_v39  ;;  %v2822_v50 = vrot.slane %v2806_v39, %v24337_v58  ;;  %v24696_v39 = vpop.f32.mrb[24].mxu0 }
 0x611   :  { %23112 = vmatpush3.bf16.xpose.msra.mxu1 %v24639_v49  ;;  %21233 = vmatprep.mubr.msk.f32.mxu1 %vm24072_vm0, %v26910_v0  ;;  %v24672_v53 = vpack.c.bf16 %v170_v46, %v169_v43  ;;  %27122 = vst [vmem:[#allocation45_spill] sm:$0xff] %v24696_v39  ;;  %v174_v43 = vld [vmem:[#allocation7 + $0x10] sm:$0xff] }
 0x612   :  { %21225 = vmatmul.mubr.f32.vlgmr.msra.gmra.mrb[28].mxu0 %v2829_v61  ;;  %21231 = vmatprep.subr.mxu1 %v26910_v0  ;;  %v2839_v16 = vcombine.high %v2829_v61, %v2829_v61  ;;  %v2836_v61 = vrot.slane %v2808_v52, %v24337_v58  ;;  %v2838_v26 = vcombine.high %v2822_v50, %v2822_v50  ;;  %v178_v46 = vld [vmem:[#allocation7 + $0x30] sm:$0xff] }
 0x613   :  { %23115 = vmatpush3.bf16.xpose.msra.mxu0 %v24642_v56  ;;  %21242 = vmatprep.mubr.msk.f32.mxu0 %vm24072_vm0, %v26910_v0  ;;  %27119 = vst [vmem:[#allocation42_spill] sm:$0xff] %v24672_v53 }
 0x614   :  { %21240 = vmatprep.subr.mxu0 %v26910_v0 }
 0x619   :  { %21232 = vmatpush3.xpose.msra.mxu1 %v156_v5  ;;  %v168_v5 = vld [vmem:[#allocation5 + $0xa0] sm:$0xff] }
 0x61a   :  { %23116 = vmatprep.subr.bf16.mxu1 %v26908_v63 }
 0x61b   :  { %21241 = vmatpush3.xpose.msra.mxu0 %v159_v3  ;;  %v171_v3 = vld [vmem:[#allocation5 + $0xb8] sm:$0xff] }
 0x61c   :  { %21234 = vmatmul.mubr.f32.vlgmr.msra.gmra.mrb[32].mxu1 %v2837_v11  ;;  %23119 = vmatprep.subr.bf16.mxu0 %v26908_v63  ;;  %v2840_v11 = vcombine.high %v2836_v61, %v2836_v61 }
 0x61d   :  { %23118 = vmatpush3.bf16.xpose.msra.mxu1 %v24653_v29  ;;  %21251 = vmatprep.mubr.msk.f32.mxu1 %vm24072_vm0, %v26910_v0 }
 0x61e   :  { %21243 = vmatmul.mubr.f32.vlgmr.msra.gmra.mrb[30].mxu0 %v2839_v16  ;;  %21249 = vmatprep.subr.mxu1 %v26910_v0  ;;  %v24694_v16 = vpop.f32.mrb[26].mxu1 }
 0x61f   :  { %23121 = vmatpush3.bf16.xpose.msra.mxu0 %v24656_v14  ;;  %21260 = vmatprep.mubr.msk.f32.mxu0 %vm24072_vm0, %v26910_v0  ;;  %27121 = vst [vmem:[#allocation44_spill] sm:$0xff] %v24694_v16  ;;  %v21181_v36 = vpop.f32.mrb[27].mxu1 }
 0x620   :  { %21258 = vmatprep.subr.mxu0 %v26910_v0  ;;  %v24698_v28 = vpop.f32.mrb[28].mxu1 }
 0x621   :  { %27123 = vst [vmem:[#allocation46_spill] sm:$0xff] %v24698_v28  ;;  %v21199_v40 = vpop.f32.mrb[29].mxu1 }
 0x625   :  { %21250 = vmatpush3.xpose.msra.mxu1 %v162_v23  ;;  %v21190_v23 = vpop.f32.mrb[25].mxu0 }
 0x626   :  { %23122 = vmatprep.subr.bf16.mxu1 %v26908_v63 }
 0x627   :  { %21259 = vmatpush3.xpose.msra.mxu0 %v165_v41  ;;  %v24700_v41 = vpop.f32.mrb[26].mxu0 }
 0x628   :  { %21252 = vmatmul.mubr.f32.vlgmr.msra.gmra.mrb[34].mxu1 %v2822_v50  ;;  %23125 = vmatprep.subr.bf16.mxu0 %v26908_v63  ;;  %27124 = vst [vmem:[#allocation47_spill] sm:$0xff] %v24700_v41  ;;  %v21208_v52 = vpop.f32.mrb[27].mxu0  ;;  %v179_v50 = vld [vmem:[#allocation7 + $0x38] sm:$0xff] }
 0x629   :  { %23124 = vmatpush3.bf16.xpose.msra.mxu1 %v24668_v47  ;;  %21269 = vmatprep.mubr.msk.f32.mxu1 %vm24072_vm0, %v26910_v0 }
 0x62a   :  { %21261 = vmatmul.mubr.f32.vlgmr.msra.gmra.mrb[32].mxu0 %v2836_v61  ;;  %21267 = vmatprep.subr.mxu1 %v26910_v0  ;;  %v24703_v61 = vpack.c.bf16 %v179_v50, %v178_v46  ;;  %v182_v46 = vld [vmem:[#allocation7 + $0x50] sm:$0xff]  ;;  %v177_v50 = vld [vmem:[#allocation7 + $0x28] sm:$0xff] }
 0x62b   :  { %23127 = vmatpush3.bf16.xpose.msra.mxu0 %v24672_v53  ;;  %21278 = vmatprep.mubr.msk.f32.mxu0 %vm24072_vm0, %v26910_v0 }
 0x62c   :  { %21276 = vmatprep.subr.mxu0 %v26910_v0  ;;  %27125 = vst [vmem:[#allocation48_spill] sm:$0xff] %v24703_v61 }
 0x631   :  { %21268 = vmatpush3.xpose.msra.mxu1 %v168_v5  ;;  %v180_v5 = vld [vmem:[#allocation7 + $0x40] sm:$0xff] }
 0x632   :  { %23128 = vmatprep.subr.bf16.mxu1 %v26908_v63 }
 0x633   :  { %21277 = vmatpush3.xpose.msra.mxu0 %v171_v3 }
 0x634   :  { %21270 = vmatmul.mubr.f32.vlgmr.msra.gmra.mrb[36].mxu1 %v2838_v26  ;;  %23134 = vmatprep.subr.bf16.mxu0 %v26908_v63  ;;  %v24708_v26 = vpack.c.bf16 %v176_v12, %v175_v10  ;;  %v184_v10 = vld [vmem:[#allocation7 + $0x60] sm:$0xff]  ;;  %v185_v12 = vld [vmem:[#allocation7 + $0x68] sm:$0xff] }
 0x635   :  { %23130 = vmatpush3.bf16.msra.mxu1 %v24684_v22  ;;  %21287 = vmatprep.mubr.msk.f32.mxu1 %vm24072_vm0, %v26910_v0 }
 0x636   :  { %21279 = vmatmul.mubr.f32.vlgmr.msra.gmra.mrb[34].mxu0 %v2840_v11  ;;  %21285 = vmatprep.subr.mxu1 %v26910_v0  ;;  %27126 = vst [vmem:[#allocation49_spill] sm:$0xff] %v24708_v26 }
 0x637   :  { %21305 = vmatprep.mubr.msk.f32.mxu0 %vm24072_vm0, %v26910_v0  ;;  %23136 = vmatpush3.bf16.msra.mxu0 %v24703_v61 }
 0x638   :  { %21303 = vmatprep.subr.mxu0 %v26910_v0 }
 0x639   :  { %21286 = vmatpush3.msra.mxu1 %v174_v43  ;;  %v181_v43 = vld [vmem:[#allocation7 + $0x48] sm:$0xff] }
 0x63a   :  { %23131 = vmatprep.subr.bf16.mxu1 %v26908_v63 }
 0x63b   :  { %21304 = vmatpush3.msra.mxu0 %v180_v5  ;;  %v24717_v5 = vpack.c.bf16 %v182_v46, %v181_v43  ;;  %v24726_v43 = vpack.c.bf16 %v185_v12, %v184_v10  ;;  %v27131_v10 = vmov 0.0   ;;  %v186_v12 = vld [vmem:[#allocation7 + $0x70] sm:$0xff] }
 0x63c   :  { %23140 = vmatprep.subr.bf16.mxu0 %v26908_v63 }
 0x63d   :  { %27127 = vst [vmem:[#allocation50_spill] sm:$0xff] %v24717_v5  ;;  %27128 = vst [vmem:[#allocation51_spill] sm:$0xff] %v24726_v43 }
 0x6e3   :  { %v2915_v3 = vpop.f32.mrb[30].mxu1 }
 0x6e4   :  { %v3409_v11 = vmul.f32 %v2915_v3, %v24627_v13  ;;  %v21217_v36 = vpop.f32.mrb[31].mxu1  ;;  %v300_v3 = vsub.s32 1, %v24328_v48 }
 0x6e5   :  { %v2985_v23 = vpop.f32.mrb[28].mxu0  ;;  %v187_v36 = vld [vmem:[#allocation7 + $0x78] sm:$0xff] }
 0x6e6   :  { %v3410_v40 = vmul.f32 %v2985_v23, %v24629_v18  ;;  %v21226_v52 = vpop.f32.mrb[29].mxu0  ;;  %21288 = vmatmul.mubr.msk.f32.vlgmr.msra.gmra.mrb[38].mxu1 %vm3417_vm9, %v3409_v11  ;;  %v183_v11 = vld [vmem:[#allocation7 + $0x58] sm:$0xff]  ;;  %v188_v23 = vld [vmem:[#allocation7 + $0x80] sm:$0xff]  ;;  %v27130_v18 = vmov 0.0|0.0  }
 0x6e7   :  { %23133 = vmatpush3.bf16.msra.mxu1 %v24708_v26  ;;  %21296 = vmatprep.mubr.msk.f32.mxu1 %vm24072_vm0, %v26910_v0  ;;  %v24732_v20 = vpack.c.bf16 %v188_v23, %v187_v36  ;;  %v194_v36 = vld [vmem:[#allocation7 + $0xb0] sm:$0xff] }
 0x6e8   :  { %21294 = vmatprep.subr.mxu1 %v26910_v0 }
 0x6e9   :  { %27129 = vst [vmem:[#allocation52_spill] sm:$0xff] %v24732_v20 }
 0x6eb   :  { %21295 = vmatpush3.msra.mxu1 %v177_v50  ;;  %v23801_v50 = vld [vmem:[%s26902_s8] sm:$0x3f] }
 0x6ec   :  { %21297 = vmatmul.mubr.msk.f32.vlgmr.msra.gmra.mrb[40].mxu1 %vm3417_vm9, %v3410_v40  ;;  %23137 = vmatprep.subr.bf16.mxu1 %v26908_v63  ;;  %v301_v63 = vrot.slane %v23801_v50, %v300_v3 }
 0x6ed   :  { %23139 = vmatpush3.bf16.msra.mxu1 %v24717_v5  ;;  %21314 = vmatprep.mubr.msk.f32.mxu1 %vm24072_vm0, %v26910_v0 }
 0x6ee   :  { %21312 = vmatprep.subr.mxu1 %v26910_v0  ;;  %v393_v3 = vadd.f32 %v24334_v54, %v301_v63 }
 0x6ef   :  { %v3055_v52 = vpop.f32.mrb[32].mxu1 }
 0x6f0   :  { %v3411_v40 = vmul.f32 %v3055_v52, %v24631_v9  ;;  %v21235_v46 = vpop.f32.mrb[33].mxu1  ;;  %23663 = vtanh.f32 %v393_v3  ;;  %v192_v3 = vld [vmem:[#allocation7 + $0xa0] sm:$0xff] }
 0x6f1   :  { %v3125_v21 = vpop.f32.mrb[30].mxu0  ;;  %21313 = vmatpush3.msra.mxu1 %v183_v11  ;;  %v191_v11 = vld [vmem:[#allocation7 + $0x98] sm:$0xff] }
 0x6f2   :  { %v3412_v0 = vmul.f32 %v3125_v21, %v24636_v15  ;;  %v21244_v19 = vpop.f32.mrb[31].mxu0  ;;  %21306 = vmatmul.mubr.msk.f32.vlgmr.msra.gmra.mrb[36].mxu0 %vm3417_vm9, %v3411_v40  ;;  %23143 = vmatprep.subr.bf16.mxu1 %v27130_v18  ;;  %v190_v21 = vld [vmem:[#allocation7 + $0x90] sm:$0xff] }
 0x6f3   :  { %23142 = vmatpush3.bf16.msra.mxu0 %v24726_v43  ;;  %21323 = vmatprep.mubr.msk.f32.mxu0 %vm24072_vm0, %v27131_v10  ;;  %v189_v19 = vld [vmem:[#allocation7 + $0x88] sm:$0xff]  ;;  %v24749_v54 = vpack.c.bf16 %v191_v11, %v190_v21 }
 0x6f4   :  { %21315 = vmatmul.mubr.msk.f32.vlgmr.msra.gmra.mrb[42].mxu1 %vm3417_vm9, %v3412_v0  ;;  %21321 = vmatprep.subr.mxu0 %v27131_v10  ;;  %v193_v0 = vld [vmem:[#allocation7 + $0xa8] sm:$0xff] }
 0x6f5   :  { %23145 = vmatpush3.bf16.msra.mxu1 %v24732_v20  ;;  %21332 = vmatprep.mubr.msk.f32.mxu1 %vm24072_vm0, %v27131_v10  ;;  %27132 = vst [vmem:[#allocation53_spill] sm:$0xff] %v24749_v54  ;;  %v24752_v46 = vpack.c.bf16 %v194_v36, %v193_v0 }
 0x6f6   :  { %21330 = vmatprep.subr.mxu1 %v27131_v10 }
 0x6f7   :  { %21322 = vmatpush3.msra.mxu0 %v186_v12  ;;  %27133 = vst [vmem:[#allocation54_spill] sm:$0xff] %v24752_v46 }
 0x6f8   :  { %23146 = vmatprep.subr.bf16.mxu0 %v27130_v18 }
 0x6f9   :  { %21331 = vmatpush3.msra.mxu1 %v189_v19  ;;  %v195_v19 = vld [vmem:[#allocation7 + $0xb8] sm:$0xff] }
 0x6fa   :  { %23149 = vmatprep.subr.bf16.mxu1 %v27130_v18  ;;  %v23664_v21 = vpop.eup %23663 }
 0x6fb   :  { %v3195_v63 = vpop.f32.mrb[34].mxu1  ;;  %v4053_v11 = vrot.slane %v23664_v21, %v24337_v58 }
 0x6fc   :  { %v3413_v23 = vmul.f32 %v3195_v63, %v24694_v16  ;;  %v21253_v52 = vpop.f32.mrb[35].mxu1 }
 0x6fd   :  { %v3265_v40 = vpop.f32.mrb[32].mxu0 }
 0x6fe   :  { %v3414_v50 = vmul.f32 %v3265_v40, %v24696_v39  ;;  %v21262_v12 = vpop.f32.mrb[33].mxu0  ;;  %21324 = vmatmul.mubr.msk.f32.vlgmr.msra.gmra.mrb[38].mxu0 %vm3417_vm9, %v3413_v23 }
 0x6ff   :  { %23148 = vmatpush3.bf16.msra.mxu0 %v24749_v54  ;;  %21341 = vmatprep.mubr.msk.f32.mxu0 %vm24072_vm0, %v27131_v10  ;;  %v4046_v12 = vcombine.high %v23664_v21, %v23664_v21 }
 0x700   :  { %21333 = vmatmul.mubr.msk.f32.vlgmr.msra.gmra.mrb[44].mxu1 %vm3417_vm9, %v3414_v50  ;;  %21339 = vmatprep.subr.mxu0 %v27131_v10  ;;  %v4069_v50 = vrot.slane %v4053_v11, %v24337_v58 }
 0x701   :  { %23151 = vmatpush3.bf16.msra.mxu1 %v24752_v46  ;;  %21350 = vmatprep.mubr.msk.f32.mxu1 %vm24072_vm0, %v27131_v10 }
 0x702   :  { %21348 = vmatprep.subr.mxu1 %v27131_v10  ;;  %v4091_v21 = vcombine.high %v4069_v50, %v4069_v50 }
 0x703   :  { %21340 = vmatpush3.msra.mxu0 %v192_v3  ;;  %v24775_v3 = vld [vmem:[%s26895_s1] sm:$0xff] }
 0x704   :  { %21353 = vmatprep.subr.mxu0 %v27131_v10  ;;  %27134 = vst [vmem:[#allocation55_spill] sm:$0xff] %v24775_v3 }
 0x705   :  { %21349 = vmatpush3.msra.mxu1 %v195_v19  ;;  %v4061_v19 = vcombine.high %v4053_v11, %v4053_v11  ;;  %v24795_v11 = vld [vmem:[%s26895_s1 + $0x8] sm:$0xff] }
 0x706   :  { %21363 = vmatprep.subr.mxu1 %v27131_v10  ;;  %27135 = vst [vmem:[#allocation56_spill] sm:$0xff] %v24795_v11 }
 0x707   :  { %v3335_v0 = vpop.f32.mrb[36].mxu1 }
 0x708   :  { %v3415_v36 = vmul.f32 %v3335_v0, %v24698_v28  ;;  %v21271_v63 = vpop.f32.mrb[37].mxu1  ;;  %v24785_v0 = vld [vmem:[%s26895_s1 + $0x10] sm:$0xff]  ;;  %v24833_v28 = vld [vmem:[%s26895_s1 + $0x28] sm:$0xff] }
 0x709   :  { %v3405_v23 = vpop.f32.mrb[34].mxu0  ;;  %v4083_v63 = vrot.slane %v4061_v19, %v24337_v58  ;;  %v24824_v19 = vld [vmem:[%s26895_s1 + $0x30] sm:$0xff] }
 0x70a   :  { %v3416_v52 = vmul.f32 %v3405_v23, %v24700_v41  ;;  %v21280_v40 = vpop.f32.mrb[35].mxu0  ;;  %21342 = vmatmul.mubr.msk.f32.vlgmr.msra.gmra.mrb[40].mxu0 %vm3417_vm9, %v3415_v36  ;;  %v4060_v36 = vrot.slane %v4046_v12, %v24337_v58  ;;  %v24805_v23 = vld [vmem:[%s26895_s1 + $0x20] sm:$0xff] }
 0x70b   :  { %21354 = vmatpush3.xpose.msra.mxu0 %v24775_v3  ;;  %21355 = vmatprep.mubr.msk.f32.mxu0 %vm24072_vm0, %v27131_v10  ;;  %v24815_v40 = vld [vmem:[%s26895_s1 + $0x18] sm:$0xff] }
 0x70c   :  { %21351 = vmatmul.mubr.msk.f32.vlgmr.msra.gmra.mrb[46].mxu1 %vm3417_vm9, %v3416_v52  ;;  %21358 = vmatprep.subr.mxu0 %v27131_v10  ;;  %v4076_v52 = vrot.slane %v4060_v36, %v24337_v58  ;;  %v4062_v12 = vcombine.high %v4060_v36, %v4060_v36 }
 0x70d   :  { %21364 = vmatpush3.xpose.msra.mxu1 %v24785_v0  ;;  %21365 = vmatprep.mubr.msk.f32.mxu1 %vm24072_vm0, %v27131_v10 }
 0x70e   :  { %21356 = vmatmul.mubr.f32.vlgmr.msra.gmra.mrb[42].mxu0 %v4069_v50  ;;  %21373 = vmatprep.subr.mxu1 %v27131_v10  ;;  %v4093_v50 = vcombine.high %v4083_v63, %v4083_v63  ;;  %v4090_v36 = vrot.slane %v4062_v12, %v24337_v58 }
 0x70f   :  { %21359 = vmatpush3.xpose.msra.mxu0 %v24795_v11  ;;  %21360 = vmatprep.mubr.msk.f32.mxu0 %vm24072_vm0, %v27131_v10 }
 0x710   :  { %21366 = vmatmul.mubr.f32.vlgmr.msra.gmra.mrb[48].mxu1 %v4091_v21  ;;  %21368 = vmatprep.subr.mxu0 %v27131_v10  ;;  %v4092_v21 = vcombine.high %v4076_v52, %v4076_v52 }
 0x711   :  { %21374 = vmatpush3.xpose.msra.mxu1 %v24805_v23  ;;  %21375 = vmatprep.mubr.msk.f32.mxu1 %vm24072_vm0, %v27131_v10 }
 0x712   :  { %21361 = vmatmul.mubr.f32.vlgmr.msra.gmra.mrb[44].mxu0 %v4083_v63  ;;  %21383 = vmatprep.subr.mxu1 %v27131_v10  ;;  %v24847_v63 = vld [vmem:[%s26895_s1 + $0x38] sm:$0xff] }
 0x713   :  { %21369 = vmatpush3.xpose.msra.mxu0 %v24815_v40  ;;  %21370 = vmatprep.mubr.msk.f32.mxu0 %vm24072_vm0, %v27131_v10 }
 0x714   :  { %21376 = vmatmul.mubr.f32.vlgmr.msra.gmra.mrb[50].mxu1 %v4076_v52  ;;  %21378 = vmatprep.subr.mxu0 %v27131_v10  ;;  %v4094_v52 = vcombine.high %v4090_v36, %v4090_v36 }
 0x715   :  { %21384 = vmatpush3.xpose.msra.mxu1 %v24824_v19  ;;  %21385 = vmatprep.mubr.msk.f32.mxu1 %vm24072_vm0, %v27131_v10 }
 0x716   :  { %21371 = vmatmul.mubr.f32.vlgmr.msra.gmra.mrb[46].mxu0 %v4093_v50  ;;  %21393 = vmatprep.subr.mxu1 %v27131_v10 }
 0x717   :  { %21379 = vmatpush3.xpose.msra.mxu0 %v24833_v28  ;;  %21380 = vmatprep.mubr.msk.f32.mxu0 %vm24072_vm0, %v27131_v10 }
 0x718   :  { %21386 = vmatmul.mubr.f32.vlgmr.msra.gmra.mrb[52].mxu1 %v4092_v21  ;;  %21388 = vmatprep.subr.mxu0 %v27131_v10 }
 0x719   :  { %21394 = vmatpush3.msra.mxu1 %v24775_v3  ;;  %21395 = vmatprep.mubr.msk.f32.mxu1 %vm24072_vm0, %v27131_v10 }
 0x71a   :  { %21381 = vmatmul.mubr.f32.vlgmr.msra.gmra.mrb[48].mxu0 %v4090_v36  ;;  %21403 = vmatprep.subr.mxu1 %v27131_v10 }
 0x71b   :  { %21389 = vmatpush3.xpose.msra.mxu0 %v24847_v63  ;;  %21390 = vmatprep.mubr.msk.f32.mxu0 %vm24072_vm0, %v27131_v10 }
 0x71c   :  { %21398 = vmatprep.subr.mxu0 %v27131_v10 }
 0x71e   :  { %21391 = vmatmul.mubr.f32.vlgmr.msra.gmra.mrb[50].mxu0 %v4094_v52 }
 0x71f   :  { %21399 = vmatpush3.msra.mxu0 %v24795_v11  ;;  %21400 = vmatprep.mubr.msk.f32.mxu0 %vm24072_vm0, %v27131_v10 }
 0x720   :  { %21408 = vmatprep.subr.mxu0 %v27131_v10 }
 0x7b9   :  { %v24857_v50 = vpop.f32.mrb[38].mxu1 }
 0x7ba   :  { %27136 = vst [vmem:[#allocation57_spill] sm:$0xff] %v24857_v50  ;;  %v21289_v12 = vpop.f32.mrb[39].mxu1 }
 0x7bf   :  { %v24859_v21 = vpop.f32.mrb[40].mxu1 }
 0x7c0   :  { %27137 = vst [vmem:[#allocation58_spill] sm:$0xff] %v24859_v21  ;;  %v21298_v16 = vpop.f32.mrb[41].mxu1 }
 0x7c5   :  { %v24861_v41 = vpop.f32.mrb[36].mxu0 }
 0x7c6   :  { %27138 = vst [vmem:[#allocation59_spill] sm:$0xff] %v24861_v41  ;;  %v21307_v9 = vpop.f32.mrb[37].mxu0 }
 0x7c7   :  { %v24863_v36 = vpop.f32.mrb[42].mxu1 }
 0x7c8   :  { %27139 = vst [vmem:[#allocation60_spill] sm:$0xff] %v24863_v36  ;;  %v21316_v39 = vpop.f32.mrb[43].mxu1 }
 0x7d1   :  { %v24865_v52 = vpop.f32.mrb[38].mxu0 }
 0x7d2   :  { %27140 = vst [vmem:[#allocation61_spill] sm:$0xff] %v24865_v52  ;;  %v21325_v15 = vpop.f32.mrb[39].mxu0 }
 0x7d3   :  { %v24867_v13 = vpop.f32.mrb[44].mxu1 }
 0x7d4   :  { %27141 = vst [vmem:[#allocation62_spill] sm:$0xff] %v24867_v13  ;;  %v21334_v60 = vpop.f32.mrb[45].mxu1 }
 0x7dd   :  { %v24869_v11 = vpop.f32.mrb[40].mxu0 }
 0x7de   :  { %27142 = vst [vmem:[#allocation63_spill] sm:$0xff] %v24869_v11  ;;  %v21343_v3 = vpop.f32.mrb[41].mxu0 }
 0x7df   :  { %v24871_v46 = vpop.f32.mrb[46].mxu1 }
 0x7e0   :  { %27143 = vst [vmem:[#allocation64_spill] sm:$0xff] %v24871_v46  ;;  %v21352_v12 = vpop.f32.mrb[47].mxu1 }
 0x7e1   :  { %v4169_v54 = vpop.f32.mrb[42].mxu0 }
 0x7e2   :  { %v21357_v16 = vpop.f32.mrb[43].mxu0 }
 0x7e3   :  { %v4309_v20 = vpop.f32.mrb[48].mxu1 }
 0x7e4   :  { %v21367_v59 = vpop.f32.mrb[49].mxu1  ;;  %v4673_v39 = vrot.slane %v4309_v20, 6 }
 0x7e5   :  { %v4239_v9 = vpop.f32.mrb[44].mxu0 }
 0x7e6   :  { %v4671_v43 = vrot.slane %v4239_v9, 7  ;;  %v21362_v48 = vpop.f32.mrb[45].mxu0 }
 0x7e7   :  { %v4449_v5 = vpop.f32.mrb[50].mxu1 }
 0x7e8   :  { %v4672_v15 = vsel %vm1292_vm1, %v4671_v43, %v4169_v54  ;;  %v21377_v61 = vpop.f32.mrb[51].mxu1  ;;  %v4677_v53 = vrot.slane %v4449_v5, 4 }
 0x7e9   :  { %v4379_v26 = vpop.f32.mrb[46].mxu0  ;;  %v4674_v60 = vsel %vm1295_vm2, %v4673_v39, %v4672_v15 }
 0x7ea   :  { %v4675_v22 = vrot.slane %v4379_v26, 5  ;;  %v21372_v3 = vpop.f32.mrb[47].mxu0 }
 0x7eb   :  { %v4589_v47 = vpop.f32.mrb[52].mxu1 }
 0x7ec   :  { %v4676_v12 = vsel %vm1298_vm3, %v4675_v22, %v4674_v60  ;;  %v21387_v16 = vpop.f32.mrb[53].mxu1  ;;  %v4681_v56 = vrot.slane %v4589_v47, 2 }
 0x7ed   :  { %v4519_v14 = vpop.f32.mrb[48].mxu0  ;;  %v4678_v59 = vsel %vm1301_vm4, %v4677_v53, %v4676_v12 }
 0x7ee   :  { %v4679_v29 = vrot.slane %v4519_v14, 3  ;;  %v21382_v48 = vpop.f32.mrb[49].mxu0 }
 0x7f0   :  { %v4680_v49 = vsel %vm1304_vm5, %v4679_v29, %v4678_v59 }
 0x7f1   :  { %v4659_v43 = vpop.f32.mrb[50].mxu0  ;;  %v4682_v61 = vsel %vm1307_vm6, %v4681_v56, %v4680_v49 }
 0x7f2   :  { %v4683_v58 = vrot.slane %v4659_v43, 1  ;;  %v21392_v39 = vpop.f32.mrb[51].mxu0 }
 0x7f4   :  { %v4684_v15 = vsel %vm1310_vm7, %v4683_v58, %v4682_v61 }
 0x7f5   :  { %v4686_v3 = vsel %vm1313_vm8, %v4684_v15, -inf }
 0x7f6   :  { %4687 = vmax.xlane.f32.xlu1 %v4686_v3 }
 0x883   :  { %v4688_v22 = vpop.xlane.xlu1 %4687 }
 0x884   :  { %v4690_v60 = vrot.slane %v4688_v22, 1  ;;  %v4691_v16 = vrot.slane %v4688_v22, 2  ;;  %v4692_v8 = vrot.slane %v4688_v22, 3  ;;  %v4693_v53 = vrot.slane %v4688_v22, 4 }
 0x885   :  { %v4694_v12 = vrot.slane %v4688_v22, 5  ;;  %v4695_v48 = vrot.slane %v4688_v22, 6  ;;  %v4696_v46 = vrot.slane %v4688_v22, 7  ;;  %v4705_v44 = vsub.f32 %v4169_v54, %v4688_v22 }
 0x886   :  { %v4706_v29 = vsub.f32 %v4239_v9, %v4690_v60  ;;  %v4707_v59 = vsub.f32 %v4309_v20, %v4691_v16  ;;  %v4708_v13 = vsub.f32 %v4379_v26, %v4692_v8  ;;  %v4709_v49 = vsub.f32 %v4449_v5, %v4693_v53 }
 0x887   :  { %v4710_v56 = vsub.f32 %v4519_v14, %v4694_v12  ;;  %v4713_v39 = vmul.f32 1.442695, %v4705_v44  ;;  %v4711_v34 = vsub.f32 %v4589_v47, %v4695_v48  ;;  %v4712_v3 = vsub.f32 %v4659_v43, %v4696_v46 }
 0x888   :  { %v4715_v58 = vmul.f32 1.442695, %v4706_v29  ;;  %v4717_v61 = vmul.f32 1.442695, %v4707_v59  ;;  %v4719_v15 = vmul.f32 1.442695, %v4708_v13 }
 0x889   :  { %23665 = vpow2.f32 %v4713_v39  ;;  %v4721_v36 = vmul.f32 1.442695, %v4709_v49  ;;  %v4723_v6 = vmul.f32 1.442695, %v4710_v56  ;;  %v4725_v55 = vmul.f32 1.442695, %v4711_v34 }
 0x88a   :  { %23667 = vpow2.f32 %v4715_v58  ;;  %v4727_v11 = vmul.f32 1.442695, %v4712_v3 }
 0x88b   :  { %23669 = vpow2.f32 %v4717_v61 }
 0x88c   :  { %23671 = vpow2.f32 %v4719_v15 }
 0x88d   :  { %23673 = vpow2.f32 %v4721_v36 }
 0x88e   :  { %23675 = vpow2.f32 %v4723_v6 }
 0x88f   :  { %23677 = vpow2.f32 %v4725_v55 }
 0x890   :  { %23679 = vpow2.f32 %v4727_v11 }
 0x893   :  { %v23666_v20 = vpop.eup %23665 }
 0x894   :  { %v23668_v8 = vpop.eup %23667 }
 0x895   :  { %v23670_v44 = vpop.eup %23669  ;;  %v4737_v14 = vrot.slane %v23668_v8, 7 }
 0x896   :  { %v23672_v47 = vpop.eup %23671  ;;  %v4739_v26 = vrot.slane %v23670_v44, 6 }
 0x897   :  { %v23674_v13 = vpop.eup %23673  ;;  %v4738_v5 = vsel %vm1292_vm1, %v4737_v14, %v23666_v20  ;;  %v4741_v54 = vrot.slane %v23672_v47, 5 }
 0x898   :  { %v23676_v46 = vpop.eup %23675  ;;  %v4740_v9 = vsel %vm1295_vm2, %v4739_v26, %v4738_v5  ;;  %v4743_v34 = vrot.slane %v23674_v13, 4 }
 0x899   :  { %v23678_v43 = vpop.eup %23677  ;;  %v4742_v36 = vsel %vm1298_vm3, %v4741_v54, %v4740_v9  ;;  %v4745_v6 = vrot.slane %v23676_v46, 3 }
 0x89a   :  { %v23680_v55 = vpop.eup %23679  ;;  %v4744_v11 = vsel %vm1301_vm4, %v4743_v34, %v4742_v36  ;;  %v4747_v22 = vrot.slane %v23678_v43, 2 }
 0x89b   :  { %v4746_v60 = vsel %vm1304_vm5, %v4745_v6, %v4744_v11  ;;  %v4749_v16 = vrot.slane %v23680_v55, 1 }
 0x89c   :  { %v4748_v53 = vsel %vm1307_vm6, %v4747_v22, %v4746_v60 }
 0x89d   :  { %v4750_v12 = vsel %vm1310_vm7, %v4749_v16, %v4748_v53  ;;  %v24896_v53 = vld [vmem:[%s26896_s2] sm:$0xff] }
 0x89e   :  { %v4752_v48 = vsel %vm1313_vm8, %v4750_v12, 0.0 }
 0x89f   :  { %4753 = vadd.xlane.f32.xlu0 %v4752_v48 }
 0x92c   :  { %v4754_v29 = vpop.xlane.xlu0 %4753 }
 0x92d   :  { %23681 = vrcp.f32 %v4754_v29 }
 0x937   :  { %v23682_v59 = vpop.eup %23681 }
 0x938   :  { %v4757_v49 = vrot.slane %v23682_v59, 1  ;;  %v4758_v56 = vrot.slane %v23682_v59, 2  ;;  %v4759_v39 = vrot.slane %v23682_v59, 3  ;;  %v4760_v58 = vrot.slane %v23682_v59, 4 }
 0x939   :  { %v4761_v61 = vrot.slane %v23682_v59, 5  ;;  %v4762_v15 = vrot.slane %v23682_v59, 6  ;;  %v4763_v3 = vrot.slane %v23682_v59, 7  ;;  %v4772_v14 = vmul.f32 %v23682_v59, %v23666_v20 }
 0x93a   :  { %v4773_v26 = vmul.f32 %v23668_v8, %v4757_v49  ;;  %v4774_v5 = vmul.f32 %v23670_v44, %v4758_v56  ;;  %v4775_v54 = vmul.f32 %v23672_v47, %v4759_v39  ;;  %v4776_v9 = vmul.f32 %v23674_v13, %v4760_v58 }
 0x93b   :  { %v4777_v34 = vmul.f32 %v23676_v46, %v4761_v61  ;;  %v4778_v36 = vmul.f32 %v23678_v43, %v4762_v15  ;;  %v4779_v6 = vmul.f32 %v23680_v55, %v4763_v3  ;;  %v4780_v20 = vmul.f32 %v24896_v53, %v4772_v14 }
 0x93c   :  { %v4781_v11 = vmul.f32 %v4773_v26, %v24436_v57  ;;  %v4782_v22 = vmul.f32 %v4774_v5, %v24438_v62  ;;  %v4783_v60 = vmul.f32 %v4775_v54, %v24440_v1  ;;  %v4784_v16 = vmul.f32 %v4776_v9, %v24442_v2 }
 0x93d   :  { %v4785_v8 = vmul.f32 %v4777_v34, %v24444_v4  ;;  %v4786_v13 = vmul.f32 %v4778_v36, %v24446_v31  ;;  %v4787_v46 = vmul.f32 %v4779_v6, %v24448_v32 }
 0x93e   :  { %v4796_v44 = vrot.slane %v4781_v11, 7  ;;  %v4798_v47 = vrot.slane %v4782_v22, 6  ;;  %v4800_v55 = vrot.slane %v4783_v60, 5  ;;  %v4802_v48 = vrot.slane %v4784_v16, 4 }
 0x93f   :  { %v4804_v59 = vrot.slane %v4785_v8, 3  ;;  %v4806_v56 = vrot.slane %v4786_v13, 2  ;;  %v4808_v58 = vrot.slane %v4787_v46, 1 }
 0x940   :  { %v4797_v43 = vsel %vm1292_vm1, %v4796_v44, %v4780_v20 }
 0x941   :  { %v4799_v12 = vsel %vm1295_vm2, %v4798_v47, %v4797_v43 }
 0x942   :  { %v4801_v29 = vsel %vm1298_vm3, %v4800_v55, %v4799_v12 }
 0x943   :  { %v4803_v49 = vsel %vm1301_vm4, %v4802_v48, %v4801_v29  ;;  %v26974_v48 = vmin.f32 %v24859_v21, 1.0  ;;  %v24986_v29 = vld [vmem:[#allocation2 + $0x40] sm:$0xff] }
 0x944   :  { %v4805_v39 = vsel %vm1304_vm5, %v4804_v59, %v4803_v49  ;;  %v26973_v59 = vmin.f32 %v24861_v41, 1.0  ;;  %v24997_v49 = vld [vmem:[#allocation2 + $0x70] sm:$0xff] }
 0x945   :  { %v4807_v61 = vsel %vm1307_vm6, %v4806_v56, %v4805_v39  ;;  %v26970_v56 = vmin.f32 %v24865_v52, 1.0  ;;  %v25008_v39 = vld [vmem:[#allocation2 + $0xa0] sm:$0xff]  ;;  %v27159_v41 = vld [vmem:[#allocation17_spill] sm:$0xff] }
 0x946   :  { %v4809_v15 = vsel %vm1310_vm7, %v4808_v58, %v4807_v61  ;;  %v27144_v58 = vld [vmem:[#allocation63_spill] sm:$0xff] }
 0x947   :  { %v4811_v3 = vsel %vm1313_vm8, %v4809_v15, 0.0  ;;  %v26968_v61 = vmin.f32 %v27144_v58, 1.0  ;;  %v27145_v15 = vld [vmem:[#allocation31_spill] sm:$0xff] }
 0x948   :  { %4812 = vadd.xlane.f32.xlu1 %v4811_v3  ;;  %v25019_v3 = vld [vmem:[#allocation5 + $0x10] sm:$0xff] }
 0x949   :  { %27146 = vst [vmem:[#allocation65_spill] sm:$0xff] %v25019_v3 }
 0x9d5   :  { %v4813_v14 = vpop.xlane.xlu1 %4812 }
 0x9d6   :  { %v4814_v26 = vadd.f32 1e-06, %v4813_v14 }
 0x9d8   :  { %23683 = vrcp.f32 %v4814_v26 }
 0x9e2   :  { %v23684_v5 = vpop.eup %23683 }
 0x9e3   :  { %v4832_v54 = vmul.f32 %v23684_v5, %v4780_v20  ;;  %v4817_v9 = vrot.slane %v23684_v5, 1  ;;  %v4818_v34 = vrot.slane %v23684_v5, 2  ;;  %v4819_v6 = vrot.slane %v23684_v5, 3 }
 0x9e4   :  { %v4820_v47 = vrot.slane %v23684_v5, 4  ;;  %v4821_v20 = vrot.slane %v23684_v5, 5  ;;  %v4822_v43 = vrot.slane %v23684_v5, 6  ;;  %v4823_v55 = vrot.slane %v23684_v5, 7 }
 0x9e5   :  { %21396 = vmatmul.mubr.msk.f32.vlgmr.msra.gmra.mrb[54].mxu1 %vm1313_vm8, %v4832_v54  ;;  %v4833_v36 = vmul.f32 %v4817_v9, %v4781_v11  ;;  %v4834_v44 = vmul.f32 %v4818_v34, %v4782_v22  ;;  %v4835_v11 = vmul.f32 %v4819_v6, %v4783_v60 }
 0x9e6   :  { %21404 = vmatpush3.msra.mxu1 %v24785_v0  ;;  %21405 = vmatprep.mubr.msk.f32.mxu1 %vm24072_vm0, %v27131_v10  ;;  %v4836_v22 = vmul.f32 %v4820_v47, %v4784_v16  ;;  %v4837_v60 = vmul.f32 %v4821_v20, %v4785_v8  ;;  %v4838_v16 = vmul.f32 %v4822_v43, %v4786_v13  ;;  %v24955_v8 = vld [vmem:[#allocation2 + $0x10] sm:$0xff]  ;;  %v26975_v13 = vmin.f32 %v24857_v50, 1.0 }
 0x9e7   :  { %21401 = vmatmul.mubr.msk.f32.vlgmr.msra.gmra.mrb[52].mxu0 %vm1313_vm8, %v4833_v36  ;;  %21413 = vmatprep.subr.mxu1 %v27131_v10  ;;  %v4839_v12 = vmul.f32 %v4823_v55, %v4787_v46  ;;  %v24972_v46 = vld [vmem:[#allocation2 + $0x28] sm:$0xff] }
 0x9e8   :  { %21409 = vmatpush3.msra.mxu0 %v24815_v40  ;;  %21410 = vmatprep.mubr.msk.f32.mxu0 %vm24072_vm0, %v27131_v10 }
 0x9e9   :  { %21406 = vmatmul.mubr.msk.f32.vlgmr.msra.gmra.mrb[56].mxu1 %vm1313_vm8, %v4834_v44  ;;  %21418 = vmatprep.subr.mxu0 %v27131_v10 }
 0x9ea   :  { %21414 = vmatpush3.msra.mxu1 %v24805_v23  ;;  %21415 = vmatprep.mubr.msk.f32.mxu1 %vm24072_vm0, %v27131_v10 }
 0x9eb   :  { %21411 = vmatmul.mubr.msk.f32.vlgmr.msra.gmra.mrb[54].mxu0 %vm1313_vm8, %v4835_v11  ;;  %21423 = vmatprep.subr.mxu1 %v27131_v10 }
 0x9ec   :  { %21419 = vmatpush3.msra.mxu0 %v24833_v28  ;;  %21420 = vmatprep.mubr.msk.f32.mxu0 %vm24072_vm0, %v27131_v10 }
 0x9ed   :  { %21416 = vmatmul.mubr.msk.f32.vlgmr.msra.gmra.mrb[58].mxu1 %vm1313_vm8, %v4836_v22  ;;  %21428 = vmatprep.subr.mxu0 %v27131_v10 }
 0x9ee   :  { %21424 = vmatpush3.msra.mxu1 %v24824_v19  ;;  %21425 = vmatprep.mubr.msk.f32.mxu1 %vm24072_vm0, %v27131_v10 }
 0x9ef   :  { %21421 = vmatmul.mubr.msk.f32.vlgmr.msra.gmra.mrb[56].mxu0 %vm1313_vm8, %v4837_v60  ;;  %23152 = vmatprep.subr.bf16.mxu1 %v27130_v18 }
 0x9f0   :  { %21429 = vmatpush3.msra.mxu0 %v24847_v63  ;;  %21430 = vmatprep.mubr.msk.f32.mxu0 %vm24072_vm0, %v27131_v10 }
 0x9f1   :  { %21426 = vmatmul.mubr.msk.f32.vlgmr.msra.gmra.mrb[60].mxu1 %vm1313_vm8, %v4838_v16  ;;  %23176 = vmatprep.subr.bf16.mxu0 %v27130_v18 }
 0x9f2   :  { %23154 = vmatpush3.bf16.msra.mxu1 %v24489_v27  ;;  %21465 = vmatprep.mubr.msk.f32.mxu1 %vm24072_vm0, %v27131_v10 }
 0x9f3   :  { %21431 = vmatmul.mubr.msk.f32.vlgmr.msra.gmra.mrb[58].mxu0 %vm1313_vm8, %v4839_v12  ;;  %23155 = vmatprep.subr.bf16.mxu1 %v27130_v18 }
 0x9f4   :  { %21474 = vmatprep.mubr.msk.f32.mxu0 %vm24072_vm0, %v27131_v10 }
 0x9f6   :  { %23157 = vmatpush3.bf16.msra.mxu1 %v24499_v33 }
 0x9f7   :  { %23178 = vmatpush3.bf16.xpose.msra.mxu0 %v24531_v51  ;;  %23158 = vmatprep.subr.bf16.mxu1 %v27130_v18 }
 0x9f8   :  { %21472 = vmatprep.subr.mxu0 %v27131_v10 }
 0x9fa   :  { %23160 = vmatpush3.bf16.msra.mxu1 %v24508_v38 }
 0x9fb   :  { %23161 = vmatprep.subr.bf16.mxu1 %v27130_v18 }
 0x9fe   :  { %23163 = vmatpush3.bf16.msra.mxu1 %v24512_v25 }
 0x9ff   :  { %21473 = vmatpush3.xpose.msra.mxu0 %v24955_v8  ;;  %23164 = vmatprep.subr.bf16.mxu1 %v27130_v18 }
 0xa00   :  { %23179 = vmatprep.subr.bf16.mxu0 %v27130_v18 }
 0xa02   :  { %21475 = vmatmul.mubr.f32.vlgmr.msra.gmra.mrb[60].mxu0 %v26975_v13  ;;  %23166 = vmatpush3.bf16.msra.mxu1 %v24517_v37 }
 0xa03   :  { %23181 = vmatpush3.bf16.xpose.msra.mxu0 %v24545_v7  ;;  %21483 = vmatprep.mubr.msk.f32.mxu0 %vm24072_vm0, %v27131_v10 }
 0xa04   :  { %21481 = vmatprep.subr.mxu0 %v27131_v10  ;;  %23167 = vmatprep.subr.bf16.mxu1 %v27130_v18 }
 0xa06   :  { %23169 = vmatpush3.bf16.msra.mxu1 %v24521_v42 }
 0xa07   :  { %23170 = vmatprep.subr.bf16.mxu1 %v27130_v18 }
 0xa0a   :  { %23172 = vmatpush3.bf16.msra.mxu1 %v24525_v45 }
 0xa0b   :  { %21482 = vmatpush3.xpose.msra.mxu0 %v24972_v46  ;;  %23173 = vmatprep.subr.bf16.mxu1 %v27130_v18 }
 0xa0c   :  { %23182 = vmatprep.subr.bf16.mxu0 %v27130_v18 }
 0xa0e   :  { %21484 = vmatmul.mubr.f32.vlgmr.msra.gmra.mrb[62].mxu0 %v26974_v48  ;;  %23175 = vmatpush3.bf16.msra.mxu1 %v24528_v30 }
 0xa0f   :  { %23184 = vmatpush3.bf16.xpose.msra.mxu0 %v24555_v17  ;;  %21492 = vmatprep.mubr.msk.f32.mxu0 %vm24072_vm0, %v27131_v10 }
 0xa10   :  { %21490 = vmatprep.subr.mxu0 %v27131_v10  ;;  %23185 = vmatprep.subr.bf16.mxu1 %v27130_v18 }
 0xa17   :  { %21491 = vmatpush3.xpose.msra.mxu0 %v24986_v29 }
 0xa18   :  { %23188 = vmatprep.subr.bf16.mxu0 %v27130_v18 }
 0xa1a   :  { %21493 = vmatmul.mubr.f32.vlgmr.msra.gmra.mrb[64].mxu0 %v26973_v59 }
 0xa1b   :  { %23190 = vmatpush3.bf16.xpose.msra.mxu0 %v24563_v24  ;;  %21510 = vmatprep.mubr.msk.f32.mxu0 %vm24072_vm0, %v27131_v10 }
 0xa1c   :  { %21508 = vmatprep.subr.mxu0 %v27131_v10 }
 0xa23   :  { %21509 = vmatpush3.xpose.msra.mxu0 %v24997_v49 }
 0xa24   :  { %23194 = vmatprep.subr.bf16.mxu0 %v27130_v18 }
 0xa26   :  { %21511 = vmatmul.mubr.f32.vlgmr.msra.gmra.mrb[66].mxu0 %v26970_v56 }
 0xa27   :  { %23196 = vmatpush3.bf16.xpose.msra.mxu0 %v24597_v35  ;;  %21528 = vmatprep.mubr.msk.f32.mxu0 %vm24072_vm0, %v27131_v10 }
 0xa28   :  { %21526 = vmatprep.subr.mxu0 %v27131_v10 }
 0xa2f   :  { %21527 = vmatpush3.xpose.msra.mxu0 %v25008_v39 }
 0xa30   :  { %23200 = vmatprep.subr.bf16.mxu0 %v27130_v18 }
 0xa32   :  { %21529 = vmatmul.mubr.f32.vlgmr.msra.gmra.mrb[68].mxu0 %v26968_v61 }
 0xa33   :  { %23202 = vmatpush3.bf16.xpose.msra.mxu0 %v27145_v15  ;;  %21546 = vmatprep.mubr.msk.f32.mxu0 %vm24072_vm0, %v27131_v10 }
 0xa34   :  { %21544 = vmatprep.subr.mxu0 %v27131_v10 }
 0xa3b   :  { %21545 = vmatpush3.xpose.msra.mxu0 %v25019_v3 }
 0xa3c   :  { %23206 = vmatprep.subr.bf16.mxu0 %v27130_v18 }
 0xab8   :  { %v4909_v14 = vpop.f32.mrb[54].mxu1 }
 0xab9   :  { %v21397_v26 = vpop.f32.mrb[55].mxu1 }
 0xaba   :  { %v4982_v5 = vpop.f32.mrb[52].mxu0 }
 0xabb   :  { %v5432_v54 = vrot.slane %v4982_v5, 7  ;;  %v21402_v9 = vpop.f32.mrb[53].mxu0 }
 0xabc   :  { %v5055_v34 = vpop.f32.mrb[56].mxu1 }
 0xabd   :  { %v5433_v36 = vsel %vm1292_vm1, %v5432_v54, %v4909_v14  ;;  %v5434_v6 = vrot.slane %v5055_v34, 6  ;;  %v21407_v44 = vpop.f32.mrb[57].mxu1 }
 0xabe   :  { %v5128_v47 = vpop.f32.mrb[54].mxu0 }
 0xabf   :  { %v5435_v11 = vsel %vm1295_vm2, %v5434_v6, %v5433_v36  ;;  %v5436_v20 = vrot.slane %v5128_v47, 5  ;;  %v21412_v22 = vpop.f32.mrb[55].mxu0 }
 0xac0   :  { %v5201_v43 = vpop.f32.mrb[58].mxu1 }
 0xac1   :  { %v5437_v60 = vsel %vm1298_vm3, %v5436_v20, %v5435_v11  ;;  %v5438_v55 = vrot.slane %v5201_v43, 4  ;;  %v21417_v16 = vpop.f32.mrb[59].mxu1  ;;  %v27147_v11 = vld [vmem:[#allocation27_spill] sm:$0xff]  ;;  %v25034_v20 = vld [vmem:[#allocation2 + $0x58] sm:$0xff] }
 0xac2   :  { %v5274_v12 = vpop.f32.mrb[56].mxu0  ;;  %27148 = vst [vmem:[#allocation66_spill] sm:$0xff] %v25034_v20  ;;  %v27150_v16 = vld [vmem:[#allocation28_spill] sm:$0xff] }
 0xac3   :  { %v5439_v26 = vsel %vm1301_vm4, %v5438_v55, %v5437_v60  ;;  %v5440_v5 = vrot.slane %v5274_v12, 3  ;;  %v21422_v9 = vpop.f32.mrb[57].mxu0  ;;  %v25047_v12 = vld [vmem:[#allocation2 + $0x88] sm:$0xff] }
 0xac4   :  { %v5347_v61 = vpop.f32.mrb[60].mxu1  ;;  %27151 = vst [vmem:[#allocation67_spill] sm:$0xff] %v25047_v12 }
 0xac5   :  { %v5441_v14 = vsel %vm1304_vm5, %v5440_v5, %v5439_v26  ;;  %v5442_v54 = vrot.slane %v5347_v61, 2  ;;  %v21427_v34 = vpop.f32.mrb[61].mxu1  ;;  %v27149_v61 = vld [vmem:[#allocation60_spill] sm:$0xff]  ;;  %v27152_v26 = vld [vmem:[#allocation62_spill] sm:$0xff] }
 0xac6   :  { %v5420_v44 = vpop.f32.mrb[58].mxu0  ;;  %v26972_v43 = vmin.f32 %v27149_v61, 1.0  ;;  %v26969_v5 = vmin.f32 %v27152_v26, 1.0  ;;  %v25060_v34 = vld [vmem:[#allocation2 + $0xb8] sm:$0xff] }
 0xac7   :  { %v5443_v36 = vsel %vm1307_vm6, %v5442_v54, %v5441_v14  ;;  %v5444_v6 = vrot.slane %v5420_v44, 1  ;;  %v21432_v47 = vpop.f32.mrb[59].mxu0  ;;  %v27153_v54 = vld [vmem:[#allocation30_spill] sm:$0xff]  ;;  %27154 = vst [vmem:[#allocation68_spill] sm:$0xff] %v25060_v34  ;;  %v27155_v44 = vld [vmem:[#allocation64_spill] sm:$0xff] }
 0xac9   :  { %v5445_v22 = vsel %vm1310_vm7, %v5444_v6, %v5443_v36  ;;  %v26971_v36 = vmin.f32 %v27155_v44, 1.0 }
 0xaca   :  { %21466 = vmatmul.mubr.f32.vlgmr.msra.gmra.mrb[62].mxu1 %v5445_v22  ;;  %v27156_v22 = vld [vmem:[#allocation32_spill] sm:$0xff] }
 0xacb   :  { %23187 = vmatpush3.bf16.xpose.msra.mxu1 %v27147_v11  ;;  %21501 = vmatprep.mubr.msk.f32.mxu1 %vm24072_vm0, %v27131_v10 }
 0xacc   :  { %21499 = vmatprep.subr.mxu1 %v27131_v10 }
 0xad3   :  { %21500 = vmatpush3.xpose.msra.mxu1 %v25034_v20 }
 0xad4   :  { %23191 = vmatprep.subr.bf16.mxu1 %v27130_v18 }
 0xad5   :  { %v25039_v60 = vpop.f32.mrb[60].mxu0 }
 0xad6   :  { %v21476_v55 = vpop.f32.mrb[61].mxu0  ;;  %21502 = vmatmul.mubr.f32.vlgmr.msra.gmra.mrb[64].mxu1 %v26972_v43  ;;  %v25084_v43 = vld [vmem:[%s26904_s10] ss:$0 sm:$0xff] }
 0xad7   :  { %23193 = vmatpush3.bf16.xpose.msra.mxu1 %v27150_v16  ;;  %21519 = vmatprep.mubr.msk.f32.mxu1 %vm24072_vm0, %v27131_v10  ;;  %v25073_v55 = vld [vmem:[#allocation5 + $0x28] sm:$0xff]  ;;  %27158 = vst [vmem:[#allocation70_spill] sm:$0xff] %v25084_v43 }
 0xad8   :  { %21517 = vmatprep.subr.mxu1 %v27131_v10  ;;  %27157 = vst [vmem:[#allocation69_spill] sm:$0xff] %v25073_v55 }
 0xadf   :  { %21518 = vmatpush3.xpose.msra.mxu1 %v25047_v12 }
 0xae0   :  { %23197 = vmatprep.subr.bf16.mxu1 %v27130_v18 }
 0xae1   :  { %v25052_v9 = vpop.f32.mrb[62].mxu0 }
 0xae2   :  { %v21485_v14 = vpop.f32.mrb[63].mxu0  ;;  %21520 = vmatmul.mubr.f32.vlgmr.msra.gmra.mrb[66].mxu1 %v26969_v5 }
 0xae3   :  { %23199 = vmatpush3.bf16.xpose.msra.mxu1 %v27153_v54  ;;  %21537 = vmatprep.mubr.msk.f32.mxu1 %vm24072_vm0, %v27131_v10 }
 0xae4   :  { %21535 = vmatprep.subr.mxu1 %v27131_v10 }
 0xaeb   :  { %21536 = vmatpush3.xpose.msra.mxu1 %v25060_v34 }
 0xaec   :  { %23203 = vmatprep.subr.bf16.mxu1 %v27130_v18 }
 0xaed   :  { %v25065_v6 = vpop.f32.mrb[64].mxu0 }
 0xaee   :  { %v21494_v47 = vpop.f32.mrb[65].mxu0  ;;  %21538 = vmatmul.mubr.f32.vlgmr.msra.gmra.mrb[68].mxu1 %v26971_v36 }
 0xaef   :  { %23205 = vmatpush3.bf16.xpose.msra.mxu1 %v27156_v22  ;;  %21555 = vmatprep.mubr.msk.f32.mxu1 %vm24072_vm0, %v27131_v10 }
 0xaf0   :  { %21553 = vmatprep.subr.mxu1 %v27131_v10 }
 0xaf7   :  { %21554 = vmatpush3.xpose.msra.mxu1 %v25073_v55 }
 0xaf8   :  { %23209 = vmatprep.subr.bf16.mxu1 %v27130_v18 }
 0xaf9   :  { %v25077_v14 = vpop.f32.mrb[66].mxu0 }
 0xafa   :  { %v21512_v5 = vpop.f32.mrb[67].mxu0 }
 0xb05   :  { %v25079_v47 = vpop.f32.mrb[68].mxu0 }
 0xb06   :  { %v21530_v56 = vpop.f32.mrb[69].mxu0 }
 0xb9d   :  { %v5513_v36 = vpop.f32.mrb[62].mxu1 }
 0xb9e   :  { %v5514_v59 = vadd.f32 %v25084_v43, %v5513_v36  ;;  %v21467_v48 = vpop.f32.mrb[63].mxu1  ;;  %v25108_v36 = vld [vmem:[#allocation5 + $0x58] sm:$0xff] }
 0xb9f   :  { %27163 = vst [vmem:[#allocation72_spill] sm:$0xff] %v25108_v36 }
 0xba0   :  { %v20053_v13 = vmul.f32 -1.442695, %v5514_v59  ;;  %v27160_v59 = vld [vmem:[#allocation37_spill] sm:$0xff] }
 0xba2   :  { %23685 = vpow2.f32 %v20053_v13  ;;  %v27161_v13 = vld [vmem:[#allocation38_spill] sm:$0xff] }
 0xba9   :  { %v25087_v44 = vpop.f32.mrb[64].mxu1 }
 0xbaa   :  { %v21503_v58 = vpop.f32.mrb[65].mxu1 }
 0xbac   :  { %v23686_v26 = vpop.eup %23685 }
 0xbad   :  { %v5520_v52 = vadd.f32 1.0, %v23686_v26 }
 0xbaf   :  { %23687 = vrcp.f32 %v5520_v52 }
 0xbb5   :  { %v25089_v5 = vpop.f32.mrb[66].mxu1 }
 0xbb6   :  { %v21521_v56 = vpop.f32.mrb[67].mxu1 }
 0xbb9   :  { %v23688_v61 = vpop.eup %23687 }
 0xbba   :  { %v6091_v21 = vrot.slane %v23688_v61, %v27159_v41  ;;  %v6084_v56 = vcombine.high %v23688_v61, %v23688_v61 }
 0xbbc   :  { %v6107_v50 = vrot.slane %v6091_v21, %v27159_v41  ;;  %v6099_v55 = vcombine.high %v6091_v21, %v6091_v21  ;;  %v25104_v21 = vld [vmem:[#allocation5 + $0x40] sm:$0xff] }
 0xbbd   :  { %27162 = vst [vmem:[#allocation71_spill] sm:$0xff] %v25104_v21 }
 0xbbe   :  { %21547 = vmatmul.mubr.f32.vlgmr.msra.gmra.mrb[70].mxu0 %v6107_v50  ;;  %v6121_v48 = vrot.slane %v6099_v55, %v27159_v41  ;;  %v6129_v26 = vcombine.high %v6107_v50, %v6107_v50  ;;  %v27165_v50 = vld [vmem:[#allocation40_spill] sm:$0xff] }
 0xbbf   :  { %23208 = vmatpush3.bf16.xpose.msra.mxu0 %v27160_v59  ;;  %21564 = vmatprep.mubr.msk.f32.mxu0 %vm24072_vm0, %v27131_v10 }
 0xbc0   :  { %21556 = vmatmul.mubr.f32.vlgmr.msra.gmra.mrb[70].mxu1 %v6121_v48  ;;  %21562 = vmatprep.subr.mxu0 %v27131_v10  ;;  %v6131_v55 = vcombine.high %v6121_v48, %v6121_v48  ;;  %v6098_v48 = vrot.slane %v6084_v56, %v27159_v41  ;;  %v27169_v56 = vld [vmem:[#allocation42_spill] sm:$0xff] }
 0xbc1   :  { %v25098_v52 = vpop.f32.mrb[68].mxu1  ;;  %23211 = vmatpush3.bf16.xpose.msra.mxu1 %v27161_v13  ;;  %21573 = vmatprep.mubr.msk.f32.mxu1 %vm24072_vm0, %v27131_v10  ;;  %v27164_v13 = vld [vmem:[#allocation39_spill] sm:$0xff] }
 0xbc2   :  { %v21539_v58 = vpop.f32.mrb[69].mxu1  ;;  %21571 = vmatprep.subr.mxu1 %v27131_v10  ;;  %v6114_v61 = vrot.slane %v6098_v48, %v27159_v41 }
 0xbc3   :  { %v6100_v58 = vcombine.high %v6098_v48, %v6098_v48  ;;  %v25139_v48 = vld [vmem:[#allocation5 + $0xa0] sm:$0xff] }
 0xbc4   :  { %27170 = vst [vmem:[#allocation75_spill] sm:$0xff] %v25139_v48 }
 0xbc7   :  { %21563 = vmatpush3.xpose.msra.mxu0 %v25104_v21 }
 0xbc8   :  { %23212 = vmatprep.subr.bf16.mxu0 %v27130_v18 }
 0xbc9   :  { %21572 = vmatpush3.xpose.msra.mxu1 %v25108_v36  ;;  %v27176_v36 = vld [vmem:[#allocation48_spill] sm:$0xff] }
 0xbca   :  { %21565 = vmatmul.mubr.f32.vlgmr.msra.gmra.mrb[72].mxu0 %v6129_v26  ;;  %23215 = vmatprep.subr.bf16.mxu1 %v27130_v18  ;;  %v25121_v26 = vld [vmem:[#allocation5 + $0x70] sm:$0xff] }
 0xbcb   :  { %23214 = vmatpush3.bf16.xpose.msra.mxu0 %v27164_v13  ;;  %21582 = vmatprep.mubr.msk.f32.mxu0 %vm24072_vm0, %v27131_v10  ;;  %27166 = vst [vmem:[#allocation73_spill] sm:$0xff] %v25121_v26  ;;  %v27168_v13 = vld [vmem:[#allocation41_spill] sm:$0xff] }
 0xbcc   :  { %21574 = vmatmul.mubr.f32.vlgmr.msra.gmra.mrb[72].mxu1 %v6131_v55  ;;  %21580 = vmatprep.subr.mxu0 %v27131_v10  ;;  %v25126_v55 = vld [vmem:[#allocation5 + $0x88] sm:$0xff] }
 0xbcd   :  { %23217 = vmatpush3.bf16.xpose.msra.mxu1 %v27165_v50  ;;  %21591 = vmatprep.mubr.msk.f32.mxu1 %vm24072_vm0, %v27131_v10  ;;  %27167 = vst [vmem:[#allocation74_spill] sm:$0xff] %v25126_v55  ;;  %v6128_v50 = vrot.slane %v6100_v58, %v27159_v41  ;;  %v6130_v58 = vcombine.high %v6114_v61, %v6114_v61 }
 0xbce   :  { %21589 = vmatprep.subr.mxu1 %v27131_v10 }
 0xbd3   :  { %21581 = vmatpush3.xpose.msra.mxu0 %v25121_v26 }
 0xbd4   :  { %23218 = vmatprep.subr.bf16.mxu0 %v27130_v18 }
 0xbd5   :  { %21590 = vmatpush3.xpose.msra.mxu1 %v25126_v55  ;;  %v6132_v55 = vcombine.high %v6128_v50, %v6128_v50 }
 0xbd6   :  { %21583 = vmatmul.mubr.f32.vlgmr.msra.gmra.mrb[74].mxu0 %v6114_v61  ;;  %23221 = vmatprep.subr.bf16.mxu1 %v27130_v18  ;;  %v25155_v61 = vld [vmem:[#allocation7 + $0x10] sm:$0xff] }
 0xbd7   :  { %23220 = vmatpush3.bf16.xpose.msra.mxu0 %v27168_v13  ;;  %21600 = vmatprep.mubr.msk.f32.mxu0 %vm24072_vm0, %v27131_v10  ;;  %v25143_v13 = vld [vmem:[#allocation5 + $0xb8] sm:$0xff]  ;;  %27174 = vst [vmem:[#allocation77_spill] sm:$0xff] %v25155_v61 }
 0xbd8   :  { %21592 = vmatmul.mubr.f32.vlgmr.msra.gmra.mrb[74].mxu1 %v6128_v50  ;;  %21598 = vmatprep.subr.mxu0 %v27131_v10  ;;  %27171 = vst [vmem:[#allocation76_spill] sm:$0xff] %v25143_v13  ;;  %v25159_v50 = vld [vmem:[#allocation7 + $0x28] sm:$0xff] }
 0xbd9   :  { %23223 = vmatpush3.bf16.xpose.msra.mxu1 %v27169_v56  ;;  %21609 = vmatprep.mubr.msk.f32.mxu1 %vm24072_vm0, %v27131_v10  ;;  %v27172_v56 = vld [vmem:[#allocation43_spill] sm:$0xff]  ;;  %27175 = vst [vmem:[#allocation78_spill] sm:$0xff] %v25159_v50 }
 0xbda   :  { %21607 = vmatprep.subr.mxu1 %v27131_v10 }
 0xbdf   :  { %21599 = vmatpush3.xpose.msra.mxu0 %v25139_v48  ;;  %v27173_v48 = vld [vmem:[#allocation49_spill] sm:$0xff] }
 0xbe0   :  { %23224 = vmatprep.subr.bf16.mxu0 %v27130_v18 }
 0xbe1   :  { %21608 = vmatpush3.xpose.msra.mxu1 %v25143_v13 }
 0xbe2   :  { %21601 = vmatmul.mubr.f32.vlgmr.msra.gmra.mrb[76].mxu0 %v6130_v58  ;;  %23227 = vmatprep.subr.bf16.mxu1 %v27130_v18 }
 0xbe3   :  { %23226 = vmatpush3.bf16.msra.mxu0 %v27172_v56  ;;  %21618 = vmatprep.mubr.msk.f32.mxu0 %vm24072_vm0, %v27131_v10 }
 0xbe4   :  { %21610 = vmatmul.mubr.f32.vlgmr.msra.gmra.mrb[76].mxu1 %v6132_v55  ;;  %21616 = vmatprep.subr.mxu0 %v27131_v10 }
 0xbe5   :  { %23229 = vmatpush3.bf16.msra.mxu1 %v27173_v48  ;;  %21627 = vmatprep.mubr.msk.f32.mxu1 %vm24072_vm0, %v27131_v10 }
 0xbe6   :  { %21625 = vmatprep.subr.mxu1 %v27131_v10 }
 0xbe7   :  { %21617 = vmatpush3.msra.mxu0 %v25155_v61 }
 0xbe8   :  { %23230 = vmatprep.subr.bf16.mxu0 %v27130_v18 }
 0xbe9   :  { %21626 = vmatpush3.msra.mxu1 %v25159_v50  ;;  %v27177_v50 = vld [vmem:[#allocation50_spill] sm:$0xff] }
 0xbea   :  { %23233 = vmatprep.subr.bf16.mxu1 %v27130_v18 }
 0xc91   :  { %v6207_v55 = vpop.f32.mrb[70].mxu0 }
 0xc92   :  { %v6701_v58 = vmul.f32 %v6207_v55, %v25039_v60  ;;  %v21548_v48 = vpop.f32.mrb[71].mxu0  ;;  %v25175_v60 = vld [vmem:[#allocation7 + $0x40] sm:$0xff] }
 0xc93   :  { %v6277_v56 = vpop.f32.mrb[70].mxu1  ;;  %27178 = vst [vmem:[#allocation79_spill] sm:$0xff] %v25175_v60 }
 0xc94   :  { %v6702_v13 = vmul.f32 %v6277_v56, %v25052_v9  ;;  %v21557_v26 = vpop.f32.mrb[71].mxu1  ;;  %21619 = vmatmul.mubr.msk.f32.vlgmr.msra.gmra.mrb[78].mxu0 %vm3417_vm9, %v6701_v58  ;;  %v27179_v9 = vld [vmem:[#allocation16_spill] sm:$0xff]  ;;  %v25180_v56 = vld [vmem:[#allocation7 + $0x58] sm:$0xff]  ;;  %v25188_v58 = vld [vmem:[%s26902_s8] sm:$0x3f] }
 0xc95   :  { %23232 = vmatpush3.bf16.msra.mxu0 %v27176_v36  ;;  %21636 = vmatprep.mubr.msk.f32.mxu0 %vm24072_vm0, %v27131_v10  ;;  %v304_v26 = vsub.s32 2, %v27179_v9  ;;  %27180 = vst [vmem:[#allocation80_spill] sm:$0xff] %v25180_v56  ;;  %27181 = vst [vmem:[#allocation81_spill] sm:$0xff] %v25188_v58 }
 0xc96   :  { %21628 = vmatmul.mubr.msk.f32.vlgmr.msra.gmra.mrb[78].mxu1 %vm3417_vm9, %v6702_v13  ;;  %21634 = vmatprep.subr.mxu0 %v27131_v10 }
 0xc97   :  { %23235 = vmatpush3.bf16.msra.mxu1 %v27177_v50  ;;  %21645 = vmatprep.mubr.msk.f32.mxu1 %vm24072_vm0, %v27131_v10 }
 0xc98   :  { %21643 = vmatprep.subr.mxu1 %v27131_v10 }
 0xc99   :  { %21635 = vmatpush3.msra.mxu0 %v25175_v60  ;;  %v305_v60 = vrot.slane %v25188_v58, %v304_v26 }
 0xc9a   :  { %23236 = vmatprep.subr.bf16.mxu0 %v27130_v18 }
 0xc9b   :  { %21644 = vmatpush3.msra.mxu1 %v25180_v56  ;;  %v27182_v56 = vld [vmem:[#allocation51_spill] sm:$0xff] }
 0xc9c   :  { %23239 = vmatprep.subr.bf16.mxu1 %v27130_v18 }
 0xc9d   :  { %v6347_v13 = vpop.f32.mrb[72].mxu0 }
 0xc9e   :  { %v6703_v48 = vmul.f32 %v6347_v13, %v25065_v6  ;;  %v21566_v55 = vpop.f32.mrb[73].mxu0  ;;  %v27183_v6 = vld [vmem:[#allocation18_spill] sm:$0xff] }
 0xc9f   :  { %v6417_v50 = vpop.f32.mrb[72].mxu1  ;;  %v462_v13 = vadd.f32 %v27183_v6, %v305_v60  ;;  %v27184_v55 = vld [vmem:[#allocation52_spill] sm:$0xff] }
 0xca0   :  { %v6704_v9 = vmul.f32 %v6417_v50, %v25087_v44  ;;  %v21575_v36 = vpop.f32.mrb[73].mxu1  ;;  %21637 = vmatmul.mubr.msk.f32.vlgmr.msra.gmra.mrb[80].mxu0 %vm3417_vm9, %v6703_v48  ;;  %v25203_v44 = vld [vmem:[#allocation7 + $0x70] sm:$0xff] }
 0xca1   :  { %23238 = vmatpush3.bf16.msra.mxu0 %v27182_v56  ;;  %21654 = vmatprep.mubr.msk.f32.mxu0 %vm24072_vm0, %v27131_v10  ;;  %27185 = vst [vmem:[#allocation18_spill] sm:$0xff] %v25203_v44  ;;  %23689 = vtanh.f32 %v462_v13  ;;  %v25207_v36 = vld [vmem:[#allocation7 + $0x88] sm:$0xff]  ;;  %v27188_v13 = vld [vmem:[#allocation54_spill] sm:$0xff] }
 0xca2   :  { %21646 = vmatmul.mubr.msk.f32.vlgmr.msra.gmra.mrb[80].mxu1 %vm3417_vm9, %v6704_v9  ;;  %21652 = vmatprep.subr.mxu0 %v27131_v10  ;;  %27186 = vst [vmem:[#allocation82_spill] sm:$0xff] %v25207_v36 }
 0xca3   :  { %23241 = vmatpush3.bf16.msra.mxu1 %v27184_v55  ;;  %21663 = vmatprep.mubr.msk.f32.mxu1 %vm24072_vm0, %v27131_v10  ;;  %v27191_v55 = vld [vmem:[#allocation55_spill] sm:$0xff] }
 0xca4   :  { %21661 = vmatprep.subr.mxu1 %v27131_v10 }
 0xca5   :  { %21653 = vmatpush3.msra.mxu0 %v25203_v44  ;;  %v27187_v44 = vld [vmem:[#allocation53_spill] sm:$0xff] }
 0xca6   :  { %23242 = vmatprep.subr.bf16.mxu0 %v27130_v18 }
 0xca7   :  { %21662 = vmatpush3.msra.mxu1 %v25207_v36 }
 0xca8   :  { %23245 = vmatprep.subr.bf16.mxu1 %v27130_v18 }
 0xca9   :  { %v6487_v50 = vpop.f32.mrb[74].mxu0 }
 0xcaa   :  { %v6705_v60 = vmul.f32 %v6487_v50, %v25077_v14  ;;  %v21584_v9 = vpop.f32.mrb[75].mxu0  ;;  %v25227_v50 = vld [vmem:[#allocation7 + $0xb8] sm:$0xff] }
 0xcab   :  { %v6557_v26 = vpop.f32.mrb[74].mxu1  ;;  %v23690_v14 = vpop.eup %23689  ;;  %27190 = vst [vmem:[#allocation84_spill] sm:$0xff] %v25227_v50 }
 0xcac   :  { %v6706_v48 = vmul.f32 %v6557_v26, %v25089_v5  ;;  %v21593_v6 = vpop.f32.mrb[75].mxu1  ;;  %21655 = vmatmul.mubr.msk.f32.vlgmr.msra.gmra.mrb[82].mxu0 %vm3417_vm9, %v6705_v60  ;;  %v25223_v5 = vld [vmem:[#allocation7 + $0xa0] sm:$0xff]  ;;  %v7343_v60 = vrot.slane %v23690_v14, %v27159_v41  ;;  %v7336_v36 = vcombine.high %v23690_v14, %v23690_v14 }
 0xcad   :  { %23244 = vmatpush3.bf16.msra.mxu0 %v27187_v44  ;;  %21672 = vmatprep.mubr.msk.f32.mxu0 %vm24072_vm0, %v27131_v10  ;;  %27189 = vst [vmem:[#allocation83_spill] sm:$0xff] %v25223_v5 }
 0xcae   :  { %21664 = vmatmul.mubr.msk.f32.vlgmr.msra.gmra.mrb[82].mxu1 %vm3417_vm9, %v6706_v48  ;;  %21670 = vmatprep.subr.mxu0 %v27131_v10 }
 0xcaf   :  { %23247 = vmatpush3.bf16.msra.mxu1 %v27188_v13  ;;  %21681 = vmatprep.mubr.msk.f32.mxu1 %vm24072_vm0, %v27131_v10 }
 0xcb0   :  { %21679 = vmatprep.subr.mxu1 %v27131_v10 }
 0xcb1   :  { %21671 = vmatpush3.msra.mxu0 %v25223_v5  ;;  %v7359_v5 = vrot.slane %v7343_v60, %v27159_v41 }
 0xcb2   :  { %21684 = vmatprep.subr.mxu0 %v27131_v10 }
 0xcb3   :  { %21680 = vmatpush3.msra.mxu1 %v25227_v50 }
 0xcb4   :  { %21694 = vmatprep.subr.mxu1 %v27131_v10 }
 0xcb5   :  { %v6627_v9 = vpop.f32.mrb[76].mxu0 }
 0xcb6   :  { %v6707_v26 = vmul.f32 %v6627_v9, %v25079_v47  ;;  %v21602_v48 = vpop.f32.mrb[77].mxu0  ;;  %v7351_v47 = vcombine.high %v7343_v60, %v7343_v60 }
 0xcb7   :  { %v6697_v6 = vpop.f32.mrb[76].mxu1 }
 0xcb8   :  { %v6708_v13 = vmul.f32 %v6697_v6, %v25098_v52  ;;  %v21611_v44 = vpop.f32.mrb[77].mxu1  ;;  %21673 = vmatmul.mubr.msk.f32.vlgmr.msra.gmra.mrb[84].mxu0 %vm3417_vm9, %v6707_v26  ;;  %v7381_v52 = vcombine.high %v7359_v5, %v7359_v5 }
 0xcb9   :  { %21685 = vmatpush3.xpose.msra.mxu0 %v27191_v55  ;;  %21686 = vmatprep.mubr.msk.f32.mxu0 %vm24072_vm0, %v27131_v10  ;;  %v7350_v44 = vrot.slane %v7336_v36, %v27159_v41  ;;  %v27192_v55 = vld [vmem:[#allocation56_spill] sm:$0xff] }
 0xcba   :  { %21682 = vmatmul.mubr.msk.f32.vlgmr.msra.gmra.mrb[84].mxu1 %vm3417_vm9, %v6708_v13  ;;  %21689 = vmatprep.subr.mxu0 %v27131_v10  ;;  %v7373_v13 = vrot.slane %v7351_v47, %v27159_v41 }
 0xcbb   :  { %21695 = vmatpush3.xpose.msra.mxu1 %v24785_v0  ;;  %21696 = vmatprep.mubr.msk.f32.mxu1 %vm24072_vm0, %v27131_v10  ;;  %v7366_v0 = vrot.slane %v7350_v44, %v27159_v41  ;;  %v7352_v14 = vcombine.high %v7350_v44, %v7350_v44 }
 0xcbc   :  { %21687 = vmatmul.mubr.f32.vlgmr.msra.gmra.mrb[86].mxu0 %v7359_v5  ;;  %21704 = vmatprep.subr.mxu1 %v27131_v10  ;;  %v7383_v36 = vcombine.high %v7373_v13, %v7373_v13  ;;  %v25285_v5 = vld [vmem:[%s26895_s1 + $0x8] sm:$0xff] }
 0xcbd   :  { %21690 = vmatpush3.xpose.msra.mxu0 %v27192_v55  ;;  %21691 = vmatprep.mubr.msk.f32.mxu0 %vm24072_vm0, %v27131_v10  ;;  %27194 = vst [vmem:[#allocation56_spill] sm:$0xff] %v25285_v5 }
 0xcbe   :  { %21697 = vmatmul.mubr.f32.vlgmr.msra.gmra.mrb[86].mxu1 %v7381_v52  ;;  %21699 = vmatprep.subr.mxu0 %v27131_v10 }
 0xcbf   :  { %21705 = vmatpush3.xpose.msra.mxu1 %v24805_v23  ;;  %21706 = vmatprep.mubr.msk.f32.mxu1 %vm24072_vm0, %v27131_v10  ;;  %v7382_v23 = vcombine.high %v7366_v0, %v7366_v0 }
 0xcc0   :  { %21692 = vmatmul.mubr.f32.vlgmr.msra.gmra.mrb[88].mxu0 %v7373_v13  ;;  %21714 = vmatprep.subr.mxu1 %v27131_v10 }
 0xcc1   :  { %21700 = vmatpush3.xpose.msra.mxu0 %v24815_v40  ;;  %21701 = vmatprep.mubr.msk.f32.mxu0 %vm24072_vm0, %v27131_v10  ;;  %v7380_v40 = vrot.slane %v7352_v14, %v27159_v41 }
 0xcc2   :  { %21707 = vmatmul.mubr.f32.vlgmr.msra.gmra.mrb[88].mxu1 %v7366_v0  ;;  %21709 = vmatprep.subr.mxu0 %v27131_v10 }
 0xcc3   :  { %21715 = vmatpush3.xpose.msra.mxu1 %v24824_v19  ;;  %21716 = vmatprep.mubr.msk.f32.mxu1 %vm24072_vm0, %v27131_v10  ;;  %v25272_v19 = vld [vmem:[%s26895_s1] sm:$0xff] }
 0xcc4   :  { %21702 = vmatmul.mubr.f32.vlgmr.msra.gmra.mrb[90].mxu0 %v7383_v36  ;;  %21724 = vmatprep.subr.mxu1 %v27131_v10  ;;  %27193 = vst [vmem:[#allocation55_spill] sm:$0xff] %v25272_v19 }
 0xcc5   :  { %21710 = vmatpush3.xpose.msra.mxu0 %v24833_v28  ;;  %21711 = vmatprep.mubr.msk.f32.mxu0 %vm24072_vm0, %v27131_v10  ;;  %v7384_v28 = vcombine.high %v7380_v40, %v7380_v40 }
 0xcc6   :  { %21717 = vmatmul.mubr.f32.vlgmr.msra.gmra.mrb[90].mxu1 %v7382_v23  ;;  %21719 = vmatprep.subr.mxu0 %v27131_v10 }
 0xcc7   :  { %21725 = vmatpush3.msra.mxu1 %v25272_v19  ;;  %21726 = vmatprep.mubr.msk.f32.mxu1 %vm24072_vm0, %v27131_v10 }
 0xcc8   :  { %21712 = vmatmul.mubr.f32.vlgmr.msra.gmra.mrb[92].mxu0 %v7380_v40  ;;  %21734 = vmatprep.subr.mxu1 %v27131_v10 }
 0xcc9   :  { %21720 = vmatpush3.xpose.msra.mxu0 %v24847_v63  ;;  %21721 = vmatprep.mubr.msk.f32.mxu0 %vm24072_vm0, %v27131_v10 }
 0xcca   :  { %21729 = vmatprep.subr.mxu0 %v27131_v10 }
 0xccc   :  { %21722 = vmatmul.mubr.f32.vlgmr.msra.gmra.mrb[94].mxu0 %v7384_v28 }
 0xccd   :  { %21730 = vmatpush3.msra.mxu0 %v25285_v5  ;;  %21731 = vmatprep.mubr.msk.f32.mxu0 %vm24072_vm0, %v27131_v10 }
 0xcce   :  { %21739 = vmatprep.subr.mxu0 %v27131_v10 }
 0xd67   :  { %v25291_v63 = vpop.f32.mrb[78].mxu0 }
 0xd68   :  { %27195 = vst [vmem:[#allocation85_spill] sm:$0xff] %v25291_v63  ;;  %v21620_v60 = vpop.f32.mrb[79].mxu0 }
 0xd69   :  { %v25293_v9 = vpop.f32.mrb[78].mxu1 }
 0xd6a   :  { %27196 = vst [vmem:[#allocation86_spill] sm:$0xff] %v25293_v9  ;;  %v21629_v26 = vpop.f32.mrb[79].mxu1 }
 0xd73   :  { %v25295_v48 = vpop.f32.mrb[80].mxu0 }
 0xd74   :  { %27197 = vst [vmem:[#allocation87_spill] sm:$0xff] %v25295_v48  ;;  %v21638_v6 = vpop.f32.mrb[81].mxu0 }
 0xd75   :  { %v25297_v47 = vpop.f32.mrb[80].mxu1 }
 0xd76   :  { %27198 = vst [vmem:[#allocation88_spill] sm:$0xff] %v25297_v47  ;;  %v21647_v52 = vpop.f32.mrb[81].mxu1 }
 0xd7f   :  { %v25299_v44 = vpop.f32.mrb[82].mxu0 }
 0xd80   :  { %27199 = vst [vmem:[#allocation89_spill] sm:$0xff] %v25299_v44  ;;  %v21656_v55 = vpop.f32.mrb[83].mxu0 }
 0xd81   :  { %v25301_v13 = vpop.f32.mrb[82].mxu1 }
 0xd82   :  { %27200 = vst [vmem:[#allocation90_spill] sm:$0xff] %v25301_v13  ;;  %v21665_v0 = vpop.f32.mrb[83].mxu1 }
 0xd8b   :  { %v25303_v36 = vpop.f32.mrb[84].mxu0 }
 0xd8c   :  { %27201 = vst [vmem:[#allocation91_spill] sm:$0xff] %v25303_v36  ;;  %v21674_v14 = vpop.f32.mrb[85].mxu0 }
 0xd8d   :  { %v25305_v23 = vpop.f32.mrb[84].mxu1 }
 0xd8e   :  { %27202 = vst [vmem:[#allocation92_spill] sm:$0xff] %v25305_v23  ;;  %v21683_v40 = vpop.f32.mrb[85].mxu1 }
 0xd8f   :  { %v7459_v28 = vpop.f32.mrb[86].mxu0 }
 0xd90   :  { %v21688_v60 = vpop.f32.mrb[87].mxu0 }
 0xd91   :  { %v7599_v26 = vpop.f32.mrb[86].mxu1 }
 0xd92   :  { %v21698_v5 = vpop.f32.mrb[87].mxu1  ;;  %v7963_v52 = vrot.slane %v7599_v26, 6 }
 0xd93   :  { %v7529_v6 = vpop.f32.mrb[88].mxu0 }
 0xd94   :  { %v7961_v19 = vrot.slane %v7529_v6, 7  ;;  %v21693_v50 = vpop.f32.mrb[89].mxu0 }
 0xd95   :  { %v7739_v56 = vpop.f32.mrb[88].mxu1 }
 0xd96   :  { %v7962_v55 = vsel %vm1292_vm1, %v7961_v19, %v7459_v28  ;;  %v21708_v58 = vpop.f32.mrb[89].mxu1  ;;  %v7967_v59 = vrot.slane %v7739_v56, 4 }
 0xd97   :  { %v7669_v61 = vpop.f32.mrb[90].mxu0  ;;  %v7964_v0 = vsel %vm1295_vm2, %v7963_v52, %v7962_v55 }
 0xd98   :  { %v7965_v21 = vrot.slane %v7669_v61, 5  ;;  %v21703_v14 = vpop.f32.mrb[91].mxu0 }
 0xd99   :  { %v7879_v41 = vpop.f32.mrb[90].mxu1 }
 0xd9a   :  { %v7966_v40 = vsel %vm1298_vm3, %v7965_v21, %v7964_v0  ;;  %v21718_v60 = vpop.f32.mrb[91].mxu1  ;;  %v7971_v23 = vrot.slane %v7879_v41, 2 }
 0xd9b   :  { %v7809_v43 = vpop.f32.mrb[92].mxu0  ;;  %v7968_v5 = vsel %vm1301_vm4, %v7967_v59, %v7966_v40 }
 0xd9c   :  { %v7969_v22 = vrot.slane %v7809_v43, 3  ;;  %v21713_v50 = vpop.f32.mrb[93].mxu0 }
 0xd9e   :  { %v7970_v34 = vsel %vm1304_vm5, %v7969_v22, %v7968_v5 }
 0xd9f   :  { %v7949_v19 = vpop.f32.mrb[94].mxu0  ;;  %v7972_v58 = vsel %vm1307_vm6, %v7971_v23, %v7970_v34 }
 0xda0   :  { %v7973_v54 = vrot.slane %v7949_v19, 1  ;;  %v21723_v52 = vpop.f32.mrb[95].mxu0 }
 0xda2   :  { %v7974_v55 = vsel %vm1310_vm7, %v7973_v54, %v7972_v58 }
 0xda3   :  { %v7976_v14 = vsel %vm1313_vm8, %v7974_v55, -inf }
 0xda4   :  { %7977 = vmax.xlane.f32.xlu0 %v7976_v14 }
 0xe31   :  { %v7978_v21 = vpop.xlane.xlu0 %7977 }
 0xe32   :  { %v7980_v0 = vrot.slane %v7978_v21, 1  ;;  %v7981_v60 = vrot.slane %v7978_v21, 2  ;;  %v7982_v13 = vrot.slane %v7978_v21, 3  ;;  %v7983_v59 = vrot.slane %v7978_v21, 4 }
 0xe33   :  { %v7984_v40 = vrot.slane %v7978_v21, 5  ;;  %v7985_v50 = vrot.slane %v7978_v21, 6  ;;  %v7986_v12 = vrot.slane %v7978_v21, 7  ;;  %v7995_v16 = vsub.f32 %v7459_v28, %v7978_v21 }
 0xe34   :  { %v7996_v22 = vsub.f32 %v7529_v6, %v7980_v0  ;;  %v7997_v5 = vsub.f32 %v7599_v26, %v7981_v60  ;;  %v7998_v47 = vsub.f32 %v7669_v61, %v7982_v13  ;;  %v7999_v34 = vsub.f32 %v7739_v56, %v7983_v59 }
 0xe35   :  { %v8000_v23 = vsub.f32 %v7809_v43, %v7984_v40  ;;  %v8003_v52 = vmul.f32 1.442695, %v7995_v16  ;;  %v8001_v20 = vsub.f32 %v7879_v41, %v7985_v50  ;;  %v8002_v14 = vsub.f32 %v7949_v19, %v7986_v12 }
 0xe36   :  { %v8005_v54 = vmul.f32 1.442695, %v7996_v22  ;;  %v8007_v58 = vmul.f32 1.442695, %v7997_v5  ;;  %v8009_v55 = vmul.f32 1.442695, %v7998_v47 }
 0xe37   :  { %23691 = vpow2.f32 %v8003_v52  ;;  %v8011_v11 = vmul.f32 1.442695, %v7999_v34  ;;  %v8013_v3 = vmul.f32 1.442695, %v8000_v23  ;;  %v8015_v15 = vmul.f32 1.442695, %v8001_v20 }
 0xe38   :  { %23693 = vpow2.f32 %v8005_v54  ;;  %v8017_v36 = vmul.f32 1.442695, %v8002_v14 }
 0xe39   :  { %23695 = vpow2.f32 %v8007_v58 }
 0xe3a   :  { %23697 = vpow2.f32 %v8009_v55 }
 0xe3b   :  { %23699 = vpow2.f32 %v8011_v11 }
 0xe3c   :  { %23701 = vpow2.f32 %v8013_v3 }
 0xe3d   :  { %23703 = vpow2.f32 %v8015_v15 }
 0xe3e   :  { %23705 = vpow2.f32 %v8017_v36 }
 0xe41   :  { %v23692_v61 = vpop.eup %23691 }
 0xe42   :  { %v23694_v43 = vpop.eup %23693 }
 0xe43   :  { %v23696_v16 = vpop.eup %23695  ;;  %v8027_v41 = vrot.slane %v23694_v43, 7 }
 0xe44   :  { %v23698_v56 = vpop.eup %23697  ;;  %v8029_v13 = vrot.slane %v23696_v16, 6 }
 0xe45   :  { %v23700_v47 = vpop.eup %23699  ;;  %v8028_v12 = vsel %vm1292_vm1, %v8027_v41, %v23692_v61  ;;  %v8031_v28 = vrot.slane %v23698_v56, 5 }
 0xe46   :  { %v23702_v26 = vpop.eup %23701  ;;  %v8030_v6 = vsel %vm1295_vm2, %v8029_v13, %v8028_v12  ;;  %v8033_v20 = vrot.slane %v23700_v47, 4 }
 0xe47   :  { %v23704_v19 = vpop.eup %23703  ;;  %v8032_v11 = vsel %vm1298_vm3, %v8031_v28, %v8030_v6  ;;  %v8035_v3 = vrot.slane %v23702_v26, 3 }
 0xe48   :  { %v23706_v15 = vpop.eup %23705  ;;  %v8034_v36 = vsel %vm1301_vm4, %v8033_v20, %v8032_v11  ;;  %v8037_v21 = vrot.slane %v23704_v19, 2 }
 0xe49   :  { %v8036_v0 = vsel %vm1304_vm5, %v8035_v3, %v8034_v36  ;;  %v8039_v60 = vrot.slane %v23706_v15, 1 }
 0xe4a   :  { %v8038_v59 = vsel %vm1307_vm6, %v8037_v21, %v8036_v0 }
 0xe4b   :  { %v8040_v40 = vsel %vm1310_vm7, %v8039_v60, %v8038_v59 }
 0xe4c   :  { %v8042_v50 = vsel %vm1313_vm8, %v8040_v40, 0.0 }
 0xe4d   :  { %8043 = vadd.xlane.f32.xlu1 %v8042_v50 }
 0xeda   :  { %v8044_v22 = vpop.xlane.xlu1 %8043 }
 0xedb   :  { %23707 = vrcp.f32 %v8044_v22 }
 0xee5   :  { %v23708_v5 = vpop.eup %23707 }
 0xee6   :  { %v8047_v34 = vrot.slane %v23708_v5, 1  ;;  %v8048_v23 = vrot.slane %v23708_v5, 2  ;;  %v8049_v52 = vrot.slane %v23708_v5, 3  ;;  %v8050_v54 = vrot.slane %v23708_v5, 4 }
 0xee7   :  { %v8051_v58 = vrot.slane %v23708_v5, 5  ;;  %v8052_v55 = vrot.slane %v23708_v5, 6  ;;  %v8053_v14 = vrot.slane %v23708_v5, 7  ;;  %v8062_v41 = vmul.f32 %v23708_v5, %v23692_v61 }
 0xee8   :  { %v8063_v13 = vmul.f32 %v23694_v43, %v8047_v34  ;;  %v8064_v12 = vmul.f32 %v23696_v16, %v8048_v23  ;;  %v8065_v28 = vmul.f32 %v23698_v56, %v8049_v52  ;;  %v8066_v6 = vmul.f32 %v23700_v47, %v8050_v54 }
 0xee9   :  { %v8067_v20 = vmul.f32 %v23702_v26, %v8051_v58  ;;  %v8068_v11 = vmul.f32 %v23704_v19, %v8052_v55  ;;  %v8069_v3 = vmul.f32 %v23706_v15, %v8053_v14  ;;  %v8070_v59 = vmul.f32 %v24896_v53, %v8062_v41 }
 0xeea   :  { %v8071_v36 = vmul.f32 %v8063_v13, %v24436_v57  ;;  %v8072_v21 = vmul.f32 %v8064_v12, %v24438_v62  ;;  %v8073_v0 = vmul.f32 %v8065_v28, %v24440_v1  ;;  %v8074_v60 = vmul.f32 %v8066_v6, %v24442_v2 }
 0xeeb   :  { %v8075_v40 = vmul.f32 %v8067_v20, %v24444_v4  ;;  %v8076_v16 = vmul.f32 %v8068_v11, %v24446_v31  ;;  %v25331_v56 = vmul.f32 %v8069_v3, %v24448_v32  ;;  %v25346_v11 = vld [vmem:[%s26895_s1 + $0x10] sm:$0xff] }
 0xeec   :  { %v8086_v61 = vrot.slane %v8071_v36, 7  ;;  %v8088_v43 = vrot.slane %v8072_v21, 6  ;;  %v8090_v26 = vrot.slane %v8073_v0, 5  ;;  %v8092_v15 = vrot.slane %v8074_v60, 4 }
 0xeed   :  { %v8094_v22 = vrot.slane %v8075_v40, 3  ;;  %v8096_v5 = vrot.slane %v8076_v16, 2  ;;  %v8098_v23 = vrot.slane %v25331_v56, 1 }
 0xeee   :  { %v8087_v47 = vsel %vm1292_vm1, %v8086_v61, %v8070_v59 }
 0xeef   :  { %v8089_v19 = vsel %vm1295_vm2, %v8088_v43, %v8087_v47 }
 0xef0   :  { %v8091_v50 = vsel %vm1298_vm3, %v8090_v26, %v8089_v19 }
 0xef1   :  { %v8093_v53 = vsel %vm1301_vm4, %v8092_v15, %v8091_v50 }
 0xef2   :  { %v8095_v34 = vsel %vm1304_vm5, %v8094_v22, %v8093_v53 }
 0xef3   :  { %v8097_v52 = vsel %vm1307_vm6, %v8096_v5, %v8095_v34 }
 0xef4   :  { %v8099_v54 = vsel %vm1310_vm7, %v8098_v23, %v8097_v52 }
 0xef5   :  { %v8101_v58 = vsel %vm1313_vm8, %v8099_v54, 0.0 }
 0xef6   :  { %8102 = vadd.xlane.f32.xlu0 %v8101_v58 }
 0xf83   :  { %v8103_v55 = vpop.xlane.xlu0 %8102 }
 0xf84   :  { %v8104_v14 = vadd.f32 1e-06, %v8103_v55 }
 0xf86   :  { %23709 = vrcp.f32 %v8104_v14 }
 0xf90   :  { %v23710_v41 = vpop.eup %23709 }
 0xf91   :  { %v8122_v13 = vmul.f32 %v23710_v41, %v8070_v59  ;;  %v8107_v12 = vrot.slane %v23710_v41, 1  ;;  %v8108_v28 = vrot.slane %v23710_v41, 2  ;;  %v8109_v20 = vrot.slane %v23710_v41, 3 }
 0xf92   :  { %v8110_v59 = vrot.slane %v23710_v41, 4  ;;  %v8111_v43 = vrot.slane %v23710_v41, 5  ;;  %v8112_v26 = vrot.slane %v23710_v41, 6  ;;  %v8113_v15 = vrot.slane %v23710_v41, 7 }
 0xf93   :  { %21727 = vmatmul.mubr.msk.f32.vlgmr.msra.gmra.mrb[92].mxu1 %vm1313_vm8, %v8122_v13  ;;  %v8123_v6 = vmul.f32 %v8107_v12, %v8071_v36  ;;  %v8124_v3 = vmul.f32 %v8108_v28, %v8072_v21  ;;  %v25356_v36 = vld [vmem:[%s26895_s1 + $0x18] sm:$0xff]  ;;  %v8125_v61 = vmul.f32 %v8109_v20, %v8073_v0  ;;  %v25366_v21 = vld [vmem:[%s26895_s1 + $0x20] sm:$0xff]  ;;  %v25376_v0 = vld [vmem:[%s26895_s1 + $0x28] sm:$0xff] }
 0xf94   :  { %21735 = vmatpush3.msra.mxu1 %v25346_v11  ;;  %21736 = vmatprep.mubr.msk.f32.mxu1 %vm24072_vm0, %v27131_v10  ;;  %v8126_v47 = vmul.f32 %v8110_v59, %v8074_v60  ;;  %v8127_v19 = vmul.f32 %v8111_v43, %v8075_v40  ;;  %v25386_v60 = vld [vmem:[%s26895_s1 + $0x30] sm:$0xff]  ;;  %v8128_v50 = vmul.f32 %v8112_v26, %v8076_v16  ;;  %v25396_v40 = vld [vmem:[%s26895_s1 + $0x38] sm:$0xff] }
 0xf95   :  { %21732 = vmatmul.mubr.msk.f32.vlgmr.msra.gmra.mrb[96].mxu0 %vm1313_vm8, %v8123_v6  ;;  %21744 = vmatprep.subr.mxu1 %v27131_v10  ;;  %v8129_v22 = vmul.f32 %v8113_v15, %v25331_v56 }
 0xf96   :  { %21740 = vmatpush3.msra.mxu0 %v25356_v36  ;;  %21741 = vmatprep.mubr.msk.f32.mxu0 %vm24072_vm0, %v27131_v10 }
 0xf97   :  { %21737 = vmatmul.mubr.msk.f32.vlgmr.msra.gmra.mrb[94].mxu1 %vm1313_vm8, %v8124_v3  ;;  %21749 = vmatprep.subr.mxu0 %v27131_v10 }
 0xf98   :  { %21745 = vmatpush3.msra.mxu1 %v25366_v21  ;;  %21746 = vmatprep.mubr.msk.f32.mxu1 %vm24072_vm0, %v27131_v10 }
 0xf99   :  { %21742 = vmatmul.mubr.msk.f32.vlgmr.msra.gmra.mrb[98].mxu0 %vm1313_vm8, %v8125_v61  ;;  %21754 = vmatprep.subr.mxu1 %v27131_v10 }
 0xf9a   :  { %21750 = vmatpush3.msra.mxu0 %v25376_v0  ;;  %21751 = vmatprep.mubr.msk.f32.mxu0 %vm24072_vm0, %v27131_v10 }
 0xf9b   :  { %21747 = vmatmul.mubr.msk.f32.vlgmr.msra.gmra.mrb[96].mxu1 %vm1313_vm8, %v8126_v47  ;;  %21759 = vmatprep.subr.mxu0 %v27131_v10 }
 0xf9c   :  { %21755 = vmatpush3.msra.mxu1 %v25386_v60  ;;  %21756 = vmatprep.mubr.msk.f32.mxu1 %vm24072_vm0, %v27131_v10 }
 0xf9d   :  { %21752 = vmatmul.mubr.msk.f32.vlgmr.msra.gmra.mrb[100].mxu0 %vm1313_vm8, %v8127_v19  ;;  %23248 = vmatprep.subr.bf16.mxu1 %v27130_v18 }
 0xf9e   :  { %21760 = vmatpush3.msra.mxu0 %v25396_v40  ;;  %21761 = vmatprep.mubr.msk.f32.mxu0 %vm24072_vm0, %v27131_v10 }
 0xf9f   :  { %21757 = vmatmul.mubr.msk.f32.vlgmr.msra.gmra.mrb[98].mxu1 %vm1313_vm8, %v8128_v50  ;;  %23272 = vmatprep.subr.bf16.mxu0 %v27130_v18  ;;  %v27206_v50 = vld [vmem:[#allocation27_spill] sm:$0xff] }
 0xfa0   :  { %23250 = vmatpush3.bf16.msra.mxu1 %v24489_v27  ;;  %21796 = vmatprep.mubr.msk.f32.mxu1 %vm24072_vm0, %v27131_v10  ;;  %v27021_v27 = vmin.f32 %v25291_v63, 1.0 }
 0xfa1   :  { %21762 = vmatmul.mubr.msk.f32.vlgmr.msra.gmra.mrb[102].mxu0 %vm1313_vm8, %v8129_v22  ;;  %23251 = vmatprep.subr.bf16.mxu1 %v27130_v18  ;;  %v27207_v22 = vld [vmem:[#allocation66_spill] sm:$0xff] }
 0xfa2   :  { %21805 = vmatprep.mubr.msk.f32.mxu0 %vm24072_vm0, %v27131_v10 }
 0xfa4   :  { %23253 = vmatpush3.bf16.msra.mxu1 %v24499_v33  ;;  %v27020_v33 = vmin.f32 %v25293_v9, 1.0 }
 0xfa5   :  { %23274 = vmatpush3.bf16.xpose.msra.mxu0 %v24531_v51  ;;  %23254 = vmatprep.subr.bf16.mxu1 %v27130_v18 }
 0xfa6   :  { %21803 = vmatprep.subr.mxu0 %v27131_v10 }
 0xfa8   :  { %23256 = vmatpush3.bf16.msra.mxu1 %v24508_v38  ;;  %v27019_v38 = vmin.f32 %v25295_v48, 1.0 }
 0xfa9   :  { %23257 = vmatprep.subr.bf16.mxu1 %v27130_v18 }
 0xfac   :  { %23259 = vmatpush3.bf16.msra.mxu1 %v24512_v25  ;;  %v27017_v25 = vmin.f32 %v25299_v44, 1.0 }
 0xfad   :  { %21804 = vmatpush3.xpose.msra.mxu0 %v24955_v8  ;;  %23260 = vmatprep.subr.bf16.mxu1 %v27130_v18 }
 0xfae   :  { %23275 = vmatprep.subr.bf16.mxu0 %v27130_v18 }
 0xfb0   :  { %21806 = vmatmul.mubr.f32.vlgmr.msra.gmra.mrb[104].mxu0 %v27021_v27  ;;  %23262 = vmatpush3.bf16.msra.mxu1 %v24517_v37  ;;  %v27203_v37 = vld [vmem:[#allocation91_spill] sm:$0xff] }
 0xfb1   :  { %23277 = vmatpush3.bf16.xpose.msra.mxu0 %v24545_v7  ;;  %21814 = vmatprep.mubr.msk.f32.mxu0 %vm24072_vm0, %v27131_v10 }
 0xfb2   :  { %21812 = vmatprep.subr.mxu0 %v27131_v10  ;;  %23263 = vmatprep.subr.bf16.mxu1 %v27130_v18 }
 0xfb4   :  { %23265 = vmatpush3.bf16.msra.mxu1 %v24521_v42  ;;  %v27015_v42 = vmin.f32 %v27203_v37, 1.0 }
 0xfb5   :  { %23266 = vmatprep.subr.bf16.mxu1 %v27130_v18 }
 0xfb8   :  { %23268 = vmatpush3.bf16.msra.mxu1 %v24525_v45  ;;  %v27204_v45 = vld [vmem:[#allocation31_spill] sm:$0xff] }
 0xfb9   :  { %21813 = vmatpush3.xpose.msra.mxu0 %v24972_v46  ;;  %23269 = vmatprep.subr.bf16.mxu1 %v27130_v18 }
 0xfba   :  { %23278 = vmatprep.subr.bf16.mxu0 %v27130_v18 }
 0xfbc   :  { %21815 = vmatmul.mubr.f32.vlgmr.msra.gmra.mrb[106].mxu0 %v27020_v33  ;;  %23271 = vmatpush3.bf16.msra.mxu1 %v24528_v30  ;;  %v27205_v30 = vld [vmem:[#allocation65_spill] sm:$0xff]  ;;  %v27250_v33 = vld [vmem:[#allocation55_spill] sm:$0xff] }
 0xfbd   :  { %23280 = vmatpush3.bf16.xpose.msra.mxu0 %v24555_v17  ;;  %21823 = vmatprep.mubr.msk.f32.mxu0 %vm24072_vm0, %v27131_v10 }
 0xfbe   :  { %21821 = vmatprep.subr.mxu0 %v27131_v10  ;;  %23281 = vmatprep.subr.bf16.mxu1 %v27130_v18 }
 0xfc5   :  { %21822 = vmatpush3.xpose.msra.mxu0 %v24986_v29 }
 0xfc6   :  { %23284 = vmatprep.subr.bf16.mxu0 %v27130_v18 }
 0xfc8   :  { %21824 = vmatmul.mubr.f32.vlgmr.msra.gmra.mrb[108].mxu0 %v27019_v38 }
 0xfc9   :  { %23286 = vmatpush3.bf16.xpose.msra.mxu0 %v24563_v24  ;;  %21841 = vmatprep.mubr.msk.f32.mxu0 %vm24072_vm0, %v27131_v10 }
 0xfca   :  { %21839 = vmatprep.subr.mxu0 %v27131_v10 }
 0xfd1   :  { %21840 = vmatpush3.xpose.msra.mxu0 %v24997_v49 }
 0xfd2   :  { %23290 = vmatprep.subr.bf16.mxu0 %v27130_v18 }
 0xfd4   :  { %21842 = vmatmul.mubr.f32.vlgmr.msra.gmra.mrb[110].mxu0 %v27017_v25 }
 0xfd5   :  { %23292 = vmatpush3.bf16.xpose.msra.mxu0 %v24597_v35  ;;  %21859 = vmatprep.mubr.msk.f32.mxu0 %vm24072_vm0, %v27131_v10 }
 0xfd6   :  { %21857 = vmatprep.subr.mxu0 %v27131_v10 }
 0xfdd   :  { %21858 = vmatpush3.xpose.msra.mxu0 %v25008_v39 }
 0xfde   :  { %23296 = vmatprep.subr.bf16.mxu0 %v27130_v18 }
 0xfe0   :  { %21860 = vmatmul.mubr.f32.vlgmr.msra.gmra.mrb[112].mxu0 %v27015_v42 }
 0xfe1   :  { %23298 = vmatpush3.bf16.xpose.msra.mxu0 %v27204_v45  ;;  %21877 = vmatprep.mubr.msk.f32.mxu0 %vm24072_vm0, %v27131_v10 }
 0xfe2   :  { %21875 = vmatprep.subr.mxu0 %v27131_v10 }
 0xfe9   :  { %21876 = vmatpush3.xpose.msra.mxu0 %v27205_v30  ;;  %v27208_v30 = vld [vmem:[#allocation88_spill] sm:$0xff] }
 0xfea   :  { %23302 = vmatprep.subr.bf16.mxu0 %v27130_v18 }
0x1066   :  { %v8199_v8 = vpop.f32.mrb[92].mxu1 }
0x1067   :  { %v21728_v46 = vpop.f32.mrb[93].mxu1 }
0x1068   :  { %v8272_v29 = vpop.f32.mrb[96].mxu0 }
0x1069   :  { %v8722_v49 = vrot.slane %v8272_v29, 7  ;;  %v21733_v39 = vpop.f32.mrb[97].mxu0 }
0x106a   :  { %v8345_v16 = vpop.f32.mrb[94].mxu1  ;;  %v27210_v39 = vld [vmem:[#allocation67_spill] sm:$0xff] }
0x106b   :  { %v8723_v56 = vsel %vm1292_vm1, %v8722_v49, %v8199_v8  ;;  %v8724_v53 = vrot.slane %v8345_v16, 6  ;;  %v21738_v5 = vpop.f32.mrb[95].mxu1  ;;  %v27018_v8 = vmin.f32 %v27208_v30, 1.0  ;;  %v27209_v49 = vld [vmem:[#allocation28_spill] sm:$0xff]  ;;  %v27211_v16 = vld [vmem:[#allocation90_spill] sm:$0xff] }
0x106c   :  { %v8418_v34 = vpop.f32.mrb[98].mxu0 }
0x106d   :  { %v8725_v23 = vsel %vm1295_vm2, %v8724_v53, %v8723_v56  ;;  %v8726_v52 = vrot.slane %v8418_v34, 5  ;;  %v21743_v54 = vpop.f32.mrb[99].mxu0  ;;  %v27016_v56 = vmin.f32 %v27211_v16, 1.0  ;;  %v27212_v34 = vld [vmem:[#allocation30_spill] sm:$0xff] }
0x106e   :  { %v8491_v58 = vpop.f32.mrb[96].mxu1 }
0x106f   :  { %v8727_v55 = vsel %vm1298_vm3, %v8726_v52, %v8725_v23  ;;  %v8728_v14 = vrot.slane %v8491_v58, 4  ;;  %v21748_v41 = vpop.f32.mrb[97].mxu1  ;;  %v27213_v23 = vld [vmem:[#allocation68_spill] sm:$0xff] }
0x1070   :  { %v8564_v13 = vpop.f32.mrb[100].mxu0  ;;  %v27214_v52 = vld [vmem:[#allocation92_spill] sm:$0xff]  ;;  %v27216_v41 = vld [vmem:[#allocation69_spill] sm:$0xff] }
0x1071   :  { %v8729_v12 = vsel %vm1301_vm4, %v8728_v14, %v8727_v55  ;;  %v8730_v28 = vrot.slane %v8564_v13, 3  ;;  %v21753_v6 = vpop.f32.mrb[101].mxu0  ;;  %v27014_v54 = vmin.f32 %v27214_v52, 1.0  ;;  %v27215_v14 = vld [vmem:[#allocation32_spill] sm:$0xff] }
0x1072   :  { %v8637_v20 = vpop.f32.mrb[98].mxu1 }
0x1073   :  { %v8731_v3 = vsel %vm1304_vm5, %v8730_v28, %v8729_v12  ;;  %v8732_v59 = vrot.slane %v8637_v20, 2  ;;  %v21758_v61 = vpop.f32.mrb[99].mxu1 }
0x1074   :  { %v8710_v43 = vpop.f32.mrb[102].mxu0 }
0x1075   :  { %v8733_v47 = vsel %vm1307_vm6, %v8732_v59, %v8731_v3  ;;  %v8734_v26 = vrot.slane %v8710_v43, 1  ;;  %v21763_v19 = vpop.f32.mrb[103].mxu0  ;;  %v27217_v3 = vld [vmem:[#allocation70_spill] sm:$0xff] }
0x1077   :  { %v8735_v15 = vsel %vm1310_vm7, %v8734_v26, %v8733_v47 }
0x1078   :  { %21797 = vmatmul.mubr.f32.vlgmr.msra.gmra.mrb[100].mxu1 %v8735_v15 }
0x1079   :  { %23283 = vmatpush3.bf16.xpose.msra.mxu1 %v27206_v50  ;;  %21832 = vmatprep.mubr.msk.f32.mxu1 %vm24072_vm0, %v27131_v10 }
0x107a   :  { %21830 = vmatprep.subr.mxu1 %v27131_v10 }
0x1081   :  { %21831 = vmatpush3.xpose.msra.mxu1 %v27207_v22 }
0x1082   :  { %23287 = vmatprep.subr.bf16.mxu1 %v27130_v18 }
0x1083   :  { %v25488_v46 = vpop.f32.mrb[104].mxu0 }
0x1084   :  { %v21807_v29 = vpop.f32.mrb[105].mxu0  ;;  %21833 = vmatmul.mubr.f32.vlgmr.msra.gmra.mrb[102].mxu1 %v27018_v8 }
0x1085   :  { %23289 = vmatpush3.bf16.xpose.msra.mxu1 %v27209_v49  ;;  %21850 = vmatprep.mubr.msk.f32.mxu1 %vm24072_vm0, %v27131_v10 }
0x1086   :  { %21848 = vmatprep.subr.mxu1 %v27131_v10 }
0x108d   :  { %21849 = vmatpush3.xpose.msra.mxu1 %v27210_v39 }
0x108e   :  { %23293 = vmatprep.subr.bf16.mxu1 %v27130_v18 }
0x108f   :  { %v25499_v53 = vpop.f32.mrb[106].mxu0 }
0x1090   :  { %v21816_v5 = vpop.f32.mrb[107].mxu0  ;;  %21851 = vmatmul.mubr.f32.vlgmr.msra.gmra.mrb[104].mxu1 %v27016_v56  ;;  %v27235_v56 = vld [vmem:[#allocation48_spill] sm:$0xff] }
0x1091   :  { %23295 = vmatpush3.bf16.xpose.msra.mxu1 %v27212_v34  ;;  %21868 = vmatprep.mubr.msk.f32.mxu1 %vm24072_vm0, %v27131_v10  ;;  %v27218_v5 = vld [vmem:[#allocation17_spill] sm:$0xff] }
0x1092   :  { %21866 = vmatprep.subr.mxu1 %v27131_v10 }
0x1099   :  { %21867 = vmatpush3.xpose.msra.mxu1 %v27213_v23 }
0x109a   :  { %23299 = vmatprep.subr.bf16.mxu1 %v27130_v18 }
0x109b   :  { %v25510_v58 = vpop.f32.mrb[108].mxu0 }
0x109c   :  { %v21825_v55 = vpop.f32.mrb[109].mxu0  ;;  %21869 = vmatmul.mubr.f32.vlgmr.msra.gmra.mrb[106].mxu1 %v27014_v54 }
0x109d   :  { %23301 = vmatpush3.bf16.xpose.msra.mxu1 %v27215_v14  ;;  %21886 = vmatprep.mubr.msk.f32.mxu1 %vm24072_vm0, %v27131_v10 }
0x109e   :  { %21884 = vmatprep.subr.mxu1 %v27131_v10 }
0x10a5   :  { %21885 = vmatpush3.xpose.msra.mxu1 %v27216_v41 }
0x10a6   :  { %23305 = vmatprep.subr.bf16.mxu1 %v27130_v18 }
0x10a7   :  { %v25520_v13 = vpop.f32.mrb[110].mxu0 }
0x10a8   :  { %v21843_v12 = vpop.f32.mrb[111].mxu0 }
0x10b3   :  { %v25522_v28 = vpop.f32.mrb[112].mxu0 }
0x10b4   :  { %v21861_v6 = vpop.f32.mrb[113].mxu0 }
0x10b5   :  { %v27219_v6 = vld [vmem:[#allocation37_spill] sm:$0xff] }
0x114b   :  { %v8803_v20 = vpop.f32.mrb[100].mxu1 }
0x114c   :  { %v8804_v59 = vadd.f32 %v27217_v3, %v8803_v20  ;;  %v21798_v61 = vpop.f32.mrb[101].mxu1  ;;  %v27220_v3 = vld [vmem:[#allocation38_spill] sm:$0xff] }
0x114d   :  { %v27221_v61 = vld [vmem:[#allocation71_spill] sm:$0xff] }
0x114e   :  { %v20070_v43 = vmul.f32 -1.442695, %v8804_v59 }
0x1150   :  { %23711 = vpow2.f32 %v20070_v43 }
0x1157   :  { %v25525_v47 = vpop.f32.mrb[102].mxu1 }
0x1158   :  { %v21834_v26 = vpop.f32.mrb[103].mxu1 }
0x1159   :  { %v27222_v26 = vld [vmem:[#allocation72_spill] sm:$0xff] }
0x115a   :  { %v23712_v19 = vpop.eup %23711 }
0x115b   :  { %v8810_v15 = vadd.f32 1.0, %v23712_v19 }
0x115d   :  { %23713 = vrcp.f32 %v8810_v15 }
0x1163   :  { %v25527_v22 = vpop.f32.mrb[104].mxu1 }
0x1164   :  { %v21852_v29 = vpop.f32.mrb[105].mxu1 }
0x1165   :  { %v27223_v29 = vld [vmem:[#allocation39_spill] sm:$0xff] }
0x1167   :  { %v23714_v39 = vpop.eup %23713 }
0x1168   :  { %v9381_v23 = vrot.slane %v23714_v39, %v27218_v5  ;;  %v9374_v15 = vcombine.high %v23714_v39, %v23714_v39 }
0x116a   :  { %v9397_v55 = vrot.slane %v9381_v23, %v27218_v5  ;;  %v9389_v41 = vcombine.high %v9381_v23, %v9381_v23  ;;  %v27224_v23 = vld [vmem:[#allocation40_spill] sm:$0xff] }
0x116c   :  { %21878 = vmatmul.mubr.f32.vlgmr.msra.gmra.mrb[114].mxu0 %v9397_v55  ;;  %v9411_v12 = vrot.slane %v9389_v41, %v27218_v5  ;;  %v9419_v43 = vcombine.high %v9397_v55, %v9397_v55  ;;  %v9388_v55 = vrot.slane %v9374_v15, %v27218_v5 }
0x116d   :  { %23304 = vmatpush3.bf16.xpose.msra.mxu0 %v27219_v6  ;;  %21895 = vmatprep.mubr.msk.f32.mxu0 %vm24072_vm0, %v27131_v10 }
0x116e   :  { %21887 = vmatmul.mubr.f32.vlgmr.msra.gmra.mrb[108].mxu1 %v9411_v12  ;;  %21893 = vmatprep.subr.mxu0 %v27131_v10  ;;  %v9421_v19 = vcombine.high %v9411_v12, %v9411_v12  ;;  %v9390_v41 = vcombine.high %v9388_v55, %v9388_v55  ;;  %v27225_v12 = vld [vmem:[#allocation73_spill] sm:$0xff]  ;;  %v9404_v39 = vrot.slane %v9388_v55, %v27218_v5  ;;  %v27230_v55 = vld [vmem:[#allocation76_spill] sm:$0xff] }
0x116f   :  { %v25536_v20 = vpop.f32.mrb[106].mxu1  ;;  %23307 = vmatpush3.bf16.xpose.msra.mxu1 %v27220_v3  ;;  %21904 = vmatprep.mubr.msk.f32.mxu1 %vm24072_vm0, %v27131_v10 }
0x1170   :  { %v21870_v59 = vpop.f32.mrb[107].mxu1  ;;  %21902 = vmatprep.subr.mxu1 %v27131_v10  ;;  %v9420_v15 = vcombine.high %v9404_v39, %v9404_v39 }
0x1171   :  { %v27226_v59 = vld [vmem:[#allocation74_spill] sm:$0xff] }
0x1175   :  { %21894 = vmatpush3.xpose.msra.mxu0 %v27221_v61  ;;  %v9418_v61 = vrot.slane %v9390_v41, %v27218_v5 }
0x1176   :  { %23308 = vmatprep.subr.bf16.mxu0 %v27130_v18 }
0x1177   :  { %21903 = vmatpush3.xpose.msra.mxu1 %v27222_v26  ;;  %v27228_v26 = vld [vmem:[#allocation42_spill] sm:$0xff]  ;;  %v9422_v41 = vcombine.high %v9418_v61, %v9418_v61 }
0x1178   :  { %21896 = vmatmul.mubr.f32.vlgmr.msra.gmra.mrb[116].mxu0 %v9419_v43  ;;  %23311 = vmatprep.subr.bf16.mxu1 %v27130_v18  ;;  %v27227_v43 = vld [vmem:[#allocation41_spill] sm:$0xff] }
0x1179   :  { %23310 = vmatpush3.bf16.xpose.msra.mxu0 %v27223_v29  ;;  %21913 = vmatprep.mubr.msk.f32.mxu0 %vm24072_vm0, %v27131_v10 }
0x117a   :  { %21905 = vmatmul.mubr.f32.vlgmr.msra.gmra.mrb[110].mxu1 %v9421_v19  ;;  %21911 = vmatprep.subr.mxu0 %v27131_v10  ;;  %v27229_v19 = vld [vmem:[#allocation75_spill] sm:$0xff] }
0x117b   :  { %23313 = vmatpush3.bf16.xpose.msra.mxu1 %v27224_v23  ;;  %21922 = vmatprep.mubr.msk.f32.mxu1 %vm24072_vm0, %v27131_v10 }
0x117c   :  { %21920 = vmatprep.subr.mxu1 %v27131_v10 }
0x1181   :  { %21912 = vmatpush3.xpose.msra.mxu0 %v27225_v12  ;;  %v27231_v12 = vld [vmem:[#allocation43_spill] sm:$0xff] }
0x1182   :  { %23314 = vmatprep.subr.bf16.mxu0 %v27130_v18 }
0x1183   :  { %21921 = vmatpush3.xpose.msra.mxu1 %v27226_v59  ;;  %v27232_v59 = vld [vmem:[#allocation49_spill] sm:$0xff] }
0x1184   :  { %21914 = vmatmul.mubr.f32.vlgmr.msra.gmra.mrb[118].mxu0 %v9404_v39  ;;  %23317 = vmatprep.subr.bf16.mxu1 %v27130_v18  ;;  %v27233_v39 = vld [vmem:[#allocation77_spill] sm:$0xff] }
0x1185   :  { %23316 = vmatpush3.bf16.xpose.msra.mxu0 %v27227_v43  ;;  %21931 = vmatprep.mubr.msk.f32.mxu0 %vm24072_vm0, %v27131_v10 }
0x1186   :  { %21923 = vmatmul.mubr.f32.vlgmr.msra.gmra.mrb[112].mxu1 %v9418_v61  ;;  %21929 = vmatprep.subr.mxu0 %v27131_v10  ;;  %v27234_v61 = vld [vmem:[#allocation78_spill] sm:$0xff] }
0x1187   :  { %23319 = vmatpush3.bf16.xpose.msra.mxu1 %v27228_v26  ;;  %21940 = vmatprep.mubr.msk.f32.mxu1 %vm24072_vm0, %v27131_v10 }
0x1188   :  { %21938 = vmatprep.subr.mxu1 %v27131_v10 }
0x118d   :  { %21930 = vmatpush3.xpose.msra.mxu0 %v27229_v19 }
0x118e   :  { %23320 = vmatprep.subr.bf16.mxu0 %v27130_v18 }
0x118f   :  { %21939 = vmatpush3.xpose.msra.mxu1 %v27230_v55 }
0x1190   :  { %21932 = vmatmul.mubr.f32.vlgmr.msra.gmra.mrb[120].mxu0 %v9420_v15  ;;  %23323 = vmatprep.subr.bf16.mxu1 %v27130_v18 }
0x1191   :  { %23322 = vmatpush3.bf16.msra.mxu0 %v27231_v12  ;;  %21949 = vmatprep.mubr.msk.f32.mxu0 %vm24072_vm0, %v27131_v10 }
0x1192   :  { %21941 = vmatmul.mubr.f32.vlgmr.msra.gmra.mrb[114].mxu1 %v9422_v41  ;;  %21947 = vmatprep.subr.mxu0 %v27131_v10 }
0x1193   :  { %23325 = vmatpush3.bf16.msra.mxu1 %v27232_v59  ;;  %21958 = vmatprep.mubr.msk.f32.mxu1 %vm24072_vm0, %v27131_v10 }
0x1194   :  { %21956 = vmatprep.subr.mxu1 %v27131_v10 }
0x1195   :  { %21948 = vmatpush3.msra.mxu0 %v27233_v39  ;;  %v27236_v39 = vld [vmem:[#allocation50_spill] sm:$0xff] }
0x1196   :  { %23326 = vmatprep.subr.bf16.mxu0 %v27130_v18 }
0x1197   :  { %21957 = vmatpush3.msra.mxu1 %v27234_v61  ;;  %v27239_v61 = vld [vmem:[#allocation80_spill] sm:$0xff] }
0x1198   :  { %23329 = vmatprep.subr.bf16.mxu1 %v27130_v18 }
0x123f   :  { %v9497_v19 = vpop.f32.mrb[114].mxu0 }
0x1240   :  { %v9991_v15 = vmul.f32 %v9497_v19, %v25488_v46  ;;  %v21879_v55 = vpop.f32.mrb[115].mxu0  ;;  %v27237_v46 = vld [vmem:[#allocation79_spill] sm:$0xff] }
0x1241   :  { %v9567_v41 = vpop.f32.mrb[108].mxu1  ;;  %v27240_v55 = vld [vmem:[#allocation81_spill] sm:$0xff] }
0x1242   :  { %v9992_v54 = vmul.f32 %v9567_v41, %v25499_v53  ;;  %v21888_v42 = vpop.f32.mrb[109].mxu1  ;;  %21950 = vmatmul.mubr.msk.f32.vlgmr.msra.gmra.mrb[122].mxu0 %vm3417_vm9, %v9991_v15 }
0x1243   :  { %23328 = vmatpush3.bf16.msra.mxu0 %v27235_v56  ;;  %21967 = vmatprep.mubr.msk.f32.mxu0 %vm24072_vm0, %v27131_v10  ;;  %v27238_v42 = vld [vmem:[#allocation16_spill] sm:$0xff] }
0x1244   :  { %21959 = vmatmul.mubr.msk.f32.vlgmr.msra.gmra.mrb[116].mxu1 %vm3417_vm9, %v9992_v54  ;;  %21965 = vmatprep.subr.mxu0 %v27131_v10  ;;  %v308_v53 = vsub.s32 3, %v27238_v42 }
0x1245   :  { %23331 = vmatpush3.bf16.msra.mxu1 %v27236_v39  ;;  %21976 = vmatprep.mubr.msk.f32.mxu1 %vm24072_vm0, %v27131_v10 }
0x1246   :  { %21974 = vmatprep.subr.mxu1 %v27131_v10  ;;  %v309_v41 = vrot.slane %v27240_v55, %v308_v53 }
0x1247   :  { %21966 = vmatpush3.msra.mxu0 %v27237_v46  ;;  %v27241_v46 = vld [vmem:[#allocation51_spill] sm:$0xff] }
0x1248   :  { %23332 = vmatprep.subr.bf16.mxu0 %v27130_v18 }
0x1249   :  { %21975 = vmatpush3.msra.mxu1 %v27239_v61  ;;  %v27242_v61 = vld [vmem:[#allocation19_spill] sm:$0xff] }
0x124a   :  { %23335 = vmatprep.subr.bf16.mxu1 %v27130_v18 }
0x124b   :  { %v9637_v54 = vpop.f32.mrb[116].mxu0 }
0x124c   :  { %v9993_v19 = vmul.f32 %v9637_v54, %v25510_v58  ;;  %v21897_v15 = vpop.f32.mrb[117].mxu0  ;;  %v464_v58 = vadd.f32 %v27242_v61, %v309_v41  ;;  %v27243_v54 = vld [vmem:[#allocation52_spill] sm:$0xff]  ;;  %v27246_v41 = vld [vmem:[#allocation53_spill] sm:$0xff]  ;;  %v27247_v61 = vld [vmem:[#allocation54_spill] sm:$0xff] }
0x124d   :  { %v9707_v25 = vpop.f32.mrb[110].mxu1 }
0x124e   :  { %v9994_v8 = vmul.f32 %v9707_v25, %v25525_v47  ;;  %v21906_v38 = vpop.f32.mrb[111].mxu1  ;;  %21968 = vmatmul.mubr.msk.f32.vlgmr.msra.gmra.mrb[124].mxu0 %vm3417_vm9, %v9993_v19  ;;  %23715 = vtanh.f32 %v464_v58  ;;  %v27245_v25 = vld [vmem:[#allocation82_spill] sm:$0xff]  ;;  %v27249_v58 = vld [vmem:[#allocation84_spill] sm:$0xff] }
0x124f   :  { %23334 = vmatpush3.bf16.msra.mxu0 %v27241_v46  ;;  %21985 = vmatprep.mubr.msk.f32.mxu0 %vm24072_vm0, %v27131_v10  ;;  %v27244_v38 = vld [vmem:[#allocation18_spill] sm:$0xff] }
0x1250   :  { %21977 = vmatmul.mubr.msk.f32.vlgmr.msra.gmra.mrb[118].mxu1 %vm3417_vm9, %v9994_v8  ;;  %21983 = vmatprep.subr.mxu0 %v27131_v10 }
0x1251   :  { %23337 = vmatpush3.bf16.msra.mxu1 %v27243_v54  ;;  %21994 = vmatprep.mubr.msk.f32.mxu1 %vm24072_vm0, %v27131_v10 }
0x1252   :  { %21992 = vmatprep.subr.mxu1 %v27131_v10 }
0x1253   :  { %21984 = vmatpush3.msra.mxu0 %v27244_v38 }
0x1254   :  { %23338 = vmatprep.subr.bf16.mxu0 %v27130_v18 }
0x1255   :  { %21993 = vmatpush3.msra.mxu1 %v27245_v25 }
0x1256   :  { %23341 = vmatprep.subr.bf16.mxu1 %v27130_v18 }
0x1257   :  { %v9777_v8 = vpop.f32.mrb[118].mxu0 }
0x1258   :  { %v9995_v47 = vmul.f32 %v9777_v8, %v25520_v13  ;;  %v21915_v53 = vpop.f32.mrb[119].mxu0  ;;  %v23716_v13 = vpop.eup %23715 }
0x1259   :  { %v9847_v19 = vpop.f32.mrb[112].mxu1  ;;  %v10668_v38 = vrot.slane %v23716_v13, %v27218_v5 }
0x125a   :  { %v9996_v15 = vmul.f32 %v9847_v19, %v25527_v22  ;;  %v21924_v55 = vpop.f32.mrb[113].mxu1  ;;  %21986 = vmatmul.mubr.msk.f32.vlgmr.msra.gmra.mrb[126].mxu0 %vm3417_vm9, %v9995_v47  ;;  %v27248_v22 = vld [vmem:[#allocation83_spill] sm:$0xff] }
0x125b   :  { %23340 = vmatpush3.bf16.msra.mxu0 %v27246_v41  ;;  %22003 = vmatprep.mubr.msk.f32.mxu0 %vm24072_vm0, %v27131_v10  ;;  %v10684_v55 = vrot.slane %v10668_v38, %v27218_v5 }
0x125c   :  { %21995 = vmatmul.mubr.msk.f32.vlgmr.msra.gmra.mrb[120].mxu1 %vm3417_vm9, %v9996_v15  ;;  %22001 = vmatprep.subr.mxu0 %v27131_v10 }
0x125d   :  { %23343 = vmatpush3.bf16.msra.mxu1 %v27247_v61  ;;  %22012 = vmatprep.mubr.msk.f32.mxu1 %vm24072_vm0, %v27131_v10 }
0x125e   :  { %22010 = vmatprep.subr.mxu1 %v27131_v10 }
0x125f   :  { %22002 = vmatpush3.msra.mxu0 %v27248_v22  ;;  %v10661_v22 = vcombine.high %v23716_v13, %v23716_v13 }
0x1260   :  { %22015 = vmatprep.subr.mxu0 %v27131_v10 }
0x1261   :  { %22011 = vmatpush3.msra.mxu1 %v27249_v58  ;;  %v10675_v13 = vrot.slane %v10661_v22, %v27218_v5  ;;  %v27251_v58 = vld [vmem:[#allocation56_spill] sm:$0xff] }
0x1262   :  { %22025 = vmatprep.subr.mxu1 %v27131_v10 }
0x1263   :  { %v9917_v25 = vpop.f32.mrb[120].mxu0 }
0x1264   :  { %v9997_v8 = vmul.f32 %v9917_v25, %v25522_v28  ;;  %v21933_v47 = vpop.f32.mrb[121].mxu0  ;;  %v10676_v28 = vcombine.high %v10668_v38, %v10668_v38  ;;  %v10691_v25 = vrot.slane %v10675_v13, %v27218_v5 }
0x1265   :  { %v9987_v53 = vpop.f32.mrb[114].mxu1  ;;  %v10677_v47 = vcombine.high %v10675_v13, %v10675_v13 }
0x1266   :  { %v9998_v19 = vmul.f32 %v9987_v53, %v25536_v20  ;;  %v21942_v15 = vpop.f32.mrb[115].mxu1  ;;  %22004 = vmatmul.mubr.msk.f32.vlgmr.msra.gmra.mrb[128].mxu0 %vm3417_vm9, %v9997_v8  ;;  %v10706_v20 = vcombine.high %v10684_v55, %v10684_v55  ;;  %v10698_v38 = vrot.slane %v10676_v28, %v27218_v5  ;;  %v10707_v53 = vcombine.high %v10691_v25, %v10691_v25 }
0x1267   :  { %22016 = vmatpush3.xpose.msra.mxu0 %v27250_v33  ;;  %22017 = vmatprep.mubr.msk.f32.mxu0 %vm24072_vm0, %v27131_v10 }
0x1268   :  { %22013 = vmatmul.mubr.msk.f32.vlgmr.msra.gmra.mrb[122].mxu1 %vm3417_vm9, %v9998_v19  ;;  %22020 = vmatprep.subr.mxu0 %v27131_v10  ;;  %v10708_v8 = vcombine.high %v10698_v38, %v10698_v38  ;;  %v10705_v19 = vrot.slane %v10677_v47, %v27218_v5 }
0x1269   :  { %22026 = vmatpush3.xpose.msra.mxu1 %v25346_v11  ;;  %22027 = vmatprep.mubr.msk.f32.mxu1 %vm24072_vm0, %v27131_v10 }
0x126a   :  { %22018 = vmatmul.mubr.f32.vlgmr.msra.gmra.mrb[130].mxu0 %v10684_v55  ;;  %22035 = vmatprep.subr.mxu1 %v27131_v10  ;;  %v10709_v15 = vcombine.high %v10705_v19, %v10705_v19 }
0x126b   :  { %22021 = vmatpush3.xpose.msra.mxu0 %v27251_v58  ;;  %22022 = vmatprep.mubr.msk.f32.mxu0 %vm24072_vm0, %v27131_v10 }
0x126c   :  { %22028 = vmatmul.mubr.f32.vlgmr.msra.gmra.mrb[124].mxu1 %v10706_v20  ;;  %22030 = vmatprep.subr.mxu0 %v27131_v10 }
0x126d   :  { %22036 = vmatpush3.xpose.msra.mxu1 %v25366_v21  ;;  %22037 = vmatprep.mubr.msk.f32.mxu1 %vm24072_vm0, %v27131_v10 }
0x126e   :  { %22023 = vmatmul.mubr.f32.vlgmr.msra.gmra.mrb[132].mxu0 %v10698_v38  ;;  %22045 = vmatprep.subr.mxu1 %v27131_v10 }
0x126f   :  { %22031 = vmatpush3.xpose.msra.mxu0 %v25356_v36  ;;  %22032 = vmatprep.mubr.msk.f32.mxu0 %vm24072_vm0, %v27131_v10 }
0x1270   :  { %22038 = vmatmul.mubr.f32.vlgmr.msra.gmra.mrb[126].mxu1 %v10691_v25  ;;  %22040 = vmatprep.subr.mxu0 %v27131_v10 }
0x1271   :  { %22046 = vmatpush3.xpose.msra.mxu1 %v25386_v60  ;;  %22047 = vmatprep.mubr.msk.f32.mxu1 %vm24072_vm0, %v27131_v10 }
0x1272   :  { %22033 = vmatmul.mubr.f32.vlgmr.msra.gmra.mrb[134].mxu0 %v10708_v8  ;;  %22055 = vmatprep.subr.mxu1 %v27131_v10 }
0x1273   :  { %22041 = vmatpush3.xpose.msra.mxu0 %v25376_v0  ;;  %22042 = vmatprep.mubr.msk.f32.mxu0 %vm24072_vm0, %v27131_v10 }
0x1274   :  { %22048 = vmatmul.mubr.f32.vlgmr.msra.gmra.mrb[128].mxu1 %v10707_v53  ;;  %22050 = vmatprep.subr.mxu0 %v27131_v10 }
0x1275   :  { %22056 = vmatpush3.msra.mxu1 %v27250_v33  ;;  %22057 = vmatprep.mubr.msk.f32.mxu1 %vm24072_vm0, %v27131_v10 }
0x1276   :  { %22043 = vmatmul.mubr.f32.vlgmr.msra.gmra.mrb[136].mxu0 %v10705_v19  ;;  %22065 = vmatprep.subr.mxu1 %v27131_v10 }
0x1277   :  { %22051 = vmatpush3.xpose.msra.mxu0 %v25396_v40  ;;  %22052 = vmatprep.mubr.msk.f32.mxu0 %vm24072_vm0, %v27131_v10 }
0x1278   :  { %22060 = vmatprep.subr.mxu0 %v27131_v10 }
0x127a   :  { %22053 = vmatmul.mubr.f32.vlgmr.msra.gmra.mrb[138].mxu0 %v10709_v15 }
0x127b   :  { %22061 = vmatpush3.msra.mxu0 %v27251_v58  ;;  %22062 = vmatprep.mubr.msk.f32.mxu0 %vm24072_vm0, %v27131_v10 }
0x127c   :  { %22070 = vmatprep.subr.mxu0 %v27131_v10 }
0x1315   :  { %v25686_v33 = vpop.f32.mrb[122].mxu0 }
0x1316   :  { %27252 = vst [vmem:[#allocation31_spill] sm:$0xff] %v25686_v33  ;;  %v21951_v55 = vpop.f32.mrb[123].mxu0 }
0x1317   :  { %v25688_v22 = vpop.f32.mrb[116].mxu1 }
0x1318   :  { %27253 = vst [vmem:[#allocation65_spill] sm:$0xff] %v25688_v22  ;;  %v21960_v40 = vpop.f32.mrb[117].mxu1 }
0x1321   :  { %v25690_v28 = vpop.f32.mrb[124].mxu0 }
0x1322   :  { %27254 = vst [vmem:[#allocation66_spill] sm:$0xff] %v25690_v28  ;;  %v21969_v20 = vpop.f32.mrb[125].mxu0 }
0x1323   :  { %v25692_v13 = vpop.f32.mrb[118].mxu1 }
0x1324   :  { %27255 = vst [vmem:[#allocation67_spill] sm:$0xff] %v25692_v13  ;;  %v21978_v38 = vpop.f32.mrb[119].mxu1 }
0x132d   :  { %v25694_v25 = vpop.f32.mrb[126].mxu0 }
0x132e   :  { %27256 = vst [vmem:[#allocation68_spill] sm:$0xff] %v25694_v25  ;;  %v21987_v58 = vpop.f32.mrb[127].mxu0 }
0x132f   :  { %v25696_v8 = vpop.f32.mrb[120].mxu1 }
0x1330   :  { %27257 = vst [vmem:[#allocation69_spill] sm:$0xff] %v25696_v8  ;;  %v21996_v47 = vpop.f32.mrb[121].mxu1 }
0x1339   :  { %v25698_v53 = vpop.f32.mrb[128].mxu0 }
0x133a   :  { %27258 = vst [vmem:[#allocation70_spill] sm:$0xff] %v25698_v53  ;;  %v22005_v19 = vpop.f32.mrb[129].mxu0 }
0x133b   :  { %v25700_v15 = vpop.f32.mrb[122].mxu1 }
0x133c   :  { %27259 = vst [vmem:[#allocation71_spill] sm:$0xff] %v25700_v15  ;;  %v22014_v55 = vpop.f32.mrb[123].mxu1 }
0x133d   :  { %v10784_v27 = vpop.f32.mrb[130].mxu0 }
0x133e   :  { %v22019_v40 = vpop.f32.mrb[131].mxu0 }
0x133f   :  { %v10924_v52 = vpop.f32.mrb[124].mxu1 }
0x1340   :  { %v22029_v37 = vpop.f32.mrb[125].mxu1  ;;  %v11288_v38 = vrot.slane %v10924_v52, 6 }
0x1341   :  { %v10854_v20 = vpop.f32.mrb[132].mxu0 }
0x1342   :  { %v11286_v16 = vrot.slane %v10854_v20, 7  ;;  %v22024_v44 = vpop.f32.mrb[133].mxu0 }
0x1343   :  { %v11064_v30 = vpop.f32.mrb[126].mxu1 }
0x1344   :  { %v11287_v58 = vsel %vm1292_vm1, %v11286_v16, %v10784_v27  ;;  %v22039_v48 = vpop.f32.mrb[127].mxu1  ;;  %v11292_v53 = vrot.slane %v11064_v30, 4 }
0x1345   :  { %v10994_v9 = vpop.f32.mrb[134].mxu0  ;;  %v11289_v47 = vsel %vm1295_vm2, %v11288_v38, %v11287_v58 }
0x1346   :  { %v11290_v63 = vrot.slane %v10994_v9, 5  ;;  %v22034_v19 = vpop.f32.mrb[135].mxu0 }
0x1347   :  { %v11204_v15 = vpop.f32.mrb[128].mxu1 }
0x1348   :  { %v11291_v55 = vsel %vm1298_vm3, %v11290_v63, %v11289_v47  ;;  %v22049_v40 = vpop.f32.mrb[129].mxu1  ;;  %v11296_v13 = vrot.slane %v11204_v15, 2 }
0x1349   :  { %v11134_v8 = vpop.f32.mrb[136].mxu0  ;;  %v11293_v37 = vsel %vm1301_vm4, %v11292_v53, %v11291_v55 }
0x134a   :  { %v11294_v25 = vrot.slane %v11134_v8, 3  ;;  %v22044_v44 = vpop.f32.mrb[137].mxu0 }
0x134c   :  { %v11295_v28 = vsel %vm1304_vm5, %v11294_v25, %v11293_v37 }
0x134d   :  { %v11274_v16 = vpop.f32.mrb[138].mxu0  ;;  %v11297_v48 = vsel %vm1307_vm6, %v11296_v13, %v11295_v28 }
0x134e   :  { %v11298_v22 = vrot.slane %v11274_v16, 1  ;;  %v22054_v38 = vpop.f32.mrb[139].mxu0 }
0x1350   :  { %v11299_v58 = vsel %vm1310_vm7, %v11298_v22, %v11297_v48 }
0x1351   :  { %v11301_v19 = vsel %vm1313_vm8, %v11299_v58, -inf }
0x1352   :  { %11302 = vmax.xlane.f32.xlu1 %v11301_v19 }
0x13df   :  { %v11303_v63 = vpop.xlane.xlu1 %11302 }
0x13e0   :  { %v11305_v47 = vrot.slane %v11303_v63, 1  ;;  %v11306_v40 = vrot.slane %v11303_v63, 2  ;;  %v11307_v33 = vrot.slane %v11303_v63, 3  ;;  %v11308_v53 = vrot.slane %v11303_v63, 4 }
0x13e1   :  { %v11309_v55 = vrot.slane %v11303_v63, 5  ;;  %v11310_v44 = vrot.slane %v11303_v63, 6  ;;  %v11311_v34 = vrot.slane %v11303_v63, 7  ;;  %v11320_v49 = vsub.f32 %v10784_v27, %v11303_v63 }
0x13e2   :  { %v11321_v25 = vsub.f32 %v10854_v20, %v11305_v47  ;;  %v11322_v37 = vsub.f32 %v10924_v52, %v11306_v40  ;;  %v11323_v50 = vsub.f32 %v10994_v9, %v11307_v33  ;;  %v11324_v28 = vsub.f32 %v11064_v30, %v11308_v53 }
0x13e3   :  { %v11325_v13 = vsub.f32 %v11134_v8, %v11309_v55  ;;  %v11328_v38 = vmul.f32 1.442695, %v11320_v49  ;;  %v11326_v35 = vsub.f32 %v11204_v15, %v11310_v44  ;;  %v11327_v19 = vsub.f32 %v11274_v16, %v11311_v34 }
0x13e4   :  { %v11330_v22 = vmul.f32 1.442695, %v11321_v25  ;;  %v11332_v48 = vmul.f32 1.442695, %v11322_v37  ;;  %v11334_v58 = vmul.f32 1.442695, %v11323_v50 }
0x13e5   :  { %23717 = vpow2.f32 %v11328_v38  ;;  %v11336_v24 = vmul.f32 1.442695, %v11324_v28  ;;  %v11338_v17 = vmul.f32 1.442695, %v11325_v13  ;;  %v11340_v7 = vmul.f32 1.442695, %v11326_v35 }
0x13e6   :  { %23719 = vpow2.f32 %v11330_v22  ;;  %v11342_v51 = vmul.f32 1.442695, %v11327_v19 }
0x13e7   :  { %23721 = vpow2.f32 %v11332_v48 }
0x13e8   :  { %23723 = vpow2.f32 %v11334_v58 }
0x13e9   :  { %23725 = vpow2.f32 %v11336_v24 }
0x13ea   :  { %23727 = vpow2.f32 %v11338_v17 }
0x13eb   :  { %23729 = vpow2.f32 %v11340_v7 }
0x13ec   :  { %23731 = vpow2.f32 %v11342_v51 }
0x13ef   :  { %v23718_v9 = vpop.eup %23717 }
0x13f0   :  { %v23720_v27 = vpop.eup %23719 }
0x13f1   :  { %v23722_v30 = vpop.eup %23721  ;;  %v11352_v49 = vrot.slane %v23720_v27, 7 }
0x13f2   :  { %v23724_v52 = vpop.eup %23723  ;;  %v11354_v33 = vrot.slane %v23722_v30, 6 }
0x13f3   :  { %v23726_v50 = vpop.eup %23725  ;;  %v11353_v34 = vsel %vm1292_vm1, %v11352_v49, %v23718_v9  ;;  %v11356_v8 = vrot.slane %v23724_v52, 5 }
0x13f4   :  { %v23728_v15 = vpop.eup %23727  ;;  %v11355_v20 = vsel %vm1295_vm2, %v11354_v33, %v11353_v34  ;;  %v11358_v35 = vrot.slane %v23726_v50, 4 }
0x13f5   :  { %v23730_v16 = vpop.eup %23729  ;;  %v11357_v24 = vsel %vm1298_vm3, %v11356_v8, %v11355_v20  ;;  %v11360_v17 = vrot.slane %v23728_v15, 3 }
0x13f6   :  { %v23732_v7 = vpop.eup %23731  ;;  %v11359_v51 = vsel %vm1301_vm4, %v11358_v35, %v11357_v24  ;;  %v11362_v63 = vrot.slane %v23730_v16, 2 }
0x13f7   :  { %v11361_v47 = vsel %vm1304_vm5, %v11360_v17, %v11359_v51  ;;  %v11364_v40 = vrot.slane %v23732_v7, 1 }
0x13f8   :  { %v11363_v53 = vsel %vm1307_vm6, %v11362_v63, %v11361_v47 }
0x13f9   :  { %v11365_v55 = vsel %vm1310_vm7, %v11364_v40, %v11363_v53  ;;  %v25725_v53 = vld [vmem:[%s26896_s2] sm:$0xff] }
0x13fa   :  { %v11367_v44 = vsel %vm1313_vm8, %v11365_v55, 0.0 }
0x13fb   :  { %11368 = vadd.xlane.f32.xlu0 %v11367_v44 }
0x1488   :  { %v11369_v25 = vpop.xlane.xlu0 %11368 }
0x1489   :  { %23733 = vrcp.f32 %v11369_v25 }
0x1493   :  { %v23734_v37 = vpop.eup %23733 }
0x1494   :  { %v11372_v28 = vrot.slane %v23734_v37, 1  ;;  %v11373_v13 = vrot.slane %v23734_v37, 2  ;;  %v11374_v38 = vrot.slane %v23734_v37, 3  ;;  %v11375_v22 = vrot.slane %v23734_v37, 4 }
0x1495   :  { %v11376_v48 = vrot.slane %v23734_v37, 5  ;;  %v11377_v58 = vrot.slane %v23734_v37, 6  ;;  %v11378_v19 = vrot.slane %v23734_v37, 7  ;;  %v11387_v49 = vmul.f32 %v23734_v37, %v23718_v9 }
0x1496   :  { %v11388_v33 = vmul.f32 %v23720_v27, %v11372_v28  ;;  %v11389_v34 = vmul.f32 %v23722_v30, %v11373_v13  ;;  %v11390_v8 = vmul.f32 %v23724_v52, %v11374_v38  ;;  %v11391_v20 = vmul.f32 %v23726_v50, %v11375_v22 }
0x1497   :  { %v11392_v35 = vmul.f32 %v23728_v15, %v11376_v48  ;;  %v11393_v24 = vmul.f32 %v23730_v16, %v11377_v58  ;;  %v11394_v17 = vmul.f32 %v23732_v7, %v11378_v19  ;;  %v11395_v9 = vmul.f32 %v25725_v53, %v11387_v49 }
0x1498   :  { %v11396_v51 = vmul.f32 %v11388_v33, %v24436_v57  ;;  %v11397_v63 = vmul.f32 %v11389_v34, %v24438_v62  ;;  %v11398_v47 = vmul.f32 %v11390_v8, %v24440_v1  ;;  %v11399_v40 = vmul.f32 %v11391_v20, %v24442_v2 }
0x1499   :  { %v11400_v27 = vmul.f32 %v11392_v35, %v24444_v4  ;;  %v11401_v50 = vmul.f32 %v11393_v24, %v24446_v31  ;;  %v25731_v15 = vmul.f32 %v11394_v17, %v24448_v32 }
0x149a   :  { %v11411_v30 = vrot.slane %v11396_v51, 7  ;;  %v11413_v52 = vrot.slane %v11397_v63, 6  ;;  %v11415_v7 = vrot.slane %v11398_v47, 5  ;;  %v11417_v44 = vrot.slane %v11399_v40, 4 }
0x149b   :  { %v11419_v37 = vrot.slane %v11400_v27, 3  ;;  %v11421_v13 = vrot.slane %v11401_v50, 2  ;;  %v11423_v22 = vrot.slane %v25731_v15, 1 }
0x149c   :  { %v11412_v16 = vsel %vm1292_vm1, %v11411_v30, %v11395_v9 }
0x149d   :  { %v11414_v55 = vsel %vm1295_vm2, %v11413_v52, %v11412_v16  ;;  %v10643_v16 = vld [vmem:[#allocation10 + $0x88] sm:$0xff] }
0x149e   :  { %v11416_v25 = vsel %vm1298_vm3, %v11415_v7, %v11414_v55  ;;  %v10645_v55 = vld [vmem:[#allocation10 + $0x98] sm:$0xff] }
0x149f   :  { %v11418_v28 = vsel %vm1301_vm4, %v11417_v44, %v11416_v25  ;;  %v25773_v44 = vld [vmem:[%s26895_s1 + $0x38] sm:$0xff]  ;;  %v10647_v25 = vld [vmem:[#allocation10 + $0xa8] sm:$0xff] }
0x14a0   :  { %v11420_v38 = vsel %vm1304_vm5, %v11419_v37, %v11418_v28  ;;  %v10648_v37 = vld [vmem:[#allocation10 + $0xb0] sm:$0xff]  ;;  %v10649_v28 = vld [vmem:[#allocation10 + $0xb8] sm:$0xff] }
0x14a1   :  { %v11422_v48 = vsel %vm1307_vm6, %v11421_v13, %v11420_v38  ;;  %v25797_v13 = vpack.c.bf16 %v10649_v28, %v10648_v37  ;;  %v25802_v38 = vld [vmem:[#allocation5 + $0x10] sm:$0xff] }
0x14a2   :  { %v11424_v58 = vsel %vm1310_vm7, %v11423_v22, %v11422_v48  ;;  %v10650_v22 = vld [vmem:[#allocation10 + $0xc0] sm:$0xff]  ;;  %v10651_v48 = vld [vmem:[#allocation10 + $0xc8] sm:$0xff] }
0x14a3   :  { %v11426_v19 = vsel %vm1313_vm8, %v11424_v58, 0.0  ;;  %v25806_v58 = vpack.c.bf16 %v10651_v48, %v10650_v22 }
0x14a4   :  { %11427 = vadd.xlane.f32.xlu1 %v11426_v19  ;;  %v10652_v19 = vld [vmem:[#allocation10 + $0xd0] sm:$0xff] }
0x1531   :  { %v11428_v49 = vpop.xlane.xlu1 %11427 }
0x1532   :  { %v11429_v33 = vadd.f32 1e-06, %v11428_v49  ;;  %v10653_v49 = vld [vmem:[#allocation10 + $0xd8] sm:$0xff] }
0x1534   :  { %23735 = vrcp.f32 %v11429_v33  ;;  %v25810_v33 = vpack.c.bf16 %v10653_v49, %v10652_v19 }
0x153e   :  { %v23736_v34 = vpop.eup %23735 }
0x153f   :  { %v11447_v8 = vmul.f32 %v23736_v34, %v11395_v9  ;;  %v11432_v20 = vrot.slane %v23736_v34, 1  ;;  %v11433_v35 = vrot.slane %v23736_v34, 2  ;;  %v11434_v17 = vrot.slane %v23736_v34, 3  ;;  %v10642_v9 = vld [vmem:[#allocation10 + $0x80] sm:$0xff] }
0x1540   :  { %v11435_v52 = vrot.slane %v23736_v34, 4 }
0x1541   :  { %22058 = vmatmul.mubr.msk.f32.vlgmr.msra.gmra.mrb[130].mxu1 %vm1313_vm8, %v11447_v8  ;;  %v11448_v24 = vmul.f32 %v11432_v20, %v11396_v51  ;;  %v11449_v30 = vmul.f32 %v11433_v35, %v11397_v63  ;;  %v11450_v51 = vmul.f32 %v11434_v17, %v11398_v47  ;;  %v11438_v47 = vrot.slane %v23736_v34, 7  ;;  %v10655_v8 = vld [vmem:[#allocation10 + $0xe8] sm:$0xff]  ;;  %v10656_v35 = vld [vmem:[#allocation10 + $0xf0] sm:$0xff] }
0x1542   :  { %22066 = vmatpush3.msra.mxu1 %v25346_v11  ;;  %22067 = vmatprep.mubr.msk.f32.mxu1 %vm24072_vm0, %v27131_v10  ;;  %v11436_v11 = vrot.slane %v23736_v34, 5  ;;  %v11451_v63 = vmul.f32 %v11435_v52, %v11399_v40  ;;  %v25766_v40 = vpack.c.bf16 %v10643_v16, %v10642_v9 }
0x1543   :  { %22063 = vmatmul.mubr.msk.f32.vlgmr.msra.gmra.mrb[140].mxu0 %vm1313_vm8, %v11448_v24  ;;  %22075 = vmatprep.subr.mxu1 %v27131_v10  ;;  %v10657_v24 = vld [vmem:[#allocation10 + $0xf8] sm:$0xff] }
0x1544   :  { %22071 = vmatpush3.msra.mxu0 %v25356_v36  ;;  %22072 = vmatprep.mubr.msk.f32.mxu0 %vm24072_vm0, %v27131_v10  ;;  %v11437_v36 = vrot.slane %v23736_v34, 6  ;;  %v10654_v34 = vld [vmem:[#allocation10 + $0xe0] sm:$0xff]  ;;  %v25817_v17 = vpack.c.bf16 %v10657_v24, %v10656_v35 }
0x1545   :  { %22068 = vmatmul.mubr.msk.f32.vlgmr.msra.gmra.mrb[132].mxu1 %vm1313_vm8, %v11449_v30  ;;  %22080 = vmatprep.subr.mxu0 %v27131_v10  ;;  %v25814_v20 = vpack.c.bf16 %v10655_v8, %v10654_v34 }
0x1546   :  { %22076 = vmatpush3.msra.mxu1 %v25366_v21  ;;  %22077 = vmatprep.mubr.msk.f32.mxu1 %vm24072_vm0, %v27131_v10  ;;  %v11452_v21 = vmul.f32 %v11436_v11, %v11400_v27  ;;  %v11453_v7 = vmul.f32 %v11437_v36, %v11401_v50  ;;  %v10646_v50 = vld [vmem:[#allocation10 + $0xa0] sm:$0xff] }
0x1547   :  { %22073 = vmatmul.mubr.msk.f32.vlgmr.msra.gmra.mrb[142].mxu0 %vm1313_vm8, %v11450_v51  ;;  %22085 = vmatprep.subr.mxu1 %v27131_v10 }
0x1548   :  { %22081 = vmatpush3.msra.mxu0 %v25376_v0  ;;  %22082 = vmatprep.mubr.msk.f32.mxu0 %vm24072_vm0, %v27131_v10  ;;  %v10644_v0 = vld [vmem:[#allocation10 + $0x90] sm:$0xff] }
0x1549   :  { %22078 = vmatmul.mubr.msk.f32.vlgmr.msra.gmra.mrb[134].mxu1 %vm1313_vm8, %v11451_v63  ;;  %22090 = vmatprep.subr.mxu0 %v27131_v10  ;;  %v25782_v27 = vpack.c.bf16 %v10645_v55, %v10644_v0 }
0x154a   :  { %22086 = vmatpush3.msra.mxu1 %v25386_v60  ;;  %22087 = vmatprep.mubr.msk.f32.mxu1 %vm24072_vm0, %v27131_v10  ;;  %v11454_v60 = vmul.f32 %v11438_v47, %v25731_v15  ;;  %v25791_v15 = vpack.c.bf16 %v10647_v25, %v10646_v50 }
0x154b   :  { %22083 = vmatmul.mubr.msk.f32.vlgmr.msra.gmra.mrb[144].mxu0 %vm1313_vm8, %v11452_v21  ;;  %23344 = vmatprep.subr.bf16.mxu1 %v27130_v18 }
0x154c   :  { %22091 = vmatpush3.msra.mxu0 %v25773_v44  ;;  %22092 = vmatprep.mubr.msk.f32.mxu0 %vm24072_vm0, %v27131_v10 }
0x154d   :  { %22088 = vmatmul.mubr.msk.f32.vlgmr.msra.gmra.mrb[136].mxu1 %vm1313_vm8, %v11453_v7  ;;  %23368 = vmatprep.subr.bf16.mxu0 %v27130_v18 }
0x154e   :  { %23346 = vmatpush3.bf16.msra.mxu1 %v25766_v40  ;;  %22127 = vmatprep.mubr.msk.f32.mxu1 %vm24072_vm0, %v27131_v10 }
0x154f   :  { %22093 = vmatmul.mubr.msk.f32.vlgmr.msra.gmra.mrb[146].mxu0 %vm1313_vm8, %v11454_v60  ;;  %23347 = vmatprep.subr.bf16.mxu1 %v27130_v18 }
0x1550   :  { %22136 = vmatprep.mubr.msk.f32.mxu0 %vm24072_vm0, %v27131_v10 }
0x1552   :  { %23349 = vmatpush3.bf16.msra.mxu1 %v25782_v27 }
0x1553   :  { %23350 = vmatprep.subr.bf16.mxu1 %v27130_v18  ;;  %23370 = vmatpush3.bf16.xpose.msra.mxu0 %v27204_v45 }
0x1554   :  { %22134 = vmatprep.subr.mxu0 %v27131_v10 }
0x1556   :  { %23352 = vmatpush3.bf16.msra.mxu1 %v25791_v15 }
0x1557   :  { %23353 = vmatprep.subr.bf16.mxu1 %v27130_v18 }
0x155a   :  { %23355 = vmatpush3.bf16.msra.mxu1 %v25797_v13 }
0x155b   :  { %23356 = vmatprep.subr.bf16.mxu1 %v27130_v18  ;;  %22135 = vmatpush3.xpose.msra.mxu0 %v25802_v38 }
0x155c   :  { %23371 = vmatprep.subr.bf16.mxu0 %v27130_v18 }
0x155e   :  { %23358 = vmatpush3.bf16.msra.mxu1 %v25806_v58 }
0x155f   :  { %23359 = vmatprep.subr.bf16.mxu1 %v27130_v18 }
0x1562   :  { %23361 = vmatpush3.bf16.msra.mxu1 %v25810_v33 }
0x1563   :  { %23362 = vmatprep.subr.bf16.mxu1 %v27130_v18 }
0x1566   :  { %23364 = vmatpush3.bf16.msra.mxu1 %v25814_v20 }
0x1567   :  { %23365 = vmatprep.subr.bf16.mxu1 %v27130_v18 }
0x156a   :  { %23367 = vmatpush3.bf16.msra.mxu1 %v25817_v17 }
0x156b   :  { %23377 = vmatprep.subr.bf16.mxu1 %v27130_v18 }
0x1614   :  { %v11524_v30 = vpop.f32.mrb[130].mxu1 }
0x1615   :  { %v22059_v52 = vpop.f32.mrb[131].mxu1 }
0x1616   :  { %v11597_v51 = vpop.f32.mrb[140].mxu0 }
0x1617   :  { %v12053_v11 = vrot.slane %v11597_v51, 7  ;;  %v22064_v63 = vpop.f32.mrb[141].mxu0 }
0x1618   :  { %v11670_v36 = vpop.f32.mrb[132].mxu1  ;;  %v23848_v63 = vld [vmem:[#allocation5 + $0x58] sm:$0xff] }
0x1619   :  { %v12054_v9 = vsel %vm1292_vm1, %v12053_v11, %v11524_v30  ;;  %v12055_v16 = vrot.slane %v11670_v36, 6  ;;  %v22069_v21 = vpop.f32.mrb[133].mxu1  ;;  %v25837_v36 = vld [vmem:[%s26904_s10 + $0x1] ss:$0 sm:$0xff] }
0x161a   :  { %v11743_v47 = vpop.f32.mrb[142].mxu0  ;;  %27260 = vst [vmem:[#allocation72_spill] sm:$0xff] %v25837_v36 }
0x161b   :  { %v12056_v7 = vsel %vm1295_vm2, %v12055_v16, %v12054_v9  ;;  %v12057_v0 = vrot.slane %v11743_v47, 5  ;;  %v22074_v55 = vpop.f32.mrb[143].mxu0 }
0x161c   :  { %v11816_v60 = vpop.f32.mrb[134].mxu1 }
0x161d   :  { %v12058_v50 = vsel %vm1298_vm3, %v12057_v0, %v12056_v7  ;;  %v12059_v25 = vrot.slane %v11816_v60, 4  ;;  %v22079_v37 = vpop.f32.mrb[135].mxu1 }
0x161e   :  { %v11889_v28 = vpop.f32.mrb[144].mxu0 }
0x161f   :  { %v12060_v22 = vsel %vm1301_vm4, %v12059_v25, %v12058_v50  ;;  %v12061_v48 = vrot.slane %v11889_v28, 3  ;;  %v22084_v19 = vpop.f32.mrb[145].mxu0 }
0x1620   :  { %v11962_v49 = vpop.f32.mrb[136].mxu1  ;;  %v25852_v19 = vld [vmem:[#allocation5 + $0x28] sm:$0xff] }
0x1621   :  { %v12062_v34 = vsel %vm1304_vm5, %v12061_v48, %v12060_v22  ;;  %v12063_v8 = vrot.slane %v11962_v49, 2  ;;  %v22089_v35 = vpop.f32.mrb[137].mxu1  ;;  %27261 = vst [vmem:[#allocation73_spill] sm:$0xff] %v25852_v19 }
0x1622   :  { %v12035_v24 = vpop.f32.mrb[146].mxu0  ;;  %v25866_v35 = vld [vmem:[#allocation5 + $0x40] sm:$0xff] }
0x1623   :  { %v12064_v30 = vsel %vm1307_vm6, %v12063_v8, %v12062_v34  ;;  %v12065_v52 = vrot.slane %v12035_v24, 1  ;;  %v22094_v51 = vpop.f32.mrb[147].mxu0  ;;  %v23850_v34 = vld [vmem:[#allocation5 + $0x88] sm:$0xff]  ;;  %27262 = vst [vmem:[#allocation74_spill] sm:$0xff] %v25866_v35 }
0x1624   :  { %v25879_v51 = vld [vmem:[#allocation5 + $0x70] sm:$0xff] }
0x1625   :  { %v12066_v11 = vsel %vm1310_vm7, %v12065_v52, %v12064_v30  ;;  %v23852_v30 = vld [vmem:[#allocation5 + $0xb8] sm:$0xff]  ;;  %27263 = vst [vmem:[#allocation75_spill] sm:$0xff] %v25879_v51 }
0x1626   :  { %22128 = vmatmul.mubr.f32.vlgmr.msra.gmra.mrb[138].mxu1 %v12066_v11  ;;  %v23854_v11 = vld [vmem:[#allocation7 + $0x28] sm:$0xff] }
0x1627   :  { %23379 = vmatpush3.bf16.xpose.msra.mxu1 %v27220_v3  ;;  %22163 = vmatprep.mubr.msk.f32.mxu1 %vm24072_vm0, %v27131_v10 }
0x1628   :  { %22161 = vmatprep.subr.mxu1 %v27131_v10 }
0x162f   :  { %22162 = vmatpush3.xpose.msra.mxu1 %v23848_v63 }
0x1630   :  { %23383 = vmatprep.subr.bf16.mxu1 %v27130_v18 }
0x16f9   :  { %v12134_v9 = vpop.f32.mrb[138].mxu1 }
0x16fa   :  { %v12135_v16 = vadd.f32 %v25837_v36, %v12134_v9  ;;  %v22129_v21 = vpop.f32.mrb[139].mxu1  ;;  %v25889_v9 = vld [vmem:[#allocation5 + $0xa0] sm:$0xff] }
0x16fb   :  { %27264 = vst [vmem:[#allocation76_spill] sm:$0xff] %v25889_v9  ;;  %v25897_v21 = vld [vmem:[#allocation7 + $0x10] sm:$0xff] }
0x16fc   :  { %v20089_v47 = vmul.f32 -1.442695, %v12135_v16  ;;  %27265 = vst [vmem:[#allocation77_spill] sm:$0xff] %v25897_v21 }
0x16fe   :  { %23737 = vpow2.f32 %v20089_v47 }
0x1708   :  { %v23738_v7 = vpop.eup %23737 }
0x1709   :  { %v12141_v0 = vadd.f32 1.0, %v23738_v7  ;;  %v27266_v7 = vld [vmem:[#allocation33_spill] sm:$0xff] }
0x170b   :  { %23739 = vrcp.f32 %v12141_v0 }
0x1715   :  { %v23740_v55 = vpop.eup %23739 }
0x1716   :  { %v12152_v60 = vrot.slane %v23740_v55, %v27218_v5  ;;  %v12145_v22 = vcombine.high %v23740_v55, %v23740_v55 }
0x1718   :  { %v12168_v50 = vrot.slane %v12152_v60, %v27218_v5  ;;  %v12160_v25 = vcombine.high %v12152_v60, %v12152_v60  ;;  %v12159_v48 = vrot.slane %v12145_v22, %v27218_v5  ;;  %v23857_v22 = vld [vmem:[#allocation7 + $0x40] sm:$0xff] }
0x171a   :  { %22137 = vmatmul.mubr.f32.vlgmr.msra.gmra.mrb[148].mxu0 %v12168_v50  ;;  %v12182_v37 = vrot.slane %v12160_v25, %v27218_v5  ;;  %v12161_v49 = vcombine.high %v12159_v48, %v12159_v48  ;;  %v12190_v24 = vcombine.high %v12168_v50, %v12168_v50  ;;  %v12175_v63 = vrot.slane %v12159_v48, %v27218_v5  ;;  %v27267_v50 = vld [vmem:[#allocation36_spill] sm:$0xff]  ;;  %v23858_v48 = vld [vmem:[%s26902_s8] sm:$0x3f] }
0x171b   :  { %23373 = vmatpush3.bf16.xpose.msra.mxu0 %v27215_v14  ;;  %22145 = vmatprep.mubr.msk.f32.mxu0 %vm24072_vm0, %v27131_v10 }
0x171c   :  { %v12192_v28 = vcombine.high %v12182_v37, %v12182_v37  ;;  %22143 = vmatprep.subr.mxu0 %v27131_v10  ;;  %v12189_v8 = vrot.slane %v12161_v49, %v27218_v5  ;;  %v12191_v16 = vcombine.high %v12175_v63, %v12175_v63 }
0x171e   :  { %22164 = vmatmul.mubr.f32.vlgmr.msra.gmra.mrb[140].mxu1 %v12192_v28  ;;  %v12193_v52 = vcombine.high %v12189_v8, %v12189_v8  ;;  %v312_v28 = vsub.s32 4, %v27238_v42 }
0x171f   :  { %23385 = vmatpush3.bf16.xpose.msra.mxu1 %v27224_v23  ;;  %22181 = vmatprep.mubr.msk.f32.mxu1 %vm24072_vm0, %v27131_v10 }
0x1720   :  { %22179 = vmatprep.subr.mxu1 %v27131_v10  ;;  %v313_v49 = vrot.slane %v23858_v48, %v312_v28  ;;  %v23860_v28 = vld [vmem:[#allocation7 + $0x88] sm:$0xff]  ;;  %v27273_v48 = vld [vmem:[#allocation47_spill] sm:$0xff] }
0x1723   :  { %22144 = vmatpush3.xpose.msra.mxu0 %v25852_v19 }
0x1724   :  { %23374 = vmatprep.subr.bf16.mxu0 %v27130_v18 }
0x1726   :  { %22146 = vmatmul.mubr.f32.vlgmr.msra.gmra.mrb[150].mxu0 %v12182_v37 }
0x1727   :  { %23376 = vmatpush3.bf16.xpose.msra.mxu0 %v27219_v6  ;;  %22180 = vmatpush3.xpose.msra.mxu1 %v23850_v34 }
0x1728   :  { %23389 = vmatprep.subr.bf16.mxu1 %v27130_v18  ;;  %22152 = vmatprep.subr.mxu0 %v27131_v10 }
0x1729   :  { %22154 = vmatprep.mubr.msk.f32.mxu0 %vm24072_vm0, %v27131_v10 }
0x172a   :  { %22182 = vmatmul.mubr.f32.vlgmr.msra.gmra.mrb[142].mxu1 %v12189_v8  ;;  %v27268_v8 = vld [vmem:[#allocation34_spill] sm:$0xff] }
0x172b   :  { %23391 = vmatpush3.bf16.xpose.msra.mxu1 %v27228_v26  ;;  %22199 = vmatprep.mubr.msk.f32.mxu1 %vm24072_vm0, %v27131_v10 }
0x172c   :  { %22197 = vmatprep.subr.mxu1 %v27131_v10 }
0x172f   :  { %22153 = vmatpush3.xpose.msra.mxu0 %v25866_v35 }
0x1730   :  { %23380 = vmatprep.subr.bf16.mxu0 %v27130_v18 }
0x1732   :  { %22155 = vmatmul.mubr.f32.vlgmr.msra.gmra.mrb[152].mxu0 %v12190_v24 }
0x1733   :  { %23382 = vmatpush3.bf16.xpose.msra.mxu0 %v27223_v29  ;;  %22198 = vmatpush3.xpose.msra.mxu1 %v23852_v30 }
0x1734   :  { %22170 = vmatprep.subr.mxu0 %v27131_v10  ;;  %22172 = vmatprep.mubr.msk.f32.mxu0 %vm24072_vm0, %v27131_v10 }
0x1735   :  { %23395 = vmatprep.subr.bf16.mxu1 %v27130_v18 }
0x1736   :  { %22200 = vmatmul.mubr.f32.vlgmr.msra.gmra.mrb[144].mxu1 %v12193_v52  ;;  %v27269_v52 = vld [vmem:[#allocation20_spill] sm:$0xff] }
0x1737   :  { %23397 = vmatpush3.bf16.msra.mxu1 %v27232_v59  ;;  %22217 = vmatprep.mubr.msk.f32.mxu1 %vm24072_vm0, %v27131_v10 }
0x1738   :  { %22215 = vmatprep.subr.mxu1 %v27131_v10 }
0x173b   :  { %22171 = vmatpush3.xpose.msra.mxu0 %v25879_v51  ;;  %22216 = vmatpush3.msra.mxu1 %v23854_v11  ;;  %v533_v11 = vadd.f32 %v27269_v52, %v313_v49 }
0x173c   :  { %23386 = vmatprep.subr.bf16.mxu0 %v27130_v18  ;;  %23401 = vmatprep.subr.bf16.mxu1 %v27130_v18 }
0x173d   :  { %23741 = vtanh.f32 %v533_v11 }
0x173e   :  { %22173 = vmatmul.mubr.f32.vlgmr.msra.gmra.mrb[154].mxu0 %v12175_v63 }
0x173f   :  { %23388 = vmatpush3.bf16.xpose.msra.mxu0 %v27227_v43  ;;  %22190 = vmatprep.mubr.msk.f32.mxu0 %vm24072_vm0, %v27131_v10 }
0x1740   :  { %22188 = vmatprep.subr.mxu0 %v27131_v10 }
0x1747   :  { %22189 = vmatpush3.xpose.msra.mxu0 %v25889_v9 }
0x1748   :  { %23392 = vmatprep.subr.bf16.mxu0 %v27130_v18 }
0x174a   :  { %22191 = vmatmul.mubr.f32.vlgmr.msra.gmra.mrb[156].mxu0 %v12191_v16  ;;  %v27270_v16 = vld [vmem:[#allocation45_spill] sm:$0xff] }
0x174b   :  { %23394 = vmatpush3.bf16.msra.mxu0 %v27231_v12  ;;  %22208 = vmatprep.mubr.msk.f32.mxu0 %vm24072_vm0, %v27131_v10 }
0x174c   :  { %22206 = vmatprep.subr.mxu0 %v27131_v10 }
0x174f   :  { %22207 = vmatpush3.msra.mxu0 %v25897_v21 }
0x1750   :  { %23398 = vmatprep.subr.bf16.mxu0 %v27130_v18 }
0x17ed   :  { %v12268_v47 = vpop.f32.mrb[148].mxu0 }
0x17ee   :  { %v12762_v0 = vmul.f32 %v12268_v47, %v27266_v7  ;;  %v22138_v55 = vpop.f32.mrb[149].mxu0 }
0x17f0   :  { %22209 = vmatmul.mubr.msk.f32.vlgmr.msra.gmra.mrb[158].mxu0 %vm3417_vm9, %v12762_v0  ;;  %v25921_v0 = vld [vmem:[#allocation7 + $0x58] sm:$0xff] }
0x17f1   :  { %v12478_v60 = vpop.f32.mrb[140].mxu1  ;;  %23400 = vmatpush3.bf16.msra.mxu0 %v27235_v56  ;;  %22226 = vmatprep.mubr.msk.f32.mxu0 %vm24072_vm0, %v27131_v10  ;;  %27271 = vst [vmem:[#allocation78_spill] sm:$0xff] %v25921_v0 }
0x17f2   :  { %v12765_v25 = vmul.f32 %v12478_v60, %v27267_v50  ;;  %v22165_v37 = vpop.f32.mrb[141].mxu1  ;;  %22224 = vmatprep.subr.mxu0 %v27131_v10  ;;  %v27272_v60 = vld [vmem:[#allocation35_spill] sm:$0xff] }
0x17f5   :  { %22225 = vmatpush3.msra.mxu0 %v23857_v22  ;;  %v23742_v22 = vpop.eup %23741 }
0x17f6   :  { %23404 = vmatprep.subr.bf16.mxu0 %v27130_v18 }
0x17f9   :  { %v12338_v34 = vpop.f32.mrb[150].mxu0 }
0x17fa   :  { %v12763_v24 = vmul.f32 %v12338_v34, %v27268_v8  ;;  %v22147_v30 = vpop.f32.mrb[151].mxu0  ;;  %v23861_v8 = vld [vmem:[#allocation7 + $0xb8] sm:$0xff] }
0x17fb   :  { %v25946_v30 = vld [vmem:[#allocation7 + $0x70] sm:$0xff] }
0x17fc   :  { %22218 = vmatmul.mubr.msk.f32.vlgmr.msra.gmra.mrb[146].mxu1 %vm3417_vm9, %v12763_v24  ;;  %v13405_v24 = vrot.slane %v23742_v22, %v27218_v5  ;;  %27274 = vst [vmem:[#allocation79_spill] sm:$0xff] %v25946_v30 }
0x17fd   :  { %23403 = vmatpush3.bf16.msra.mxu1 %v27236_v39  ;;  %v12618_v63 = vpop.f32.mrb[142].mxu1  ;;  %22235 = vmatprep.mubr.msk.f32.mxu1 %vm24072_vm0, %v27131_v10 }
0x17fe   :  { %v12767_v47 = vmul.f32 %v12618_v63, %v27270_v16  ;;  %v22183_v7 = vpop.f32.mrb[143].mxu1  ;;  %22233 = vmatprep.subr.mxu1 %v27131_v10  ;;  %v13421_v11 = vrot.slane %v13405_v24, %v27218_v5  ;;  %v13398_v63 = vcombine.high %v23742_v22, %v23742_v22  ;;  %v27275_v16 = vld [vmem:[#allocation44_spill] sm:$0xff]  ;;  %v25984_v22 = vld [vmem:[%s26895_s1 + $0x30] sm:$0xff] }
0x1801   :  { %22234 = vmatpush3.msra.mxu1 %v25921_v0 }
0x1802   :  { %22236 = vmatmul.mubr.msk.f32.vlgmr.msra.gmra.mrb[148].mxu1 %vm3417_vm9, %v12765_v25  ;;  %23407 = vmatprep.subr.bf16.mxu1 %v27130_v18 }
0x1803   :  { %23409 = vmatpush3.bf16.msra.mxu1 %v27243_v54  ;;  %22253 = vmatprep.mubr.msk.f32.mxu1 %vm24072_vm0, %v27131_v10 }
0x1804   :  { %22251 = vmatprep.subr.mxu1 %v27131_v10 }
0x1805   :  { %v12408_v55 = vpop.f32.mrb[152].mxu0 }
0x1806   :  { %v12764_v50 = vmul.f32 %v12408_v55, %v27272_v60  ;;  %v22156_v37 = vpop.f32.mrb[153].mxu0  ;;  %v25957_v55 = vld [vmem:[%s26895_s1 + $0x10] sm:$0xff]  ;;  %v13443_v60 = vcombine.high %v13421_v11, %v13421_v11 }
0x1807   :  { %22252 = vmatpush3.msra.mxu1 %v23860_v28  ;;  %v25970_v37 = vld [vmem:[%s26895_s1 + $0x20] sm:$0xff] }
0x1808   :  { %22254 = vmatmul.mubr.msk.f32.vlgmr.msra.gmra.mrb[150].mxu1 %vm3417_vm9, %v12767_v47  ;;  %23413 = vmatprep.subr.bf16.mxu1 %v27130_v18  ;;  %v25975_v28 = vld [vmem:[#allocation7 + $0xa0] sm:$0xff] }
0x1809   :  { %22227 = vmatmul.mubr.msk.f32.vlgmr.msra.gmra.mrb[160].mxu0 %vm3417_vm9, %v12764_v50  ;;  %23415 = vmatpush3.bf16.msra.mxu1 %v27247_v61  ;;  %v12758_v25 = vpop.f32.mrb[144].mxu1  ;;  %v13412_v50 = vrot.slane %v13398_v63, %v27218_v5  ;;  %27276 = vst [vmem:[#allocation80_spill] sm:$0xff] %v25975_v28  ;;  %v25995_v63 = vld [vmem:[%s26895_s1] sm:$0xff] }
0x180a   :  { %v12769_v49 = vmul.f32 %v12758_v25, %v27273_v48  ;;  %v22201_v34 = vpop.f32.mrb[145].mxu1  ;;  %22269 = vmatprep.subr.mxu1 %v27131_v10  ;;  %22271 = vmatprep.mubr.msk.f32.mxu1 %vm24072_vm0, %v27131_v10  ;;  %27278 = vst [vmem:[#allocation81_spill] sm:$0xff] %v25995_v63 }
0x180b   :  { %23406 = vmatpush3.bf16.msra.mxu0 %v27241_v46  ;;  %22244 = vmatprep.mubr.msk.f32.mxu0 %vm24072_vm0, %v27131_v10  ;;  %v13428_v25 = vrot.slane %v13412_v50, %v27218_v5  ;;  %v27277_v34 = vld [vmem:[#allocation46_spill] sm:$0xff] }
0x180c   :  { %22242 = vmatprep.subr.mxu0 %v27131_v10 }
0x180d   :  { %22270 = vmatpush3.msra.mxu1 %v23861_v8 }
0x180e   :  { %22272 = vmatmul.mubr.msk.f32.vlgmr.msra.gmra.mrb[152].mxu1 %vm3417_vm9, %v12769_v49  ;;  %22284 = vmatprep.subr.mxu1 %v27131_v10  ;;  %v13444_v49 = vcombine.high %v13428_v25, %v13428_v25 }
0x180f   :  { %22243 = vmatpush3.msra.mxu0 %v25946_v30  ;;  %22286 = vmatprep.mubr.msk.f32.mxu1 %vm24072_vm0, %v27131_v10 }
0x1810   :  { %23410 = vmatprep.subr.bf16.mxu0 %v27130_v18 }
0x1811   :  { %v12548_v52 = vpop.f32.mrb[154].mxu0 }
0x1812   :  { %v12766_v47 = vmul.f32 %v12548_v52, %v27275_v16  ;;  %v22174_v7 = vpop.f32.mrb[155].mxu0  ;;  %v13413_v16 = vcombine.high %v13405_v24, %v13405_v24 }
0x1813   :  { %v26018_v7 = vld [vmem:[%s26895_s1 + $0x18] sm:$0xff] }
0x1814   :  { %22285 = vmatpush3.xpose.msra.mxu1 %v25957_v55  ;;  %22245 = vmatmul.mubr.msk.f32.vlgmr.msra.gmra.mrb[162].mxu0 %vm3417_vm9, %v12766_v47  ;;  %v26008_v47 = vld [vmem:[%s26895_s1 + $0x8] sm:$0xff]  ;;  %v13435_v24 = vrot.slane %v13413_v16, %v27218_v5 }
0x1815   :  { %23412 = vmatpush3.bf16.msra.mxu0 %v27246_v41  ;;  %22294 = vmatprep.subr.mxu1 %v27131_v10  ;;  %27279 = vst [vmem:[#allocation19_spill] sm:$0xff] %v26008_v47 }
0x1816   :  { %22260 = vmatprep.subr.mxu0 %v27131_v10  ;;  %22262 = vmatprep.mubr.msk.f32.mxu0 %vm24072_vm0, %v27131_v10 }
0x1817   :  { %22287 = vmatmul.mubr.f32.vlgmr.msra.gmra.mrb[154].mxu1 %v13443_v60  ;;  %v13414_v60 = vcombine.high %v13412_v50, %v13412_v50 }
0x1818   :  { %22295 = vmatpush3.xpose.msra.mxu1 %v25970_v37  ;;  %22296 = vmatprep.mubr.msk.f32.mxu1 %vm24072_vm0, %v27131_v10 }
0x1819   :  { %22261 = vmatpush3.msra.mxu0 %v25975_v28  ;;  %22304 = vmatprep.subr.mxu1 %v27131_v10 }
0x181a   :  { %22274 = vmatprep.subr.mxu0 %v27131_v10 }
0x181b   :  { %22297 = vmatmul.mubr.f32.vlgmr.msra.gmra.mrb[156].mxu1 %v13428_v25  ;;  %v26027_v25 = vld [vmem:[%s26895_s1 + $0x28] sm:$0xff] }
0x181c   :  { %22305 = vmatpush3.xpose.msra.mxu1 %v25984_v22  ;;  %22306 = vmatprep.mubr.msk.f32.mxu1 %vm24072_vm0, %v27131_v10 }
0x181d   :  { %v12688_v48 = vpop.f32.mrb[156].mxu0  ;;  %22314 = vmatprep.subr.mxu1 %v27131_v10 }
0x181e   :  { %v12768_v8 = vmul.f32 %v12688_v48, %v27277_v34  ;;  %v22192_v52 = vpop.f32.mrb[157].mxu0  ;;  %v13442_v48 = vrot.slane %v13414_v60, %v27218_v5 }
0x181f   :  { %22307 = vmatmul.mubr.f32.vlgmr.msra.gmra.mrb[158].mxu1 %v13444_v49 }
0x1820   :  { %22263 = vmatmul.mubr.msk.f32.vlgmr.msra.gmra.mrb[164].mxu0 %vm3417_vm9, %v12768_v8  ;;  %22315 = vmatpush3.msra.mxu1 %v25995_v63  ;;  %v13446_v50 = vcombine.high %v13442_v48, %v13442_v48 }
0x1821   :  { %22275 = vmatpush3.xpose.msra.mxu0 %v25995_v63  ;;  %22276 = vmatprep.mubr.msk.f32.mxu0 %vm24072_vm0, %v27131_v10 }
0x1822   :  { %22279 = vmatprep.subr.mxu0 %v27131_v10  ;;  %22316 = vmatprep.mubr.msk.f32.mxu1 %vm24072_vm0, %v27131_v10 }
0x1823   :  { %22324 = vmatprep.subr.mxu1 %v27131_v10 }
0x1824   :  { %22277 = vmatmul.mubr.f32.vlgmr.msra.gmra.mrb[166].mxu0 %v13421_v11  ;;  %v13445_v11 = vcombine.high %v13435_v24, %v13435_v24 }
0x1825   :  { %22280 = vmatpush3.xpose.msra.mxu0 %v26008_v47  ;;  %22281 = vmatprep.mubr.msk.f32.mxu0 %vm24072_vm0, %v27131_v10 }
0x1826   :  { %22289 = vmatprep.subr.mxu0 %v27131_v10 }
0x1828   :  { %22282 = vmatmul.mubr.f32.vlgmr.msra.gmra.mrb[168].mxu0 %v13435_v24 }
0x1829   :  { %22290 = vmatpush3.xpose.msra.mxu0 %v26018_v7  ;;  %22291 = vmatprep.mubr.msk.f32.mxu0 %vm24072_vm0, %v27131_v10 }
0x182a   :  { %22299 = vmatprep.subr.mxu0 %v27131_v10 }
0x182c   :  { %22292 = vmatmul.mubr.f32.vlgmr.msra.gmra.mrb[170].mxu0 %v13445_v11 }
0x182d   :  { %22300 = vmatpush3.xpose.msra.mxu0 %v26027_v25  ;;  %22301 = vmatprep.mubr.msk.f32.mxu0 %vm24072_vm0, %v27131_v10 }
0x182e   :  { %22309 = vmatprep.subr.mxu0 %v27131_v10 }
0x1830   :  { %22302 = vmatmul.mubr.f32.vlgmr.msra.gmra.mrb[172].mxu0 %v13442_v48 }
0x1831   :  { %22310 = vmatpush3.xpose.msra.mxu0 %v25773_v44  ;;  %22311 = vmatprep.mubr.msk.f32.mxu0 %vm24072_vm0, %v27131_v10 }
0x1832   :  { %22319 = vmatprep.subr.mxu0 %v27131_v10 }
0x1834   :  { %22312 = vmatmul.mubr.f32.vlgmr.msra.gmra.mrb[174].mxu0 %v13446_v50 }
0x1835   :  { %22320 = vmatpush3.msra.mxu0 %v26008_v47  ;;  %22321 = vmatprep.mubr.msk.f32.mxu0 %vm24072_vm0, %v27131_v10 }
0x1836   :  { %22329 = vmatprep.subr.mxu0 %v27131_v10 }
0x18c3   :  { %v26042_v49 = vpop.f32.mrb[158].mxu0 }
0x18c4   :  { %27280 = vst [vmem:[#allocation18_spill] sm:$0xff] %v26042_v49  ;;  %v22210_v34 = vpop.f32.mrb[159].mxu0 }
0x18cf   :  { %v26044_v8 = vpop.f32.mrb[146].mxu1 }
0x18d0   :  { %27281 = vst [vmem:[#allocation82_spill] sm:$0xff] %v26044_v8  ;;  %v22219_v52 = vpop.f32.mrb[147].mxu1 }
0x18d5   :  { %v26046_v16 = vpop.f32.mrb[148].mxu1 }
0x18d6   :  { %27282 = vst [vmem:[#allocation83_spill] sm:$0xff] %v26046_v16  ;;  %v22237_v24 = vpop.f32.mrb[149].mxu1 }
0x18db   :  { %v26048_v11 = vpop.f32.mrb[150].mxu1 }
0x18dc   :  { %27283 = vst [vmem:[#allocation84_spill] sm:$0xff] %v26048_v11  ;;  %v26050_v60 = vpop.f32.mrb[160].mxu0  ;;  %v22255_v48 = vpop.f32.mrb[151].mxu1 }
0x18dd   :  { %27284 = vst [vmem:[#allocation55_spill] sm:$0xff] %v26050_v60  ;;  %v22228_v50 = vpop.f32.mrb[161].mxu0 }
0x18e1   :  { %v26052_v47 = vpop.f32.mrb[152].mxu1 }
0x18e2   :  { %27285 = vst [vmem:[#allocation56_spill] sm:$0xff] %v26052_v47  ;;  %v22273_v63 = vpop.f32.mrb[153].mxu1 }
0x18e7   :  { %v26054_v28 = vpop.f32.mrb[162].mxu0 }
0x18e8   :  { %27286 = vst [vmem:[#allocation33_spill] sm:$0xff] %v26054_v28  ;;  %v22246_v61 = vpop.f32.mrb[163].mxu0 }
0x18ea   :  { %v13661_v41 = vpop.f32.mrb[154].mxu1 }
0x18eb   :  { %v22288_v34 = vpop.f32.mrb[155].mxu1  ;;  %v14025_v21 = vrot.slane %v13661_v41, 6 }
0x18ee   :  { %v13801_v30 = vpop.f32.mrb[156].mxu1 }
0x18ef   :  { %v22298_v54 = vpop.f32.mrb[157].mxu1  ;;  %v14029_v9 = vrot.slane %v13801_v30, 4 }
0x18f2   :  { %v13941_v52 = vpop.f32.mrb[158].mxu1 }
0x18f3   :  { %v22308_v46 = vpop.f32.mrb[159].mxu1  ;;  %v26056_v0 = vpop.f32.mrb[164].mxu0 }
0x18f4   :  { %27287 = vst [vmem:[#allocation36_spill] sm:$0xff] %v26056_v0  ;;  %v22264_v24 = vpop.f32.mrb[165].mxu0 }
0x18f7   :  { %v13521_v42 = vpop.f32.mrb[166].mxu0 }
0x18f8   :  { %v22278_v39 = vpop.f32.mrb[167].mxu0 }
0x18f9   :  { %v14033_v39 = vrot.slane %v13941_v52, 2 }
0x18fb   :  { %v13591_v56 = vpop.f32.mrb[168].mxu0 }
0x18fc   :  { %v14023_v48 = vrot.slane %v13591_v56, 7  ;;  %v22283_v50 = vpop.f32.mrb[169].mxu0 }
0x18fe   :  { %v14024_v63 = vsel %vm1292_vm1, %v14023_v48, %v13521_v42 }
0x18ff   :  { %v13731_v59 = vpop.f32.mrb[170].mxu0  ;;  %v14026_v61 = vsel %vm1295_vm2, %v14025_v21, %v14024_v63 }
0x1900   :  { %v14027_v12 = vrot.slane %v13731_v59, 5  ;;  %v22293_v34 = vpop.f32.mrb[171].mxu0 }
0x1902   :  { %v14028_v54 = vsel %vm1298_vm3, %v14027_v12, %v14026_v61 }
0x1903   :  { %v13871_v46 = vpop.f32.mrb[172].mxu0  ;;  %v14030_v26 = vsel %vm1301_vm4, %v14029_v9, %v14028_v54 }
0x1904   :  { %v14031_v24 = vrot.slane %v13871_v46, 3  ;;  %v22303_v43 = vpop.f32.mrb[173].mxu0 }
0x1906   :  { %v14032_v51 = vsel %vm1304_vm5, %v14031_v24, %v14030_v26 }
0x1907   :  { %v14011_v50 = vpop.f32.mrb[174].mxu0  ;;  %v14034_v23 = vsel %vm1307_vm6, %v14033_v39, %v14032_v51 }
0x1908   :  { %v14035_v48 = vrot.slane %v14011_v50, 1  ;;  %v22313_v29 = vpop.f32.mrb[175].mxu0 }
0x190a   :  { %v14036_v21 = vsel %vm1310_vm7, %v14035_v48, %v14034_v23 }
0x190b   :  { %v14038_v63 = vsel %vm1313_vm8, %v14036_v21, -inf }
0x190c   :  { %14039 = vmax.xlane.f32.xlu0 %v14038_v63 }
0x1999   :  { %v14040_v34 = vpop.xlane.xlu0 %14039 }
0x199a   :  { %v14042_v12 = vrot.slane %v14040_v34, 1  ;;  %v14043_v61 = vrot.slane %v14040_v34, 2  ;;  %v14044_v35 = vrot.slane %v14040_v34, 3  ;;  %v14045_v9 = vrot.slane %v14040_v34, 4 }
0x199b   :  { %v14046_v54 = vrot.slane %v14040_v34, 5  ;;  %v14047_v43 = vrot.slane %v14040_v34, 6  ;;  %v14048_v3 = vrot.slane %v14040_v34, 7  ;;  %v14057_v6 = vsub.f32 %v13521_v42, %v14040_v34 }
0x199c   :  { %v14058_v26 = vsub.f32 %v13591_v56, %v14042_v12  ;;  %v14059_v24 = vsub.f32 %v13661_v41, %v14043_v61  ;;  %v14060_v5 = vsub.f32 %v13731_v59, %v14044_v35  ;;  %v14061_v51 = vsub.f32 %v13801_v30, %v14045_v9 }
0x199d   :  { %v14062_v39 = vsub.f32 %v13871_v46, %v14046_v54  ;;  %v14065_v29 = vmul.f32 1.442695, %v14057_v6  ;;  %v14063_v36 = vsub.f32 %v13941_v52, %v14047_v43  ;;  %v14064_v63 = vsub.f32 %v14011_v50, %v14048_v3 }
0x199e   :  { %v14067_v23 = vmul.f32 1.442695, %v14058_v26  ;;  %v14069_v48 = vmul.f32 1.442695, %v14059_v24  ;;  %v14071_v21 = vmul.f32 1.442695, %v14060_v5 }
0x199f   :  { %23743 = vpow2.f32 %v14065_v29  ;;  %v14073_v19 = vmul.f32 1.442695, %v14061_v51  ;;  %v14075_v14 = vmul.f32 1.442695, %v14062_v39  ;;  %v14077_v47 = vmul.f32 1.442695, %v14063_v36 }
0x19a0   :  { %23745 = vpow2.f32 %v14067_v23  ;;  %v14079_v11 = vmul.f32 1.442695, %v14064_v63 }
0x19a1   :  { %23747 = vpow2.f32 %v14069_v48 }
0x19a2   :  { %23749 = vpow2.f32 %v14071_v21 }
0x19a3   :  { %23751 = vpow2.f32 %v14073_v19 }
0x19a4   :  { %23753 = vpow2.f32 %v14075_v14 }
0x19a5   :  { %23755 = vpow2.f32 %v14077_v47 }
0x19a6   :  { %23757 = vpow2.f32 %v14079_v11 }
0x19a9   :  { %v23744_v56 = vpop.eup %23743 }
0x19aa   :  { %v23746_v59 = vpop.eup %23745 }
0x19ab   :  { %v23748_v6 = vpop.eup %23747  ;;  %v14089_v42 = vrot.slane %v23746_v59, 7 }
0x19ac   :  { %v23750_v41 = vpop.eup %23749  ;;  %v14091_v35 = vrot.slane %v23748_v6, 6 }
0x19ad   :  { %v23752_v5 = vpop.eup %23751  ;;  %v14090_v3 = vsel %vm1292_vm1, %v14089_v42, %v23744_v56  ;;  %v14093_v30 = vrot.slane %v23750_v41, 5 }
0x19ae   :  { %v23754_v52 = vpop.eup %23753  ;;  %v14092_v46 = vsel %vm1295_vm2, %v14091_v35, %v14090_v3  ;;  %v14095_v36 = vrot.slane %v23752_v5, 4 }
0x19af   :  { %v23756_v50 = vpop.eup %23755  ;;  %v14094_v19 = vsel %vm1298_vm3, %v14093_v30, %v14092_v46  ;;  %v14097_v14 = vrot.slane %v23754_v52, 3 }
0x19b0   :  { %v23758_v47 = vpop.eup %23757  ;;  %v14096_v11 = vsel %vm1301_vm4, %v14095_v36, %v14094_v19  ;;  %v14099_v34 = vrot.slane %v23756_v50, 2 }
0x19b1   :  { %v14098_v12 = vsel %vm1304_vm5, %v14097_v14, %v14096_v11  ;;  %v14101_v61 = vrot.slane %v23758_v47, 1 }
0x19b2   :  { %v14100_v9 = vsel %vm1307_vm6, %v14099_v34, %v14098_v12 }
0x19b3   :  { %v14102_v54 = vsel %vm1310_vm7, %v14101_v61, %v14100_v9 }
0x19b4   :  { %v14104_v43 = vsel %vm1313_vm8, %v14102_v54, 0.0 }
0x19b5   :  { %14105 = vadd.xlane.f32.xlu1 %v14104_v43 }
0x1a42   :  { %v14106_v26 = vpop.xlane.xlu1 %14105 }
0x1a43   :  { %23759 = vrcp.f32 %v14106_v26 }
0x1a4d   :  { %v23760_v24 = vpop.eup %23759 }
0x1a4e   :  { %v14109_v51 = vrot.slane %v23760_v24, 1  ;;  %v14110_v39 = vrot.slane %v23760_v24, 2  ;;  %v14111_v29 = vrot.slane %v23760_v24, 3  ;;  %v14112_v23 = vrot.slane %v23760_v24, 4 }
0x1a4f   :  { %v14113_v48 = vrot.slane %v23760_v24, 5  ;;  %v14114_v21 = vrot.slane %v23760_v24, 6  ;;  %v14115_v63 = vrot.slane %v23760_v24, 7  ;;  %v14124_v42 = vmul.f32 %v23760_v24, %v23744_v56 }
0x1a50   :  { %v14125_v35 = vmul.f32 %v23746_v59, %v14109_v51  ;;  %v14126_v3 = vmul.f32 %v23748_v6, %v14110_v39  ;;  %v14127_v30 = vmul.f32 %v23750_v41, %v14111_v29  ;;  %v14128_v46 = vmul.f32 %v23752_v5, %v14112_v23 }
0x1a51   :  { %v14129_v36 = vmul.f32 %v23754_v52, %v14113_v48  ;;  %v14130_v19 = vmul.f32 %v23756_v50, %v14114_v21  ;;  %v14131_v14 = vmul.f32 %v23758_v47, %v14115_v63  ;;  %v14132_v9 = vmul.f32 %v25725_v53, %v14124_v42 }
0x1a52   :  { %v14133_v11 = vmul.f32 %v14125_v35, %v24436_v57  ;;  %v14134_v34 = vmul.f32 %v14126_v3, %v24438_v62  ;;  %v14135_v12 = vmul.f32 %v14127_v30, %v24440_v1  ;;  %v14136_v61 = vmul.f32 %v14128_v46, %v24442_v2 }
0x1a53   :  { %v14137_v54 = vmul.f32 %v14129_v36, %v24444_v4  ;;  %v14138_v6 = vmul.f32 %v14130_v19, %v24446_v31  ;;  %v14139_v41 = vmul.f32 %v14131_v14, %v24448_v32 }
0x1a54   :  { %v14148_v56 = vrot.slane %v14133_v11, 7  ;;  %v14150_v59 = vrot.slane %v14134_v34, 6  ;;  %v14152_v52 = vrot.slane %v14135_v12, 5  ;;  %v14154_v47 = vrot.slane %v14136_v61, 4 }
0x1a55   :  { %v14156_v26 = vrot.slane %v14137_v54, 3  ;;  %v14158_v53 = vrot.slane %v14138_v6, 2  ;;  %v14160_v39 = vrot.slane %v14139_v41, 1 }
0x1a56   :  { %v14149_v5 = vsel %vm1292_vm1, %v14148_v56, %v14132_v9 }
0x1a57   :  { %v14151_v50 = vsel %vm1295_vm2, %v14150_v59, %v14149_v5  ;;  %v27289_v59 = vld [vmem:[#allocation24_spill] sm:$0xff]  ;;  %v27290_v5 = vld [vmem:[#allocation25_spill] sm:$0xff] }
0x1a58   :  { %v14153_v43 = vsel %vm1298_vm3, %v14152_v52, %v14151_v50  ;;  %v23873_v52 = vld [vmem:[#allocation2 + $0x40] sm:$0xff]  ;;  %v27076_v50 = vmin.f32 %v26050_v60, 1.0 }
0x1a59   :  { %v14155_v24 = vsel %vm1301_vm4, %v14154_v47, %v14153_v43  ;;  %v27291_v47 = vld [vmem:[#allocation26_spill] sm:$0xff]  ;;  %v23874_v43 = vld [vmem:[#allocation2 + $0x70] sm:$0xff] }
0x1a5a   :  { %v14157_v51 = vsel %vm1304_vm5, %v14156_v26, %v14155_v24  ;;  %v27074_v26 = vmin.f32 %v26054_v28, 1.0  ;;  %v27292_v24 = vld [vmem:[#allocation29_spill] sm:$0xff] }
0x1a5b   :  { %v14159_v29 = vsel %vm1307_vm6, %v14158_v53, %v14157_v51  ;;  %v23875_v53 = vld [vmem:[#allocation2 + $0xa0] sm:$0xff]  ;;  %v27072_v51 = vmin.f32 %v26056_v0, 1.0  ;;  %v27325_v0 = vld [vmem:[#allocation81_spill] sm:$0xff] }
0x1a5c   :  { %v14161_v23 = vsel %vm1310_vm7, %v14160_v39, %v14159_v29 }
0x1a5d   :  { %v14163_v48 = vsel %vm1313_vm8, %v14161_v23, 0.0 }
0x1a5e   :  { %14164 = vadd.xlane.f32.xlu0 %v14163_v48 }
0x1aeb   :  { %v14165_v21 = vpop.xlane.xlu0 %14164 }
0x1aec   :  { %v14166_v63 = vadd.f32 1e-06, %v14165_v21 }
0x1aee   :  { %23761 = vrcp.f32 %v14166_v63 }
0x1af8   :  { %v23762_v42 = vpop.eup %23761 }
0x1af9   :  { %v14184_v35 = vmul.f32 %v23762_v42, %v14132_v9  ;;  %v14169_v3 = vrot.slane %v23762_v42, 1  ;;  %v14170_v30 = vrot.slane %v23762_v42, 2  ;;  %v14171_v36 = vrot.slane %v23762_v42, 3 }
0x1afa   :  { %v14172_v14 = vrot.slane %v23762_v42, 4  ;;  %v14174_v9 = vrot.slane %v23762_v42, 6 }
0x1afb   :  { %22317 = vmatmul.mubr.msk.f32.vlgmr.msra.gmra.mrb[160].mxu1 %vm1313_vm8, %v14184_v35  ;;  %v14185_v46 = vmul.f32 %v14169_v3, %v14133_v11  ;;  %v14186_v19 = vmul.f32 %v14170_v30, %v14134_v34  ;;  %v14187_v11 = vmul.f32 %v14171_v36, %v14135_v12 }
0x1afc   :  { %22325 = vmatpush3.msra.mxu1 %v25957_v55  ;;  %22326 = vmatprep.mubr.msk.f32.mxu1 %vm24072_vm0, %v27131_v10  ;;  %v14173_v55 = vrot.slane %v23762_v42, 5  ;;  %v14188_v34 = vmul.f32 %v14172_v14, %v14136_v61  ;;  %v14190_v61 = vmul.f32 %v14174_v9, %v14138_v6  ;;  %v23872_v6 = vld [vmem:[#allocation2 + $0x28] sm:$0xff] }
0x1afd   :  { %22322 = vmatmul.mubr.msk.f32.vlgmr.msra.gmra.mrb[176].mxu0 %vm1313_vm8, %v14185_v46  ;;  %22334 = vmatprep.subr.mxu1 %v27131_v10 }
0x1afe   :  { %22330 = vmatpush3.msra.mxu0 %v26018_v7  ;;  %22331 = vmatprep.mubr.msk.f32.mxu0 %vm24072_vm0, %v27131_v10  ;;  %v14189_v12 = vmul.f32 %v14173_v55, %v14137_v54  ;;  %v27078_v54 = vmin.f32 %v26042_v49, 1.0 }
0x1aff   :  { %22327 = vmatmul.mubr.msk.f32.vlgmr.msra.gmra.mrb[162].mxu1 %vm1313_vm8, %v14186_v19  ;;  %22339 = vmatprep.subr.mxu0 %v27131_v10 }
0x1b00   :  { %22335 = vmatpush3.msra.mxu1 %v25970_v37  ;;  %22336 = vmatprep.mubr.msk.f32.mxu1 %vm24072_vm0, %v27131_v10  ;;  %v14175_v37 = vrot.slane %v23762_v42, 7 }
0x1b01   :  { %22332 = vmatmul.mubr.msk.f32.vlgmr.msra.gmra.mrb[178].mxu0 %vm1313_vm8, %v14187_v11  ;;  %22344 = vmatprep.subr.mxu1 %v27131_v10 }
0x1b02   :  { %22340 = vmatpush3.msra.mxu0 %v26027_v25  ;;  %22341 = vmatprep.mubr.msk.f32.mxu0 %vm24072_vm0, %v27131_v10  ;;  %v14191_v56 = vmul.f32 %v14175_v37, %v14139_v41  ;;  %v27077_v41 = vmin.f32 %v26044_v8, 1.0 }
0x1b03   :  { %22337 = vmatmul.mubr.msk.f32.vlgmr.msra.gmra.mrb[164].mxu1 %vm1313_vm8, %v14188_v34  ;;  %22349 = vmatprep.subr.mxu0 %v27131_v10 }
0x1b04   :  { %22345 = vmatpush3.msra.mxu1 %v25984_v22  ;;  %22346 = vmatprep.mubr.msk.f32.mxu1 %vm24072_vm0, %v27131_v10  ;;  %v23871_v22 = vld [vmem:[#allocation2 + $0x10] sm:$0xff] }
0x1b05   :  { %22342 = vmatmul.mubr.msk.f32.vlgmr.msra.gmra.mrb[180].mxu0 %vm1313_vm8, %v14189_v12  ;;  %23416 = vmatprep.subr.bf16.mxu1 %v27130_v18 }
0x1b06   :  { %22350 = vmatpush3.msra.mxu0 %v25773_v44  ;;  %22351 = vmatprep.mubr.msk.f32.mxu0 %vm24072_vm0, %v27131_v10  ;;  %v27288_v44 = vld [vmem:[#allocation23_spill] sm:$0xff] }
0x1b07   :  { %22347 = vmatmul.mubr.msk.f32.vlgmr.msra.gmra.mrb[166].mxu1 %vm1313_vm8, %v14190_v61  ;;  %23440 = vmatprep.subr.bf16.mxu0 %v27130_v18 }
0x1b08   :  { %23418 = vmatpush3.bf16.msra.mxu1 %v25766_v40  ;;  %22386 = vmatprep.mubr.msk.f32.mxu1 %vm24072_vm0, %v27131_v10 }
0x1b09   :  { %22352 = vmatmul.mubr.msk.f32.vlgmr.msra.gmra.mrb[182].mxu0 %vm1313_vm8, %v14191_v56  ;;  %23419 = vmatprep.subr.bf16.mxu1 %v27130_v18 }
0x1b0a   :  { %22395 = vmatprep.mubr.msk.f32.mxu0 %vm24072_vm0, %v27131_v10 }
0x1b0c   :  { %23421 = vmatpush3.bf16.msra.mxu1 %v25782_v27 }
0x1b0d   :  { %23442 = vmatpush3.bf16.xpose.msra.mxu0 %v27288_v44  ;;  %23422 = vmatprep.subr.bf16.mxu1 %v27130_v18 }
0x1b0e   :  { %22393 = vmatprep.subr.mxu0 %v27131_v10 }
0x1b10   :  { %23424 = vmatpush3.bf16.msra.mxu1 %v25791_v15 }
0x1b11   :  { %23425 = vmatprep.subr.bf16.mxu1 %v27130_v18 }
0x1b14   :  { %23427 = vmatpush3.bf16.msra.mxu1 %v25797_v13 }
0x1b15   :  { %22394 = vmatpush3.xpose.msra.mxu0 %v23871_v22  ;;  %23428 = vmatprep.subr.bf16.mxu1 %v27130_v18 }
0x1b16   :  { %23443 = vmatprep.subr.bf16.mxu0 %v27130_v18 }
0x1b18   :  { %22396 = vmatmul.mubr.f32.vlgmr.msra.gmra.mrb[184].mxu0 %v27078_v54  ;;  %23430 = vmatpush3.bf16.msra.mxu1 %v25806_v58 }
0x1b19   :  { %23445 = vmatpush3.bf16.xpose.msra.mxu0 %v27289_v59  ;;  %22404 = vmatprep.mubr.msk.f32.mxu0 %vm24072_vm0, %v27131_v10 }
0x1b1a   :  { %22402 = vmatprep.subr.mxu0 %v27131_v10  ;;  %23431 = vmatprep.subr.bf16.mxu1 %v27130_v18 }
0x1b1c   :  { %23433 = vmatpush3.bf16.msra.mxu1 %v25810_v33 }
0x1b1d   :  { %23434 = vmatprep.subr.bf16.mxu1 %v27130_v18 }
0x1b20   :  { %23436 = vmatpush3.bf16.msra.mxu1 %v25814_v20 }
0x1b21   :  { %22403 = vmatpush3.xpose.msra.mxu0 %v23872_v6  ;;  %23437 = vmatprep.subr.bf16.mxu1 %v27130_v18 }
0x1b22   :  { %23446 = vmatprep.subr.bf16.mxu0 %v27130_v18 }
0x1b24   :  { %22405 = vmatmul.mubr.f32.vlgmr.msra.gmra.mrb[186].mxu0 %v27077_v41  ;;  %23439 = vmatpush3.bf16.msra.mxu1 %v25817_v17  ;;  %v27314_v41 = vld [vmem:[#allocation48_spill] sm:$0xff] }
0x1b25   :  { %23448 = vmatpush3.bf16.xpose.msra.mxu0 %v27290_v5  ;;  %22413 = vmatprep.mubr.msk.f32.mxu0 %vm24072_vm0, %v27131_v10 }
0x1b26   :  { %22411 = vmatprep.subr.mxu0 %v27131_v10  ;;  %23449 = vmatprep.subr.bf16.mxu1 %v27130_v18 }
0x1b2d   :  { %22412 = vmatpush3.xpose.msra.mxu0 %v23873_v52 }
0x1b2e   :  { %23452 = vmatprep.subr.bf16.mxu0 %v27130_v18 }
0x1b30   :  { %22414 = vmatmul.mubr.f32.vlgmr.msra.gmra.mrb[188].mxu0 %v27076_v50 }
0x1b31   :  { %23454 = vmatpush3.bf16.xpose.msra.mxu0 %v27291_v47  ;;  %22431 = vmatprep.mubr.msk.f32.mxu0 %vm24072_vm0, %v27131_v10 }
0x1b32   :  { %22429 = vmatprep.subr.mxu0 %v27131_v10 }
0x1b39   :  { %22430 = vmatpush3.xpose.msra.mxu0 %v23874_v43 }
0x1b3a   :  { %23458 = vmatprep.subr.bf16.mxu0 %v27130_v18 }
0x1b3c   :  { %22432 = vmatmul.mubr.f32.vlgmr.msra.gmra.mrb[190].mxu0 %v27074_v26  ;;  %v27312_v26 = vld [vmem:[#allocation49_spill] sm:$0xff] }
0x1b3d   :  { %23460 = vmatpush3.bf16.xpose.msra.mxu0 %v27292_v24  ;;  %22449 = vmatprep.mubr.msk.f32.mxu0 %vm24072_vm0, %v27131_v10 }
0x1b3e   :  { %22447 = vmatprep.subr.mxu0 %v27131_v10 }
0x1b45   :  { %22448 = vmatpush3.xpose.msra.mxu0 %v23875_v53 }
0x1b46   :  { %23464 = vmatprep.subr.bf16.mxu0 %v27130_v18 }
0x1b48   :  { %22450 = vmatmul.mubr.f32.vlgmr.msra.gmra.mrb[192].mxu0 %v27072_v51 }
0x1b49   :  { %23466 = vmatpush3.bf16.xpose.msra.mxu0 %v27204_v45  ;;  %22467 = vmatprep.mubr.msk.f32.mxu0 %vm24072_vm0, %v27131_v10 }
0x1b4a   :  { %22465 = vmatprep.subr.mxu0 %v27131_v10 }
0x1b51   :  { %22466 = vmatpush3.xpose.msra.mxu0 %v25802_v38 }
0x1b52   :  { %23470 = vmatprep.subr.bf16.mxu0 %v27130_v18 }
0x1bce   :  { %v14261_v39 = vpop.f32.mrb[160].mxu1 }
0x1bcf   :  { %v22318_v29 = vpop.f32.mrb[161].mxu1 }
0x1bd0   :  { %v14334_v23 = vpop.f32.mrb[176].mxu0 }
0x1bd1   :  { %v14784_v48 = vrot.slane %v14334_v23, 7  ;;  %v22323_v21 = vpop.f32.mrb[177].mxu0  ;;  %v27293_v23 = vld [vmem:[#allocation27_spill] sm:$0xff] }
0x1bd2   :  { %v14407_v63 = vpop.f32.mrb[162].mxu1  ;;  %v27075_v21 = vmin.f32 %v26046_v16, 1.0 }
0x1bd3   :  { %v14785_v42 = vsel %vm1292_vm1, %v14784_v48, %v14261_v39  ;;  %v14786_v35 = vrot.slane %v14407_v63, 6  ;;  %v22328_v3 = vpop.f32.mrb[163].mxu1  ;;  %v23876_v48 = vld [vmem:[#allocation2 + $0x58] sm:$0xff] }
0x1bd4   :  { %v14480_v30 = vpop.f32.mrb[178].mxu0  ;;  %v23877_v3 = vld [vmem:[#allocation2 + $0x88] sm:$0xff] }
0x1bd5   :  { %v14787_v46 = vsel %vm1295_vm2, %v14786_v35, %v14785_v42  ;;  %v14788_v36 = vrot.slane %v14480_v30, 5  ;;  %v22333_v19 = vpop.f32.mrb[179].mxu0  ;;  %v27294_v35 = vld [vmem:[#allocation28_spill] sm:$0xff] }
0x1bd6   :  { %v14553_v14 = vpop.f32.mrb[164].mxu1  ;;  %v27295_v30 = vld [vmem:[#allocation84_spill] sm:$0xff] }
0x1bd7   :  { %v14789_v38 = vsel %vm1298_vm3, %v14788_v36, %v14787_v46  ;;  %v14790_v11 = vrot.slane %v14553_v14, 4  ;;  %v22338_v55 = vpop.f32.mrb[165].mxu1  ;;  %v27073_v46 = vmin.f32 %v27295_v30, 1.0  ;;  %v27296_v14 = vld [vmem:[#allocation30_spill] sm:$0xff] }
0x1bd8   :  { %v14626_v34 = vpop.f32.mrb[180].mxu0 }
0x1bd9   :  { %v14791_v9 = vsel %vm1301_vm4, %v14790_v11, %v14789_v38  ;;  %v14792_v12 = vrot.slane %v14626_v34, 3  ;;  %v22343_v37 = vpop.f32.mrb[181].mxu0  ;;  %v23878_v38 = vld [vmem:[#allocation2 + $0xb8] sm:$0xff]  ;;  %v27297_v11 = vld [vmem:[#allocation56_spill] sm:$0xff] }
0x1bda   :  { %v14699_v61 = vpop.f32.mrb[166].mxu1  ;;  %v27071_v55 = vmin.f32 %v27297_v11, 1.0  ;;  %v27299_v37 = vld [vmem:[#allocation73_spill] sm:$0xff] }
0x1bdb   :  { %v14793_v56 = vsel %vm1304_vm5, %v14792_v12, %v14791_v9  ;;  %v14794_v22 = vrot.slane %v14699_v61, 2  ;;  %v22348_v6 = vpop.f32.mrb[167].mxu1  ;;  %v27298_v12 = vld [vmem:[#allocation32_spill] sm:$0xff] }
0x1bdc   :  { %v14772_v52 = vpop.f32.mrb[182].mxu0 }
0x1bdd   :  { %v14795_v43 = vsel %vm1307_vm6, %v14794_v22, %v14793_v56  ;;  %v14796_v53 = vrot.slane %v14772_v52, 1  ;;  %v22353_v39 = vpop.f32.mrb[183].mxu0 }
0x1bdf   :  { %v14797_v29 = vsel %vm1310_vm7, %v14796_v53, %v14795_v43  ;;  %v27300_v43 = vld [vmem:[#allocation72_spill] sm:$0xff] }
0x1be0   :  { %22387 = vmatmul.mubr.f32.vlgmr.msra.gmra.mrb[168].mxu1 %v14797_v29 }
0x1be1   :  { %23451 = vmatpush3.bf16.xpose.msra.mxu1 %v27293_v23  ;;  %22422 = vmatprep.mubr.msk.f32.mxu1 %vm24072_vm0, %v27131_v10 }
0x1be2   :  { %22420 = vmatprep.subr.mxu1 %v27131_v10 }
0x1be9   :  { %22421 = vmatpush3.xpose.msra.mxu1 %v23876_v48 }
0x1bea   :  { %23455 = vmatprep.subr.bf16.mxu1 %v27130_v18 }
0x1beb   :  { %v26199_v63 = vpop.f32.mrb[184].mxu0 }
0x1bec   :  { %v22397_v42 = vpop.f32.mrb[185].mxu0  ;;  %22423 = vmatmul.mubr.f32.vlgmr.msra.gmra.mrb[170].mxu1 %v27075_v21 }
0x1bed   :  { %23457 = vmatpush3.bf16.xpose.msra.mxu1 %v27294_v35  ;;  %22440 = vmatprep.mubr.msk.f32.mxu1 %vm24072_vm0, %v27131_v10 }
0x1bee   :  { %22438 = vmatprep.subr.mxu1 %v27131_v10 }
0x1bf5   :  { %22439 = vmatpush3.xpose.msra.mxu1 %v23877_v3 }
0x1bf6   :  { %23461 = vmatprep.subr.bf16.mxu1 %v27130_v18 }
0x1bf7   :  { %v26209_v36 = vpop.f32.mrb[186].mxu0 }
0x1bf8   :  { %v22406_v19 = vpop.f32.mrb[187].mxu0  ;;  %22441 = vmatmul.mubr.f32.vlgmr.msra.gmra.mrb[172].mxu1 %v27073_v46  ;;  %v27311_v46 = vld [vmem:[#allocation43_spill] sm:$0xff] }
0x1bf9   :  { %23463 = vmatpush3.bf16.xpose.msra.mxu1 %v27296_v14  ;;  %22458 = vmatprep.mubr.msk.f32.mxu1 %vm24072_vm0, %v27131_v10 }
0x1bfa   :  { %22456 = vmatprep.subr.mxu1 %v27131_v10 }
0x1c01   :  { %22457 = vmatpush3.xpose.msra.mxu1 %v23878_v38 }
0x1c02   :  { %23467 = vmatprep.subr.bf16.mxu1 %v27130_v18 }
0x1c03   :  { %v26219_v34 = vpop.f32.mrb[188].mxu0 }
0x1c04   :  { %v22415_v9 = vpop.f32.mrb[189].mxu0  ;;  %22459 = vmatmul.mubr.f32.vlgmr.msra.gmra.mrb[174].mxu1 %v27071_v55 }
0x1c05   :  { %23469 = vmatpush3.bf16.xpose.msra.mxu1 %v27298_v12  ;;  %22476 = vmatprep.mubr.msk.f32.mxu1 %vm24072_vm0, %v27131_v10 }
0x1c06   :  { %22474 = vmatprep.subr.mxu1 %v27131_v10 }
0x1c0d   :  { %22475 = vmatpush3.xpose.msra.mxu1 %v27299_v37 }
0x1c0e   :  { %23473 = vmatprep.subr.bf16.mxu1 %v27130_v18 }
0x1c0f   :  { %v26229_v61 = vpop.f32.mrb[190].mxu0 }
0x1c10   :  { %v22433_v56 = vpop.f32.mrb[191].mxu0 }
0x1c11   :  { %v27301_v56 = vld [vmem:[#allocation17_spill] sm:$0xff] }
0x1c1b   :  { %v26231_v22 = vpop.f32.mrb[192].mxu0 }
0x1c1c   :  { %v22451_v6 = vpop.f32.mrb[193].mxu0 }
0x1cb3   :  { %v14865_v52 = vpop.f32.mrb[168].mxu1 }
0x1cb4   :  { %v14866_v53 = vadd.f32 %v27300_v43, %v14865_v52  ;;  %v22388_v39 = vpop.f32.mrb[169].mxu1  ;;  %v27302_v43 = vld [vmem:[#allocation37_spill] sm:$0xff] }
0x1cb5   :  { %v27303_v39 = vld [vmem:[#allocation38_spill] sm:$0xff] }
0x1cb6   :  { %v20106_v29 = vmul.f32 -1.442695, %v14866_v53 }
0x1cb8   :  { %23763 = vpow2.f32 %v20106_v29 }
0x1cbf   :  { %v26234_v48 = vpop.f32.mrb[170].mxu1 }
0x1cc0   :  { %v22424_v42 = vpop.f32.mrb[171].mxu1 }
0x1cc1   :  { %v23879_v42 = vld [vmem:[#allocation5 + $0x58] sm:$0xff] }
0x1cc2   :  { %v23764_v3 = vpop.eup %23763 }
0x1cc3   :  { %v14872_v19 = vadd.f32 1.0, %v23764_v3 }
0x1cc5   :  { %23765 = vrcp.f32 %v14872_v19 }
0x1ccb   :  { %v26236_v38 = vpop.f32.mrb[172].mxu1 }
0x1ccc   :  { %v22442_v9 = vpop.f32.mrb[173].mxu1 }
0x1ccd   :  { %v27305_v9 = vld [vmem:[#allocation39_spill] sm:$0xff] }
0x1ccf   :  { %v23766_v37 = vpop.eup %23765 }
0x1cd0   :  { %v15443_v55 = vrot.slane %v23766_v37, %v27301_v56  ;;  %v15436_v19 = vcombine.high %v23766_v37, %v23766_v37 }
0x1cd2   :  { %v15459_v6 = vrot.slane %v15443_v55, %v27301_v56  ;;  %v15451_v51 = vcombine.high %v15443_v55, %v15443_v55  ;;  %v27304_v55 = vld [vmem:[#allocation74_spill] sm:$0xff] }
0x1cd4   :  { %22468 = vmatmul.mubr.f32.vlgmr.msra.gmra.mrb[194].mxu0 %v15459_v6  ;;  %v15473_v52 = vrot.slane %v15451_v51, %v27301_v56  ;;  %v15481_v51 = vcombine.high %v15459_v6, %v15459_v6  ;;  %v15450_v6 = vrot.slane %v15436_v19, %v27301_v56  ;;  %v27309_v19 = vld [vmem:[#allocation42_spill] sm:$0xff] }
0x1cd5   :  { %23472 = vmatpush3.bf16.xpose.msra.mxu0 %v27302_v43  ;;  %22485 = vmatprep.mubr.msk.f32.mxu0 %vm24072_vm0, %v27131_v10 }
0x1cd6   :  { %22477 = vmatmul.mubr.f32.vlgmr.msra.gmra.mrb[176].mxu1 %v15473_v52  ;;  %22483 = vmatprep.subr.mxu0 %v27131_v10  ;;  %v15483_v3 = vcombine.high %v15473_v52, %v15473_v52  ;;  %v15452_v52 = vcombine.high %v15450_v6, %v15450_v6  ;;  %v15466_v37 = vrot.slane %v15450_v6, %v27301_v56  ;;  %v27310_v6 = vld [vmem:[#allocation76_spill] sm:$0xff] }
0x1cd7   :  { %v26245_v53 = vpop.f32.mrb[174].mxu1  ;;  %23475 = vmatpush3.bf16.xpose.msra.mxu1 %v27303_v39  ;;  %22494 = vmatprep.mubr.msk.f32.mxu1 %vm24072_vm0, %v27131_v10 }
0x1cd8   :  { %v22460_v29 = vpop.f32.mrb[175].mxu1  ;;  %22492 = vmatprep.subr.mxu1 %v27131_v10 }
0x1cd9   :  { %v27306_v29 = vld [vmem:[#allocation40_spill] sm:$0xff] }
0x1cdd   :  { %22484 = vmatpush3.xpose.msra.mxu0 %v27304_v55  ;;  %v27307_v55 = vld [vmem:[#allocation75_spill] sm:$0xff] }
0x1cde   :  { %23476 = vmatprep.subr.bf16.mxu0 %v27130_v18 }
0x1cdf   :  { %22493 = vmatpush3.xpose.msra.mxu1 %v23879_v42  ;;  %v15480_v42 = vrot.slane %v15452_v52, %v27301_v56  ;;  %v15482_v52 = vcombine.high %v15466_v37, %v15466_v37 }
0x1ce0   :  { %22486 = vmatmul.mubr.f32.vlgmr.msra.gmra.mrb[196].mxu0 %v15481_v51  ;;  %23479 = vmatprep.subr.bf16.mxu1 %v27130_v18  ;;  %v23880_v51 = vld [vmem:[#allocation5 + $0x88] sm:$0xff] }
0x1ce1   :  { %23478 = vmatpush3.bf16.xpose.msra.mxu0 %v27305_v9  ;;  %22503 = vmatprep.mubr.msk.f32.mxu0 %vm24072_vm0, %v27131_v10 }
0x1ce2   :  { %22495 = vmatmul.mubr.f32.vlgmr.msra.gmra.mrb[178].mxu1 %v15483_v3  ;;  %22501 = vmatprep.subr.mxu0 %v27131_v10  ;;  %v27308_v3 = vld [vmem:[#allocation41_spill] sm:$0xff] }
0x1ce3   :  { %23481 = vmatpush3.bf16.xpose.msra.mxu1 %v27306_v29  ;;  %22512 = vmatprep.mubr.msk.f32.mxu1 %vm24072_vm0, %v27131_v10 }
0x1ce4   :  { %22510 = vmatprep.subr.mxu1 %v27131_v10 }
0x1ce9   :  { %22502 = vmatpush3.xpose.msra.mxu0 %v27307_v55  ;;  %v23881_v55 = vld [vmem:[#allocation5 + $0xb8] sm:$0xff] }
0x1cea   :  { %23482 = vmatprep.subr.bf16.mxu0 %v27130_v18 }
0x1ceb   :  { %22511 = vmatpush3.xpose.msra.mxu1 %v23880_v51  ;;  %v15484_v51 = vcombine.high %v15480_v42, %v15480_v42 }
0x1cec   :  { %22504 = vmatmul.mubr.f32.vlgmr.msra.gmra.mrb[198].mxu0 %v15466_v37  ;;  %23485 = vmatprep.subr.bf16.mxu1 %v27130_v18  ;;  %v27313_v37 = vld [vmem:[#allocation77_spill] sm:$0xff] }
0x1ced   :  { %23484 = vmatpush3.bf16.xpose.msra.mxu0 %v27308_v3  ;;  %22521 = vmatprep.mubr.msk.f32.mxu0 %vm24072_vm0, %v27131_v10 }
0x1cee   :  { %22513 = vmatmul.mubr.f32.vlgmr.msra.gmra.mrb[180].mxu1 %v15480_v42  ;;  %22519 = vmatprep.subr.mxu0 %v27131_v10  ;;  %v23882_v42 = vld [vmem:[#allocation7 + $0x28] sm:$0xff] }
0x1cef   :  { %23487 = vmatpush3.bf16.xpose.msra.mxu1 %v27309_v19  ;;  %22530 = vmatprep.mubr.msk.f32.mxu1 %vm24072_vm0, %v27131_v10 }
0x1cf0   :  { %22528 = vmatprep.subr.mxu1 %v27131_v10 }
0x1cf5   :  { %22520 = vmatpush3.xpose.msra.mxu0 %v27310_v6 }
0x1cf6   :  { %23488 = vmatprep.subr.bf16.mxu0 %v27130_v18 }
0x1cf7   :  { %22529 = vmatpush3.xpose.msra.mxu1 %v23881_v55 }
0x1cf8   :  { %22522 = vmatmul.mubr.f32.vlgmr.msra.gmra.mrb[200].mxu0 %v15482_v52  ;;  %23491 = vmatprep.subr.bf16.mxu1 %v27130_v18 }
0x1cf9   :  { %23490 = vmatpush3.bf16.msra.mxu0 %v27311_v46  ;;  %22539 = vmatprep.mubr.msk.f32.mxu0 %vm24072_vm0, %v27131_v10 }
0x1cfa   :  { %22531 = vmatmul.mubr.f32.vlgmr.msra.gmra.mrb[182].mxu1 %v15484_v51  ;;  %22537 = vmatprep.subr.mxu0 %v27131_v10 }
0x1cfb   :  { %23493 = vmatpush3.bf16.msra.mxu1 %v27312_v26  ;;  %22548 = vmatprep.mubr.msk.f32.mxu1 %vm24072_vm0, %v27131_v10 }
0x1cfc   :  { %22546 = vmatprep.subr.mxu1 %v27131_v10 }
0x1cfd   :  { %22538 = vmatpush3.msra.mxu0 %v27313_v37  ;;  %v27315_v37 = vld [vmem:[#allocation50_spill] sm:$0xff] }
0x1cfe   :  { %23494 = vmatprep.subr.bf16.mxu0 %v27130_v18 }
0x1cff   :  { %22547 = vmatpush3.msra.mxu1 %v23882_v42  ;;  %v27317_v42 = vld [vmem:[#allocation78_spill] sm:$0xff] }
0x1d00   :  { %23497 = vmatprep.subr.bf16.mxu1 %v27130_v18 }
0x1da7   :  { %v15559_v6 = vpop.f32.mrb[194].mxu0 }
0x1da8   :  { %v16053_v52 = vmul.f32 %v15559_v6, %v26199_v63  ;;  %v22469_v55 = vpop.f32.mrb[195].mxu0  ;;  %v23883_v63 = vld [vmem:[#allocation7 + $0x40] sm:$0xff] }
0x1da9   :  { %v15629_v51 = vpop.f32.mrb[176].mxu1  ;;  %v23884_v55 = vld [vmem:[%s26902_s8] sm:$0x3f] }
0x1daa   :  { %v16054_v21 = vmul.f32 %v15629_v51, %v26209_v36  ;;  %v22478_v50 = vpop.f32.mrb[177].mxu1  ;;  %22540 = vmatmul.mubr.msk.f32.vlgmr.msra.gmra.mrb[202].mxu0 %vm3417_vm9, %v16053_v52 }
0x1dab   :  { %23496 = vmatpush3.bf16.msra.mxu0 %v27314_v41  ;;  %22557 = vmatprep.mubr.msk.f32.mxu0 %vm24072_vm0, %v27131_v10  ;;  %v27316_v50 = vld [vmem:[#allocation16_spill] sm:$0xff] }
0x1dac   :  { %22549 = vmatmul.mubr.msk.f32.vlgmr.msra.gmra.mrb[184].mxu1 %vm3417_vm9, %v16054_v21  ;;  %22555 = vmatprep.subr.mxu0 %v27131_v10  ;;  %v316_v36 = vsub.s32 5, %v27316_v50  ;;  %v27318_v50 = vld [vmem:[#allocation51_spill] sm:$0xff] }
0x1dad   :  { %23499 = vmatpush3.bf16.msra.mxu1 %v27315_v37  ;;  %22566 = vmatprep.mubr.msk.f32.mxu1 %vm24072_vm0, %v27131_v10 }
0x1dae   :  { %22564 = vmatprep.subr.mxu1 %v27131_v10  ;;  %v317_v51 = vrot.slane %v23884_v55, %v316_v36 }
0x1daf   :  { %22556 = vmatpush3.msra.mxu0 %v23883_v63 }
0x1db0   :  { %23500 = vmatprep.subr.bf16.mxu0 %v27130_v18 }
0x1db1   :  { %22565 = vmatpush3.msra.mxu1 %v27317_v42 }
0x1db2   :  { %23503 = vmatprep.subr.bf16.mxu1 %v27130_v18 }
0x1db3   :  { %v15699_v21 = vpop.f32.mrb[196].mxu0 }
0x1db4   :  { %v16055_v6 = vmul.f32 %v15699_v21, %v26219_v34  ;;  %v22487_v52 = vpop.f32.mrb[197].mxu0  ;;  %v27319_v34 = vld [vmem:[#allocation21_spill] sm:$0xff]  ;;  %v27320_v21 = vld [vmem:[#allocation52_spill] sm:$0xff] }
0x1db5   :  { %v15769_v54 = vpop.f32.mrb[178].mxu1  ;;  %v535_v42 = vadd.f32 %v27319_v34, %v317_v51  ;;  %v27323_v34 = vld [vmem:[#allocation54_spill] sm:$0xff] }
0x1db6   :  { %v16056_v63 = vmul.f32 %v15769_v54, %v26234_v48  ;;  %v22496_v11 = vpop.f32.mrb[179].mxu1  ;;  %22558 = vmatmul.mubr.msk.f32.vlgmr.msra.gmra.mrb[204].mxu0 %vm3417_vm9, %v16055_v6  ;;  %v27321_v54 = vld [vmem:[#allocation79_spill] sm:$0xff] }
0x1db7   :  { %23502 = vmatpush3.bf16.msra.mxu0 %v27318_v50  ;;  %22575 = vmatprep.mubr.msk.f32.mxu0 %vm24072_vm0, %v27131_v10  ;;  %23767 = vtanh.f32 %v535_v42  ;;  %v23885_v11 = vld [vmem:[#allocation7 + $0x88] sm:$0xff]  ;;  %v23886_v42 = vld [vmem:[#allocation7 + $0xb8] sm:$0xff] }
0x1db8   :  { %22567 = vmatmul.mubr.msk.f32.vlgmr.msra.gmra.mrb[186].mxu1 %vm3417_vm9, %v16056_v63  ;;  %22573 = vmatprep.subr.mxu0 %v27131_v10  ;;  %v27322_v63 = vld [vmem:[#allocation53_spill] sm:$0xff] }
0x1db9   :  { %23505 = vmatpush3.bf16.msra.mxu1 %v27320_v21  ;;  %22584 = vmatprep.mubr.msk.f32.mxu1 %vm24072_vm0, %v27131_v10 }
0x1dba   :  { %22582 = vmatprep.subr.mxu1 %v27131_v10 }
0x1dbb   :  { %22574 = vmatpush3.msra.mxu0 %v27321_v54 }
0x1dbc   :  { %23506 = vmatprep.subr.bf16.mxu0 %v27130_v18 }
0x1dbd   :  { %22583 = vmatpush3.msra.mxu1 %v23885_v11 }
0x1dbe   :  { %23509 = vmatprep.subr.bf16.mxu1 %v27130_v18 }
0x1dbf   :  { %v15839_v48 = vpop.f32.mrb[198].mxu0 }
0x1dc0   :  { %v16057_v36 = vmul.f32 %v15839_v48, %v26229_v61  ;;  %v22505_v6 = vpop.f32.mrb[199].mxu0 }
0x1dc1   :  { %v15909_v52 = vpop.f32.mrb[180].mxu1  ;;  %v23768_v61 = vpop.eup %23767 }
0x1dc2   :  { %v16058_v55 = vmul.f32 %v15909_v52, %v26236_v38  ;;  %v22514_v51 = vpop.f32.mrb[181].mxu1  ;;  %22576 = vmatmul.mubr.msk.f32.vlgmr.msra.gmra.mrb[206].mxu0 %vm3417_vm9, %v16057_v36  ;;  %v27324_v38 = vld [vmem:[#allocation80_spill] sm:$0xff]  ;;  %v16695_v54 = vrot.slane %v23768_v61, %v27301_v56 }
0x1dc3   :  { %23508 = vmatpush3.bf16.msra.mxu0 %v27322_v63  ;;  %22593 = vmatprep.mubr.msk.f32.mxu0 %vm24072_vm0, %v27131_v10 }
0x1dc4   :  { %22585 = vmatmul.mubr.msk.f32.vlgmr.msra.gmra.mrb[188].mxu1 %vm3417_vm9, %v16058_v55  ;;  %22591 = vmatprep.subr.mxu0 %v27131_v10  ;;  %v16711_v51 = vrot.slane %v16695_v54, %v27301_v56 }
0x1dc5   :  { %23511 = vmatpush3.bf16.msra.mxu1 %v27323_v34  ;;  %22602 = vmatprep.mubr.msk.f32.mxu1 %vm24072_vm0, %v27131_v10 }
0x1dc6   :  { %22600 = vmatprep.subr.mxu1 %v27131_v10 }
0x1dc7   :  { %22592 = vmatpush3.msra.mxu0 %v27324_v38  ;;  %v16688_v38 = vcombine.high %v23768_v61, %v23768_v61 }
0x1dc8   :  { %22605 = vmatprep.subr.mxu0 %v27131_v10 }
0x1dc9   :  { %22601 = vmatpush3.msra.mxu1 %v23886_v42  ;;  %v16702_v61 = vrot.slane %v16688_v38, %v27301_v56  ;;  %v27326_v42 = vld [vmem:[#allocation19_spill] sm:$0xff] }
0x1dca   :  { %22615 = vmatprep.subr.mxu1 %v27131_v10 }
0x1dcb   :  { %v15979_v11 = vpop.f32.mrb[200].mxu0 }
0x1dcc   :  { %v16059_v48 = vmul.f32 %v15979_v11, %v26231_v22  ;;  %v22523_v36 = vpop.f32.mrb[201].mxu0  ;;  %v16703_v22 = vcombine.high %v16695_v54, %v16695_v54  ;;  %v26368_v11 = vld [vmem:[%s26895_s1 + $0x20] sm:$0xff] }
0x1dcd   :  { %v16049_v6 = vpop.f32.mrb[182].mxu1 }
0x1dce   :  { %v16060_v52 = vmul.f32 %v16049_v6, %v26245_v53  ;;  %v22532_v55 = vpop.f32.mrb[183].mxu1  ;;  %22594 = vmatmul.mubr.msk.f32.vlgmr.msra.gmra.mrb[208].mxu0 %vm3417_vm9, %v16059_v48  ;;  %v26353_v53 = vld [vmem:[%s26895_s1 + $0x10] sm:$0xff]  ;;  %v16725_v54 = vrot.slane %v16703_v22, %v27301_v56  ;;  %v16718_v48 = vrot.slane %v16702_v61, %v27301_v56  ;;  %v16704_v6 = vcombine.high %v16702_v61, %v16702_v61  ;;  %v23892_v22 = vld [vmem:[%s26895_s1 + $0x8] sm:$0xff] }
0x1dcf   :  { %22606 = vmatpush3.xpose.msra.mxu0 %v27325_v0  ;;  %22607 = vmatprep.mubr.msk.f32.mxu0 %vm24072_vm0, %v27131_v10  ;;  %v16733_v0 = vcombine.high %v16711_v51, %v16711_v51 }
0x1dd0   :  { %22603 = vmatmul.mubr.msk.f32.vlgmr.msra.gmra.mrb[190].mxu1 %vm3417_vm9, %v16060_v52  ;;  %22610 = vmatprep.subr.mxu0 %v27131_v10  ;;  %v16735_v36 = vcombine.high %v16725_v54, %v16725_v54  ;;  %v26382_v52 = vld [vmem:[%s26895_s1 + $0x30] sm:$0xff]  ;;  %v16732_v55 = vrot.slane %v16704_v6, %v27301_v56 }
0x1dd1   :  { %22616 = vmatpush3.xpose.msra.mxu1 %v26353_v53  ;;  %22617 = vmatprep.mubr.msk.f32.mxu1 %vm24072_vm0, %v27131_v10 }
0x1dd2   :  { %22608 = vmatmul.mubr.f32.vlgmr.msra.gmra.mrb[210].mxu0 %v16711_v51  ;;  %22625 = vmatprep.subr.mxu1 %v27131_v10  ;;  %v23890_v51 = vld [vmem:[%s26895_s1] sm:$0xff]  ;;  %v16736_v38 = vcombine.high %v16732_v55, %v16732_v55 }
0x1dd3   :  { %22611 = vmatpush3.xpose.msra.mxu0 %v27326_v42  ;;  %22612 = vmatprep.mubr.msk.f32.mxu0 %vm24072_vm0, %v27131_v10 }
0x1dd4   :  { %22618 = vmatmul.mubr.f32.vlgmr.msra.gmra.mrb[192].mxu1 %v16733_v0  ;;  %22620 = vmatprep.subr.mxu0 %v27131_v10 }
0x1dd5   :  { %22626 = vmatpush3.xpose.msra.mxu1 %v26368_v11  ;;  %22627 = vmatprep.mubr.msk.f32.mxu1 %vm24072_vm0, %v27131_v10 }
0x1dd6   :  { %22613 = vmatmul.mubr.f32.vlgmr.msra.gmra.mrb[212].mxu0 %v16725_v54  ;;  %22635 = vmatprep.subr.mxu1 %v27131_v10 }
0x1dd7   :  { %22621 = vmatpush3.xpose.msra.mxu0 %v26018_v7  ;;  %22622 = vmatprep.mubr.msk.f32.mxu0 %vm24072_vm0, %v27131_v10  ;;  %v16734_v7 = vcombine.high %v16718_v48, %v16718_v48 }
0x1dd8   :  { %22628 = vmatmul.mubr.f32.vlgmr.msra.gmra.mrb[194].mxu1 %v16718_v48  ;;  %22630 = vmatprep.subr.mxu0 %v27131_v10 }
0x1dd9   :  { %22636 = vmatpush3.xpose.msra.mxu1 %v26382_v52  ;;  %22637 = vmatprep.mubr.msk.f32.mxu1 %vm24072_vm0, %v27131_v10 }
0x1dda   :  { %22623 = vmatmul.mubr.f32.vlgmr.msra.gmra.mrb[214].mxu0 %v16735_v36  ;;  %22645 = vmatprep.subr.mxu1 %v27131_v10 }
0x1ddb   :  { %22631 = vmatpush3.xpose.msra.mxu0 %v26027_v25  ;;  %22632 = vmatprep.mubr.msk.f32.mxu0 %vm24072_vm0, %v27131_v10  ;;  %v26402_v25 = vld [vmem:[%s26895_s1 + $0x38] sm:$0xff] }
0x1ddc   :  { %22638 = vmatmul.mubr.f32.vlgmr.msra.gmra.mrb[196].mxu1 %v16734_v7  ;;  %22640 = vmatprep.subr.mxu0 %v27131_v10 }
0x1ddd   :  { %22646 = vmatpush3.msra.mxu1 %v23890_v51  ;;  %22647 = vmatprep.mubr.msk.f32.mxu1 %vm24072_vm0, %v27131_v10 }
0x1dde   :  { %22633 = vmatmul.mubr.f32.vlgmr.msra.gmra.mrb[216].mxu0 %v16732_v55  ;;  %22655 = vmatprep.subr.mxu1 %v27131_v10 }
0x1ddf   :  { %22641 = vmatpush3.xpose.msra.mxu0 %v26402_v25  ;;  %22642 = vmatprep.mubr.msk.f32.mxu0 %vm24072_vm0, %v27131_v10 }
0x1de0   :  { %22650 = vmatprep.subr.mxu0 %v27131_v10 }
0x1de2   :  { %22643 = vmatmul.mubr.f32.vlgmr.msra.gmra.mrb[218].mxu0 %v16736_v38 }
0x1de3   :  { %22651 = vmatpush3.msra.mxu0 %v23892_v22  ;;  %22652 = vmatprep.mubr.msk.f32.mxu0 %vm24072_vm0, %v27131_v10 }
0x1de4   :  { %22660 = vmatprep.subr.mxu0 %v27131_v10 }
0x1e7d   :  { %v26414_v0 = vpop.f32.mrb[202].mxu0 }
0x1e7e   :  { %v22541_v61 = vpop.f32.mrb[203].mxu0 }
0x1e7f   :  { %v26416_v42 = vpop.f32.mrb[184].mxu1 }
0x1e80   :  { %v22550_v54 = vpop.f32.mrb[185].mxu1 }
0x1e89   :  { %v26418_v48 = vpop.f32.mrb[204].mxu0 }
0x1e8a   :  { %v22559_v36 = vpop.f32.mrb[205].mxu0 }
0x1e8b   :  { %v26420_v6 = vpop.f32.mrb[186].mxu1 }
0x1e8c   :  { %27327 = vst [vmem:[#allocation34_spill] sm:$0xff] %v26420_v6  ;;  %v22568_v7 = vpop.f32.mrb[187].mxu1 }
0x1e95   :  { %v26422_v55 = vpop.f32.mrb[206].mxu0 }
0x1e96   :  { %v22577_v51 = vpop.f32.mrb[207].mxu0 }
0x1e97   :  { %v26424_v38 = vpop.f32.mrb[188].mxu1 }
0x1e98   :  { %27328 = vst [vmem:[#allocation20_spill] sm:$0xff] %v26424_v38  ;;  %v22586_v22 = vpop.f32.mrb[189].mxu1 }
0x1ea1   :  { %v26426_v30 = vpop.f32.mrb[208].mxu0 }
0x1ea2   :  { %v22595_v28 = vpop.f32.mrb[209].mxu0 }
0x1ea3   :  { %v26428_v16 = vpop.f32.mrb[190].mxu1 }
0x1ea4   :  { %27329 = vst [vmem:[#allocation45_spill] sm:$0xff] %v26428_v16  ;;  %v22604_v61 = vpop.f32.mrb[191].mxu1 }
0x1ea5   :  { %v16811_v60 = vpop.f32.mrb[210].mxu0 }
0x1ea6   :  { %v22609_v54 = vpop.f32.mrb[211].mxu0 }
0x1ea7   :  { %v16951_v8 = vpop.f32.mrb[192].mxu1 }
0x1ea8   :  { %v22619_v49 = vpop.f32.mrb[193].mxu1  ;;  %v17315_v7 = vrot.slane %v16951_v8, 6 }
0x1ea9   :  { %v16881_v36 = vpop.f32.mrb[212].mxu0 }
0x1eaa   :  { %v17313_v34 = vrot.slane %v16881_v36, 7  ;;  %v22614_v63 = vpop.f32.mrb[213].mxu0 }
0x1eab   :  { %v17091_v21 = vpop.f32.mrb[194].mxu1 }
0x1eac   :  { %v17314_v51 = vsel %vm1292_vm1, %v17313_v34, %v16811_v60  ;;  %v22629_v50 = vpop.f32.mrb[195].mxu1  ;;  %v17319_v26 = vrot.slane %v17091_v21, 4 }
0x1ead   :  { %v17021_v37 = vpop.f32.mrb[214].mxu0  ;;  %v17316_v22 = vsel %vm1295_vm2, %v17315_v7, %v17314_v51 }
0x1eae   :  { %v17317_v41 = vrot.slane %v17021_v37, 5  ;;  %v22624_v28 = vpop.f32.mrb[215].mxu0 }
0x1eaf   :  { %v17231_v46 = vpop.f32.mrb[196].mxu1 }
0x1eb0   :  { %v17318_v61 = vsel %vm1298_vm3, %v17317_v41, %v17316_v22  ;;  %v22639_v54 = vpop.f32.mrb[197].mxu1  ;;  %v17323_v29 = vrot.slane %v17231_v46, 2 }
0x1eb1   :  { %v17161_v19 = vpop.f32.mrb[216].mxu0  ;;  %v17320_v49 = vsel %vm1301_vm4, %v17319_v26, %v17318_v61 }
0x1eb2   :  { %v17321_v3 = vrot.slane %v17161_v19, 3  ;;  %v22634_v63 = vpop.f32.mrb[217].mxu0 }
0x1eb4   :  { %v17322_v9 = vsel %vm1304_vm5, %v17321_v3, %v17320_v49 }
0x1eb5   :  { %v17301_v34 = vpop.f32.mrb[218].mxu0  ;;  %v17324_v50 = vsel %vm1307_vm6, %v17323_v29, %v17322_v9 }
0x1eb6   :  { %v17325_v39 = vrot.slane %v17301_v34, 1  ;;  %v22644_v7 = vpop.f32.mrb[219].mxu0 }
0x1eb8   :  { %v17326_v51 = vsel %vm1310_vm7, %v17325_v39, %v17324_v50 }
0x1eb9   :  { %v17328_v28 = vsel %vm1313_vm8, %v17326_v51, -inf }
0x1eba   :  { %17329 = vmax.xlane.f32.xlu1 %v17328_v28 }
0x1f47   :  { %v17330_v41 = vpop.xlane.xlu1 %17329 }
0x1f48   :  { %v17332_v22 = vrot.slane %v17330_v41, 1  ;;  %v17333_v54 = vrot.slane %v17330_v41, 2  ;;  %v17334_v43 = vrot.slane %v17330_v41, 3  ;;  %v17335_v26 = vrot.slane %v17330_v41, 4 }
0x1f49   :  { %v17336_v61 = vrot.slane %v17330_v41, 5  ;;  %v17337_v63 = vrot.slane %v17330_v41, 6  ;;  %v17338_v56 = vrot.slane %v17330_v41, 7  ;;  %v17347_v12 = vsub.f32 %v16811_v60, %v17330_v41 }
0x1f4a   :  { %v17348_v3 = vsub.f32 %v16881_v36, %v17332_v22  ;;  %v17349_v49 = vsub.f32 %v16951_v8, %v17333_v54  ;;  %v17350_v16 = vsub.f32 %v17021_v37, %v17334_v43  ;;  %v17351_v9 = vsub.f32 %v17091_v21, %v17335_v26  ;;  %v20026_v22 = vld [vmem:[%s26906_s12] ss:$0 sm:$0xff] }
0x1f4b   :  { %v17352_v29 = vsub.f32 %v17161_v19, %v17336_v61  ;;  %v17355_v7 = vmul.f32 1.442695, %v17347_v12  ;;  %v17353_v14 = vsub.f32 %v17231_v46, %v17337_v63  ;;  %v17354_v28 = vsub.f32 %v17301_v34, %v17338_v56 }
0x1f4c   :  { %v17357_v39 = vmul.f32 1.442695, %v17348_v3  ;;  %v17359_v50 = vmul.f32 1.442695, %v17349_v49  ;;  %v17361_v51 = vmul.f32 1.442695, %v17350_v16 }
0x1f4d   :  { %23769 = vpow2.f32 %v17355_v7  ;;  %v17363_v38 = vmul.f32 1.442695, %v17351_v9  ;;  %v17365_v35 = vmul.f32 1.442695, %v17352_v29  ;;  %v17367_v6 = vmul.f32 1.442695, %v17353_v14 }
0x1f4e   :  { %23771 = vpow2.f32 %v17357_v39  ;;  %v17369_v23 = vmul.f32 1.442695, %v17354_v28  ;;  %v27330_v3 = vld [vmem:[#allocation22_spill] sm:$0xff] }
0x1f4f   :  { %23773 = vpow2.f32 %v17359_v50  ;;  %v26449_v49 = vadd.f32 %v20026_v22, %v27330_v3 }
0x1f50   :  { %23775 = vpow2.f32 %v17361_v51 }
0x1f51   :  { %23777 = vpow2.f32 %v17363_v38  ;;  %v10626_v29 = vsel %vm10625_vm10, %v26449_v49, -inf }
0x1f52   :  { %23779 = vpow2.f32 %v17365_v35 }
0x1f53   :  { %23781 = vpow2.f32 %v17367_v6 }
0x1f54   :  { %23783 = vpow2.f32 %v17369_v23 }
0x1f57   :  { %v23770_v8 = vpop.eup %23769 }
0x1f58   :  { %v23772_v60 = vpop.eup %23771 }
0x1f59   :  { %v23774_v12 = vpop.eup %23773  ;;  %v17379_v46 = vrot.slane %v23772_v60, 7 }
0x1f5a   :  { %v23776_v43 = vpop.eup %23775  ;;  %v17381_v19 = vrot.slane %v23774_v12, 6 }
0x1f5b   :  { %v23778_v16 = vpop.eup %23777  ;;  %v17380_v56 = vsel %vm1292_vm1, %v17379_v46, %v23770_v8  ;;  %v17383_v37 = vrot.slane %v23776_v43, 5 }
0x1f5c   :  { %v23780_v21 = vpop.eup %23779  ;;  %v17382_v36 = vsel %vm1295_vm2, %v17381_v19, %v17380_v56  ;;  %v17385_v14 = vrot.slane %v23778_v16, 4 }
0x1f5d   :  { %v23782_v34 = vpop.eup %23781  ;;  %v17384_v38 = vsel %vm1298_vm3, %v17383_v37, %v17382_v36  ;;  %v17387_v35 = vrot.slane %v23780_v21, 3 }
0x1f5e   :  { %v23784_v6 = vpop.eup %23783  ;;  %v17386_v23 = vsel %vm1301_vm4, %v17385_v14, %v17384_v38  ;;  %v17389_v41 = vrot.slane %v23782_v34, 2 }
0x1f5f   :  { %v17388_v54 = vsel %vm1304_vm5, %v17387_v35, %v17386_v23  ;;  %v17391_v26 = vrot.slane %v23784_v6, 1 }
0x1f60   :  { %v17390_v61 = vsel %vm1307_vm6, %v17389_v41, %v17388_v54 }
0x1f61   :  { %v17392_v63 = vsel %vm1310_vm7, %v17391_v26, %v17390_v61 }
0x1f62   :  { %v17394_v9 = vsel %vm1313_vm8, %v17392_v63, 0.0 }
0x1f63   :  { %17395 = vadd.xlane.f32.xlu0 %v17394_v9 }
0x1f67   :  { %10627 = vmax.xlane.f32.xlu0 %v10626_v29 }
0x1ff0   :  { %v17396_v7 = vpop.xlane.xlu0 %17395 }
0x1ff1   :  { %23785 = vrcp.f32 %v17396_v7 }
0x1ffb   :  { %v23786_v39 = vpop.eup %23785 }
0x1ffc   :  { %v17399_v50 = vrot.slane %v23786_v39, 1  ;;  %v17400_v51 = vrot.slane %v23786_v39, 2  ;;  %v17401_v28 = vrot.slane %v23786_v39, 3  ;;  %v17402_v46 = vrot.slane %v23786_v39, 4 }
0x1ffd   :  { %v17403_v19 = vrot.slane %v23786_v39, 5  ;;  %v17404_v56 = vrot.slane %v23786_v39, 6  ;;  %v17405_v37 = vrot.slane %v23786_v39, 7  ;;  %v17414_v36 = vmul.f32 %v23786_v39, %v23770_v8  ;;  %v23893_v8 = vld [vmem:[%s26896_s2] sm:$0xff]  ;;  %s24074_s2 = smov 125  }
0x1ffe   :  { %v17415_v14 = vmul.f32 %v23772_v60, %v17399_v50  ;;  %v17416_v38 = vmul.f32 %v23774_v12, %v17400_v51  ;;  %v17417_v35 = vmul.f32 %v23776_v43, %v17401_v28  ;;  %v17418_v23 = vmul.f32 %v23778_v16, %v17402_v46  ;;  %v10628_v50 = vpop.xlane.xlu0 %10627 }
0x1fff   :  { %v17419_v41 = vmul.f32 %v23780_v21, %v17403_v19  ;;  %v17420_v22 = vmul.f32 %v23782_v34, %v17404_v56  ;;  %v17421_v54 = vmul.f32 %v23784_v6, %v17405_v37  ;;  %v17422_v60 = vmul.f32 %v23893_v8, %v17414_v36 }
0x2000   :  { %v17423_v26 = vmul.f32 %v17415_v14, %v24436_v57  ;;  %v17424_v61 = vmul.f32 %v17416_v38, %v24438_v62  ;;  %v17425_v63 = vmul.f32 %v17417_v35, %v24440_v1  ;;  %v26457_v3 = vmul.f32 %v17418_v23, %v24442_v2 }
0x2001   :  { %v26463_v12 = vmul.f32 %v17419_v41, %v24444_v4  ;;  %v26466_v21 = vmul.f32 %v17420_v22, %v24446_v31  ;;  %v26469_v57 = vmul.f32 %v17421_v54, %v24448_v32  ;;  %v10629_v28 = vsub.f32 %v26449_v49, %v10628_v50 }
0x2002   :  { %v17438_v43 = vrot.slane %v17423_v26, 7  ;;  %v17440_v16 = vrot.slane %v17424_v61, 6  ;;  %v17442_v1 = vrot.slane %v17425_v63, 5  ;;  %v17444_v34 = vrot.slane %v26457_v3, 4 }
0x2003   :  { %v17446_v4 = vrot.slane %v26463_v12, 3  ;;  %v17448_v29 = vrot.slane %v26466_v21, 2  ;;  %v17450_v32 = vrot.slane %v26469_v57, 1  ;;  %v637_v46 = vsel %vm636_vm11, %v26449_v49, -inf }
0x2004   :  { %v17439_v62 = vsel %vm1292_vm1, %v17438_v43, %v17422_v60  ;;  %v10630_v19 = vmul.f32 1.442695, %v10629_v28  ;;  %v24078_v28 = vmov 5  }
0x2005   :  { %v17441_v2 = vsel %vm1295_vm2, %v17440_v16, %v17439_v62 }
0x2006   :  { %v17443_v6 = vsel %vm1298_vm3, %v17442_v1, %v17441_v2  ;;  %23787 = vpow2.f32 %v10630_v19 }
0x2007   :  { %v17445_v9 = vsel %vm1301_vm4, %v17444_v34, %v17443_v6  ;;  %v23895_v34 = vld [vmem:[%s26895_s1 + $0x28] sm:$0xff] }
0x2008   :  { %v17447_v31 = vsel %vm1304_vm5, %v17446_v4, %v17445_v9 }
0x2009   :  { %v17449_v7 = vsel %vm1307_vm6, %v17448_v29, %v17447_v31 }
0x200a   :  { %v17451_v39 = vsel %vm1310_vm7, %v17450_v32, %v17449_v7 }
0x200b   :  { %v17453_v51 = vsel %vm1313_vm8, %v17451_v39, 0.0 }
0x200c   :  { %17454 = vadd.xlane.f32.xlu1 %v17453_v51 }
0x2010   :  { %638 = vmax.xlane.f32.xlu1 %v637_v46  ;;  %v26486_v56 = vpop.eup %23787  ;;  %v24079_v46 = vmov 3  }
0x2021   :  { %10633 = vrot.lane.b32.xlu1 %v26486_v56, %s24074_s2 }
0x2099   :  { %v17455_v37 = vpop.xlane.xlu1 %17454 }
0x209a   :  { %v17456_v36 = vadd.f32 1e-06, %v17455_v37 }
0x209c   :  { %23789 = vrcp.f32 %v17456_v36 }
0x209d   :  { %v639_v14 = vpop.xlane.xlu1 %638 }
0x209e   :  { %v640_v38 = vsub.f32 %v26449_v49, %v639_v14 }
0x20a0   :  { %v641_v35 = vmul.f32 1.442695, %v640_v38 }
0x20a2   :  { %23791 = vpow2.f32 %v641_v35 }
0x20a6   :  { %v23790_v23 = vpop.eup %23789 }
0x20a7   :  { %v17474_v41 = vmul.f32 %v23790_v23, %v17422_v60  ;;  %v17459_v22 = vrot.slane %v23790_v23, 1  ;;  %v17460_v54 = vrot.slane %v23790_v23, 2  ;;  %v17461_v43 = vrot.slane %v23790_v23, 3  ;;  %v23894_v60 = vld [vmem:[%s26895_s1 + $0x18] sm:$0xff] }
0x20a8   :  { %v17462_v49 = vrot.slane %v23790_v23, 4  ;;  %v17464_v2 = vrot.slane %v23790_v23, 6 }
0x20a9   :  { %22648 = vmatmul.mubr.msk.f32.vlgmr.msra.gmra.mrb[198].mxu1 %vm1313_vm8, %v17474_v41  ;;  %v17475_v8 = vmul.f32 %v17459_v22, %v17423_v26  ;;  %v17476_v16 = vmul.f32 %v17460_v54, %v17424_v61  ;;  %v17477_v26 = vmul.f32 %v17461_v43, %v17425_v63  ;;  %v17463_v61 = vrot.slane %v23790_v23, 5 }
0x20aa   :  { %22656 = vmatpush3.msra.mxu1 %v26353_v53  ;;  %22657 = vmatprep.mubr.msk.f32.mxu1 %vm24072_vm0, %v27131_v10  ;;  %v17478_v1 = vmul.f32 %v17462_v49, %v26457_v3  ;;  %v17465_v63 = vrot.slane %v23790_v23, 7  ;;  %v17480_v3 = vmul.f32 %v17464_v2, %v26466_v21 }
0x20ab   :  { %22653 = vmatmul.mubr.msk.f32.vlgmr.msra.gmra.mrb[220].mxu0 %vm1313_vm8, %v17475_v8  ;;  %22665 = vmatprep.subr.mxu1 %v27131_v10 }
0x20ac   :  { %v26496_v62 = vpop.eup %23791  ;;  %22661 = vmatpush3.msra.mxu0 %v23894_v60  ;;  %22662 = vmatprep.mubr.msk.f32.mxu0 %vm24072_vm0, %v27131_v10 }
0x20ad   :  { %22658 = vmatmul.mubr.msk.f32.vlgmr.msra.gmra.mrb[200].mxu1 %vm1313_vm8, %v17476_v16  ;;  %22670 = vmatprep.subr.mxu0 %v27131_v10  ;;  %v643_v53 = vsel %vm636_vm11, %v26496_v62, 0.0 }
0x20ae   :  { %22666 = vmatpush3.msra.mxu1 %v26368_v11  ;;  %644 = vadd.xlane.f32.xlu0 %v643_v53  ;;  %v17479_v11 = vmul.f32 %v17463_v61, %v26463_v12  ;;  %v17481_v12 = vmul.f32 %v17465_v63, %v26469_v57  ;;  %v24077_v57 = vmov 2   ;;  %v27332_v63 = vld [vmem:[#allocation34_spill] sm:$0xff] }
0x20af   :  { %22663 = vmatmul.mubr.msk.f32.vlgmr.msra.gmra.mrb[222].mxu0 %vm1313_vm8, %v17477_v26  ;;  %22667 = vmatprep.mubr.msk.f32.mxu1 %vm24072_vm0, %v27131_v10 }
0x20b0   :  { %22671 = vmatpush3.msra.mxu0 %v23895_v34  ;;  %22675 = vmatprep.subr.mxu1 %v27131_v10  ;;  %v27331_v34 = vld [vmem:[#allocation27_spill] sm:$0xff] }
0x20b1   :  { %22668 = vmatmul.mubr.msk.f32.vlgmr.msra.gmra.mrb[202].mxu1 %vm1313_vm8, %v17478_v1  ;;  %22672 = vmatprep.mubr.msk.f32.mxu0 %vm24072_vm0, %v27131_v10 }
0x20b2   :  { %22676 = vmatpush3.msra.mxu1 %v26382_v52  ;;  %22680 = vmatprep.subr.mxu0 %v27131_v10  ;;  %v24075_v52 = vmov 1  }
0x20b3   :  { %22673 = vmatmul.mubr.msk.f32.vlgmr.msra.gmra.mrb[224].mxu0 %vm1313_vm8, %v17479_v11  ;;  %22677 = vmatprep.mubr.msk.f32.mxu1 %vm24072_vm0, %v27131_v10  ;;  %v23902_v11 = vld [vmem:[#allocation2 + $0x58] sm:$0xff] }
0x20b4   :  { %22681 = vmatpush3.msra.mxu0 %v26402_v25  ;;  %22682 = vmatprep.mubr.msk.f32.mxu0 %vm24072_vm0, %v27131_v10  ;;  %v24076_v25 = vmov 0  }
0x20b5   :  { %22678 = vmatmul.mubr.msk.f32.vlgmr.msra.gmra.mrb[204].mxu1 %vm1313_vm8, %v17480_v3  ;;  %23536 = vmatprep.subr.bf16.mxu0 %v27130_v18  ;;  %v16648_v3 = vmin.f32 %v27332_v63, 1.0 }
0x20b6   :  { %23512 = vmatprep.subr.bf16.mxu1 %v27130_v18  ;;  %22717 = vmatprep.mubr.msk.f32.mxu1 %vm24072_vm0, %v27131_v10 }
0x20b7   :  { %22683 = vmatmul.mubr.msk.f32.vlgmr.msra.gmra.mrb[226].mxu0 %vm1313_vm8, %v17481_v12  ;;  %23514 = vmatpush3.bf16.msra.mxu1 %v25766_v40  ;;  %v23896_v40 = vld [vmem:[#allocation2 + $0x10] sm:$0xff] }
0x20b8   :  { %22726 = vmatprep.mubr.msk.f32.mxu0 %vm24072_vm0, %v27131_v10  ;;  %23515 = vmatprep.subr.bf16.mxu1 %v27130_v18 }
0x20b9   :  { %23630 = vset.pattern.permute.xlu1 %v24075_v52  ;;  %23629 = vset.pattern.permute.xlu0 %v24076_v25  ;;  %v27333_v25 = vld [vmem:[#allocation28_spill] sm:$0xff] }
0x20bb   :  { %23538 = vmatpush3.bf16.xpose.msra.mxu0 %v27288_v44  ;;  %23517 = vmatpush3.bf16.msra.mxu1 %v25782_v27  ;;  %v16645_v44 = vmin.f32 %v26414_v0, 1.0  ;;  %v23897_v27 = vld [vmem:[#allocation2 + $0x28] sm:$0xff] }
0x20bc   :  { %22724 = vmatprep.subr.mxu0 %v27131_v10  ;;  %23518 = vmatprep.subr.bf16.mxu1 %v27130_v18 }
0x20bf   :  { %23520 = vmatpush3.bf16.msra.mxu1 %v25791_v15  ;;  %v16646_v15 = vmin.f32 %v26416_v42, 1.0 }
0x20c0   :  { %23521 = vmatprep.subr.bf16.mxu1 %v27130_v18 }
0x20c3   :  { %22725 = vmatpush3.xpose.msra.mxu0 %v23896_v40  ;;  %23523 = vmatpush3.bf16.msra.mxu1 %v25797_v13  ;;  %v23898_v13 = vld [vmem:[#allocation2 + $0x40] sm:$0xff]  ;;  %v23903_v40 = vld [vmem:[#allocation2 + $0x88] sm:$0xff] }
0x20c4   :  { %23539 = vmatprep.subr.bf16.mxu0 %v27130_v18  ;;  %23524 = vmatprep.subr.bf16.mxu1 %v27130_v18 }
0x20c6   :  { %22727 = vmatmul.mubr.f32.vlgmr.msra.gmra.mrb[228].mxu0 %v16645_v44 }
0x20c7   :  { %23541 = vmatpush3.bf16.xpose.msra.mxu0 %v27289_v59  ;;  %22735 = vmatprep.mubr.msk.f32.mxu0 %vm24072_vm0, %v27131_v10  ;;  %v27092_v59 = vmin.f32 %v26426_v30, 1.0 }
0x20c8   :  { %22733 = vmatprep.subr.mxu0 %v27131_v10  ;;  %23526 = vmatpush3.bf16.msra.mxu1 %v25806_v58  ;;  %v16647_v58 = vmin.f32 %v26418_v48, 1.0 }
0x20c9   :  { %23527 = vmatprep.subr.bf16.mxu1 %v27130_v18 }
0x20cc   :  { %23529 = vmatpush3.bf16.msra.mxu1 %v25810_v33  ;;  %v23899_v33 = vld [vmem:[#allocation2 + $0x70] sm:$0xff] }
0x20cd   :  { %23530 = vmatprep.subr.bf16.mxu1 %v27130_v18 }
0x20cf   :  { %22734 = vmatpush3.xpose.msra.mxu0 %v23897_v27  ;;  %v27334_v27 = vld [vmem:[#allocation20_spill] sm:$0xff] }
0x20d0   :  { %23542 = vmatprep.subr.bf16.mxu0 %v27130_v18  ;;  %23532 = vmatpush3.bf16.msra.mxu1 %v25814_v20  ;;  %v16649_v20 = vmin.f32 %v26422_v55, 1.0 }
0x20d1   :  { %23533 = vmatprep.subr.bf16.mxu1 %v27130_v18 }
0x20d2   :  { %22736 = vmatmul.mubr.f32.vlgmr.msra.gmra.mrb[230].mxu0 %v16646_v15 }
0x20d3   :  { %23544 = vmatpush3.bf16.xpose.msra.mxu0 %v27290_v5  ;;  %22744 = vmatprep.mubr.msk.f32.mxu0 %vm24072_vm0, %v27131_v10  ;;  %v23901_v5 = vld [vmem:[#allocation5 + $0x10] sm:$0xff] }
0x20d4   :  { %22742 = vmatprep.subr.mxu0 %v27131_v10  ;;  %23535 = vmatpush3.bf16.msra.mxu1 %v25817_v17  ;;  %v23900_v17 = vld [vmem:[#allocation2 + $0xa0] sm:$0xff] }
0x20d5   :  { %23545 = vmatprep.subr.bf16.mxu1 %v27130_v18 }
0x20db   :  { %22743 = vmatpush3.xpose.msra.mxu0 %v23898_v13  ;;  %v16650_v13 = vmin.f32 %v27334_v27, 1.0 }
0x20dc   :  { %23548 = vmatprep.subr.bf16.mxu0 %v27130_v18 }
0x20de   :  { %22745 = vmatmul.mubr.f32.vlgmr.msra.gmra.mrb[232].mxu0 %v16647_v58 }
0x20df   :  { %23550 = vmatpush3.bf16.xpose.msra.mxu0 %v27291_v47  ;;  %22762 = vmatprep.mubr.msk.f32.mxu0 %vm24072_vm0, %v27131_v10 }
0x20e0   :  { %22760 = vmatprep.subr.mxu0 %v27131_v10 }
0x20e7   :  { %22761 = vmatpush3.xpose.msra.mxu0 %v23899_v33 }
0x20e8   :  { %23554 = vmatprep.subr.bf16.mxu0 %v27130_v18 }
0x20ea   :  { %22763 = vmatmul.mubr.f32.vlgmr.msra.gmra.mrb[234].mxu0 %v16649_v20 }
0x20eb   :  { %23556 = vmatpush3.bf16.xpose.msra.mxu0 %v27292_v24  ;;  %22780 = vmatprep.mubr.msk.f32.mxu0 %vm24072_vm0, %v27131_v10 }
0x20ec   :  { %22778 = vmatprep.subr.mxu0 %v27131_v10 }
0x20f3   :  { %22779 = vmatpush3.xpose.msra.mxu0 %v23900_v17 }
0x20f4   :  { %23560 = vmatprep.subr.bf16.mxu0 %v27130_v18 }
0x20f6   :  { %22781 = vmatmul.mubr.f32.vlgmr.msra.gmra.mrb[236].mxu0 %v27092_v59 }
0x20f7   :  { %23562 = vmatpush3.bf16.xpose.msra.mxu0 %v27204_v45  ;;  %22798 = vmatprep.mubr.msk.f32.mxu0 %vm24072_vm0, %v27131_v10  ;;  %v10634_v45 = vpop.permute.xlu1 %10633 }
0x20f8   :  { %22796 = vmatprep.subr.mxu0 %v27131_v10  ;;  %v10636_v6 = vsel %vm636_vm11, %v10634_v45, 0.0 }
0x20ff   :  { %22797 = vmatpush3.xpose.msra.mxu0 %v23901_v5  ;;  %v27335_v5 = vld [vmem:[#allocation30_spill] sm:$0xff] }
0x2100   :  { %23566 = vmatprep.subr.bf16.mxu0 %v27130_v18 }
0x213b   :  { %v645_v47 = vpop.xlane.xlu0 %644 }
0x213c   :  { %23793 = vrcp.f32 %v645_v47  ;;  %v23904_v47 = vld [vmem:[#allocation2 + $0xb8] sm:$0xff] }
0x2146   :  { %v23794_v24 = vpop.eup %23793 }
0x2147   :  { %v647_v21 = vmul.f32 %v23794_v24, %v26496_v62  ;;  %v27336_v24 = vld [vmem:[#allocation45_spill] sm:$0xff] }
0x2149   :  { %7302 = vperm.xlu1 %23630, %v647_v21   ;;  %4012 = vperm.xlu0 %23629, %v647_v21  }
0x214d   :  { %23631 = vset.pattern.permute.xlu1 %v24077_v57  ;;  %23632 = vset.pattern.permute.xlu0 %v24079_v46  ;;  %v27341_v46 = vld [vmem:[#allocation67_spill] sm:$0xff] }
0x214e   :  { %10592 = vperm.xlu1 %23631, %v647_v21   ;;  %v27091_v21 = vmin.f32 %v27336_v24, 1.0 }
0x2152   :  { %23634 = vset.pattern.permute.xlu1 %v24078_v28 }
0x2172   :  { %10637 = vadd.xlane.f32.xlu1 %v10636_v6  ;;  %v27337_v6 = vld [vmem:[#allocation32_spill] sm:$0xff] }
0x217c   :  { %v17551_v4 = vpop.f32.mrb[198].mxu1 }
0x217d   :  { %v22649_v9 = vpop.f32.mrb[199].mxu1 }
0x217e   :  { %v17624_v29 = vpop.f32.mrb[220].mxu0 }
0x217f   :  { %v18074_v31 = vrot.slane %v17624_v29, 7  ;;  %v22654_v32 = vpop.f32.mrb[221].mxu0 }
0x2180   :  { %v17697_v7 = vpop.f32.mrb[200].mxu1 }
0x2181   :  { %v18075_v39 = vsel %vm1292_vm1, %v18074_v31, %v17551_v4  ;;  %v18076_v50 = vrot.slane %v17697_v7, 6  ;;  %v22659_v51 = vpop.f32.mrb[201].mxu1  ;;  %v23905_v4 = vld [vmem:[#allocation5 + $0x28] sm:$0xff]  ;;  %v27338_v31 = vld [vmem:[#allocation31_spill] sm:$0xff]  ;;  %v27339_v7 = vld [vmem:[#allocation65_spill] sm:$0xff] }
0x2182   :  { %v17770_v19 = vpop.f32.mrb[222].mxu0  ;;  %v10583_v32 = vmin.f32 %v27338_v31, 1.0  ;;  %v27354_v31 = vld [vmem:[#allocation59_spill] sm:$0xff] }
0x2183   :  { %v18077_v37 = vsel %vm1295_vm2, %v18076_v50, %v18075_v39  ;;  %v18078_v36 = vrot.slane %v17770_v19, 5  ;;  %v22664_v14 = vpop.f32.mrb[223].mxu0  ;;  %v10584_v39 = vmin.f32 %v27339_v7, 1.0  ;;  %v27340_v50 = vld [vmem:[#allocation66_spill] sm:$0xff]  ;;  %v10586_v19 = vmin.f32 %v27341_v46, 1.0  ;;  %v27356_v46 = vld [vmem:[#allocation87_spill] sm:$0xff] }
0x2184   :  { %v17843_v38 = vpop.f32.mrb[202].mxu1  ;;  %v10585_v51 = vmin.f32 %v27340_v50, 1.0  ;;  %v27343_v14 = vld [vmem:[#allocation69_spill] sm:$0xff]  ;;  %v27355_v7 = vmin.f32 %v27354_v31, 1.0 }
0x2185   :  { %v18079_v35 = vsel %vm1298_vm3, %v18078_v36, %v18077_v37  ;;  %v18080_v23 = vrot.slane %v17843_v38, 4  ;;  %v22669_v41 = vpop.f32.mrb[203].mxu1  ;;  %v27342_v37 = vld [vmem:[#allocation68_spill] sm:$0xff]  ;;  %v10588_v38 = vmin.f32 %v27343_v14, 1.0 }
0x2186   :  { %v17916_v22 = vpop.f32.mrb[224].mxu0  ;;  %v10587_v36 = vmin.f32 %v27342_v37, 1.0  ;;  %v27345_v41 = vld [vmem:[#allocation71_spill] sm:$0xff]  ;;  %v27357_v37 = vmin.f32 %v27356_v46, 1.0 }
0x2187   :  { %v18081_v54 = vsel %vm1301_vm4, %v18080_v23, %v18079_v35  ;;  %v18082_v8 = vrot.slane %v17916_v22, 3  ;;  %v22674_v43 = vpop.f32.mrb[225].mxu0  ;;  %v27344_v35 = vld [vmem:[#allocation70_spill] sm:$0xff]  ;;  %v10590_v22 = vmin.f32 %v27345_v41, 1.0  ;;  %v23906_v41 = vld [vmem:[%s26904_s10 + $0x1] ss:$0 sm:$0xff] }
0x2188   :  { %v17989_v16 = vpop.f32.mrb[204].mxu1  ;;  %v10589_v23 = vmin.f32 %v27344_v35, 1.0  ;;  %v27358_v35 = vld [vmem:[#allocation60_spill] sm:$0xff]  ;;  %s24081_s10 = smov [#allocation11]  }
0x2189   :  { %v18083_v49 = vsel %vm1304_vm5, %v18082_v8, %v18081_v54  ;;  %v18084_v62 = vrot.slane %v17989_v16, 2  ;;  %v22679_v60 = vpop.f32.mrb[205].mxu1  ;;  %v27346_v16 = vld [vmem:[#allocation57_spill] sm:$0xff]  ;;  %s20015_s5 = sshll.u32 %s24081_s10, 4  ;;  %s20016_s5 = int_to_ptr.vmem [resolvable:$true] %s20015_s5 }
0x218a   :  { %v18062_v53 = vpop.f32.mrb[226].mxu0  ;;  %v27348_v60 = vld [vmem:[#allocation85_spill] sm:$0xff]  ;;  %s24031_s26 = scalar_lea.vmem %s20016_s5, 128  ;;  %p24036_p13 = scmp.lt.s32.totalorder %s20016_s5, %s20016_s5 }
0x218b   :  { %v18085_v26 = vsel %vm1307_vm6, %v18084_v62, %v18083_v49  ;;  %v18086_v61 = vrot.slane %v18062_v53, 1  ;;  %v22684_v1 = vpop.f32.mrb[227].mxu0  ;;  %v27347_v49 = vmin.f32 %v27346_v16, 1.0  ;;  %v27349_v53 = vmin.f32 %v27348_v60, 1.0  ;;  %v27360_v60 = vld [vmem:[#allocation88_spill] sm:$0xff]  ;;  %p24032_p12 = scmp.ne.s32.totalorder %s20016_s5, %s24031_s26  ;;  %p24037_p0 = scmp.lt.s32.totalorder %s24031_s26, %s24031_s26 }
0x218c   :  { %v27359_v16 = vmin.f32 %v27358_v35, 1.0 }
0x218d   :  { %v18087_v2 = vsel %vm1310_vm7, %v18086_v61, %v18085_v26  ;;  %p24038_p1 = por %p24037_p0, %p24036_p13 }
0x218e   :  { %22718 = vmatmul.mubr.f32.vlgmr.msra.gmra.mrb[206].mxu1 %v18087_v2 }
0x218f   :  { %23547 = vmatpush3.bf16.xpose.msra.mxu1 %v27331_v34  ;;  %22753 = vmatprep.mubr.msk.f32.mxu1 %vm24072_vm0, %v27131_v10  ;;  %p24039_p2 = pnand %p24038_p1, %p24032_p12 }
0x2190   :  { %22751 = vmatprep.subr.mxu1 %v27131_v10 }
0x2197   :  { %22752 = vmatpush3.xpose.msra.mxu1 %v23902_v11 }
0x2198   :  { %23551 = vmatprep.subr.bf16.mxu1 %v27130_v18 }
0x2199   :  { %v26613_v12 = vpop.f32.mrb[228].mxu0 }
0x219a   :  { %v22728_v52 = vpop.f32.mrb[229].mxu0  ;;  %22754 = vmatmul.mubr.f32.vlgmr.msra.gmra.mrb[208].mxu1 %v16648_v3 }
0x219b   :  { %23553 = vmatpush3.bf16.xpose.msra.mxu1 %v27333_v25  ;;  %22771 = vmatprep.mubr.msk.f32.mxu1 %vm24072_vm0, %v27131_v10 }
0x219c   :  { %22769 = vmatprep.subr.mxu1 %v27131_v10 }
0x21a3   :  { %22770 = vmatpush3.xpose.msra.mxu1 %v23903_v40 }
0x21a4   :  { %23557 = vmatprep.subr.bf16.mxu1 %v27130_v18 }
0x21a5   :  { %v26623_v33 = vpop.f32.mrb[230].mxu0 }
0x21a6   :  { %v22737_v17 = vpop.f32.mrb[231].mxu0  ;;  %22772 = vmatmul.mubr.f32.vlgmr.msra.gmra.mrb[210].mxu1 %v16650_v13 }
0x21a7   :  { %23559 = vmatpush3.bf16.xpose.msra.mxu1 %v27335_v5  ;;  %22789 = vmatprep.mubr.msk.f32.mxu1 %vm24072_vm0, %v27131_v10  ;;  %v27350_v17 = vld [vmem:[#allocation58_spill] sm:$0xff] }
0x21a8   :  { %22787 = vmatprep.subr.mxu1 %v27131_v10  ;;  %v27351_v5 = vmin.f32 %v27350_v17, 1.0  ;;  %v27362_v17 = vld [vmem:[#allocation61_spill] sm:$0xff] }
0x21af   :  { %22788 = vmatpush3.xpose.msra.mxu1 %v23904_v47 }
0x21b0   :  { %23563 = vmatprep.subr.bf16.mxu1 %v27130_v18 }
0x21b1   :  { %v26633_v57 = vpop.f32.mrb[232].mxu0 }
0x21b2   :  { %v22746_v45 = vpop.f32.mrb[233].mxu0  ;;  %22790 = vmatmul.mubr.f32.vlgmr.msra.gmra.mrb[212].mxu1 %v27091_v21 }
0x21b3   :  { %23565 = vmatpush3.bf16.xpose.msra.mxu1 %v27337_v6  ;;  %22807 = vmatprep.mubr.msk.f32.mxu1 %vm24072_vm0, %v27131_v10  ;;  %v27352_v45 = vld [vmem:[#allocation86_spill] sm:$0xff] }
0x21b4   :  { %22805 = vmatprep.subr.mxu1 %v27131_v10  ;;  %v27353_v6 = vmin.f32 %v27352_v45, 1.0 }
0x21bb   :  { %22806 = vmatpush3.xpose.msra.mxu1 %v23905_v4 }
0x21bc   :  { %23569 = vmatprep.subr.bf16.mxu1 %v27130_v18 }
0x21bd   :  { %v26642_v9 = vpop.f32.mrb[234].mxu0 }
0x21be   :  { %v22764_v29 = vpop.f32.mrb[235].mxu0 }
0x21c8   :  { %v7303_v54 = vpop.permute.xlu1 %7302  ;;  %v4013_v8 = vpop.permute.xlu0 %4012 }
0x21c9   :  { %v26652_v43 = vpop.f32.mrb[236].mxu0  ;;  %v4029_v62 = vmul.f32 %v4013_v8, %v27347_v49  ;;  %v7319_v26 = vmul.f32 %v7303_v54, %v27349_v53  ;;  %v4014_v61 = vrot.slane %v4013_v8, 1  ;;  %v7304_v1 = vrot.slane %v7303_v54, 1 }
0x21ca   :  { %v22782_v2 = vpop.f32.mrb[237].mxu0  ;;  %v4015_v34 = vrot.slane %v4013_v8, 2  ;;  %v7305_v11 = vrot.slane %v7303_v54, 2  ;;  %v4016_v52 = vrot.slane %v4013_v8, 3  ;;  %v7306_v25 = vrot.slane %v7303_v54, 3 }
0x21cb   :  { %v7327_v40 = vadd.f32 %v7319_v26, %v4029_v62  ;;  %v4030_v47 = vmul.f32 %v4014_v61, %v27351_v5  ;;  %v7320_v4 = vmul.f32 %v7304_v1, %v27353_v6  ;;  %v4017_v29 = vrot.slane %v4013_v8, 4 }
0x21cc   :  { %v4031_v50 = vmul.f32 %v4015_v34, %v27355_v7  ;;  %v7321_v14 = vmul.f32 %v7305_v11, %v27357_v37  ;;  %v4032_v49 = vmul.f32 %v4016_v52, %v27359_v16  ;;  %v27361_v53 = vmin.f32 %v27360_v60, 1.0  ;;  %v27364_v11 = vld [vmem:[#allocation89_spill] sm:$0xff] }
0x21cd   :  { %v10593_v62 = vpop.permute.xlu1 %10592  ;;  %v7328_v26 = vadd.f32 %v7320_v4, %v4030_v47  ;;  %v27363_v61 = vmin.f32 %v27362_v17, 1.0  ;;  %v7307_v45 = vrot.slane %v7303_v54, 4  ;;  %v4018_v1 = vrot.slane %v4013_v8, 5  ;;  %v27366_v47 = vld [vmem:[#allocation62_spill] sm:$0xff] }
0x21ce   :  { %v7322_v2 = vmul.f32 %v7306_v25, %v27361_v53  ;;  %v10609_v6 = vmul.f32 %v10593_v62, %v10583_v32  ;;  %v10594_v21 = vrot.slane %v10593_v62, 1  ;;  %v7329_v31 = vadd.f32 %v7321_v14, %v4031_v50 }
0x21cf   :  { %v4033_v5 = vmul.f32 %v4017_v29, %v27363_v61  ;;  %v10595_v34 = vrot.slane %v10593_v62, 2  ;;  %v10596_v46 = vrot.slane %v10593_v62, 3  ;;  %v27365_v37 = vmin.f32 %v27364_v11, 1.0 }
0x21d0   :  { %v7330_v7 = vadd.f32 %v7322_v2, %v4032_v49  ;;  %v10597_v52 = vrot.slane %v10593_v62, 4  ;;  %v26674_v16 = vadd.f32 %v10609_v6, %v7327_v40  ;;  %v10610_v25 = vmul.f32 %v10594_v21, %v10584_v39  ;;  %v27368_v40 = vld [vmem:[#allocation90_spill] sm:$0xff] }
0x21d1   :  { %v7323_v35 = vmul.f32 %v7307_v45, %v27365_v37  ;;  %v10611_v60 = vmul.f32 %v10595_v34, %v10585_v51  ;;  %v27367_v4 = vmin.f32 %v27366_v47, 1.0  ;;  %v10612_v29 = vmul.f32 %v10596_v46, %v10586_v19  ;;  %v27372_v46 = vld [vmem:[#allocation91_spill] sm:$0xff] }
0x21d2   :  { %v10613_v61 = vmul.f32 %v10597_v52, %v10587_v36  ;;  %v7308_v32 = vrot.slane %v7303_v54, 5  ;;  %v26678_v59 = vadd.f32 %v10610_v25, %v7328_v26  ;;  %v10598_v14 = vrot.slane %v10593_v62, 5  ;;  %v27374_v52 = vld [vmem:[#allocation64_spill] sm:$0xff] }
0x21d3   :  { %v4034_v53 = vmul.f32 %v4018_v1, %v27367_v4  ;;  %v7331_v17 = vadd.f32 %v7323_v35, %v4033_v5  ;;  %v26680_v50 = vadd.f32 %v10611_v60, %v7329_v31  ;;  %v4019_v49 = vrot.slane %v4013_v8, 6  ;;  %v27370_v1 = vld [vmem:[#allocation63_spill] sm:$0xff] }
0x21d4   :  { %v26682_v2 = vadd.f32 %v10612_v29, %v7330_v7  ;;  %v27369_v21 = vmin.f32 %v27368_v40, 1.0  ;;  %v7309_v51 = vrot.slane %v7303_v54, 6  ;;  %v10614_v6 = vmul.f32 %v10598_v14, %v10588_v38  ;;  %v27376_v29 = vld [vmem:[#allocation92_spill] sm:$0xff] }
0x21d5   :  { %v26684_v45 = vadd.f32 %v10613_v61, %v7331_v17  ;;  %v27371_v19 = vmin.f32 %v27370_v1, 1.0  ;;  %v10599_v36 = vrot.slane %v10593_v62, 6  ;;  %v4020_v34 = vrot.slane %v4013_v8, 7 }
0x21d6   :  { %v7324_v39 = vmul.f32 %v7308_v32, %v27369_v21  ;;  %v27373_v31 = vmin.f32 %v27372_v46, 1.0  ;;  %v7310_v37 = vrot.slane %v7303_v54, 7  ;;  %v10600_v35 = vrot.slane %v10593_v62, 7 }
0x21d7   :  { %v4035_v5 = vmul.f32 %v4019_v49, %v27371_v19  ;;  %v10615_v7 = vmul.f32 %v10599_v36, %v10589_v23  ;;  %v27375_v25 = vmin.f32 %v27374_v52, 1.0  ;;  %v27377_v38 = vmin.f32 %v27376_v29, 1.0  ;;  %v27381_v29 = vld [vmem:[#allocation39_spill] sm:$0xff] }
0x21d8   :  { %v7332_v26 = vadd.f32 %v7324_v39, %v4034_v53  ;;  %v7325_v11 = vmul.f32 %v7309_v51, %v27373_v31  ;;  %v10616_v61 = vmul.f32 %v10600_v35, %v10590_v22  ;;  %v24080_v14 = vmov 4   ;;  %v27379_v31 = vld [vmem:[#allocation37_spill] sm:$0xff] }
0x21d9   :  { %v4036_v60 = vmul.f32 %v4020_v34, %v27375_v25  ;;  %v7326_v17 = vmul.f32 %v7310_v37, %v27377_v38  ;;  %v27380_v37 = vld [vmem:[#allocation38_spill] sm:$0xff]  ;;  %v27382_v38 = vld [vmem:[#allocation40_spill] sm:$0xff] }
0x21da   :  { %v26694_v47 = vadd.f32 %v10614_v6, %v7332_v26  ;;  %v7333_v4 = vadd.f32 %v7325_v11, %v4035_v5  ;;  %v23908_v25 = vld [vmem:[#allocation5 + $0x58] sm:$0xff] }
0x21db   :  { %v7334_v53 = vadd.f32 %v7326_v17, %v4036_v60 }
0x21dc   :  { %v26700_v8 = vadd.f32 %v10615_v7, %v7333_v4  ;;  %v23907_v7 = vld [vmem:[#allocation5 + $0x40] sm:$0xff] }
0x21dd   :  { %v26702_v32 = vadd.f32 %v10616_v61, %v7334_v53  ;;  %v23909_v53 = vld [vmem:[#allocation5 + $0x70] sm:$0xff] }
0x21ff   :  { %v10638_v54 = vpop.xlane.xlu1 %10637 }
0x2200   :  { %23795 = vrcp.f32 %v10638_v54 }
0x220a   :  { %v23796_v23 = vpop.eup %23795 }
0x220b   :  { %v10640_v62 = vmul.f32 %v23796_v23, %v26486_v56  ;;  %v23910_v23 = vld [vmem:[#allocation5 + $0x88] sm:$0xff] }
0x220d   :  { %19944 = vperm.xlu1 %23634, %v10640_v62   ;;  %13364 = vperm.xlu0 %23632, %v10640_v62  }
0x2211   :  { %23633 = vset.pattern.permute.xlu0 %v24080_v14  ;;  %v27383_v14 = vld [vmem:[#allocation41_spill] sm:$0xff] }
0x2212   :  { %16654 = vperm.xlu0 %23633, %v10640_v62  }
0x2216   :  { %23635 = vset.pattern.permute.xlu0 %v24078_v28  ;;  %v27378_v28 = vld [vmem:[#allocation17_spill] sm:$0xff] }
0x2261   :  { %v18155_v49 = vpop.f32.mrb[206].mxu1 }
0x2262   :  { %v18156_v22 = vadd.f32 %v23906_v41, %v18155_v49  ;;  %v22719_v40 = vpop.f32.mrb[207].mxu1  ;;  %v27384_v49 = vld [vmem:[#allocation42_spill] sm:$0xff]  ;;  %v23911_v41 = vld [vmem:[#allocation5 + $0xa0] sm:$0xff] }
0x2263   :  { %v23912_v40 = vld [vmem:[#allocation5 + $0xb8] sm:$0xff] }
0x2264   :  { %v20123_v21 = vmul.f32 -1.442695, %v18156_v22 }
0x2266   :  { %23797 = vpow2.f32 %v20123_v21 }
0x226d   :  { %v26709_v39 = vpop.f32.mrb[208].mxu1 }
0x226e   :  { %v22755_v51 = vpop.f32.mrb[209].mxu1 }
0x226f   :  { %v27385_v51 = vld [vmem:[#allocation43_spill] sm:$0xff] }
0x2270   :  { %v23798_v56 = vpop.eup %23797 }
0x2271   :  { %v18162_v6 = vadd.f32 1.0, %v23798_v56  ;;  %v27386_v56 = vld [vmem:[#allocation49_spill] sm:$0xff] }
0x2273   :  { %23799 = vrcp.f32 %v18162_v6  ;;  %v23913_v6 = vld [vmem:[#allocation7 + $0x10] sm:$0xff] }
0x2279   :  { %v26711_v1 = vpop.f32.mrb[210].mxu1 }
0x227a   :  { %v22773_v19 = vpop.f32.mrb[211].mxu1 }
0x227b   :  { %v23914_v19 = vld [vmem:[#allocation7 + $0x28] sm:$0xff] }
0x227d   :  { %v23800_v5 = vpop.eup %23799 }
0x227e   :  { %v18733_v36 = vrot.slane %v23800_v5, %v27378_v28  ;;  %v18726_v4 = vcombine.high %v23800_v5, %v23800_v5 }
0x2280   :  { %v18749_v34 = vrot.slane %v18733_v36, %v27378_v28  ;;  %v18741_v26 = vcombine.high %v18733_v36, %v18733_v36  ;;  %v18740_v17 = vrot.slane %v18726_v4, %v27378_v28 }
0x2282   :  { %22799 = vmatmul.mubr.f32.vlgmr.msra.gmra.mrb[238].mxu0 %v18749_v34  ;;  %v18763_v46 = vrot.slane %v18741_v26, %v27378_v28  ;;  %v18771_v52 = vcombine.high %v18749_v34, %v18749_v34  ;;  %v18742_v61 = vcombine.high %v18740_v17, %v18740_v17  ;;  %v18756_v54 = vrot.slane %v18740_v17, %v27378_v28 }
0x2283   :  { %23568 = vmatpush3.bf16.xpose.msra.mxu0 %v27379_v31  ;;  %22816 = vmatprep.mubr.msk.f32.mxu0 %vm24072_vm0, %v27131_v10  ;;  %v27387_v31 = vld [vmem:[#allocation48_spill] sm:$0xff] }
0x2284   :  { %22808 = vmatmul.mubr.f32.vlgmr.msra.gmra.mrb[214].mxu1 %v18763_v46  ;;  %22814 = vmatprep.subr.mxu0 %v27131_v10  ;;  %v18773_v60 = vcombine.high %v18763_v46, %v18763_v46  ;;  %v18770_v62 = vrot.slane %v18742_v61, %v27378_v28  ;;  %v18772_v22 = vcombine.high %v18756_v54, %v18756_v54 }
0x2285   :  { %v26720_v11 = vpop.f32.mrb[212].mxu1  ;;  %23571 = vmatpush3.bf16.xpose.msra.mxu1 %v27380_v37  ;;  %22825 = vmatprep.mubr.msk.f32.mxu1 %vm24072_vm0, %v27131_v10  ;;  %v27388_v37 = vld [vmem:[#allocation50_spill] sm:$0xff] }
0x2286   :  { %v22791_v35 = vpop.f32.mrb[213].mxu1  ;;  %22823 = vmatprep.subr.mxu1 %v27131_v10  ;;  %v18774_v21 = vcombine.high %v18770_v62, %v18770_v62 }
0x228b   :  { %22815 = vmatpush3.xpose.msra.mxu0 %v23907_v7 }
0x228c   :  { %23572 = vmatprep.subr.bf16.mxu0 %v27130_v18 }
0x228d   :  { %22824 = vmatpush3.xpose.msra.mxu1 %v23908_v25 }
0x228e   :  { %22817 = vmatmul.mubr.f32.vlgmr.msra.gmra.mrb[240].mxu0 %v18771_v52  ;;  %23575 = vmatprep.subr.bf16.mxu1 %v27130_v18 }
0x228f   :  { %23574 = vmatpush3.bf16.xpose.msra.mxu0 %v27381_v29  ;;  %22834 = vmatprep.mubr.msk.f32.mxu0 %vm24072_vm0, %v27131_v10  ;;  %v27389_v29 = vld [vmem:[#allocation51_spill] sm:$0xff] }
0x2290   :  { %22826 = vmatmul.mubr.f32.vlgmr.msra.gmra.mrb[216].mxu1 %v18773_v60  ;;  %22832 = vmatprep.subr.mxu0 %v27131_v10 }
0x2291   :  { %23577 = vmatpush3.bf16.xpose.msra.mxu1 %v27382_v38  ;;  %22843 = vmatprep.mubr.msk.f32.mxu1 %vm24072_vm0, %v27131_v10  ;;  %v27390_v38 = vld [vmem:[#allocation52_spill] sm:$0xff] }
0x2292   :  { %22841 = vmatprep.subr.mxu1 %v27131_v10 }
0x2297   :  { %22833 = vmatpush3.xpose.msra.mxu0 %v23909_v53 }
0x2298   :  { %23578 = vmatprep.subr.bf16.mxu0 %v27130_v18 }
0x2299   :  { %22842 = vmatpush3.xpose.msra.mxu1 %v23910_v23 }
0x229a   :  { %22835 = vmatmul.mubr.f32.vlgmr.msra.gmra.mrb[242].mxu0 %v18756_v54  ;;  %23581 = vmatprep.subr.bf16.mxu1 %v27130_v18 }
0x229b   :  { %23580 = vmatpush3.bf16.xpose.msra.mxu0 %v27383_v14  ;;  %22852 = vmatprep.mubr.msk.f32.mxu0 %vm24072_vm0, %v27131_v10  ;;  %v27391_v14 = vld [vmem:[#allocation53_spill] sm:$0xff] }
0x229c   :  { %22844 = vmatmul.mubr.f32.vlgmr.msra.gmra.mrb[218].mxu1 %v18770_v62  ;;  %22850 = vmatprep.subr.mxu0 %v27131_v10 }
0x229d   :  { %23583 = vmatpush3.bf16.xpose.msra.mxu1 %v27384_v49  ;;  %22861 = vmatprep.mubr.msk.f32.mxu1 %vm24072_vm0, %v27131_v10 }
0x229e   :  { %22859 = vmatprep.subr.mxu1 %v27131_v10 }
0x22a3   :  { %22851 = vmatpush3.xpose.msra.mxu0 %v23911_v41 }
0x22a4   :  { %23584 = vmatprep.subr.bf16.mxu0 %v27130_v18 }
0x22a5   :  { %22860 = vmatpush3.xpose.msra.mxu1 %v23912_v40 }
0x22a6   :  { %22853 = vmatmul.mubr.f32.vlgmr.msra.gmra.mrb[244].mxu0 %v18772_v22  ;;  %23587 = vmatprep.subr.bf16.mxu1 %v27130_v18 }
0x22a7   :  { %23586 = vmatpush3.bf16.msra.mxu0 %v27385_v51  ;;  %22870 = vmatprep.mubr.msk.f32.mxu0 %vm24072_vm0, %v27131_v10 }
0x22a8   :  { %22862 = vmatmul.mubr.f32.vlgmr.msra.gmra.mrb[220].mxu1 %v18774_v21  ;;  %22868 = vmatprep.subr.mxu0 %v27131_v10 }
0x22a9   :  { %23589 = vmatpush3.bf16.msra.mxu1 %v27386_v56  ;;  %22879 = vmatprep.mubr.msk.f32.mxu1 %vm24072_vm0, %v27131_v10  ;;  %v26805_v56 = vpop.permute.xlu0 %13364 }
0x22aa   :  { %22877 = vmatprep.subr.mxu1 %v27131_v10 }
0x22ab   :  { %22869 = vmatpush3.msra.mxu0 %v23913_v6 }
0x22ac   :  { %23590 = vmatprep.subr.bf16.mxu0 %v27130_v18 }
0x22ad   :  { %22878 = vmatpush3.msra.mxu1 %v23914_v19  ;;  %v26807_v6 = vpop.permute.xlu0 %16654  ;;  %v26810_v19 = vpop.permute.xlu1 %19944 }
0x22ae   :  { %23593 = vmatprep.subr.bf16.mxu1 %v27130_v18  ;;  %v16657_v42 = vrot.slane %v26807_v6, 2 }
0x2355   :  { %v18849_v5 = vpop.f32.mrb[238].mxu0 }
0x2356   :  { %v19343_v28 = vmul.f32 %v18849_v5, %v26613_v12  ;;  %v22800_v36 = vpop.f32.mrb[239].mxu0  ;;  %v23915_v12 = vld [vmem:[#allocation7 + $0x40] sm:$0xff]  ;;  %v13366_v5 = vrot.slane %v26805_v56, 1 }
0x2357   :  { %v18919_v34 = vpop.f32.mrb[214].mxu1 }
0x2358   :  { %v19344_v26 = vmul.f32 %v18919_v34, %v26623_v33  ;;  %v22809_v46 = vpop.f32.mrb[215].mxu1  ;;  %22871 = vmatmul.mubr.msk.f32.vlgmr.msra.gmra.mrb[246].mxu0 %vm3417_vm9, %v19343_v28  ;;  %v23916_v33 = vld [vmem:[#allocation7 + $0x58] sm:$0xff] }
0x2359   :  { %23592 = vmatpush3.bf16.msra.mxu0 %v27387_v31  ;;  %22888 = vmatprep.mubr.msk.f32.mxu0 %vm24072_vm0, %v27131_v10  ;;  %v27393_v28 = vld [vmem:[#allocation18_spill] sm:$0xff] }
0x235a   :  { %22880 = vmatmul.mubr.msk.f32.vlgmr.msra.gmra.mrb[222].mxu1 %vm3417_vm9, %v19344_v26  ;;  %22886 = vmatprep.subr.mxu0 %v27131_v10  ;;  %v27394_v36 = vmin.f32 %v27393_v28, 1.0 }
0x235b   :  { %23595 = vmatpush3.bf16.msra.mxu1 %v27388_v37  ;;  %22897 = vmatprep.mubr.msk.f32.mxu1 %vm24072_vm0, %v27131_v10 }
0x235c   :  { %22895 = vmatprep.subr.mxu1 %v27131_v10  ;;  %v13381_v34 = vmul.f32 %v26805_v56, %v27394_v36 }
0x235d   :  { %22887 = vmatpush3.msra.mxu0 %v23915_v12  ;;  %v19946_v12 = vrot.slane %v26810_v19, 1 }
0x235e   :  { %23596 = vmatprep.subr.bf16.mxu0 %v27130_v18 }
0x235f   :  { %22896 = vmatpush3.msra.mxu1 %v23916_v33 }
0x2360   :  { %23599 = vmatprep.subr.bf16.mxu1 %v27130_v18 }
0x2361   :  { %v18989_v35 = vpop.f32.mrb[240].mxu0 }
0x2362   :  { %v19345_v7 = vmul.f32 %v18989_v35, %v26633_v57  ;;  %v22818_v52 = vpop.f32.mrb[241].mxu0  ;;  %v23917_v57 = vld [vmem:[#allocation7 + $0x70] sm:$0xff]  ;;  %v27395_v35 = vld [vmem:[#allocation82_spill] sm:$0xff] }
0x2363   :  { %v19059_v25 = vpop.f32.mrb[216].mxu1 }
0x2364   :  { %v19346_v60 = vmul.f32 %v19059_v25, %v26709_v39  ;;  %v22827_v4 = vpop.f32.mrb[217].mxu1  ;;  %22889 = vmatmul.mubr.msk.f32.vlgmr.msra.gmra.mrb[248].mxu0 %vm3417_vm9, %v19345_v7  ;;  %v23918_v39 = vld [vmem:[#allocation7 + $0x88] sm:$0xff] }
0x2365   :  { %23598 = vmatpush3.bf16.msra.mxu0 %v27389_v29  ;;  %22906 = vmatprep.mubr.msk.f32.mxu0 %vm24072_vm0, %v27131_v10 }
0x2366   :  { %22898 = vmatmul.mubr.msk.f32.vlgmr.msra.gmra.mrb[224].mxu1 %vm3417_vm9, %v19346_v60  ;;  %22904 = vmatprep.subr.mxu0 %v27131_v10 }
0x2367   :  { %23601 = vmatpush3.bf16.msra.mxu1 %v27390_v38  ;;  %22915 = vmatprep.mubr.msk.f32.mxu1 %vm24072_vm0, %v27131_v10 }
0x2368   :  { %22913 = vmatprep.subr.mxu1 %v27131_v10 }
0x2369   :  { %22905 = vmatpush3.msra.mxu0 %v23917_v57 }
0x236a   :  { %23602 = vmatprep.subr.bf16.mxu0 %v27130_v18 }
0x236b   :  { %22914 = vmatpush3.msra.mxu1 %v23918_v39  ;;  %v13367_v39 = vrot.slane %v26805_v56, 2 }
0x236c   :  { %23605 = vmatprep.subr.bf16.mxu1 %v27130_v18  ;;  %v27392_v18 = vld [vmem:[#allocation54_spill] sm:$0xff] }
0x236d   :  { %v19129_v17 = vpop.f32.mrb[242].mxu0 }
0x236e   :  { %v19347_v61 = vmul.f32 %v19129_v17, %v26642_v9  ;;  %v22836_v53 = vpop.f32.mrb[243].mxu0  ;;  %v23919_v9 = vld [vmem:[#allocation7 + $0xa0] sm:$0xff]  ;;  %v16658_v17 = vrot.slane %v26807_v6, 3 }
0x236f   :  { %v19199_v54 = vpop.f32.mrb[218].mxu1  ;;  %v16673_v53 = vmul.f32 %v16657_v42, %v16647_v58 }
0x2370   :  { %v19348_v23 = vmul.f32 %v19199_v54, %v26711_v1  ;;  %v22845_v62 = vpop.f32.mrb[219].mxu1  ;;  %22907 = vmatmul.mubr.msk.f32.vlgmr.msra.gmra.mrb[250].mxu0 %vm3417_vm9, %v19347_v61  ;;  %v23920_v1 = vld [vmem:[#allocation7 + $0xb8] sm:$0xff]  ;;  %v13368_v54 = vrot.slane %v26805_v56, 3 }
0x2371   :  { %23604 = vmatpush3.bf16.msra.mxu0 %v27391_v14  ;;  %22924 = vmatprep.mubr.msk.f32.mxu0 %vm24072_vm0, %v27131_v10  ;;  %v19947_v62 = vrot.slane %v26810_v19, 2  ;;  %v27397_v14 = vld [vmem:[#allocation55_spill] sm:$0xff] }
0x2372   :  { %22916 = vmatmul.mubr.msk.f32.vlgmr.msra.gmra.mrb[226].mxu1 %vm3417_vm9, %v19348_v23  ;;  %22922 = vmatprep.subr.mxu0 %v27131_v10 }
0x2373   :  { %23607 = vmatpush3.bf16.msra.mxu1 %v27392_v18  ;;  %22933 = vmatprep.mubr.msk.f32.mxu1 %vm24072_vm0, %v27131_v10  ;;  %v27398_v18 = vmin.f32 %v27397_v14, 1.0  ;;  %v13371_v14 = vrot.slane %v26805_v56, 6 }
0x2374   :  { %22931 = vmatprep.subr.mxu1 %v27131_v10  ;;  %v16656_v10 = vrot.slane %v26807_v6, 1 }
0x2375   :  { %22923 = vmatpush3.msra.mxu0 %v23919_v9  ;;  %v13383_v9 = vmul.f32 %v13367_v39, %v27398_v18  ;;  %v16662_v18 = vrot.slane %v26807_v6, 7 }
0x2376   :  { %v16672_v31 = vmul.f32 %v16656_v10, %v16646_v15 }
0x2377   :  { %22932 = vmatpush3.msra.mxu1 %v23920_v1  ;;  %v16681_v48 = vadd.f32 %v16673_v53, %v13383_v9 }
0x2379   :  { %v19269_v49 = vpop.f32.mrb[244].mxu0 }
0x237a   :  { %v19349_v41 = vmul.f32 %v19269_v49, %v26652_v43  ;;  %v22854_v22 = vpop.f32.mrb[245].mxu0  ;;  %v16671_v43 = vmul.f32 %v26807_v6, %v16645_v44  ;;  %v27396_v44 = vmin.f32 %v27395_v35, 1.0  ;;  %v16674_v49 = vmul.f32 %v16658_v17, %v16648_v3 }
0x237b   :  { %v19339_v40 = vpop.f32.mrb[220].mxu1  ;;  %v19948_v22 = vrot.slane %v26810_v19, 3 }
0x237c   :  { %v19350_v21 = vmul.f32 %v19339_v40, %v26720_v11  ;;  %v22863_v51 = vpop.f32.mrb[221].mxu1  ;;  %22925 = vmatmul.mubr.msk.f32.vlgmr.msra.gmra.mrb[252].mxu0 %vm3417_vm9, %v19349_v41  ;;  %v16679_v33 = vadd.f32 %v16671_v43, %v13381_v34  ;;  %v13382_v7 = vmul.f32 %v13366_v5, %v27396_v44  ;;  %v27399_v40 = vld [vmem:[#allocation83_spill] sm:$0xff] }
0x237e   :  { %22934 = vmatmul.mubr.msk.f32.vlgmr.msra.gmra.mrb[228].mxu1 %vm3417_vm9, %v19350_v21  ;;  %v16680_v4 = vadd.f32 %v16672_v31, %v13382_v7  ;;  %v27400_v21 = vmin.f32 %v27399_v40, 1.0  ;;  %v16660_v31 = vrot.slane %v26807_v6, 5  ;;  %v27401_v7 = vld [vmem:[#allocation33_spill] sm:$0xff] }
0x2380   :  { %v13384_v51 = vmul.f32 %v13368_v54, %v27400_v21 }
0x242b   :  { %v19420_v11 = vpop.f32.mrb[246].mxu0 }
0x242c   :  { %v19935_v26 = vmin.f32 %v19420_v11, 1.0  ;;  %v22872_v46 = vpop.f32.mrb[247].mxu0  ;;  %v16682_v11 = vadd.f32 %v16674_v49, %v13384_v51  ;;  %v13372_v49 = vrot.slane %v26805_v56, 7  ;;  %v27408_v51 = vmin.f32 %v27336_v24, 1.0 }
0x242d   :  { %v19493_v37 = vpop.f32.mrb[222].mxu1  ;;  %v13369_v46 = vrot.slane %v26805_v56, 4 }
0x242e   :  { %v19961_v0 = vmul.f32 %v26810_v19, %v19935_v26  ;;  %v19936_v52 = vmin.f32 %v19493_v37, 1.0  ;;  %v22881_v25 = vpop.f32.mrb[223].mxu1  ;;  %v16659_v26 = vrot.slane %v26807_v6, 4 }
0x2430   :  { %v19969_v60 = vadd.f32 %v19961_v0, %v16679_v33  ;;  %v19962_v29 = vmul.f32 %v19946_v12, %v19936_v52  ;;  %v16675_v33 = vmul.f32 %v16659_v26, %v16649_v20  ;;  %v13370_v0 = vrot.slane %v26805_v56, 5 }
0x2431   :  { %v27402_v52 = vmin.f32 %v27401_v7, 1.0 }
0x2432   :  { %v19977_v38 = vmul.f32 %v19969_v60, %v26674_v16  ;;  %v19970_v57 = vadd.f32 %v19962_v29, %v16680_v4  ;;  %v16676_v4 = vmul.f32 %v16660_v31, %v16650_v13 }
0x2434   :  { %v19978_v15 = vmul.f32 %v19970_v57, %v26678_v59  ;;  %v27403_v57 = vld [vmem:[#allocation84_spill] sm:$0xff] }
0x2435   :  { %v27404_v42 = vmin.f32 %v27403_v57, 1.0 }
0x2436   :  { %v19993_v61 = vrot.slane %v19978_v15, 7 }
0x2437   :  { %v19566_v23 = vpop.f32.mrb[248].mxu0  ;;  %v13386_v15 = vmul.f32 %v13370_v0, %v27404_v42 }
0x2438   :  { %v19994_v16 = vsel %vm1292_vm1, %v19993_v61, %v19977_v38  ;;  %v19937_v1 = vmin.f32 %v19566_v23, 1.0  ;;  %v22890_v59 = vpop.f32.mrb[249].mxu0  ;;  %v19950_v38 = vrot.slane %v26810_v19, 5 }
0x2439   :  { %v19639_v41 = vpop.f32.mrb[224].mxu1  ;;  %v16684_v53 = vadd.f32 %v16676_v4, %v13386_v15 }
0x243a   :  { %v19963_v58 = vmul.f32 %v19947_v62, %v19937_v1  ;;  %v19938_v10 = vmin.f32 %v19639_v41, 1.0  ;;  %v22899_v43 = vpop.f32.mrb[225].mxu1  ;;  %v27405_v1 = vmin.f32 %v26426_v30, 1.0  ;;  %v19952_v30 = vrot.slane %v26810_v19, 7 }
0x243c   :  { %v19971_v5 = vadd.f32 %v19963_v58, %v16681_v48  ;;  %v19964_v28 = vmul.f32 %v19948_v22, %v19938_v10  ;;  %v27406_v48 = vld [vmem:[#allocation36_spill] sm:$0xff]  ;;  %v16678_v10 = vmul.f32 %v16662_v18, %v27408_v51 }
0x243d   :  { %v27407_v58 = vmin.f32 %v27406_v48, 1.0 }
0x243e   :  { %v19979_v36 = vmul.f32 %v19971_v5, %v26680_v50  ;;  %v19972_v34 = vadd.f32 %v19964_v28, %v16682_v11  ;;  %v19949_v50 = vrot.slane %v26810_v19, 4  ;;  %v27409_v11 = vld [vmem:[#allocation56_spill] sm:$0xff] }
0x243f   :  { %v13387_v40 = vmul.f32 %v13371_v14, %v27407_v58  ;;  %v27410_v28 = vmin.f32 %v27409_v11, 1.0 }
0x2440   :  { %v19995_v63 = vrot.slane %v19979_v36, 6  ;;  %v19980_v3 = vmul.f32 %v19972_v34, %v26682_v2  ;;  %v13385_v2 = vmul.f32 %v13369_v46, %v27402_v52 }
0x2441   :  { %v13388_v36 = vmul.f32 %v13372_v49, %v27410_v28 }
0x2442   :  { %v19996_v37 = vsel %vm1295_vm2, %v19995_v63, %v19994_v16  ;;  %v19997_v12 = vrot.slane %v19980_v3, 5  ;;  %v16683_v55 = vadd.f32 %v16675_v33, %v13385_v2  ;;  %v16661_v16 = vrot.slane %v26807_v6, 6 }
0x2443   :  { %v19712_v35 = vpop.f32.mrb[250].mxu0  ;;  %v16686_v3 = vadd.f32 %v16678_v10, %v13388_v36 }
0x2444   :  { %v19998_v44 = vsel %vm1298_vm3, %v19997_v12, %v19996_v37  ;;  %v19939_v25 = vmin.f32 %v19712_v35, 1.0  ;;  %v22908_v60 = vpop.f32.mrb[251].mxu0  ;;  %v16677_v59 = vmul.f32 %v16661_v16, %v27405_v1 }
0x2445   :  { %v19785_v29 = vpop.f32.mrb[226].mxu1 }
0x2446   :  { %v19965_v20 = vmul.f32 %v19949_v50, %v19939_v25  ;;  %v19940_v39 = vmin.f32 %v19785_v29, 1.0  ;;  %v22917_v17 = vpop.f32.mrb[227].mxu1  ;;  %v16685_v5 = vadd.f32 %v16677_v59, %v13387_v40 }
0x2448   :  { %v19973_v61 = vadd.f32 %v19965_v20, %v16683_v55  ;;  %v19966_v54 = vmul.f32 %v19950_v38, %v19940_v39 }
0x244a   :  { %v19981_v23 = vmul.f32 %v19973_v61, %v26684_v45  ;;  %v19974_v62 = vadd.f32 %v19966_v54, %v16684_v53  ;;  %v19951_v45 = vrot.slane %v26810_v19, 6 }
0x244c   :  { %v19999_v27 = vrot.slane %v19981_v23, 4  ;;  %v19982_v13 = vmul.f32 %v19974_v62, %v26694_v47 }
0x244e   :  { %v20001_v9 = vrot.slane %v19982_v13, 3  ;;  %v20000_v41 = vsel %vm1301_vm4, %v19999_v27, %v19998_v44 }
0x244f   :  { %v19858_v22 = vpop.f32.mrb[252].mxu0 }
0x2450   :  { %v19941_v21 = vmin.f32 %v19858_v22, 1.0  ;;  %v22926_v47 = vpop.f32.mrb[253].mxu0  ;;  %v20002_v6 = vsel %vm1304_vm5, %v20001_v9, %v20000_v41 }
0x2451   :  { %v19931_v43 = vpop.f32.mrb[228].mxu1 }
0x2452   :  { %v19967_v56 = vmul.f32 %v19951_v45, %v19941_v21  ;;  %v19942_v34 = vmin.f32 %v19931_v43, 1.0  ;;  %v22935_v26 = vpop.f32.mrb[229].mxu1 }
0x2454   :  { %v19975_v63 = vadd.f32 %v19967_v56, %v16685_v5  ;;  %v19968_v46 = vmul.f32 %v19952_v30, %v19942_v34 }
0x2456   :  { %v19983_v31 = vmul.f32 %v19975_v63, %v26700_v8  ;;  %v19976_v37 = vadd.f32 %v19968_v46, %v16686_v3 }
0x2458   :  { %v20003_v24 = vrot.slane %v19983_v31, 2  ;;  %v19984_v12 = vmul.f32 %v19976_v37, %v26702_v32 }
0x245a   :  { %v20005_v33 = vrot.slane %v19984_v12, 1  ;;  %v20004_v19 = vsel %vm1307_vm6, %v20003_v24, %v20002_v6 }
0x245c   :  { %v20006_v0 = vsel %vm1310_vm7, %v20005_v33, %v20004_v19 }
0x245d   :  { %20008 = vst [vmem:[#allocation11] sm:$0xff] %v20006_v0 }
0x245e   :  { %24042 = shalt.err (!%p24039_p2)
}
0x245f   :  { %s24043_s6 = scalar_lea.hbm %s26907_s13, 128 }
0x2460   :  { %p24044_p3 = scmp.ne.s32.totalorder %s26907_s13, %s24043_s6  ;;  %p24047_p4 = scmp.lt.u32.totalorder %s24043_s6, %s26907_s13 }
0x2462   :  { %p24049_p5 = pnand %p24047_p4, %p24044_p3 }
0x2464   :  { %24052 = shalt.err (!%p24049_p5)
}
0x2465   :  { %20018 = dma.vmem_to_hbm [thread:$0]  %s20016_s5, 128, %s26907_s13, [#allocation4]  }
0x2466   :  { %24059 = dma.done.wait [#allocation4], 128  }
0x2467   :  { %24060 = vsyncadd [#allocation4], 4294967168 }
0x2468   :  { %20022 = vsyncpa [#allocation3], 1 }
0x2469   :  { %20023 = vsyncpa [#allocation6], 1 }
0x246a   :  { %20024 = vsyncpa [#allocation9], 1 }
0x246b   :  { %20025 = vsyncpa [#allocation4], 1 }

</bundles_post_ra>
